<compile_context>
chip_gen: v7x
topology: tpu7x:2x2x1
jax: 0.10.0
libtpu: 0.0.40
codegen_flags: <defaults>
</compile_context>

<pallas_src>
import functools

import numpy as np

import jax
import jax.numpy as jnp
from jax.experimental import pallas as pl
from jax.experimental.pallas import tpu as pltpu

CPAD = 128          # padded channel width (lane-dense, full MXU columns)
NUM_CLASSES = 4
BN_EPS = 1e-5


def _full_spec(shape):
    # full-array block, trivial index map (grid=(1,))
    return pl.BlockSpec(shape, lambda i: (0,) * len(shape))


def _round_up(x, m):
    return (x + m - 1) // m * m


# ----------------------------------------------------------------------------
# BatchNorm (training mode, biased variance) helpers — run on f32 in VMEM
# ----------------------------------------------------------------------------
def _bn_train_prefix(y, gamma, beta, m_valid, eps):
    """BN over axis 0 using only the first m_valid rows (rows >= m_valid are pad)."""
    m_pad = y.shape[0]
    inv_m = 1.0 / float(m_valid)
    if m_valid != m_pad:
        mask = (jax.lax.broadcasted_iota(jnp.int32, y.shape, 0) < m_valid
                ).astype(jnp.float32)
        ysum = jnp.sum(y * mask, axis=0, keepdims=True)
    else:
        mask = None
        ysum = jnp.sum(y, axis=0, keepdims=True)
    mean = ysum * inv_m
    diff = y - mean
    dm = diff if mask is None else diff * mask
    var = jnp.sum(dm * dm, axis=0, keepdims=True) * inv_m
    inv = jax.lax.rsqrt(var + eps)
    return diff * inv * gamma + beta


def _bn_train_masked(y, gamma, beta, mask, m_valid, eps):
    """BN over axis 0; `mask` (M,1) selects the real (non-pad) rows, count m_valid."""
    inv_m = 1.0 / float(m_valid)
    mean = jnp.sum(y * mask, axis=0, keepdims=True) * inv_m
    diff = y - mean
    dm = diff * mask
    var = jnp.sum(dm * dm, axis=0, keepdims=True) * inv_m
    inv = jax.lax.rsqrt(var + eps)
    return diff * inv * gamma + beta


# ----------------------------------------------------------------------------
# Kernel 1: conv1 (7x7 s2) as im2col-GEMM + bias + ReLU + BN(train)
# ----------------------------------------------------------------------------
def _conv1_kernel(a_ref, w_ref, b_ref, g_ref, beta_ref, o_ref, *, m_valid, eps):
    acc = jnp.dot(a_ref[...], w_ref[...], preferred_element_type=jnp.float32)
    y = jnp.maximum(acc + b_ref[...], 0.0)
    o_ref[...] = _bn_train_prefix(y, g_ref[...], beta_ref[...], m_valid, eps)


def conv1_stage(a, layer, *, m_valid, eps=BN_EPS):
    """a: (M_pad, K_pad) bf16 patches; layer: packed conv1 + bn1 parameters."""
    M, K = a.shape
    C = layer["w"].shape[1]
    kernel = functools.partial(_conv1_kernel, m_valid=m_valid, eps=eps)
    return pl.pallas_call(
        kernel,
        out_shape=jax.ShapeDtypeStruct((M, C), jnp.float32),
        grid=(1,),
        in_specs=[_full_spec((M, K)), _full_spec((K, C)), _full_spec((1, C)),
                  _full_spec((1, C)), _full_spec((1, C))],
        out_specs=_full_spec((M, C)),
        compiler_params=pltpu.CompilerParams(dimension_semantics=("arbitrary",)),
    )(a, layer["w"], layer["b"], layer["g"], layer["beta"])


# ----------------------------------------------------------------------------
# Kernel 2: trunk = 3x fused ResBlock + GAP + Linear head, all in one kernel.
#
# Activations live in a VMEM scratch `xbuf` of shape (R, C) f32:
#   R = slack + N*(H+2)*(W+2) + slack,  rows laid out as (n, i_pad, j_pad)
# with spatial-pad rows and slack rows identically zero.  A 3x3/s1/p1 conv is
# then 9 statically-shifted (Mp, C) x (C, C) MXU matmuls — boundary taps read
# the zero pad rows, so no per-tap masks are needed; a single (Mp,1) mask
# re-zeroes pad rows and restricts BN statistics to real pixels.
# ----------------------------------------------------------------------------
def _trunk_kernel(h_ref, mask_ref, w1_ref, b1_ref, g1_ref, bt1_ref,
                  w2_ref, b2_ref, g2_ref, bt2_ref,
                  p_ref, ffw_ref, ffb_ref, o_ref, xbuf,
                  *, n_blocks, wp, slack, m_valid, eps):
    mp = mask_ref.shape[0]
    c = h_ref.shape[1]
    mask = mask_ref[...]                      # (Mp, 1) f32, 1 at real pixels
    xbuf[...] = h_ref[...]                    # slack + pad rows arrive as zeros

    def conv3x3(w_ref, blk):
        acc = jnp.zeros((mp, c), jnp.float32)
        for t in range(9):
            off = (t // 3 - 1) * wp + (t % 3 - 1)
            a = xbuf[pl.ds(slack + off, mp), :].astype(jnp.bfloat16)
            acc = acc + jnp.dot(a, w_ref[blk, t],
                                preferred_element_type=jnp.float32)
        return acc

    for b in range(n_blocks):
        shortcut = xbuf[pl.ds(slack, mp), :]              # block input (f32)
        # conv1 -> relu1 -> bn1
        y1 = jnp.maximum(conv3x3(w1_ref, b) + b1_ref[b], 0.0)
        y1 = _bn_train_masked(y1, g1_ref[b], bt1_ref[b], mask, m_valid, eps) * mask
        xbuf[pl.ds(slack, mp), :] = y1
        # conv2 -> += shortcut -> relu2 -> bn2
        y2 = jnp.maximum(conv3x3(w2_ref, b) + b2_ref[b] + shortcut, 0.0)
        y2 = _bn_train_masked(y2, g2_ref[b], bt2_ref[b], mask, m_valid, eps) * mask
        xbuf[pl.ds(slack, mp), :] = y2

    # Global average pool (as a tiny selection matmul) + Linear head.
    yf = xbuf[pl.ds(slack, mp), :]
    pooled = jnp.dot(p_ref[...], yf, preferred_element_type=jnp.float32)  # (N, C)
    o_ref[...] = (jnp.dot(pooled, ffw_ref[...],
                          preferred_element_type=jnp.float32) + ffb_ref[...])


def trunk(h, mask, blkp, p_mat, ffw, ffb, *, wp, slack, m_valid, eps=BN_EPS):
    R, C = h.shape
    Mp = mask.shape[0]
    N = p_mat.shape[0]
    nb = blkp["w1"].shape[0]
    kernel = functools.partial(_trunk_kernel, n_blocks=nb, wp=wp, slack=slack,
                               m_valid=m_valid, eps=eps)
    return pl.pallas_call(
        kernel,
        out_shape=jax.ShapeDtypeStruct((N, C), jnp.float32),
        grid=(1,),
        in_specs=[
            _full_spec((R, C)), _full_spec((Mp, 1)),
            _full_spec((nb, 9, C, C)), _full_spec((nb, 1, C)),
            _full_spec((nb, 1, C)), _full_spec((nb, 1, C)),
            _full_spec((nb, 9, C, C)), _full_spec((nb, 1, C)),
            _full_spec((nb, 1, C)), _full_spec((nb, 1, C)),
            _full_spec((N, Mp)), _full_spec((C, C)), _full_spec((1, C)),
        ],
        out_specs=_full_spec((N, C)),
        scratch_shapes=[pltpu.VMEM((R, C), jnp.float32)],
        compiler_params=pltpu.CompilerParams(dimension_semantics=("arbitrary",)),
    )(h, mask, blkp["w1"], blkp["b1"], blkp["g1"], blkp["bt1"],
      blkp["w2"], blkp["b2"], blkp["g2"], blkp["bt2"], p_mat, ffw, ffb)


# ----------------------------------------------------------------------------
# Forward pass (glue: NCHW->NHWC, conv1 im2col, maxpool fold, layout packing)
# ----------------------------------------------------------------------------
def resnet_forward(x_nchw, pp):
    x = jnp.transpose(x_nchw, (0, 2, 3, 1)).astype(jnp.float32)   # NHWC, C=3
    N, H, W, CIN = x.shape

    # ---- conv1 (k7, s2, p0) + relu1 + bn1 : im2col in glue, fused GEMM kernel
    KH = KW = 7
    ST = 2
    OH = (H - KH) // ST + 1
    OW = (W - KW) // ST + 1
    rows = jnp.stack([x[:, di:di + ST * OH:ST, :, :] for di in range(KH)], axis=2)
    pats = jnp.stack([rows[:, :, :, dj:dj + ST * OW:ST, :] for dj in range(KW)],
                     axis=4)                               # (N, OH, KH, OW, KW, 3)
    pats = pats.transpose(0, 1, 3, 2, 4, 5).reshape(N * OH * OW, KH * KW * CIN)
    M1 = N * OH * OW
    M1p = _round_up(M1, 8)
    K1p = pp["conv1"]["w"].shape[0]
    a = jnp.pad(pats, ((0, M1p - M1), (0, K1p - pats.shape[1]))
                ).astype(jnp.bfloat16)
    h = conv1_stage(a, pp["conv1"], m_valid=M1)[:M1].reshape(N, OH, OW, CPAD)

    # ---- maxpool 3x3 / s2 : separable 2-stage fold (fused by XLA)
    # TODO(synk): the 3x3/s2 strided-window walk has no clean unit-stride
    # Pallas access pattern at these shapes, so the fold is left to XLA.
    PH = (OH - 3) // 2 + 1
    PW = (OW - 3) // 2 + 1
    t = functools.reduce(jnp.maximum,
                         [h[:, di:di + 2 * PH:2, :, :] for di in range(3)])
    hp = functools.reduce(jnp.maximum,
                          [t[:, :, dj:dj + 2 * PW:2, :] for dj in range(3)])

    # ---- pack into padded-spatial-flat (+slack) layout for the trunk kernel
    Hp, Wp = PH + 2, PW + 2
    SLACK = _round_up(Wp + 1, 8)                # >= max tap shift, sublane aligned
    Mp = N * Hp * Wp
    hflat = jnp.pad(hp, ((0, 0), (1, 1), (1, 1), (0, 0))).reshape(Mp, CPAD)
    hflat = jnp.pad(hflat, ((SLACK, SLACK), (0, 0)))       # (Mp + 2*SLACK, CPAD)

    # static (trace-time) real-pixel mask and per-image average-pool matrix
    m2d = np.zeros((Hp, Wp), np.float32)
    m2d[1:1 + PH, 1:1 + PW] = 1.0
    mask = jnp.asarray(np.tile(m2d.reshape(-1), N).reshape(Mp, 1))
    pmat = jnp.asarray(np.kron(np.eye(N, dtype=np.float32),
                               m2d.reshape(1, -1) / float(PH * PW)))   # (N, Mp)

    logits = trunk(hflat, mask, pp["blocks"], pmat, pp["ff_w"], pp["ff_b"],
                   wp=Wp, slack=SLACK, m_valid=N * PH * PW)
    return logits[:, :NUM_CLASSES]


# ----------------------------------------------------------------------------
# Parameters: torch-layout init, then one-time padding/packing for the kernels
# ----------------------------------------------------------------------------
def init_params(key):
    """Torch-layout parameters (same shapes as the nn.Module __init__)."""
    ks = jax.random.split(key, 8)

    def conv_w(k, cout, cin, kh, kw):
        return (0.05 * jax.random.normal(k, (cout, cin, kh, kw))).astype(jnp.float32)

    params = {
        "conv1_w": conv_w(ks[0], 64, 3, 7, 7),
        "conv1_b": 0.01 * jax.random.normal(ks[1], (64,)).astype(jnp.float32),
        "bn1_g": jnp.ones((64,), jnp.float32),
        "bn1_b": jnp.zeros((64,), jnp.float32),
        "ff_w": (0.05 * jax.random.normal(ks[2], (64, 4))).astype(jnp.float32),
        "ff_b": 0.01 * jax.random.normal(ks[3], (4,)).astype(jnp.float32),
        "blocks": [],
    }
    for i in range(3):
        kb = jax.random.split(ks[4 + i], 4)
        params["blocks"].append({
            "conv1_w": conv_w(kb[0], 64, 64, 3, 3),
            "conv1_b": 0.01 * jax.random.normal(kb[1], (64,)).astype(jnp.float32),
            "bn1_g": jnp.ones((64,), jnp.float32),
            "bn1_b": jnp.zeros((64,), jnp.float32),
            "conv2_w": conv_w(kb[2], 64, 64, 3, 3),
            "conv2_b": 0.01 * jax.random.normal(kb[3], (64,)).astype(jnp.float32),
            "bn2_g": jnp.ones((64,), jnp.float32),
            "bn2_b": jnp.zeros((64,), jnp.float32),
        })
    return params


def _pad_vec(v):
    return jnp.pad(v.astype(jnp.float32), (0, CPAD - v.shape[0])).reshape(1, CPAD)


def _prep_conv1(w, b, g, beta, *, pad_k_to):
    cout, cin, kh, kw = w.shape
    wt = jnp.transpose(w, (2, 3, 1, 0)).reshape(kh * kw * cin, cout)
    wt = jnp.pad(wt, ((0, pad_k_to - wt.shape[0]), (0, CPAD - cout)))
    return {"w": wt.astype(jnp.bfloat16), "b": _pad_vec(b),
            "g": _pad_vec(g), "beta": _pad_vec(beta)}


def _prep_res_w(w):
    # (cout, cin, 3, 3) -> (9, CPAD, CPAD) bf16, tap-major; rows=cin, cols=cout
    cout, cin, kh, kw = w.shape
    wt = jnp.transpose(w, (2, 3, 1, 0)).reshape(kh * kw, cin, cout)
    wt = jnp.pad(wt, ((0, 0), (0, CPAD - cin), (0, CPAD - cout)))
    return wt.astype(jnp.bfloat16)


def prepare_params(params):
    pp = {
        "conv1": _prep_conv1(params["conv1_w"], params["conv1_b"],
                             params["bn1_g"], params["bn1_b"],
                             pad_k_to=_round_up(7 * 7 * 3, 128)),   # 147 -> 256
        "ff_w": jnp.pad(params["ff_w"].astype(jnp.float32),
                        ((0, CPAD - params["ff_w"].shape[0]),
                         (0, CPAD - params["ff_w"].shape[1]))),
        "ff_b": jnp.pad(params["ff_b"].astype(jnp.float32),
                        (0, CPAD - params["ff_b"].shape[0])).reshape(1, CPAD),
    }
    blocks = params["blocks"]
    pp["blocks"] = {
        "w1": jnp.stack([_prep_res_w(b["conv1_w"]) for b in blocks]),
        "b1": jnp.stack([_pad_vec(b["conv1_b"]) for b in blocks]),
        "g1": jnp.stack([_pad_vec(b["bn1_g"]) for b in blocks]),
        "bt1": jnp.stack([_pad_vec(b["bn1_b"]) for b in blocks]),
        "w2": jnp.stack([_prep_res_w(b["conv2_w"]) for b in blocks]),
        "b2": jnp.stack([_pad_vec(b["conv2_b"]) for b in blocks]),
        "g2": jnp.stack([_pad_vec(b["bn2_g"]) for b in blocks]),
        "bt2": jnp.stack([_pad_vec(b["bn2_b"]) for b in blocks]),
    }
    return pp


if __name__ == "__main__":
    key = jax.random.PRNGKey(0)
    x = jax.random.normal(key, (2, 3, 32, 32), dtype=jnp.float32)   # NCHW like torch
    params = init_params(jax.random.PRNGKey(1))
    pp = prepare_params(params)          # one-time pad/transpose/cast of weights

    fwd = jax.jit(resnet_forward)
    out = jax.block_until_ready(fwd(x, pp))
    assert out.shape == (2, NUM_CLASSES), out.shape
    print("KERNEL_OK")
</pallas_src>

<mosaic_0001>
module attributes {stable_mosaic.version = 11 : i64} {
  func.func @_conv1_kernel(%arg0: i32, %arg1: memref<344x256xbf16, #tpu.memory_space<vmem>>, %arg2: memref<256x128xbf16, #tpu.memory_space<vmem>>, %arg3: memref<1x128xf32, #tpu.memory_space<vmem>>, %arg4: memref<1x128xf32, #tpu.memory_space<vmem>>, %arg5: memref<1x128xf32, #tpu.memory_space<vmem>>, %arg6: memref<344x128xf32, #tpu.memory_space<vmem>>) attributes {dimension_semantics = [#tpu.dimension_semantics<arbitrary>], iteration_bounds = array<i64: 1>, scalar_prefetch = 0 : i64, scratch_operands = 0 : i64, tpu.core_type = #tpu.core_type<tc>, window_params = [{pipeline_mode = #tpu.pipeline_mode<synchronous>, transform_indices = @transform_0, window_bounds = array<i64: 344, 256>}, {pipeline_mode = #tpu.pipeline_mode<synchronous>, transform_indices = @transform_1, window_bounds = array<i64: 256, 128>}, {pipeline_mode = #tpu.pipeline_mode<synchronous>, transform_indices = @transform_2, window_bounds = array<i64: 1, 128>}, {pipeline_mode = #tpu.pipeline_mode<synchronous>, transform_indices = @transform_3, window_bounds = array<i64: 1, 128>}, {pipeline_mode = #tpu.pipeline_mode<synchronous>, transform_indices = @transform_4, window_bounds = array<i64: 1, 128>}, {pipeline_mode = #tpu.pipeline_mode<synchronous>, transform_indices = @transform_5, window_bounds = array<i64: 344, 128>}]} {
    %c0 = arith.constant 0 : index
    %c0_0 = arith.constant 0 : index
    %0 = vector.load %arg1[%c0, %c0_0] : memref<344x256xbf16, #tpu.memory_space<vmem>>, vector<344x256xbf16>
    %c0_1 = arith.constant 0 : index
    %c0_2 = arith.constant 0 : index
    %1 = vector.load %arg2[%c0_1, %c0_2] : memref<256x128xbf16, #tpu.memory_space<vmem>>, vector<256x128xbf16>
    %cst = arith.constant dense<0.000000e+00> : vector<344x128xf32>
    %2 = tpu.matmul %0, %1, %cst {dimension_numbers = #tpu.dot_dimension_numbers<[1], [0], [0], [1], [0, 0, 1, 1], [], []>} : vector<344x256xbf16>, vector<256x128xbf16>, vector<344x128xf32> -> vector<344x128xf32>
    %c0_3 = arith.constant 0 : index
    %c0_4 = arith.constant 0 : index
    %3 = vector.load %arg3[%c0_3, %c0_4] : memref<1x128xf32, #tpu.memory_space<vmem>>, vector<1x128xf32>
    %4 = vector.broadcast %3 : vector<1x128xf32> to vector<344x128xf32>
    %5 = arith.addf %2, %4 : vector<344x128xf32>
    %cst_5 = arith.constant 0.000000e+00 : f32
    %6 = vector.broadcast %cst_5 : f32 to vector<344x128xf32>
    %7 = arith.maximumf %5, %6 : vector<344x128xf32>
    %c0_6 = arith.constant 0 : index
    %c0_7 = arith.constant 0 : index
    %8 = vector.load %arg4[%c0_6, %c0_7] : memref<1x128xf32, #tpu.memory_space<vmem>>, vector<1x128xf32>
    %c0_8 = arith.constant 0 : index
    %c0_9 = arith.constant 0 : index
    %9 = vector.load %arg5[%c0_8, %c0_9] : memref<1x128xf32, #tpu.memory_space<vmem>>, vector<1x128xf32>
    %10 = tpu.iota {dimensions = array<i32: 0>} : vector<344x128xi32>
    %c338_i32 = arith.constant 338 : i32
    %11 = vector.broadcast %c338_i32 : i32 to vector<344x128xi32>
    %12 = arith.cmpi slt, %10, %11 : vector<344x128xi32>
    %13 = arith.extui %12 : vector<344x128xi1> to vector<344x128xi32>
    %14 = arith.sitofp %13 : vector<344x128xi32> to vector<344x128xf32>
    %15 = arith.mulf %7, %14 : vector<344x128xf32>
    %cst_10 = arith.constant dense<0.000000e+00> : vector<128xf32>
    %16 = vector.multi_reduction <add>, %15, %cst_10 [0] : vector<344x128xf32> to vector<128xf32>
    %17 = vector.shape_cast %16 : vector<128xf32> to vector<1x128xf32>
    %cst_11 = arith.constant 2.958580e-03 : f32
    %18 = vector.broadcast %cst_11 : f32 to vector<1x128xf32>
    %19 = arith.mulf %17, %18 : vector<1x128xf32>
    %20 = vector.broadcast %19 : vector<1x128xf32> to vector<344x128xf32>
    %21 = arith.subf %7, %20 : vector<344x128xf32>
    %22 = arith.mulf %21, %14 : vector<344x128xf32>
    %23 = arith.mulf %22, %22 : vector<344x128xf32>
    %cst_12 = arith.constant dense<0.000000e+00> : vector<128xf32>
    %24 = vector.multi_reduction <add>, %23, %cst_12 [0] : vector<344x128xf32> to vector<128xf32>
    %25 = vector.shape_cast %24 : vector<128xf32> to vector<1x128xf32>
    %cst_13 = arith.constant 2.958580e-03 : f32
    %26 = vector.broadcast %cst_13 : f32 to vector<1x128xf32>
    %27 = arith.mulf %25, %26 : vector<1x128xf32>
    %cst_14 = arith.constant 9.99999974E-6 : f32
    %28 = vector.broadcast %cst_14 : f32 to vector<1x128xf32>
    %29 = arith.addf %27, %28 : vector<1x128xf32>
    %30 = math.rsqrt %29 : vector<1x128xf32>
    %31 = vector.broadcast %30 : vector<1x128xf32> to vector<344x128xf32>
    %32 = arith.mulf %21, %31 : vector<344x128xf32>
    %33 = vector.broadcast %8 : vector<1x128xf32> to vector<344x128xf32>
    %34 = arith.mulf %32, %33 : vector<344x128xf32>
    %35 = vector.broadcast %9 : vector<1x128xf32> to vector<344x128xf32>
    %36 = arith.addf %34, %35 : vector<344x128xf32>
    %c0_15 = arith.constant 0 : index
    %c0_16 = arith.constant 0 : index
    %37 = vector.load %arg6[%c0_15, %c0_16] : memref<344x128xf32, #tpu.memory_space<vmem>>, vector<344x128xf32>
    tpu.vector_store %arg6[%c0_15, %c0_16], %36 {strides = array<i32>} : memref<344x128xf32, #tpu.memory_space<vmem>>, vector<344x128xf32>,
    return
  }
  func.func @transform_0(%arg0: i32) -> (i32, i32) {
    %c0_i32 = arith.constant 0 : i32
    %c0_i32_0 = arith.constant 0 : i32
    %c0_i32_1 = arith.constant 0 : i32
    return %c0_i32, %c0_i32_0 : i32, i32
  }
  func.func @transform_1(%arg0: i32) -> (i32, i32) {
    %c0_i32 = arith.constant 0 : i32
    %c0_i32_0 = arith.constant 0 : i32
    %c0_i32_1 = arith.constant 0 : i32
    return %c0_i32, %c0_i32_0 : i32, i32
  }
  func.func @transform_2(%arg0: i32) -> (i32, i32) {
    %c0_i32 = arith.constant 0 : i32
    %c0_i32_0 = arith.constant 0 : i32
    %c0_i32_1 = arith.constant 0 : i32
    return %c0_i32, %c0_i32_0 : i32, i32
  }
  func.func @transform_3(%arg0: i32) -> (i32, i32) {
    %c0_i32 = arith.constant 0 : i32
    %c0_i32_0 = arith.constant 0 : i32
    %c0_i32_1 = arith.constant 0 : i32
    return %c0_i32, %c0_i32_0 : i32, i32
  }
  func.func @transform_4(%arg0: i32) -> (i32, i32) {
    %c0_i32 = arith.constant 0 : i32
    %c0_i32_0 = arith.constant 0 : i32
    %c0_i32_1 = arith.constant 0 : i32
    return %c0_i32, %c0_i32_0 : i32, i32
  }
  func.func @transform_5(%arg0: i32) -> (i32, i32) {
    %c0_i32 = arith.constant 0 : i32
    %c0_i32_0 = arith.constant 0 : i32
    %c0_i32_1 = arith.constant 0 : i32
    return %c0_i32, %c0_i32_0 : i32, i32
  }
}

module attributes {stable_mosaic.version = 11 : i64} {
  func.func @_trunk_kernel(%arg0: i32, %arg1: memref<160x128xf32, #tpu.memory_space<vmem>>, %arg2: memref<128x1xf32, #tpu.memory_space<vmem>>, %arg3: memref<3x9x128x128xbf16, #tpu.memory_space<vmem>>, %arg4: memref<3x1x128xf32, #tpu.memory_space<vmem>>, %arg5: memref<3x1x128xf32, #tpu.memory_space<vmem>>, %arg6: memref<3x1x128xf32, #tpu.memory_space<vmem>>, %arg7: memref<3x9x128x128xbf16, #tpu.memory_space<vmem>>, %arg8: memref<3x1x128xf32, #tpu.memory_space<vmem>>, %arg9: memref<3x1x128xf32, #tpu.memory_space<vmem>>, %arg10: memref<3x1x128xf32, #tpu.memory_space<vmem>>, %arg11: memref<2x128xf32, #tpu.memory_space<vmem>>, %arg12: memref<128x128xf32, #tpu.memory_space<vmem>>, %arg13: memref<1x128xf32, #tpu.memory_space<vmem>>, %arg14: memref<2x128xf32, #tpu.memory_space<vmem>>, %arg15: memref<160x128xf32, #tpu.memory_space<vmem>>) attributes {dimension_semantics = [#tpu.dimension_semantics<arbitrary>], iteration_bounds = array<i64: 1>, scalar_prefetch = 0 : i64, scratch_operands = 1 : i64, tpu.core_type = #tpu.core_type<tc>, window_params = [{pipeline_mode = #tpu.pipeline_mode<synchronous>, transform_indices = @transform_0, window_bounds = array<i64: 160, 128>}, {pipeline_mode = #tpu.pipeline_mode<synchronous>, transform_indices = @transform_1, window_bounds = array<i64: 128, 1>}, {pipeline_mode = #tpu.pipeline_mode<synchronous>, transform_indices = @transform_2, window_bounds = array<i64: 3, 9, 128, 128>}, {pipeline_mode = #tpu.pipeline_mode<synchronous>, transform_indices = @transform_3, window_bounds = array<i64: 3, 1, 128>}, {pipeline_mode = #tpu.pipeline_mode<synchronous>, transform_indices = @transform_4, window_bounds = array<i64: 3, 1, 128>}, {pipeline_mode = #tpu.pipeline_mode<synchronous>, transform_indices = @transform_5, window_bounds = array<i64: 3, 1, 128>}, {pipeline_mode = #tpu.pipeline_mode<synchronous>, transform_indices = @transform_6, window_bounds = array<i64: 3, 9, 128, 128>}, {pipeline_mode = #tpu.pipeline_mode<synchronous>, transform_indices = @transform_7, window_bounds = array<i64: 3, 1, 128>}, {pipeline_mode = #tpu.pipeline_mode<synchronous>, transform_indices = @transform_8, window_bounds = array<i64: 3, 1, 128>}, {pipeline_mode = #tpu.pipeline_mode<synchronous>, transform_indices = @transform_9, window_bounds = array<i64: 3, 1, 128>}, {pipeline_mode = #tpu.pipeline_mode<synchronous>, transform_indices = @transform_10, window_bounds = array<i64: 2, 128>}, {pipeline_mode = #tpu.pipeline_mode<synchronous>, transform_indices = @transform_11, window_bounds = array<i64: 128, 128>}, {pipeline_mode = #tpu.pipeline_mode<synchronous>, transform_indices = @transform_12, window_bounds = array<i64: 1, 128>}, {pipeline_mode = #tpu.pipeline_mode<synchronous>, transform_indices = @transform_13, window_bounds = array<i64: 2, 128>}]} {
    %c0 = arith.constant 0 : index
    %c0_0 = arith.constant 0 : index
    %0 = vector.load %arg2[%c0, %c0_0] : memref<128x1xf32, #tpu.memory_space<vmem>>, vector<128x1xf32>
    %c0_1 = arith.constant 0 : index
    %c0_2 = arith.constant 0 : index
    %1 = vector.load %arg1[%c0_1, %c0_2] : memref<160x128xf32, #tpu.memory_space<vmem>>, vector<160x128xf32>
    %c0_3 = arith.constant 0 : index
    %c0_4 = arith.constant 0 : index
    %2 = vector.load %arg15[%c0_3, %c0_4] : memref<160x128xf32, #tpu.memory_space<vmem>>, vector<160x128xf32>
    tpu.vector_store %arg15[%c0_3, %c0_4], %1 {strides = array<i32>} : memref<160x128xf32, #tpu.memory_space<vmem>>, vector<160x128xf32>,
    %c16 = arith.constant 16 : index
    %c0_5 = arith.constant 0 : index
    %3 = vector.load %arg15[%c16, %c0_5] : memref<160x128xf32, #tpu.memory_space<vmem>>, vector<128x128xf32>
    %cst = arith.constant 0.000000e+00 : f32
    %4 = vector.broadcast %cst : f32 to vector<128x128xf32>
    %c7 = arith.constant 7 : index
    %c0_6 = arith.constant 0 : index
    %5 = vector.load %arg15[%c7, %c0_6] : memref<160x128xf32, #tpu.memory_space<vmem>>, vector<128x128xf32>
    %6 = arith.truncf %5 : vector<128x128xf32> to vector<128x128xbf16>
    %c0_7 = arith.constant 0 : index
    %c0_8 = arith.constant 0 : index
    %c0_9 = arith.constant 0 : index
    %c0_10 = arith.constant 0 : index
    %7 = vector.load %arg3[%c0_7, %c0_8, %c0_9, %c0_10] : memref<3x9x128x128xbf16, #tpu.memory_space<vmem>>, vector<1x1x128x128xbf16>
    %8 = vector.shape_cast %7 : vector<1x1x128x128xbf16> to vector<128x128xbf16>
    %cst_11 = arith.constant dense<0.000000e+00> : vector<128x128xf32>
    %9 = tpu.matmul %6, %8, %cst_11 {dimension_numbers = #tpu.dot_dimension_numbers<[1], [0], [0], [1], [0, 0, 1, 1], [], []>} : vector<128x128xbf16>, vector<128x128xbf16>, vector<128x128xf32> -> vector<128x128xf32>
    %10 = arith.addf %4, %9 : vector<128x128xf32>
    %c8 = arith.constant 8 : index
    %c0_12 = arith.constant 0 : index
    %11 = vector.load %arg15[%c8, %c0_12] : memref<160x128xf32, #tpu.memory_space<vmem>>, vector<128x128xf32>
    %12 = arith.truncf %11 : vector<128x128xf32> to vector<128x128xbf16>
    %c0_13 = arith.constant 0 : index
    %c1 = arith.constant 1 : index
    %c0_14 = arith.constant 0 : index
    %c0_15 = arith.constant 0 : index
    %13 = vector.load %arg3[%c0_13, %c1, %c0_14, %c0_15] : memref<3x9x128x128xbf16, #tpu.memory_space<vmem>>, vector<1x1x128x128xbf16>
    %14 = vector.shape_cast %13 : vector<1x1x128x128xbf16> to vector<128x128xbf16>
    %cst_16 = arith.constant dense<0.000000e+00> : vector<128x128xf32>
    %15 = tpu.matmul %12, %14, %cst_16 {dimension_numbers = #tpu.dot_dimension_numbers<[1], [0], [0], [1], [0, 0, 1, 1], [], []>} : vector<128x128xbf16>, vector<128x128xbf16>, vector<128x128xf32> -> vector<128x128xf32>
    %16 = arith.addf %10, %15 : vector<128x128xf32>
    %c9 = arith.constant 9 : index
    %c0_17 = arith.constant 0 : index
    %17 = vector.load %arg15[%c9, %c0_17] : memref<160x128xf32, #tpu.memory_space<vmem>>, vector<128x128xf32>
    %18 = arith.truncf %17 : vector<128x128xf32> to vector<128x128xbf16>
    %c0_18 = arith.constant 0 : index
    %c2 = arith.constant 2 : index
    %c0_19 = arith.constant 0 : index
    %c0_20 = arith.constant 0 : index
    %19 = vector.load %arg3[%c0_18, %c2, %c0_19, %c0_20] : memref<3x9x128x128xbf16, #tpu.memory_space<vmem>>, vector<1x1x128x128xbf16>
    %20 = vector.shape_cast %19 : vector<1x1x128x128xbf16> to vector<128x128xbf16>
    %cst_21 = arith.constant dense<0.000000e+00> : vector<128x128xf32>
    %21 = tpu.matmul %18, %20, %cst_21 {dimension_numbers = #tpu.dot_dimension_numbers<[1], [0], [0], [1], [0, 0, 1, 1], [], []>} : vector<128x128xbf16>, vector<128x128xbf16>, vector<128x128xf32> -> vector<128x128xf32>
    %22 = arith.addf %16, %21 : vector<128x128xf32>
    %c15 = arith.constant 15 : index
    %c0_22 = arith.constant 0 : index
    %23 = vector.load %arg15[%c15, %c0_22] : memref<160x128xf32, #tpu.memory_space<vmem>>, vector<128x128xf32>
    %24 = arith.truncf %23 : vector<128x128xf32> to vector<128x128xbf16>
    %c0_23 = arith.constant 0 : index
    %c3 = arith.constant 3 : index
    %c0_24 = arith.constant 0 : index
    %c0_25 = arith.constant 0 : index
    %25 = vector.load %arg3[%c0_23, %c3, %c0_24, %c0_25] : memref<3x9x128x128xbf16, #tpu.memory_space<vmem>>, vector<1x1x128x128xbf16>
    %26 = vector.shape_cast %25 : vector<1x1x128x128xbf16> to vector<128x128xbf16>
    %cst_26 = arith.constant dense<0.000000e+00> : vector<128x128xf32>
    %27 = tpu.matmul %24, %26, %cst_26 {dimension_numbers = #tpu.dot_dimension_numbers<[1], [0], [0], [1], [0, 0, 1, 1], [], []>} : vector<128x128xbf16>, vector<128x128xbf16>, vector<128x128xf32> -> vector<128x128xf32>
    %28 = arith.addf %22, %27 : vector<128x128xf32>
    %c16_27 = arith.constant 16 : index
    %c0_28 = arith.constant 0 : index
    %29 = vector.load %arg15[%c16_27, %c0_28] : memref<160x128xf32, #tpu.memory_space<vmem>>, vector<128x128xf32>
    %30 = arith.truncf %29 : vector<128x128xf32> to vector<128x128xbf16>
    %c0_29 = arith.constant 0 : index
    %c4 = arith.constant 4 : index
    %c0_30 = arith.constant 0 : index
    %c0_31 = arith.constant 0 : index
    %31 = vector.load %arg3[%c0_29, %c4, %c0_30, %c0_31] : memref<3x9x128x128xbf16, #tpu.memory_space<vmem>>, vector<1x1x128x128xbf16>
    %32 = vector.shape_cast %31 : vector<1x1x128x128xbf16> to vector<128x128xbf16>
    %cst_32 = arith.constant dense<0.000000e+00> : vector<128x128xf32>
    %33 = tpu.matmul %30, %32, %cst_32 {dimension_numbers = #tpu.dot_dimension_numbers<[1], [0], [0], [1], [0, 0, 1, 1], [], []>} : vector<128x128xbf16>, vector<128x128xbf16>, vector<128x128xf32> -> vector<128x128xf32>
    %34 = arith.addf %28, %33 : vector<128x128xf32>
    %c17 = arith.constant 17 : index
    %c0_33 = arith.constant 0 : index
    %35 = vector.load %arg15[%c17, %c0_33] : memref<160x128xf32, #tpu.memory_space<vmem>>, vector<128x128xf32>
    %36 = arith.truncf %35 : vector<128x128xf32> to vector<128x128xbf16>
    %c0_34 = arith.constant 0 : index
    %c5 = arith.constant 5 : index
    %c0_35 = arith.constant 0 : index
    %c0_36 = arith.constant 0 : index
    %37 = vector.load %arg3[%c0_34, %c5, %c0_35, %c0_36] : memref<3x9x128x128xbf16, #tpu.memory_space<vmem>>, vector<1x1x128x128xbf16>
    %38 = vector.shape_cast %37 : vector<1x1x128x128xbf16> to vector<128x128xbf16>
    %cst_37 = arith.constant dense<0.000000e+00> : vector<128x128xf32>
    %39 = tpu.matmul %36, %38, %cst_37 {dimension_numbers = #tpu.dot_dimension_numbers<[1], [0], [0], [1], [0, 0, 1, 1], [], []>} : vector<128x128xbf16>, vector<128x128xbf16>, vector<128x128xf32> -> vector<128x128xf32>
    %40 = arith.addf %34, %39 : vector<128x128xf32>
    %c23 = arith.constant 23 : index
    %c0_38 = arith.constant 0 : index
    %41 = vector.load %arg15[%c23, %c0_38] : memref<160x128xf32, #tpu.memory_space<vmem>>, vector<128x128xf32>
    %42 = arith.truncf %41 : vector<128x128xf32> to vector<128x128xbf16>
    %c0_39 = arith.constant 0 : index
    %c6 = arith.constant 6 : index
    %c0_40 = arith.constant 0 : index
    %c0_41 = arith.constant 0 : index
    %43 = vector.load %arg3[%c0_39, %c6, %c0_40, %c0_41] : memref<3x9x128x128xbf16, #tpu.memory_space<vmem>>, vector<1x1x128x128xbf16>
    %44 = vector.shape_cast %43 : vector<1x1x128x128xbf16> to vector<128x128xbf16>
    %cst_42 = arith.constant dense<0.000000e+00> : vector<128x128xf32>
    %45 = tpu.matmul %42, %44, %cst_42 {dimension_numbers = #tpu.dot_dimension_numbers<[1], [0], [0], [1], [0, 0, 1, 1], [], []>} : vector<128x128xbf16>, vector<128x128xbf16>, vector<128x128xf32> -> vector<128x128xf32>
    %46 = arith.addf %40, %45 : vector<128x128xf32>
    %c24 = arith.constant 24 : index
    %c0_43 = arith.constant 0 : index
    %47 = vector.load %arg15[%c24, %c0_43] : memref<160x128xf32, #tpu.memory_space<vmem>>, vector<128x128xf32>
    %48 = arith.truncf %47 : vector<128x128xf32> to vector<128x128xbf16>
    %c0_44 = arith.constant 0 : index
    %c7_45 = arith.constant 7 : index
    %c0_46 = arith.constant 0 : index
    %c0_47 = arith.constant 0 : index
    %49 = vector.load %arg3[%c0_44, %c7_45, %c0_46, %c0_47] : memref<3x9x128x128xbf16, #tpu.memory_space<vmem>>, vector<1x1x128x128xbf16>
    %50 = vector.shape_cast %49 : vector<1x1x128x128xbf16> to vector<128x128xbf16>
    %cst_48 = arith.constant dense<0.000000e+00> : vector<128x128xf32>
    %51 = tpu.matmul %48, %50, %cst_48 {dimension_numbers = #tpu.dot_dimension_numbers<[1], [0], [0], [1], [0, 0, 1, 1], [], []>} : vector<128x128xbf16>, vector<128x128xbf16>, vector<128x128xf32> -> vector<128x128xf32>
    %52 = arith.addf %46, %51 : vector<128x128xf32>
    %c25 = arith.constant 25 : index
    %c0_49 = arith.constant 0 : index
    %53 = vector.load %arg15[%c25, %c0_49] : memref<160x128xf32, #tpu.memory_space<vmem>>, vector<128x128xf32>
    %54 = arith.truncf %53 : vector<128x128xf32> to vector<128x128xbf16>
    %c0_50 = arith.constant 0 : index
    %c8_51 = arith.constant 8 : index
    %c0_52 = arith.constant 0 : index
    %c0_53 = arith.constant 0 : index
    %55 = vector.load %arg3[%c0_50, %c8_51, %c0_52, %c0_53] : memref<3x9x128x128xbf16, #tpu.memory_space<vmem>>, vector<1x1x128x128xbf16>
    %56 = vector.shape_cast %55 : vector<1x1x128x128xbf16> to vector<128x128xbf16>
    %cst_54 = arith.constant dense<0.000000e+00> : vector<128x128xf32>
    %57 = tpu.matmul %54, %56, %cst_54 {dimension_numbers = #tpu.dot_dimension_numbers<[1], [0], [0], [1], [0, 0, 1, 1], [], []>} : vector<128x128xbf16>, vector<128x128xbf16>, vector<128x128xf32> -> vector<128x128xf32>
    %58 = arith.addf %52, %57 : vector<128x128xf32>
    %c0_55 = arith.constant 0 : index
    %c0_56 = arith.constant 0 : index
    %c0_57 = arith.constant 0 : index
    %59 = vector.load %arg4[%c0_55, %c0_56, %c0_57] : memref<3x1x128xf32, #tpu.memory_space<vmem>>, vector<1x1x128xf32>
    %60 = vector.shape_cast %59 : vector<1x1x128xf32> to vector<1x128xf32>
    %61 = vector.broadcast %60 : vector<1x128xf32> to vector<128x128xf32>
    %62 = arith.addf %58, %61 : vector<128x128xf32>
    %cst_58 = arith.constant 0.000000e+00 : f32
    %63 = vector.broadcast %cst_58 : f32 to vector<128x128xf32>
    %64 = arith.maximumf %62, %63 : vector<128x128xf32>
    %c0_59 = arith.constant 0 : index
    %c0_60 = arith.constant 0 : index
    %c0_61 = arith.constant 0 : index
    %65 = vector.load %arg5[%c0_59, %c0_60, %c0_61] : memref<3x1x128xf32, #tpu.memory_space<vmem>>, vector<1x1x128xf32>
    %66 = vector.shape_cast %65 : vector<1x1x128xf32> to vector<1x128xf32>
    %c0_62 = arith.constant 0 : index
    %c0_63 = arith.constant 0 : index
    %c0_64 = arith.constant 0 : index
    %67 = vector.load %arg6[%c0_62, %c0_63, %c0_64] : memref<3x1x128xf32, #tpu.memory_space<vmem>>, vector<1x1x128xf32>
    %68 = vector.shape_cast %67 : vector<1x1x128xf32> to vector<1x128xf32>
    %69 = vector.broadcast %0 : vector<128x1xf32> to vector<128x128xf32>
    %70 = arith.mulf %64, %69 : vector<128x128xf32>
    %cst_65 = arith.constant dense<0.000000e+00> : vector<128xf32>
    %71 = vector.multi_reduction <add>, %70, %cst_65 [0] : vector<128x128xf32> to vector<128xf32>
    %72 = vector.shape_cast %71 : vector<128xf32> to vector<1x128xf32>
    %cst_66 = arith.constant 0.013888889 : f32
    %73 = vector.broadcast %cst_66 : f32 to vector<1x128xf32>
    %74 = arith.mulf %72, %73 : vector<1x128xf32>
    %75 = vector.broadcast %74 : vector<1x128xf32> to vector<128x128xf32>
    %76 = arith.subf %64, %75 : vector<128x128xf32>
    %77 = vector.broadcast %0 : vector<128x1xf32> to vector<128x128xf32>
    %78 = arith.mulf %76, %77 : vector<128x128xf32>
    %79 = arith.mulf %78, %78 : vector<128x128xf32>
    %cst_67 = arith.constant dense<0.000000e+00> : vector<128xf32>
    %80 = vector.multi_reduction <add>, %79, %cst_67 [0] : vector<128x128xf32> to vector<128xf32>
    %81 = vector.shape_cast %80 : vector<128xf32> to vector<1x128xf32>
    %cst_68 = arith.constant 0.013888889 : f32
    %82 = vector.broadcast %cst_68 : f32 to vector<1x128xf32>
    %83 = arith.mulf %81, %82 : vector<1x128xf32>
    %cst_69 = arith.constant 9.99999974E-6 : f32
    %84 = vector.broadcast %cst_69 : f32 to vector<1x128xf32>
    %85 = arith.addf %83, %84 : vector<1x128xf32>
    %86 = math.rsqrt %85 : vector<1x128xf32>
    %87 = vector.broadcast %86 : vector<1x128xf32> to vector<128x128xf32>
    %88 = arith.mulf %76, %87 : vector<128x128xf32>
    %89 = vector.broadcast %66 : vector<1x128xf32> to vector<128x128xf32>
    %90 = arith.mulf %88, %89 : vector<128x128xf32>
    %91 = vector.broadcast %68 : vector<1x128xf32> to vector<128x128xf32>
    %92 = arith.addf %90, %91 : vector<128x128xf32>
    %93 = vector.broadcast %0 : vector<128x1xf32> to vector<128x128xf32>
    %94 = arith.mulf %92, %93 : vector<128x128xf32>
    %c16_70 = arith.constant 16 : index
    %c0_71 = arith.constant 0 : index
    %95 = vector.load %arg15[%c16_70, %c0_71] : memref<160x128xf32, #tpu.memory_space<vmem>>, vector<128x128xf32>
    tpu.vector_store %arg15[%c16_70, %c0_71], %94 {strides = array<i32>} : memref<160x128xf32, #tpu.memory_space<vmem>>, vector<128x128xf32>,
    %cst_72 = arith.constant 0.000000e+00 : f32
    %96 = vector.broadcast %cst_72 : f32 to vector<128x128xf32>
    %c7_73 = arith.constant 7 : index
    %c0_74 = arith.constant 0 : index
    %97 = vector.load %arg15[%c7_73, %c0_74] : memref<160x128xf32, #tpu.memory_space<vmem>>, vector<128x128xf32>
    %98 = arith.truncf %97 : vector<128x128xf32> to vector<128x128xbf16>
    %c0_75 = arith.constant 0 : index
    %c0_76 = arith.constant 0 : index
    %c0_77 = arith.constant 0 : index
    %c0_78 = arith.constant 0 : index
    %99 = vector.load %arg7[%c0_75, %c0_76, %c0_77, %c0_78] : memref<3x9x128x128xbf16, #tpu.memory_space<vmem>>, vector<1x1x128x128xbf16>
    %100 = vector.shape_cast %99 : vector<1x1x128x128xbf16> to vector<128x128xbf16>
    %cst_79 = arith.constant dense<0.000000e+00> : vector<128x128xf32>
    %101 = tpu.matmul %98, %100, %cst_79 {dimension_numbers = #tpu.dot_dimension_numbers<[1], [0], [0], [1], [0, 0, 1, 1], [], []>} : vector<128x128xbf16>, vector<128x128xbf16>, vector<128x128xf32> -> vector<128x128xf32>
    %102 = arith.addf %96, %101 : vector<128x128xf32>
    %c8_80 = arith.constant 8 : index
    %c0_81 = arith.constant 0 : index
    %103 = vector.load %arg15[%c8_80, %c0_81] : memref<160x128xf32, #tpu.memory_space<vmem>>, vector<128x128xf32>
    %104 = arith.truncf %103 : vector<128x128xf32> to vector<128x128xbf16>
    %c0_82 = arith.constant 0 : index
    %c1_83 = arith.constant 1 : index
    %c0_84 = arith.constant 0 : index
    %c0_85 = arith.constant 0 : index
    %105 = vector.load %arg7[%c0_82, %c1_83, %c0_84, %c0_85] : memref<3x9x128x128xbf16, #tpu.memory_space<vmem>>, vector<1x1x128x128xbf16>
    %106 = vector.shape_cast %105 : vector<1x1x128x128xbf16> to vector<128x128xbf16>
    %cst_86 = arith.constant dense<0.000000e+00> : vector<128x128xf32>
    %107 = tpu.matmul %104, %106, %cst_86 {dimension_numbers = #tpu.dot_dimension_numbers<[1], [0], [0], [1], [0, 0, 1, 1], [], []>} : vector<128x128xbf16>, vector<128x128xbf16>, vector<128x128xf32> -> vector<128x128xf32>
    %108 = arith.addf %102, %107 : vector<128x128xf32>
    %c9_87 = arith.constant 9 : index
    %c0_88 = arith.constant 0 : index
    %109 = vector.load %arg15[%c9_87, %c0_88] : memref<160x128xf32, #tpu.memory_space<vmem>>, vector<128x128xf32>
    %110 = arith.truncf %109 : vector<128x128xf32> to vector<128x128xbf16>
    %c0_89 = arith.constant 0 : index
    %c2_90 = arith.constant 2 : index
    %c0_91 = arith.constant 0 : index
    %c0_92 = arith.constant 0 : index
    %111 = vector.load %arg7[%c0_89, %c2_90, %c0_91, %c0_92] : memref<3x9x128x128xbf16, #tpu.memory_space<vmem>>, vector<1x1x128x128xbf16>
    %112 = vector.shape_cast %111 : vector<1x1x128x128xbf16> to vector<128x128xbf16>
    %cst_93 = arith.constant dense<0.000000e+00> : vector<128x128xf32>
    %113 = tpu.matmul %110, %112, %cst_93 {dimension_numbers = #tpu.dot_dimension_numbers<[1], [0], [0], [1], [0, 0, 1, 1], [], []>} : vector<128x128xbf16>, vector<128x128xbf16>, vector<128x128xf32> -> vector<128x128xf32>
    %114 = arith.addf %108, %113 : vector<128x128xf32>
    %c15_94 = arith.constant 15 : index
    %c0_95 = arith.constant 0 : index
    %115 = vector.load %arg15[%c15_94, %c0_95] : memref<160x128xf32, #tpu.memory_space<vmem>>, vector<128x128xf32>
    %116 = arith.truncf %115 : vector<128x128xf32> to vector<128x128xbf16>
    %c0_96 = arith.constant 0 : index
    %c3_97 = arith.constant 3 : index
    %c0_98 = arith.constant 0 : index
    %c0_99 = arith.constant 0 : index
    %117 = vector.load %arg7[%c0_96, %c3_97, %c0_98, %c0_99] : memref<3x9x128x128xbf16, #tpu.memory_space<vmem>>, vector<1x1x128x128xbf16>
    %118 = vector.shape_cast %117 : vector<1x1x128x128xbf16> to vector<128x128xbf16>
    %cst_100 = arith.constant dense<0.000000e+00> : vector<128x128xf32>
    %119 = tpu.matmul %116, %118, %cst_100 {dimension_numbers = #tpu.dot_dimension_numbers<[1], [0], [0], [1], [0, 0, 1, 1], [], []>} : vector<128x128xbf16>, vector<128x128xbf16>, vector<128x128xf32> -> vector<128x128xf32>
    %120 = arith.addf %114, %119 : vector<128x128xf32>
    %c16_101 = arith.constant 16 : index
    %c0_102 = arith.constant 0 : index
    %121 = vector.load %arg15[%c16_101, %c0_102] : memref<160x128xf32, #tpu.memory_space<vmem>>, vector<128x128xf32>
    %122 = arith.truncf %121 : vector<128x128xf32> to vector<128x128xbf16>
    %c0_103 = arith.constant 0 : index
    %c4_104 = arith.constant 4 : index
    %c0_105 = arith.constant 0 : index
    %c0_106 = arith.constant 0 : index
    %123 = vector.load %arg7[%c0_103, %c4_104, %c0_105, %c0_106] : memref<3x9x128x128xbf16, #tpu.memory_space<vmem>>, vector<1x1x128x128xbf16>
    %124 = vector.shape_cast %123 : vector<1x1x128x128xbf16> to vector<128x128xbf16>
    %cst_107 = arith.constant dense<0.000000e+00> : vector<128x128xf32>
    %125 = tpu.matmul %122, %124, %cst_107 {dimension_numbers = #tpu.dot_dimension_numbers<[1], [0], [0], [1], [0, 0, 1, 1], [], []>} : vector<128x128xbf16>, vector<128x128xbf16>, vector<128x128xf32> -> vector<128x128xf32>
    %126 = arith.addf %120, %125 : vector<128x128xf32>
    %c17_108 = arith.constant 17 : index
    %c0_109 = arith.constant 0 : index
    %127 = vector.load %arg15[%c17_108, %c0_109] : memref<160x128xf32, #tpu.memory_space<vmem>>, vector<128x128xf32>
    %128 = arith.truncf %127 : vector<128x128xf32> to vector<128x128xbf16>
    %c0_110 = arith.constant 0 : index
    %c5_111 = arith.constant 5 : index
    %c0_112 = arith.constant 0 : index
    %c0_113 = arith.constant 0 : index
    %129 = vector.load %arg7[%c0_110, %c5_111, %c0_112, %c0_113] : memref<3x9x128x128xbf16, #tpu.memory_space<vmem>>, vector<1x1x128x128xbf16>
    %130 = vector.shape_cast %129 : vector<1x1x128x128xbf16> to vector<128x128xbf16>
    %cst_114 = arith.constant dense<0.000000e+00> : vector<128x128xf32>
    %131 = tpu.matmul %128, %130, %cst_114 {dimension_numbers = #tpu.dot_dimension_numbers<[1], [0], [0], [1], [0, 0, 1, 1], [], []>} : vector<128x128xbf16>, vector<128x128xbf16>, vector<128x128xf32> -> vector<128x128xf32>
    %132 = arith.addf %126, %131 : vector<128x128xf32>
    %c23_115 = arith.constant 23 : index
    %c0_116 = arith.constant 0 : index
    %133 = vector.load %arg15[%c23_115, %c0_116] : memref<160x128xf32, #tpu.memory_space<vmem>>, vector<128x128xf32>
    %134 = arith.truncf %133 : vector<128x128xf32> to vector<128x128xbf16>
    %c0_117 = arith.constant 0 : index
    %c6_118 = arith.constant 6 : index
    %c0_119 = arith.constant 0 : index
    %c0_120 = arith.constant 0 : index
    %135 = vector.load %arg7[%c0_117, %c6_118, %c0_119, %c0_120] : memref<3x9x128x128xbf16, #tpu.memory_space<vmem>>, vector<1x1x128x128xbf16>
    %136 = vector.shape_cast %135 : vector<1x1x128x128xbf16> to vector<128x128xbf16>
    %cst_121 = arith.constant dense<0.000000e+00> : vector<128x128xf32>
    %137 = tpu.matmul %134, %136, %cst_121 {dimension_numbers = #tpu.dot_dimension_numbers<[1], [0], [0], [1], [0, 0, 1, 1], [], []>} : vector<128x128xbf16>, vector<128x128xbf16>, vector<128x128xf32> -> vector<128x128xf32>
    %138 = arith.addf %132, %137 : vector<128x128xf32>
    %c24_122 = arith.constant 24 : index
    %c0_123 = arith.constant 0 : index
    %139 = vector.load %arg15[%c24_122, %c0_123] : memref<160x128xf32, #tpu.memory_space<vmem>>, vector<128x128xf32>
    %140 = arith.truncf %139 : vector<128x128xf32> to vector<128x128xbf16>
    %c0_124 = arith.constant 0 : index
    %c7_125 = arith.constant 7 : index
    %c0_126 = arith.constant 0 : index
    %c0_127 = arith.constant 0 : index
    %141 = vector.load %arg7[%c0_124, %c7_125, %c0_126, %c0_127] : memref<3x9x128x128xbf16, #tpu.memory_space<vmem>>, vector<1x1x128x128xbf16>
    %142 = vector.shape_cast %141 : vector<1x1x128x128xbf16> to vector<128x128xbf16>
    %cst_128 = arith.constant dense<0.000000e+00> : vector<128x128xf32>
    %143 = tpu.matmul %140, %142, %cst_128 {dimension_numbers = #tpu.dot_dimension_numbers<[1], [0], [0], [1], [0, 0, 1, 1], [], []>} : vector<128x128xbf16>, vector<128x128xbf16>, vector<128x128xf32> -> vector<128x128xf32>
    %144 = arith.addf %138, %143 : vector<128x128xf32>
    %c25_129 = arith.constant 25 : index
    %c0_130 = arith.constant 0 : index
    %145 = vector.load %arg15[%c25_129, %c0_130] : memref<160x128xf32, #tpu.memory_space<vmem>>, vector<128x128xf32>
    %146 = arith.truncf %145 : vector<128x128xf32> to vector<128x128xbf16>
    %c0_131 = arith.constant 0 : index
    %c8_132 = arith.constant 8 : index
    %c0_133 = arith.constant 0 : index
    %c0_134 = arith.constant 0 : index
    %147 = vector.load %arg7[%c0_131, %c8_132, %c0_133, %c0_134] : memref<3x9x128x128xbf16, #tpu.memory_space<vmem>>, vector<1x1x128x128xbf16>
    %148 = vector.shape_cast %147 : vector<1x1x128x128xbf16> to vector<128x128xbf16>
    %cst_135 = arith.constant dense<0.000000e+00> : vector<128x128xf32>
    %149 = tpu.matmul %146, %148, %cst_135 {dimension_numbers = #tpu.dot_dimension_numbers<[1], [0], [0], [1], [0, 0, 1, 1], [], []>} : vector<128x128xbf16>, vector<128x128xbf16>, vector<128x128xf32> -> vector<128x128xf32>
    %150 = arith.addf %144, %149 : vector<128x128xf32>
    %c0_136 = arith.constant 0 : index
    %c0_137 = arith.constant 0 : index
    %c0_138 = arith.constant 0 : index
    %151 = vector.load %arg8[%c0_136, %c0_137, %c0_138] : memref<3x1x128xf32, #tpu.memory_space<vmem>>, vector<1x1x128xf32>
    %152 = vector.shape_cast %151 : vector<1x1x128xf32> to vector<1x128xf32>
    %153 = vector.broadcast %152 : vector<1x128xf32> to vector<128x128xf32>
    %154 = arith.addf %150, %153 : vector<128x128xf32>
    %155 = arith.addf %154, %3 : vector<128x128xf32>
    %cst_139 = arith.constant 0.000000e+00 : f32
    %156 = vector.broadcast %cst_139 : f32 to vector<128x128xf32>
    %157 = arith.maximumf %155, %156 : vector<128x128xf32>
    %c0_140 = arith.constant 0 : index
    %c0_141 = arith.constant 0 : index
    %c0_142 = arith.constant 0 : index
    %158 = vector.load %arg9[%c0_140, %c0_141, %c0_142] : memref<3x1x128xf32, #tpu.memory_space<vmem>>, vector<1x1x128xf32>
    %159 = vector.shape_cast %158 : vector<1x1x128xf32> to vector<1x128xf32>
    %c0_143 = arith.constant 0 : index
    %c0_144 = arith.constant 0 : index
    %c0_145 = arith.constant 0 : index
    %160 = vector.load %arg10[%c0_143, %c0_144, %c0_145] : memref<3x1x128xf32, #tpu.memory_space<vmem>>, vector<1x1x128xf32>
    %161 = vector.shape_cast %160 : vector<1x1x128xf32> to vector<1x128xf32>
    %162 = vector.broadcast %0 : vector<128x1xf32> to vector<128x128xf32>
    %163 = arith.mulf %157, %162 : vector<128x128xf32>
    %cst_146 = arith.constant dense<0.000000e+00> : vector<128xf32>
    %164 = vector.multi_reduction <add>, %163, %cst_146 [0] : vector<128x128xf32> to vector<128xf32>
    %165 = vector.shape_cast %164 : vector<128xf32> to vector<1x128xf32>
    %cst_147 = arith.constant 0.013888889 : f32
    %166 = vector.broadcast %cst_147 : f32 to vector<1x128xf32>
    %167 = arith.mulf %165, %166 : vector<1x128xf32>
    %168 = vector.broadcast %167 : vector<1x128xf32> to vector<128x128xf32>
    %169 = arith.subf %157, %168 : vector<128x128xf32>
    %170 = vector.broadcast %0 : vector<128x1xf32> to vector<128x128xf32>
    %171 = arith.mulf %169, %170 : vector<128x128xf32>
    %172 = arith.mulf %171, %171 : vector<128x128xf32>
    %cst_148 = arith.constant dense<0.000000e+00> : vector<128xf32>
    %173 = vector.multi_reduction <add>, %172, %cst_148 [0] : vector<128x128xf32> to vector<128xf32>
    %174 = vector.shape_cast %173 : vector<128xf32> to vector<1x128xf32>
    %cst_149 = arith.constant 0.013888889 : f32
    %175 = vector.broadcast %cst_149 : f32 to vector<1x128xf32>
    %176 = arith.mulf %174, %175 : vector<1x128xf32>
    %cst_150 = arith.constant 9.99999974E-6 : f32
    %177 = vector.broadcast %cst_150 : f32 to vector<1x128xf32>
    %178 = arith.addf %176, %177 : vector<1x128xf32>
    %179 = math.rsqrt %178 : vector<1x128xf32>
    %180 = vector.broadcast %179 : vector<1x128xf32> to vector<128x128xf32>
    %181 = arith.mulf %169, %180 : vector<128x128xf32>
    %182 = vector.broadcast %159 : vector<1x128xf32> to vector<128x128xf32>
    %183 = arith.mulf %181, %182 : vector<128x128xf32>
    %184 = vector.broadcast %161 : vector<1x128xf32> to vector<128x128xf32>
    %185 = arith.addf %183, %184 : vector<128x128xf32>
    %186 = vector.broadcast %0 : vector<128x1xf32> to vector<128x128xf32>
    %187 = arith.mulf %185, %186 : vector<128x128xf32>
    %c16_151 = arith.constant 16 : index
    %c0_152 = arith.constant 0 : index
    %188 = vector.load %arg15[%c16_151, %c0_152] : memref<160x128xf32, #tpu.memory_space<vmem>>, vector<128x128xf32>
    tpu.vector_store %arg15[%c16_151, %c0_152], %187 {strides = array<i32>} : memref<160x128xf32, #tpu.memory_space<vmem>>, vector<128x128xf32>,
    %c16_153 = arith.constant 16 : index
    %c0_154 = arith.constant 0 : index
    %189 = vector.load %arg15[%c16_153, %c0_154] : memref<160x128xf32, #tpu.memory_space<vmem>>, vector<128x128xf32>
    %cst_155 = arith.constant 0.000000e+00 : f32
    %190 = vector.broadcast %cst_155 : f32 to vector<128x128xf32>
    %c7_156 = arith.constant 7 : index
    %c0_157 = arith.constant 0 : index
    %191 = vector.load %arg15[%c7_156, %c0_157] : memref<160x128xf32, #tpu.memory_space<vmem>>, vector<128x128xf32>
    %192 = arith.truncf %191 : vector<128x128xf32> to vector<128x128xbf16>
    %c1_158 = arith.constant 1 : index
    %c0_159 = arith.constant 0 : index
    %c0_160 = arith.constant 0 : index
    %c0_161 = arith.constant 0 : index
    %193 = vector.load %arg3[%c1_158, %c0_159, %c0_160, %c0_161] : memref<3x9x128x128xbf16, #tpu.memory_space<vmem>>, vector<1x1x128x128xbf16>
    %194 = vector.shape_cast %193 : vector<1x1x128x128xbf16> to vector<128x128xbf16>
    %cst_162 = arith.constant dense<0.000000e+00> : vector<128x128xf32>
    %195 = tpu.matmul %192, %194, %cst_162 {dimension_numbers = #tpu.dot_dimension_numbers<[1], [0], [0], [1], [0, 0, 1, 1], [], []>} : vector<128x128xbf16>, vector<128x128xbf16>, vector<128x128xf32> -> vector<128x128xf32>
    %196 = arith.addf %190, %195 : vector<128x128xf32>
    %c8_163 = arith.constant 8 : index
    %c0_164 = arith.constant 0 : index
    %197 = vector.load %arg15[%c8_163, %c0_164] : memref<160x128xf32, #tpu.memory_space<vmem>>, vector<128x128xf32>
    %198 = arith.truncf %197 : vector<128x128xf32> to vector<128x128xbf16>
    %c1_165 = arith.constant 1 : index
    %c1_166 = arith.constant 1 : index
    %c0_167 = arith.constant 0 : index
    %c0_168 = arith.constant 0 : index
    %199 = vector.load %arg3[%c1_165, %c1_166, %c0_167, %c0_168] : memref<3x9x128x128xbf16, #tpu.memory_space<vmem>>, vector<1x1x128x128xbf16>
    %200 = vector.shape_cast %199 : vector<1x1x128x128xbf16> to vector<128x128xbf16>
    %cst_169 = arith.constant dense<0.000000e+00> : vector<128x128xf32>
    %201 = tpu.matmul %198, %200, %cst_169 {dimension_numbers = #tpu.dot_dimension_numbers<[1], [0], [0], [1], [0, 0, 1, 1], [], []>} : vector<128x128xbf16>, vector<128x128xbf16>, vector<128x128xf32> -> vector<128x128xf32>
    %202 = arith.addf %196, %201 : vector<128x128xf32>
    %c9_170 = arith.constant 9 : index
    %c0_171 = arith.constant 0 : index
    %203 = vector.load %arg15[%c9_170, %c0_171] : memref<160x128xf32, #tpu.memory_space<vmem>>, vector<128x128xf32>
    %204 = arith.truncf %203 : vector<128x128xf32> to vector<128x128xbf16>
    %c1_172 = arith.constant 1 : index
    %c2_173 = arith.constant 2 : index
    %c0_174 = arith.constant 0 : index
    %c0_175 = arith.constant 0 : index
    %205 = vector.load %arg3[%c1_172, %c2_173, %c0_174, %c0_175] : memref<3x9x128x128xbf16, #tpu.memory_space<vmem>>, vector<1x1x128x128xbf16>
    %206 = vector.shape_cast %205 : vector<1x1x128x128xbf16> to vector<128x128xbf16>
    %cst_176 = arith.constant dense<0.000000e+00> : vector<128x128xf32>
    %207 = tpu.matmul %204, %206, %cst_176 {dimension_numbers = #tpu.dot_dimension_numbers<[1], [0], [0], [1], [0, 0, 1, 1], [], []>} : vector<128x128xbf16>, vector<128x128xbf16>, vector<128x128xf32> -> vector<128x128xf32>
    %208 = arith.addf %202, %207 : vector<128x128xf32>
    %c15_177 = arith.constant 15 : index
    %c0_178 = arith.constant 0 : index
    %209 = vector.load %arg15[%c15_177, %c0_178] : memref<160x128xf32, #tpu.memory_space<vmem>>, vector<128x128xf32>
    %210 = arith.truncf %209 : vector<128x128xf32> to vector<128x128xbf16>
    %c1_179 = arith.constant 1 : index
    %c3_180 = arith.constant 3 : index
    %c0_181 = arith.constant 0 : index
    %c0_182 = arith.constant 0 : index
    %211 = vector.load %arg3[%c1_179, %c3_180, %c0_181, %c0_182] : memref<3x9x128x128xbf16, #tpu.memory_space<vmem>>, vector<1x1x128x128xbf16>
    %212 = vector.shape_cast %211 : vector<1x1x128x128xbf16> to vector<128x128xbf16>
    %cst_183 = arith.constant dense<0.000000e+00> : vector<128x128xf32>
    %213 = tpu.matmul %210, %212, %cst_183 {dimension_numbers = #tpu.dot_dimension_numbers<[1], [0], [0], [1], [0, 0, 1, 1], [], []>} : vector<128x128xbf16>, vector<128x128xbf16>, vector<128x128xf32> -> vector<128x128xf32>
    %214 = arith.addf %208, %213 : vector<128x128xf32>
    %c16_184 = arith.constant 16 : index
    %c0_185 = arith.constant 0 : index
    %215 = vector.load %arg15[%c16_184, %c0_185] : memref<160x128xf32, #tpu.memory_space<vmem>>, vector<128x128xf32>
    %216 = arith.truncf %215 : vector<128x128xf32> to vector<128x128xbf16>
    %c1_186 = arith.constant 1 : index
    %c4_187 = arith.constant 4 : index
    %c0_188 = arith.constant 0 : index
    %c0_189 = arith.constant 0 : index
    %217 = vector.load %arg3[%c1_186, %c4_187, %c0_188, %c0_189] : memref<3x9x128x128xbf16, #tpu.memory_space<vmem>>, vector<1x1x128x128xbf16>
    %218 = vector.shape_cast %217 : vector<1x1x128x128xbf16> to vector<128x128xbf16>
    %cst_190 = arith.constant dense<0.000000e+00> : vector<128x128xf32>
    %219 = tpu.matmul %216, %218, %cst_190 {dimension_numbers = #tpu.dot_dimension_numbers<[1], [0], [0], [1], [0, 0, 1, 1], [], []>} : vector<128x128xbf16>, vector<128x128xbf16>, vector<128x128xf32> -> vector<128x128xf32>
    %220 = arith.addf %214, %219 : vector<128x128xf32>
    %c17_191 = arith.constant 17 : index
    %c0_192 = arith.constant 0 : index
    %221 = vector.load %arg15[%c17_191, %c0_192] : memref<160x128xf32, #tpu.memory_space<vmem>>, vector<128x128xf32>
    %222 = arith.truncf %221 : vector<128x128xf32> to vector<128x128xbf16>
    %c1_193 = arith.constant 1 : index
    %c5_194 = arith.constant 5 : index
    %c0_195 = arith.constant 0 : index
    %c0_196 = arith.constant 0 : index
    %223 = vector.load %arg3[%c1_193, %c5_194, %c0_195, %c0_196] : memref<3x9x128x128xbf16, #tpu.memory_space<vmem>>, vector<1x1x128x128xbf16>
    %224 = vector.shape_cast %223 : vector<1x1x128x128xbf16> to vector<128x128xbf16>
    %cst_197 = arith.constant dense<0.000000e+00> : vector<128x128xf32>
    %225 = tpu.matmul %222, %224, %cst_197 {dimension_numbers = #tpu.dot_dimension_numbers<[1], [0], [0], [1], [0, 0, 1, 1], [], []>} : vector<128x128xbf16>, vector<128x128xbf16>, vector<128x128xf32> -> vector<128x128xf32>
    %226 = arith.addf %220, %225 : vector<128x128xf32>
    %c23_198 = arith.constant 23 : index
    %c0_199 = arith.constant 0 : index
    %227 = vector.load %arg15[%c23_198, %c0_199] : memref<160x128xf32, #tpu.memory_space<vmem>>, vector<128x128xf32>
    %228 = arith.truncf %227 : vector<128x128xf32> to vector<128x128xbf16>
    %c1_200 = arith.constant 1 : index
    %c6_201 = arith.constant 6 : index
    %c0_202 = arith.constant 0 : index
    %c0_203 = arith.constant 0 : index
    %229 = vector.load %arg3[%c1_200, %c6_201, %c0_202, %c0_203] : memref<3x9x128x128xbf16, #tpu.memory_space<vmem>>, vector<1x1x128x128xbf16>
    %230 = vector.shape_cast %229 : vector<1x1x128x128xbf16> to vector<128x128xbf16>
    %cst_204 = arith.constant dense<0.000000e+00> : vector<128x128xf32>
    %231 = tpu.matmul %228, %230, %cst_204 {dimension_numbers = #tpu.dot_dimension_numbers<[1], [0], [0], [1], [0, 0, 1, 1], [], []>} : vector<128x128xbf16>, vector<128x128xbf16>, vector<128x128xf32> -> vector<128x128xf32>
    %232 = arith.addf %226, %231 : vector<128x128xf32>
    %c24_205 = arith.constant 24 : index
    %c0_206 = arith.constant 0 : index
    %233 = vector.load %arg15[%c24_205, %c0_206] : memref<160x128xf32, #tpu.memory_space<vmem>>, vector<128x128xf32>
    %234 = arith.truncf %233 : vector<128x128xf32> to vector<128x128xbf16>
    %c1_207 = arith.constant 1 : index
    %c7_208 = arith.constant 7 : index
    %c0_209 = arith.constant 0 : index
    %c0_210 = arith.constant 0 : index
    %235 = vector.load %arg3[%c1_207, %c7_208, %c0_209, %c0_210] : memref<3x9x128x128xbf16, #tpu.memory_space<vmem>>, vector<1x1x128x128xbf16>
    %236 = vector.shape_cast %235 : vector<1x1x128x128xbf16> to vector<128x128xbf16>
    %cst_211 = arith.constant dense<0.000000e+00> : vector<128x128xf32>
    %237 = tpu.matmul %234, %236, %cst_211 {dimension_numbers = #tpu.dot_dimension_numbers<[1], [0], [0], [1], [0, 0, 1, 1], [], []>} : vector<128x128xbf16>, vector<128x128xbf16>, vector<128x128xf32> -> vector<128x128xf32>
    %238 = arith.addf %232, %237 : vector<128x128xf32>
    %c25_212 = arith.constant 25 : index
    %c0_213 = arith.constant 0 : index
    %239 = vector.load %arg15[%c25_212, %c0_213] : memref<160x128xf32, #tpu.memory_space<vmem>>, vector<128x128xf32>
    %240 = arith.truncf %239 : vector<128x128xf32> to vector<128x128xbf16>
    %c1_214 = arith.constant 1 : index
    %c8_215 = arith.constant 8 : index
    %c0_216 = arith.constant 0 : index
    %c0_217 = arith.constant 0 : index
    %241 = vector.load %arg3[%c1_214, %c8_215, %c0_216, %c0_217] : memref<3x9x128x128xbf16, #tpu.memory_space<vmem>>, vector<1x1x128x128xbf16>
    %242 = vector.shape_cast %241 : vector<1x1x128x128xbf16> to vector<128x128xbf16>
    %cst_218 = arith.constant dense<0.000000e+00> : vector<128x128xf32>
    %243 = tpu.matmul %240, %242, %cst_218 {dimension_numbers = #tpu.dot_dimension_numbers<[1], [0], [0], [1], [0, 0, 1, 1], [], []>} : vector<128x128xbf16>, vector<128x128xbf16>, vector<128x128xf32> -> vector<128x128xf32>
    %244 = arith.addf %238, %243 : vector<128x128xf32>
    %c1_219 = arith.constant 1 : index
    %c0_220 = arith.constant 0 : index
    %c0_221 = arith.constant 0 : index
    %245 = vector.load %arg4[%c1_219, %c0_220, %c0_221] : memref<3x1x128xf32, #tpu.memory_space<vmem>>, vector<1x1x128xf32>
    %246 = vector.shape_cast %245 : vector<1x1x128xf32> to vector<1x128xf32>
    %247 = vector.broadcast %246 : vector<1x128xf32> to vector<128x128xf32>
    %248 = arith.addf %244, %247 : vector<128x128xf32>
    %cst_222 = arith.constant 0.000000e+00 : f32
    %249 = vector.broadcast %cst_222 : f32 to vector<128x128xf32>
    %250 = arith.maximumf %248, %249 : vector<128x128xf32>
    %c1_223 = arith.constant 1 : index
    %c0_224 = arith.constant 0 : index
    %c0_225 = arith.constant 0 : index
    %251 = vector.load %arg5[%c1_223, %c0_224, %c0_225] : memref<3x1x128xf32, #tpu.memory_space<vmem>>, vector<1x1x128xf32>
    %252 = vector.shape_cast %251 : vector<1x1x128xf32> to vector<1x128xf32>
    %c1_226 = arith.constant 1 : index
    %c0_227 = arith.constant 0 : index
    %c0_228 = arith.constant 0 : index
    %253 = vector.load %arg6[%c1_226, %c0_227, %c0_228] : memref<3x1x128xf32, #tpu.memory_space<vmem>>, vector<1x1x128xf32>
    %254 = vector.shape_cast %253 : vector<1x1x128xf32> to vector<1x128xf32>
    %255 = vector.broadcast %0 : vector<128x1xf32> to vector<128x128xf32>
    %256 = arith.mulf %250, %255 : vector<128x128xf32>
    %cst_229 = arith.constant dense<0.000000e+00> : vector<128xf32>
    %257 = vector.multi_reduction <add>, %256, %cst_229 [0] : vector<128x128xf32> to vector<128xf32>
    %258 = vector.shape_cast %257 : vector<128xf32> to vector<1x128xf32>
    %cst_230 = arith.constant 0.013888889 : f32
    %259 = vector.broadcast %cst_230 : f32 to vector<1x128xf32>
    %260 = arith.mulf %258, %259 : vector<1x128xf32>
    %261 = vector.broadcast %260 : vector<1x128xf32> to vector<128x128xf32>
    %262 = arith.subf %250, %261 : vector<128x128xf32>
    %263 = vector.broadcast %0 : vector<128x1xf32> to vector<128x128xf32>
    %264 = arith.mulf %262, %263 : vector<128x128xf32>
    %265 = arith.mulf %264, %264 : vector<128x128xf32>
    %cst_231 = arith.constant dense<0.000000e+00> : vector<128xf32>
    %266 = vector.multi_reduction <add>, %265, %cst_231 [0] : vector<128x128xf32> to vector<128xf32>
    %267 = vector.shape_cast %266 : vector<128xf32> to vector<1x128xf32>
    %cst_232 = arith.constant 0.013888889 : f32
    %268 = vector.broadcast %cst_232 : f32 to vector<1x128xf32>
    %269 = arith.mulf %267, %268 : vector<1x128xf32>
    %cst_233 = arith.constant 9.99999974E-6 : f32
    %270 = vector.broadcast %cst_233 : f32 to vector<1x128xf32>
    %271 = arith.addf %269, %270 : vector<1x128xf32>
    %272 = math.rsqrt %271 : vector<1x128xf32>
    %273 = vector.broadcast %272 : vector<1x128xf32> to vector<128x128xf32>
    %274 = arith.mulf %262, %273 : vector<128x128xf32>
    %275 = vector.broadcast %252 : vector<1x128xf32> to vector<128x128xf32>
    %276 = arith.mulf %274, %275 : vector<128x128xf32>
    %277 = vector.broadcast %254 : vector<1x128xf32> to vector<128x128xf32>
    %278 = arith.addf %276, %277 : vector<128x128xf32>
    %279 = vector.broadcast %0 : vector<128x1xf32> to vector<128x128xf32>
    %280 = arith.mulf %278, %279 : vector<128x128xf32>
    %c16_234 = arith.constant 16 : index
    %c0_235 = arith.constant 0 : index
    %281 = vector.load %arg15[%c16_234, %c0_235] : memref<160x128xf32, #tpu.memory_space<vmem>>, vector<128x128xf32>
    tpu.vector_store %arg15[%c16_234, %c0_235], %280 {strides = array<i32>} : memref<160x128xf32, #tpu.memory_space<vmem>>, vector<128x128xf32>,
    %cst_236 = arith.constant 0.000000e+00 : f32
    %282 = vector.broadcast %cst_236 : f32 to vector<128x128xf32>
    %c7_237 = arith.constant 7 : index
    %c0_238 = arith.constant 0 : index
    %283 = vector.load %arg15[%c7_237, %c0_238] : memref<160x128xf32, #tpu.memory_space<vmem>>, vector<128x128xf32>
    %284 = arith.truncf %283 : vector<128x128xf32> to vector<128x128xbf16>
    %c1_239 = arith.constant 1 : index
    %c0_240 = arith.constant 0 : index
    %c0_241 = arith.constant 0 : index
    %c0_242 = arith.constant 0 : index
    %285 = vector.load %arg7[%c1_239, %c0_240, %c0_241, %c0_242] : memref<3x9x128x128xbf16, #tpu.memory_space<vmem>>, vector<1x1x128x128xbf16>
    %286 = vector.shape_cast %285 : vector<1x1x128x128xbf16> to vector<128x128xbf16>
    %cst_243 = arith.constant dense<0.000000e+00> : vector<128x128xf32>
    %287 = tpu.matmul %284, %286, %cst_243 {dimension_numbers = #tpu.dot_dimension_numbers<[1], [0], [0], [1], [0, 0, 1, 1], [], []>} : vector<128x128xbf16>, vector<128x128xbf16>, vector<128x128xf32> -> vector<128x128xf32>
    %288 = arith.addf %282, %287 : vector<128x128xf32>
    %c8_244 = arith.constant 8 : index
    %c0_245 = arith.constant 0 : index
    %289 = vector.load %arg15[%c8_244, %c0_245] : memref<160x128xf32, #tpu.memory_space<vmem>>, vector<128x128xf32>
    %290 = arith.truncf %289 : vector<128x128xf32> to vector<128x128xbf16>
    %c1_246 = arith.constant 1 : index
    %c1_247 = arith.constant 1 : index
    %c0_248 = arith.constant 0 : index
    %c0_249 = arith.constant 0 : index
    %291 = vector.load %arg7[%c1_246, %c1_247, %c0_248, %c0_249] : memref<3x9x128x128xbf16, #tpu.memory_space<vmem>>, vector<1x1x128x128xbf16>
    %292 = vector.shape_cast %291 : vector<1x1x128x128xbf16> to vector<128x128xbf16>
    %cst_250 = arith.constant dense<0.000000e+00> : vector<128x128xf32>
    %293 = tpu.matmul %290, %292, %cst_250 {dimension_numbers = #tpu.dot_dimension_numbers<[1], [0], [0], [1], [0, 0, 1, 1], [], []>} : vector<128x128xbf16>, vector<128x128xbf16>, vector<128x128xf32> -> vector<128x128xf32>
    %294 = arith.addf %288, %293 : vector<128x128xf32>
    %c9_251 = arith.constant 9 : index
    %c0_252 = arith.constant 0 : index
    %295 = vector.load %arg15[%c9_251, %c0_252] : memref<160x128xf32, #tpu.memory_space<vmem>>, vector<128x128xf32>
    %296 = arith.truncf %295 : vector<128x128xf32> to vector<128x128xbf16>
    %c1_253 = arith.constant 1 : index
    %c2_254 = arith.constant 2 : index
    %c0_255 = arith.constant 0 : index
    %c0_256 = arith.constant 0 : index
    %297 = vector.load %arg7[%c1_253, %c2_254, %c0_255, %c0_256] : memref<3x9x128x128xbf16, #tpu.memory_space<vmem>>, vector<1x1x128x128xbf16>
    %298 = vector.shape_cast %297 : vector<1x1x128x128xbf16> to vector<128x128xbf16>
    %cst_257 = arith.constant dense<0.000000e+00> : vector<128x128xf32>
    %299 = tpu.matmul %296, %298, %cst_257 {dimension_numbers = #tpu.dot_dimension_numbers<[1], [0], [0], [1], [0, 0, 1, 1], [], []>} : vector<128x128xbf16>, vector<128x128xbf16>, vector<128x128xf32> -> vector<128x128xf32>
    %300 = arith.addf %294, %299 : vector<128x128xf32>
    %c15_258 = arith.constant 15 : index
    %c0_259 = arith.constant 0 : index
    %301 = vector.load %arg15[%c15_258, %c0_259] : memref<160x128xf32, #tpu.memory_space<vmem>>, vector<128x128xf32>
    %302 = arith.truncf %301 : vector<128x128xf32> to vector<128x128xbf16>
    %c1_260 = arith.constant 1 : index
    %c3_261 = arith.constant 3 : index
    %c0_262 = arith.constant 0 : index
    %c0_263 = arith.constant 0 : index
    %303 = vector.load %arg7[%c1_260, %c3_261, %c0_262, %c0_263] : memref<3x9x128x128xbf16, #tpu.memory_space<vmem>>, vector<1x1x128x128xbf16>
    %304 = vector.shape_cast %303 : vector<1x1x128x128xbf16> to vector<128x128xbf16>
    %cst_264 = arith.constant dense<0.000000e+00> : vector<128x128xf32>
    %305 = tpu.matmul %302, %304, %cst_264 {dimension_numbers = #tpu.dot_dimension_numbers<[1], [0], [0], [1], [0, 0, 1, 1], [], []>} : vector<128x128xbf16>, vector<128x128xbf16>, vector<128x128xf32> -> vector<128x128xf32>
    %306 = arith.addf %300, %305 : vector<128x128xf32>
    %c16_265 = arith.constant 16 : index
    %c0_266 = arith.constant 0 : index
    %307 = vector.load %arg15[%c16_265, %c0_266] : memref<160x128xf32, #tpu.memory_space<vmem>>, vector<128x128xf32>
    %308 = arith.truncf %307 : vector<128x128xf32> to vector<128x128xbf16>
    %c1_267 = arith.constant 1 : index
    %c4_268 = arith.constant 4 : index
    %c0_269 = arith.constant 0 : index
    %c0_270 = arith.constant 0 : index
    %309 = vector.load %arg7[%c1_267, %c4_268, %c0_269, %c0_270] : memref<3x9x128x128xbf16, #tpu.memory_space<vmem>>, vector<1x1x128x128xbf16>
    %310 = vector.shape_cast %309 : vector<1x1x128x128xbf16> to vector<128x128xbf16>
    %cst_271 = arith.constant dense<0.000000e+00> : vector<128x128xf32>
    %311 = tpu.matmul %308, %310, %cst_271 {dimension_numbers = #tpu.dot_dimension_numbers<[1], [0], [0], [1], [0, 0, 1, 1], [], []>} : vector<128x128xbf16>, vector<128x128xbf16>, vector<128x128xf32> -> vector<128x128xf32>
    %312 = arith.addf %306, %311 : vector<128x128xf32>
    %c17_272 = arith.constant 17 : index
    %c0_273 = arith.constant 0 : index
    %313 = vector.load %arg15[%c17_272, %c0_273] : memref<160x128xf32, #tpu.memory_space<vmem>>, vector<128x128xf32>
    %314 = arith.truncf %313 : vector<128x128xf32> to vector<128x128xbf16>
    %c1_274 = arith.constant 1 : index
    %c5_275 = arith.constant 5 : index
    %c0_276 = arith.constant 0 : index
    %c0_277 = arith.constant 0 : index
    %315 = vector.load %arg7[%c1_274, %c5_275, %c0_276, %c0_277] : memref<3x9x128x128xbf16, #tpu.memory_space<vmem>>, vector<1x1x128x128xbf16>
    %316 = vector.shape_cast %315 : vector<1x1x128x128xbf16> to vector<128x128xbf16>
    %cst_278 = arith.constant dense<0.000000e+00> : vector<128x128xf32>
    %317 = tpu.matmul %314, %316, %cst_278 {dimension_numbers = #tpu.dot_dimension_numbers<[1], [0], [0], [1], [0, 0, 1, 1], [], []>} : vector<128x128xbf16>, vector<128x128xbf16>, vector<128x128xf32> -> vector<128x128xf32>
    %318 = arith.addf %312, %317 : vector<128x128xf32>
    %c23_279 = arith.constant 23 : index
    %c0_280 = arith.constant 0 : index
    %319 = vector.load %arg15[%c23_279, %c0_280] : memref<160x128xf32, #tpu.memory_space<vmem>>, vector<128x128xf32>
    %320 = arith.truncf %319 : vector<128x128xf32> to vector<128x128xbf16>
    %c1_281 = arith.constant 1 : index
    %c6_282 = arith.constant 6 : index
    %c0_283 = arith.constant 0 : index
    %c0_284 = arith.constant 0 : index
    %321 = vector.load %arg7[%c1_281, %c6_282, %c0_283, %c0_284] : memref<3x9x128x128xbf16, #tpu.memory_space<vmem>>, vector<1x1x128x128xbf16>
    %322 = vector.shape_cast %321 : vector<1x1x128x128xbf16> to vector<128x128xbf16>
    %cst_285 = arith.constant dense<0.000000e+00> : vector<128x128xf32>
    %323 = tpu.matmul %320, %322, %cst_285 {dimension_numbers = #tpu.dot_dimension_numbers<[1], [0], [0], [1], [0, 0, 1, 1], [], []>} : vector<128x128xbf16>, vector<128x128xbf16>, vector<128x128xf32> -> vector<128x128xf32>
    %324 = arith.addf %318, %323 : vector<128x128xf32>
    %c24_286 = arith.constant 24 : index
    %c0_287 = arith.constant 0 : index
    %325 = vector.load %arg15[%c24_286, %c0_287] : memref<160x128xf32, #tpu.memory_space<vmem>>, vector<128x128xf32>
    %326 = arith.truncf %325 : vector<128x128xf32> to vector<128x128xbf16>
    %c1_288 = arith.constant 1 : index
    %c7_289 = arith.constant 7 : index
    %c0_290 = arith.constant 0 : index
    %c0_291 = arith.constant 0 : index
    %327 = vector.load %arg7[%c1_288, %c7_289, %c0_290, %c0_291] : memref<3x9x128x128xbf16, #tpu.memory_space<vmem>>, vector<1x1x128x128xbf16>
    %328 = vector.shape_cast %327 : vector<1x1x128x128xbf16> to vector<128x128xbf16>
    %cst_292 = arith.constant dense<0.000000e+00> : vector<128x128xf32>
    %329 = tpu.matmul %326, %328, %cst_292 {dimension_numbers = #tpu.dot_dimension_numbers<[1], [0], [0], [1], [0, 0, 1, 1], [], []>} : vector<128x128xbf16>, vector<128x128xbf16>, vector<128x128xf32> -> vector<128x128xf32>
    %330 = arith.addf %324, %329 : vector<128x128xf32>
    %c25_293 = arith.constant 25 : index
    %c0_294 = arith.constant 0 : index
    %331 = vector.load %arg15[%c25_293, %c0_294] : memref<160x128xf32, #tpu.memory_space<vmem>>, vector<128x128xf32>
    %332 = arith.truncf %331 : vector<128x128xf32> to vector<128x128xbf16>
    %c1_295 = arith.constant 1 : index
    %c8_296 = arith.constant 8 : index
    %c0_297 = arith.constant 0 : index
    %c0_298 = arith.constant 0 : index
    %333 = vector.load %arg7[%c1_295, %c8_296, %c0_297, %c0_298] : memref<3x9x128x128xbf16, #tpu.memory_space<vmem>>, vector<1x1x128x128xbf16>
    %334 = vector.shape_cast %333 : vector<1x1x128x128xbf16> to vector<128x128xbf16>
    %cst_299 = arith.constant dense<0.000000e+00> : vector<128x128xf32>
    %335 = tpu.matmul %332, %334, %cst_299 {dimension_numbers = #tpu.dot_dimension_numbers<[1], [0], [0], [1], [0, 0, 1, 1], [], []>} : vector<128x128xbf16>, vector<128x128xbf16>, vector<128x128xf32> -> vector<128x128xf32>
    %336 = arith.addf %330, %335 : vector<128x128xf32>
    %c1_300 = arith.constant 1 : index
    %c0_301 = arith.constant 0 : index
    %c0_302 = arith.constant 0 : index
    %337 = vector.load %arg8[%c1_300, %c0_301, %c0_302] : memref<3x1x128xf32, #tpu.memory_space<vmem>>, vector<1x1x128xf32>
    %338 = vector.shape_cast %337 : vector<1x1x128xf32> to vector<1x128xf32>
    %339 = vector.broadcast %338 : vector<1x128xf32> to vector<128x128xf32>
    %340 = arith.addf %336, %339 : vector<128x128xf32>
    %341 = arith.addf %340, %189 : vector<128x128xf32>
    %cst_303 = arith.constant 0.000000e+00 : f32
    %342 = vector.broadcast %cst_303 : f32 to vector<128x128xf32>
    %343 = arith.maximumf %341, %342 : vector<128x128xf32>
    %c1_304 = arith.constant 1 : index
    %c0_305 = arith.constant 0 : index
    %c0_306 = arith.constant 0 : index
    %344 = vector.load %arg9[%c1_304, %c0_305, %c0_306] : memref<3x1x128xf32, #tpu.memory_space<vmem>>, vector<1x1x128xf32>
    %345 = vector.shape_cast %344 : vector<1x1x128xf32> to vector<1x128xf32>
    %c1_307 = arith.constant 1 : index
    %c0_308 = arith.constant 0 : index
    %c0_309 = arith.constant 0 : index
    %346 = vector.load %arg10[%c1_307, %c0_308, %c0_309] : memref<3x1x128xf32, #tpu.memory_space<vmem>>, vector<1x1x128xf32>
    %347 = vector.shape_cast %346 : vector<1x1x128xf32> to vector<1x128xf32>
    %348 = vector.broadcast %0 : vector<128x1xf32> to vector<128x128xf32>
    %349 = arith.mulf %343, %348 : vector<128x128xf32>
    %cst_310 = arith.constant dense<0.000000e+00> : vector<128xf32>
    %350 = vector.multi_reduction <add>, %349, %cst_310 [0] : vector<128x128xf32> to vector<128xf32>
    %351 = vector.shape_cast %350 : vector<128xf32> to vector<1x128xf32>
    %cst_311 = arith.constant 0.013888889 : f32
    %352 = vector.broadcast %cst_311 : f32 to vector<1x128xf32>
    %353 = arith.mulf %351, %352 : vector<1x128xf32>
    %354 = vector.broadcast %353 : vector<1x128xf32> to vector<128x128xf32>
    %355 = arith.subf %343, %354 : vector<128x128xf32>
    %356 = vector.broadcast %0 : vector<128x1xf32> to vector<128x128xf32>
    %357 = arith.mulf %355, %356 : vector<128x128xf32>
    %358 = arith.mulf %357, %357 : vector<128x128xf32>
    %cst_312 = arith.constant dense<0.000000e+00> : vector<128xf32>
    %359 = vector.multi_reduction <add>, %358, %cst_312 [0] : vector<128x128xf32> to vector<128xf32>
    %360 = vector.shape_cast %359 : vector<128xf32> to vector<1x128xf32>
    %cst_313 = arith.constant 0.013888889 : f32
    %361 = vector.broadcast %cst_313 : f32 to vector<1x128xf32>
    %362 = arith.mulf %360, %361 : vector<1x128xf32>
    %cst_314 = arith.constant 9.99999974E-6 : f32
    %363 = vector.broadcast %cst_314 : f32 to vector<1x128xf32>
    %364 = arith.addf %362, %363 : vector<1x128xf32>
    %365 = math.rsqrt %364 : vector<1x128xf32>
    %366 = vector.broadcast %365 : vector<1x128xf32> to vector<128x128xf32>
    %367 = arith.mulf %355, %366 : vector<128x128xf32>
    %368 = vector.broadcast %345 : vector<1x128xf32> to vector<128x128xf32>
    %369 = arith.mulf %367, %368 : vector<128x128xf32>
    %370 = vector.broadcast %347 : vector<1x128xf32> to vector<128x128xf32>
    %371 = arith.addf %369, %370 : vector<128x128xf32>
    %372 = vector.broadcast %0 : vector<128x1xf32> to vector<128x128xf32>
    %373 = arith.mulf %371, %372 : vector<128x128xf32>
    %c16_315 = arith.constant 16 : index
    %c0_316 = arith.constant 0 : index
    %374 = vector.load %arg15[%c16_315, %c0_316] : memref<160x128xf32, #tpu.memory_space<vmem>>, vector<128x128xf32>
    tpu.vector_store %arg15[%c16_315, %c0_316], %373 {strides = array<i32>} : memref<160x128xf32, #tpu.memory_space<vmem>>, vector<128x128xf32>,
    %c16_317 = arith.constant 16 : index
    %c0_318 = arith.constant 0 : index
    %375 = vector.load %arg15[%c16_317, %c0_318] : memref<160x128xf32, #tpu.memory_space<vmem>>, vector<128x128xf32>
    %cst_319 = arith.constant 0.000000e+00 : f32
    %376 = vector.broadcast %cst_319 : f32 to vector<128x128xf32>
    %c7_320 = arith.constant 7 : index
    %c0_321 = arith.constant 0 : index
    %377 = vector.load %arg15[%c7_320, %c0_321] : memref<160x128xf32, #tpu.memory_space<vmem>>, vector<128x128xf32>
    %378 = arith.truncf %377 : vector<128x128xf32> to vector<128x128xbf16>
    %c2_322 = arith.constant 2 : index
    %c0_323 = arith.constant 0 : index
    %c0_324 = arith.constant 0 : index
    %c0_325 = arith.constant 0 : index
    %379 = vector.load %arg3[%c2_322, %c0_323, %c0_324, %c0_325] : memref<3x9x128x128xbf16, #tpu.memory_space<vmem>>, vector<1x1x128x128xbf16>
    %380 = vector.shape_cast %379 : vector<1x1x128x128xbf16> to vector<128x128xbf16>
    %cst_326 = arith.constant dense<0.000000e+00> : vector<128x128xf32>
    %381 = tpu.matmul %378, %380, %cst_326 {dimension_numbers = #tpu.dot_dimension_numbers<[1], [0], [0], [1], [0, 0, 1, 1], [], []>} : vector<128x128xbf16>, vector<128x128xbf16>, vector<128x128xf32> -> vector<128x128xf32>
    %382 = arith.addf %376, %381 : vector<128x128xf32>
    %c8_327 = arith.constant 8 : index
    %c0_328 = arith.constant 0 : index
    %383 = vector.load %arg15[%c8_327, %c0_328] : memref<160x128xf32, #tpu.memory_space<vmem>>, vector<128x128xf32>
    %384 = arith.truncf %383 : vector<128x128xf32> to vector<128x128xbf16>
    %c2_329 = arith.constant 2 : index
    %c1_330 = arith.constant 1 : index
    %c0_331 = arith.constant 0 : index
    %c0_332 = arith.constant 0 : index
    %385 = vector.load %arg3[%c2_329, %c1_330, %c0_331, %c0_332] : memref<3x9x128x128xbf16, #tpu.memory_space<vmem>>, vector<1x1x128x128xbf16>
    %386 = vector.shape_cast %385 : vector<1x1x128x128xbf16> to vector<128x128xbf16>
    %cst_333 = arith.constant dense<0.000000e+00> : vector<128x128xf32>
    %387 = tpu.matmul %384, %386, %cst_333 {dimension_numbers = #tpu.dot_dimension_numbers<[1], [0], [0], [1], [0, 0, 1, 1], [], []>} : vector<128x128xbf16>, vector<128x128xbf16>, vector<128x128xf32> -> vector<128x128xf32>
    %388 = arith.addf %382, %387 : vector<128x128xf32>
    %c9_334 = arith.constant 9 : index
    %c0_335 = arith.constant 0 : index
    %389 = vector.load %arg15[%c9_334, %c0_335] : memref<160x128xf32, #tpu.memory_space<vmem>>, vector<128x128xf32>
    %390 = arith.truncf %389 : vector<128x128xf32> to vector<128x128xbf16>
    %c2_336 = arith.constant 2 : index
    %c2_337 = arith.constant 2 : index
    %c0_338 = arith.constant 0 : index
    %c0_339 = arith.constant 0 : index
    %391 = vector.load %arg3[%c2_336, %c2_337, %c0_338, %c0_339] : memref<3x9x128x128xbf16, #tpu.memory_space<vmem>>, vector<1x1x128x128xbf16>
    %392 = vector.shape_cast %391 : vector<1x1x128x128xbf16> to vector<128x128xbf16>
    %cst_340 = arith.constant dense<0.000000e+00> : vector<128x128xf32>
    %393 = tpu.matmul %390, %392, %cst_340 {dimension_numbers = #tpu.dot_dimension_numbers<[1], [0], [0], [1], [0, 0, 1, 1], [], []>} : vector<128x128xbf16>, vector<128x128xbf16>, vector<128x128xf32> -> vector<128x128xf32>
    %394 = arith.addf %388, %393 : vector<128x128xf32>
    %c15_341 = arith.constant 15 : index
    %c0_342 = arith.constant 0 : index
    %395 = vector.load %arg15[%c15_341, %c0_342] : memref<160x128xf32, #tpu.memory_space<vmem>>, vector<128x128xf32>
    %396 = arith.truncf %395 : vector<128x128xf32> to vector<128x128xbf16>
    %c2_343 = arith.constant 2 : index
    %c3_344 = arith.constant 3 : index
    %c0_345 = arith.constant 0 : index
    %c0_346 = arith.constant 0 : index
    %397 = vector.load %arg3[%c2_343, %c3_344, %c0_345, %c0_346] : memref<3x9x128x128xbf16, #tpu.memory_space<vmem>>, vector<1x1x128x128xbf16>
    %398 = vector.shape_cast %397 : vector<1x1x128x128xbf16> to vector<128x128xbf16>
    %cst_347 = arith.constant dense<0.000000e+00> : vector<128x128xf32>
    %399 = tpu.matmul %396, %398, %cst_347 {dimension_numbers = #tpu.dot_dimension_numbers<[1], [0], [0], [1], [0, 0, 1, 1], [], []>} : vector<128x128xbf16>, vector<128x128xbf16>, vector<128x128xf32> -> vector<128x128xf32>
    %400 = arith.addf %394, %399 : vector<128x128xf32>
    %c16_348 = arith.constant 16 : index
    %c0_349 = arith.constant 0 : index
    %401 = vector.load %arg15[%c16_348, %c0_349] : memref<160x128xf32, #tpu.memory_space<vmem>>, vector<128x128xf32>
    %402 = arith.truncf %401 : vector<128x128xf32> to vector<128x128xbf16>
    %c2_350 = arith.constant 2 : index
    %c4_351 = arith.constant 4 : index
    %c0_352 = arith.constant 0 : index
    %c0_353 = arith.constant 0 : index
    %403 = vector.load %arg3[%c2_350, %c4_351, %c0_352, %c0_353] : memref<3x9x128x128xbf16, #tpu.memory_space<vmem>>, vector<1x1x128x128xbf16>
    %404 = vector.shape_cast %403 : vector<1x1x128x128xbf16> to vector<128x128xbf16>
    %cst_354 = arith.constant dense<0.000000e+00> : vector<128x128xf32>
    %405 = tpu.matmul %402, %404, %cst_354 {dimension_numbers = #tpu.dot_dimension_numbers<[1], [0], [0], [1], [0, 0, 1, 1], [], []>} : vector<128x128xbf16>, vector<128x128xbf16>, vector<128x128xf32> -> vector<128x128xf32>
    %406 = arith.addf %400, %405 : vector<128x128xf32>
    %c17_355 = arith.constant 17 : index
    %c0_356 = arith.constant 0 : index
    %407 = vector.load %arg15[%c17_355, %c0_356] : memref<160x128xf32, #tpu.memory_space<vmem>>, vector<128x128xf32>
    %408 = arith.truncf %407 : vector<128x128xf32> to vector<128x128xbf16>
    %c2_357 = arith.constant 2 : index
    %c5_358 = arith.constant 5 : index
    %c0_359 = arith.constant 0 : index
    %c0_360 = arith.constant 0 : index
    %409 = vector.load %arg3[%c2_357, %c5_358, %c0_359, %c0_360] : memref<3x9x128x128xbf16, #tpu.memory_space<vmem>>, vector<1x1x128x128xbf16>
    %410 = vector.shape_cast %409 : vector<1x1x128x128xbf16> to vector<128x128xbf16>
    %cst_361 = arith.constant dense<0.000000e+00> : vector<128x128xf32>
    %411 = tpu.matmul %408, %410, %cst_361 {dimension_numbers = #tpu.dot_dimension_numbers<[1], [0], [0], [1], [0, 0, 1, 1], [], []>} : vector<128x128xbf16>, vector<128x128xbf16>, vector<128x128xf32> -> vector<128x128xf32>
    %412 = arith.addf %406, %411 : vector<128x128xf32>
    %c23_362 = arith.constant 23 : index
    %c0_363 = arith.constant 0 : index
    %413 = vector.load %arg15[%c23_362, %c0_363] : memref<160x128xf32, #tpu.memory_space<vmem>>, vector<128x128xf32>
    %414 = arith.truncf %413 : vector<128x128xf32> to vector<128x128xbf16>
    %c2_364 = arith.constant 2 : index
    %c6_365 = arith.constant 6 : index
    %c0_366 = arith.constant 0 : index
    %c0_367 = arith.constant 0 : index
    %415 = vector.load %arg3[%c2_364, %c6_365, %c0_366, %c0_367] : memref<3x9x128x128xbf16, #tpu.memory_space<vmem>>, vector<1x1x128x128xbf16>
    %416 = vector.shape_cast %415 : vector<1x1x128x128xbf16> to vector<128x128xbf16>
    %cst_368 = arith.constant dense<0.000000e+00> : vector<128x128xf32>
    %417 = tpu.matmul %414, %416, %cst_368 {dimension_numbers = #tpu.dot_dimension_numbers<[1], [0], [0], [1], [0, 0, 1, 1], [], []>} : vector<128x128xbf16>, vector<128x128xbf16>, vector<128x128xf32> -> vector<128x128xf32>
    %418 = arith.addf %412, %417 : vector<128x128xf32>
    %c24_369 = arith.constant 24 : index
    %c0_370 = arith.constant 0 : index
    %419 = vector.load %arg15[%c24_369, %c0_370] : memref<160x128xf32, #tpu.memory_space<vmem>>, vector<128x128xf32>
    %420 = arith.truncf %419 : vector<128x128xf32> to vector<128x128xbf16>
    %c2_371 = arith.constant 2 : index
    %c7_372 = arith.constant 7 : index
    %c0_373 = arith.constant 0 : index
    %c0_374 = arith.constant 0 : index
    %421 = vector.load %arg3[%c2_371, %c7_372, %c0_373, %c0_374] : memref<3x9x128x128xbf16, #tpu.memory_space<vmem>>, vector<1x1x128x128xbf16>
    %422 = vector.shape_cast %421 : vector<1x1x128x128xbf16> to vector<128x128xbf16>
    %cst_375 = arith.constant dense<0.000000e+00> : vector<128x128xf32>
    %423 = tpu.matmul %420, %422, %cst_375 {dimension_numbers = #tpu.dot_dimension_numbers<[1], [0], [0], [1], [0, 0, 1, 1], [], []>} : vector<128x128xbf16>, vector<128x128xbf16>, vector<128x128xf32> -> vector<128x128xf32>
    %424 = arith.addf %418, %423 : vector<128x128xf32>
    %c25_376 = arith.constant 25 : index
    %c0_377 = arith.constant 0 : index
    %425 = vector.load %arg15[%c25_376, %c0_377] : memref<160x128xf32, #tpu.memory_space<vmem>>, vector<128x128xf32>
    %426 = arith.truncf %425 : vector<128x128xf32> to vector<128x128xbf16>
    %c2_378 = arith.constant 2 : index
    %c8_379 = arith.constant 8 : index
    %c0_380 = arith.constant 0 : index
    %c0_381 = arith.constant 0 : index
    %427 = vector.load %arg3[%c2_378, %c8_379, %c0_380, %c0_381] : memref<3x9x128x128xbf16, #tpu.memory_space<vmem>>, vector<1x1x128x128xbf16>
    %428 = vector.shape_cast %427 : vector<1x1x128x128xbf16> to vector<128x128xbf16>
    %cst_382 = arith.constant dense<0.000000e+00> : vector<128x128xf32>
    %429 = tpu.matmul %426, %428, %cst_382 {dimension_numbers = #tpu.dot_dimension_numbers<[1], [0], [0], [1], [0, 0, 1, 1], [], []>} : vector<128x128xbf16>, vector<128x128xbf16>, vector<128x128xf32> -> vector<128x128xf32>
    %430 = arith.addf %424, %429 : vector<128x128xf32>
    %c2_383 = arith.constant 2 : index
    %c0_384 = arith.constant 0 : index
    %c0_385 = arith.constant 0 : index
    %431 = vector.load %arg4[%c2_383, %c0_384, %c0_385] : memref<3x1x128xf32, #tpu.memory_space<vmem>>, vector<1x1x128xf32>
    %432 = vector.shape_cast %431 : vector<1x1x128xf32> to vector<1x128xf32>
    %433 = vector.broadcast %432 : vector<1x128xf32> to vector<128x128xf32>
    %434 = arith.addf %430, %433 : vector<128x128xf32>
    %cst_386 = arith.constant 0.000000e+00 : f32
    %435 = vector.broadcast %cst_386 : f32 to vector<128x128xf32>
    %436 = arith.maximumf %434, %435 : vector<128x128xf32>
    %c2_387 = arith.constant 2 : index
    %c0_388 = arith.constant 0 : index
    %c0_389 = arith.constant 0 : index
    %437 = vector.load %arg5[%c2_387, %c0_388, %c0_389] : memref<3x1x128xf32, #tpu.memory_space<vmem>>, vector<1x1x128xf32>
    %438 = vector.shape_cast %437 : vector<1x1x128xf32> to vector<1x128xf32>
    %c2_390 = arith.constant 2 : index
    %c0_391 = arith.constant 0 : index
    %c0_392 = arith.constant 0 : index
    %439 = vector.load %arg6[%c2_390, %c0_391, %c0_392] : memref<3x1x128xf32, #tpu.memory_space<vmem>>, vector<1x1x128xf32>
    %440 = vector.shape_cast %439 : vector<1x1x128xf32> to vector<1x128xf32>
    %441 = vector.broadcast %0 : vector<128x1xf32> to vector<128x128xf32>
    %442 = arith.mulf %436, %441 : vector<128x128xf32>
    %cst_393 = arith.constant dense<0.000000e+00> : vector<128xf32>
    %443 = vector.multi_reduction <add>, %442, %cst_393 [0] : vector<128x128xf32> to vector<128xf32>
    %444 = vector.shape_cast %443 : vector<128xf32> to vector<1x128xf32>
    %cst_394 = arith.constant 0.013888889 : f32
    %445 = vector.broadcast %cst_394 : f32 to vector<1x128xf32>
    %446 = arith.mulf %444, %445 : vector<1x128xf32>
    %447 = vector.broadcast %446 : vector<1x128xf32> to vector<128x128xf32>
    %448 = arith.subf %436, %447 : vector<128x128xf32>
    %449 = vector.broadcast %0 : vector<128x1xf32> to vector<128x128xf32>
    %450 = arith.mulf %448, %449 : vector<128x128xf32>
    %451 = arith.mulf %450, %450 : vector<128x128xf32>
    %cst_395 = arith.constant dense<0.000000e+00> : vector<128xf32>
    %452 = vector.multi_reduction <add>, %451, %cst_395 [0] : vector<128x128xf32> to vector<128xf32>
    %453 = vector.shape_cast %452 : vector<128xf32> to vector<1x128xf32>
    %cst_396 = arith.constant 0.013888889 : f32
    %454 = vector.broadcast %cst_396 : f32 to vector<1x128xf32>
    %455 = arith.mulf %453, %454 : vector<1x128xf32>
    %cst_397 = arith.constant 9.99999974E-6 : f32
    %456 = vector.broadcast %cst_397 : f32 to vector<1x128xf32>
    %457 = arith.addf %455, %456 : vector<1x128xf32>
    %458 = math.rsqrt %457 : vector<1x128xf32>
    %459 = vector.broadcast %458 : vector<1x128xf32> to vector<128x128xf32>
    %460 = arith.mulf %448, %459 : vector<128x128xf32>
    %461 = vector.broadcast %438 : vector<1x128xf32> to vector<128x128xf32>
    %462 = arith.mulf %460, %461 : vector<128x128xf32>
    %463 = vector.broadcast %440 : vector<1x128xf32> to vector<128x128xf32>
    %464 = arith.addf %462, %463 : vector<128x128xf32>
    %465 = vector.broadcast %0 : vector<128x1xf32> to vector<128x128xf32>
    %466 = arith.mulf %464, %465 : vector<128x128xf32>
    %c16_398 = arith.constant 16 : index
    %c0_399 = arith.constant 0 : index
    %467 = vector.load %arg15[%c16_398, %c0_399] : memref<160x128xf32, #tpu.memory_space<vmem>>, vector<128x128xf32>
    tpu.vector_store %arg15[%c16_398, %c0_399], %466 {strides = array<i32>} : memref<160x128xf32, #tpu.memory_space<vmem>>, vector<128x128xf32>,
    %cst_400 = arith.constant 0.000000e+00 : f32
    %468 = vector.broadcast %cst_400 : f32 to vector<128x128xf32>
    %c7_401 = arith.constant 7 : index
    %c0_402 = arith.constant 0 : index
    %469 = vector.load %arg15[%c7_401, %c0_402] : memref<160x128xf32, #tpu.memory_space<vmem>>, vector<128x128xf32>
    %470 = arith.truncf %469 : vector<128x128xf32> to vector<128x128xbf16>
    %c2_403 = arith.constant 2 : index
    %c0_404 = arith.constant 0 : index
    %c0_405 = arith.constant 0 : index
    %c0_406 = arith.constant 0 : index
    %471 = vector.load %arg7[%c2_403, %c0_404, %c0_405, %c0_406] : memref<3x9x128x128xbf16, #tpu.memory_space<vmem>>, vector<1x1x128x128xbf16>
    %472 = vector.shape_cast %471 : vector<1x1x128x128xbf16> to vector<128x128xbf16>
    %cst_407 = arith.constant dense<0.000000e+00> : vector<128x128xf32>
    %473 = tpu.matmul %470, %472, %cst_407 {dimension_numbers = #tpu.dot_dimension_numbers<[1], [0], [0], [1], [0, 0, 1, 1], [], []>} : vector<128x128xbf16>, vector<128x128xbf16>, vector<128x128xf32> -> vector<128x128xf32>
    %474 = arith.addf %468, %473 : vector<128x128xf32>
    %c8_408 = arith.constant 8 : index
    %c0_409 = arith.constant 0 : index
    %475 = vector.load %arg15[%c8_408, %c0_409] : memref<160x128xf32, #tpu.memory_space<vmem>>, vector<128x128xf32>
    %476 = arith.truncf %475 : vector<128x128xf32> to vector<128x128xbf16>
    %c2_410 = arith.constant 2 : index
    %c1_411 = arith.constant 1 : index
    %c0_412 = arith.constant 0 : index
    %c0_413 = arith.constant 0 : index
    %477 = vector.load %arg7[%c2_410, %c1_411, %c0_412, %c0_413] : memref<3x9x128x128xbf16, #tpu.memory_space<vmem>>, vector<1x1x128x128xbf16>
    %478 = vector.shape_cast %477 : vector<1x1x128x128xbf16> to vector<128x128xbf16>
    %cst_414 = arith.constant dense<0.000000e+00> : vector<128x128xf32>
    %479 = tpu.matmul %476, %478, %cst_414 {dimension_numbers = #tpu.dot_dimension_numbers<[1], [0], [0], [1], [0, 0, 1, 1], [], []>} : vector<128x128xbf16>, vector<128x128xbf16>, vector<128x128xf32> -> vector<128x128xf32>
    %480 = arith.addf %474, %479 : vector<128x128xf32>
    %c9_415 = arith.constant 9 : index
    %c0_416 = arith.constant 0 : index
    %481 = vector.load %arg15[%c9_415, %c0_416] : memref<160x128xf32, #tpu.memory_space<vmem>>, vector<128x128xf32>
    %482 = arith.truncf %481 : vector<128x128xf32> to vector<128x128xbf16>
    %c2_417 = arith.constant 2 : index
    %c2_418 = arith.constant 2 : index
    %c0_419 = arith.constant 0 : index
    %c0_420 = arith.constant 0 : index
    %483 = vector.load %arg7[%c2_417, %c2_418, %c0_419, %c0_420] : memref<3x9x128x128xbf16, #tpu.memory_space<vmem>>, vector<1x1x128x128xbf16>
    %484 = vector.shape_cast %483 : vector<1x1x128x128xbf16> to vector<128x128xbf16>
    %cst_421 = arith.constant dense<0.000000e+00> : vector<128x128xf32>
    %485 = tpu.matmul %482, %484, %cst_421 {dimension_numbers = #tpu.dot_dimension_numbers<[1], [0], [0], [1], [0, 0, 1, 1], [], []>} : vector<128x128xbf16>, vector<128x128xbf16>, vector<128x128xf32> -> vector<128x128xf32>
    %486 = arith.addf %480, %485 : vector<128x128xf32>
    %c15_422 = arith.constant 15 : index
    %c0_423 = arith.constant 0 : index
    %487 = vector.load %arg15[%c15_422, %c0_423] : memref<160x128xf32, #tpu.memory_space<vmem>>, vector<128x128xf32>
    %488 = arith.truncf %487 : vector<128x128xf32> to vector<128x128xbf16>
    %c2_424 = arith.constant 2 : index
    %c3_425 = arith.constant 3 : index
    %c0_426 = arith.constant 0 : index
    %c0_427 = arith.constant 0 : index
    %489 = vector.load %arg7[%c2_424, %c3_425, %c0_426, %c0_427] : memref<3x9x128x128xbf16, #tpu.memory_space<vmem>>, vector<1x1x128x128xbf16>
    %490 = vector.shape_cast %489 : vector<1x1x128x128xbf16> to vector<128x128xbf16>
    %cst_428 = arith.constant dense<0.000000e+00> : vector<128x128xf32>
    %491 = tpu.matmul %488, %490, %cst_428 {dimension_numbers = #tpu.dot_dimension_numbers<[1], [0], [0], [1], [0, 0, 1, 1], [], []>} : vector<128x128xbf16>, vector<128x128xbf16>, vector<128x128xf32> -> vector<128x128xf32>
    %492 = arith.addf %486, %491 : vector<128x128xf32>
    %c16_429 = arith.constant 16 : index
    %c0_430 = arith.constant 0 : index
    %493 = vector.load %arg15[%c16_429, %c0_430] : memref<160x128xf32, #tpu.memory_space<vmem>>, vector<128x128xf32>
    %494 = arith.truncf %493 : vector<128x128xf32> to vector<128x128xbf16>
    %c2_431 = arith.constant 2 : index
    %c4_432 = arith.constant 4 : index
    %c0_433 = arith.constant 0 : index
    %c0_434 = arith.constant 0 : index
    %495 = vector.load %arg7[%c2_431, %c4_432, %c0_433, %c0_434] : memref<3x9x128x128xbf16, #tpu.memory_space<vmem>>, vector<1x1x128x128xbf16>
    %496 = vector.shape_cast %495 : vector<1x1x128x128xbf16> to vector<128x128xbf16>
    %cst_435 = arith.constant dense<0.000000e+00> : vector<128x128xf32>
    %497 = tpu.matmul %494, %496, %cst_435 {dimension_numbers = #tpu.dot_dimension_numbers<[1], [0], [0], [1], [0, 0, 1, 1], [], []>} : vector<128x128xbf16>, vector<128x128xbf16>, vector<128x128xf32> -> vector<128x128xf32>
    %498 = arith.addf %492, %497 : vector<128x128xf32>
    %c17_436 = arith.constant 17 : index
    %c0_437 = arith.constant 0 : index
    %499 = vector.load %arg15[%c17_436, %c0_437] : memref<160x128xf32, #tpu.memory_space<vmem>>, vector<128x128xf32>
    %500 = arith.truncf %499 : vector<128x128xf32> to vector<128x128xbf16>
    %c2_438 = arith.constant 2 : index
    %c5_439 = arith.constant 5 : index
    %c0_440 = arith.constant 0 : index
    %c0_441 = arith.constant 0 : index
    %501 = vector.load %arg7[%c2_438, %c5_439, %c0_440, %c0_441] : memref<3x9x128x128xbf16, #tpu.memory_space<vmem>>, vector<1x1x128x128xbf16>
    %502 = vector.shape_cast %501 : vector<1x1x128x128xbf16> to vector<128x128xbf16>
    %cst_442 = arith.constant dense<0.000000e+00> : vector<128x128xf32>
    %503 = tpu.matmul %500, %502, %cst_442 {dimension_numbers = #tpu.dot_dimension_numbers<[1], [0], [0], [1], [0, 0, 1, 1], [], []>} : vector<128x128xbf16>, vector<128x128xbf16>, vector<128x128xf32> -> vector<128x128xf32>
    %504 = arith.addf %498, %503 : vector<128x128xf32>
    %c23_443 = arith.constant 23 : index
    %c0_444 = arith.constant 0 : index
    %505 = vector.load %arg15[%c23_443, %c0_444] : memref<160x128xf32, #tpu.memory_space<vmem>>, vector<128x128xf32>
    %506 = arith.truncf %505 : vector<128x128xf32> to vector<128x128xbf16>
    %c2_445 = arith.constant 2 : index
    %c6_446 = arith.constant 6 : index
    %c0_447 = arith.constant 0 : index
    %c0_448 = arith.constant 0 : index
    %507 = vector.load %arg7[%c2_445, %c6_446, %c0_447, %c0_448] : memref<3x9x128x128xbf16, #tpu.memory_space<vmem>>, vector<1x1x128x128xbf16>
    %508 = vector.shape_cast %507 : vector<1x1x128x128xbf16> to vector<128x128xbf16>
    %cst_449 = arith.constant dense<0.000000e+00> : vector<128x128xf32>
    %509 = tpu.matmul %506, %508, %cst_449 {dimension_numbers = #tpu.dot_dimension_numbers<[1], [0], [0], [1], [0, 0, 1, 1], [], []>} : vector<128x128xbf16>, vector<128x128xbf16>, vector<128x128xf32> -> vector<128x128xf32>
    %510 = arith.addf %504, %509 : vector<128x128xf32>
    %c24_450 = arith.constant 24 : index
    %c0_451 = arith.constant 0 : index
    %511 = vector.load %arg15[%c24_450, %c0_451] : memref<160x128xf32, #tpu.memory_space<vmem>>, vector<128x128xf32>
    %512 = arith.truncf %511 : vector<128x128xf32> to vector<128x128xbf16>
    %c2_452 = arith.constant 2 : index
    %c7_453 = arith.constant 7 : index
    %c0_454 = arith.constant 0 : index
    %c0_455 = arith.constant 0 : index
    %513 = vector.load %arg7[%c2_452, %c7_453, %c0_454, %c0_455] : memref<3x9x128x128xbf16, #tpu.memory_space<vmem>>, vector<1x1x128x128xbf16>
    %514 = vector.shape_cast %513 : vector<1x1x128x128xbf16> to vector<128x128xbf16>
    %cst_456 = arith.constant dense<0.000000e+00> : vector<128x128xf32>
    %515 = tpu.matmul %512, %514, %cst_456 {dimension_numbers = #tpu.dot_dimension_numbers<[1], [0], [0], [1], [0, 0, 1, 1], [], []>} : vector<128x128xbf16>, vector<128x128xbf16>, vector<128x128xf32> -> vector<128x128xf32>
    %516 = arith.addf %510, %515 : vector<128x128xf32>
    %c25_457 = arith.constant 25 : index
    %c0_458 = arith.constant 0 : index
    %517 = vector.load %arg15[%c25_457, %c0_458] : memref<160x128xf32, #tpu.memory_space<vmem>>, vector<128x128xf32>
    %518 = arith.truncf %517 : vector<128x128xf32> to vector<128x128xbf16>
    %c2_459 = arith.constant 2 : index
    %c8_460 = arith.constant 8 : index
    %c0_461 = arith.constant 0 : index
    %c0_462 = arith.constant 0 : index
    %519 = vector.load %arg7[%c2_459, %c8_460, %c0_461, %c0_462] : memref<3x9x128x128xbf16, #tpu.memory_space<vmem>>, vector<1x1x128x128xbf16>
    %520 = vector.shape_cast %519 : vector<1x1x128x128xbf16> to vector<128x128xbf16>
    %cst_463 = arith.constant dense<0.000000e+00> : vector<128x128xf32>
    %521 = tpu.matmul %518, %520, %cst_463 {dimension_numbers = #tpu.dot_dimension_numbers<[1], [0], [0], [1], [0, 0, 1, 1], [], []>} : vector<128x128xbf16>, vector<128x128xbf16>, vector<128x128xf32> -> vector<128x128xf32>
    %522 = arith.addf %516, %521 : vector<128x128xf32>
    %c2_464 = arith.constant 2 : index
    %c0_465 = arith.constant 0 : index
    %c0_466 = arith.constant 0 : index
    %523 = vector.load %arg8[%c2_464, %c0_465, %c0_466] : memref<3x1x128xf32, #tpu.memory_space<vmem>>, vector<1x1x128xf32>
    %524 = vector.shape_cast %523 : vector<1x1x128xf32> to vector<1x128xf32>
    %525 = vector.broadcast %524 : vector<1x128xf32> to vector<128x128xf32>
    %526 = arith.addf %522, %525 : vector<128x128xf32>
    %527 = arith.addf %526, %375 : vector<128x128xf32>
    %cst_467 = arith.constant 0.000000e+00 : f32
    %528 = vector.broadcast %cst_467 : f32 to vector<128x128xf32>
    %529 = arith.maximumf %527, %528 : vector<128x128xf32>
    %c2_468 = arith.constant 2 : index
    %c0_469 = arith.constant 0 : index
    %c0_470 = arith.constant 0 : index
    %530 = vector.load %arg9[%c2_468, %c0_469, %c0_470] : memref<3x1x128xf32, #tpu.memory_space<vmem>>, vector<1x1x128xf32>
    %531 = vector.shape_cast %530 : vector<1x1x128xf32> to vector<1x128xf32>
    %c2_471 = arith.constant 2 : index
    %c0_472 = arith.constant 0 : index
    %c0_473 = arith.constant 0 : index
    %532 = vector.load %arg10[%c2_471, %c0_472, %c0_473] : memref<3x1x128xf32, #tpu.memory_space<vmem>>, vector<1x1x128xf32>
    %533 = vector.shape_cast %532 : vector<1x1x128xf32> to vector<1x128xf32>
    %534 = vector.broadcast %0 : vector<128x1xf32> to vector<128x128xf32>
    %535 = arith.mulf %529, %534 : vector<128x128xf32>
    %cst_474 = arith.constant dense<0.000000e+00> : vector<128xf32>
    %536 = vector.multi_reduction <add>, %535, %cst_474 [0] : vector<128x128xf32> to vector<128xf32>
    %537 = vector.shape_cast %536 : vector<128xf32> to vector<1x128xf32>
    %cst_475 = arith.constant 0.013888889 : f32
    %538 = vector.broadcast %cst_475 : f32 to vector<1x128xf32>
    %539 = arith.mulf %537, %538 : vector<1x128xf32>
    %540 = vector.broadcast %539 : vector<1x128xf32> to vector<128x128xf32>
    %541 = arith.subf %529, %540 : vector<128x128xf32>
    %542 = vector.broadcast %0 : vector<128x1xf32> to vector<128x128xf32>
    %543 = arith.mulf %541, %542 : vector<128x128xf32>
    %544 = arith.mulf %543, %543 : vector<128x128xf32>
    %cst_476 = arith.constant dense<0.000000e+00> : vector<128xf32>
    %545 = vector.multi_reduction <add>, %544, %cst_476 [0] : vector<128x128xf32> to vector<128xf32>
    %546 = vector.shape_cast %545 : vector<128xf32> to vector<1x128xf32>
    %cst_477 = arith.constant 0.013888889 : f32
    %547 = vector.broadcast %cst_477 : f32 to vector<1x128xf32>
    %548 = arith.mulf %546, %547 : vector<1x128xf32>
    %cst_478 = arith.constant 9.99999974E-6 : f32
    %549 = vector.broadcast %cst_478 : f32 to vector<1x128xf32>
    %550 = arith.addf %548, %549 : vector<1x128xf32>
    %551 = math.rsqrt %550 : vector<1x128xf32>
    %552 = vector.broadcast %551 : vector<1x128xf32> to vector<128x128xf32>
    %553 = arith.mulf %541, %552 : vector<128x128xf32>
    %554 = vector.broadcast %531 : vector<1x128xf32> to vector<128x128xf32>
    %555 = arith.mulf %553, %554 : vector<128x128xf32>
    %556 = vector.broadcast %533 : vector<1x128xf32> to vector<128x128xf32>
    %557 = arith.addf %555, %556 : vector<128x128xf32>
    %558 = vector.broadcast %0 : vector<128x1xf32> to vector<128x128xf32>
    %559 = arith.mulf %557, %558 : vector<128x128xf32>
    %c16_479 = arith.constant 16 : index
    %c0_480 = arith.constant 0 : index
    %560 = vector.load %arg15[%c16_479, %c0_480] : memref<160x128xf32, #tpu.memory_space<vmem>>, vector<128x128xf32>
    tpu.vector_store %arg15[%c16_479, %c0_480], %559 {strides = array<i32>} : memref<160x128xf32, #tpu.memory_space<vmem>>, vector<128x128xf32>,
    %c16_481 = arith.constant 16 : index
    %c0_482 = arith.constant 0 : index
    %561 = vector.load %arg15[%c16_481, %c0_482] : memref<160x128xf32, #tpu.memory_space<vmem>>, vector<128x128xf32>
    %c0_483 = arith.constant 0 : index
    %c0_484 = arith.constant 0 : index
    %562 = vector.load %arg11[%c0_483, %c0_484] : memref<2x128xf32, #tpu.memory_space<vmem>>, vector<2x128xf32>
    %cst_485 = arith.constant dense<0.000000e+00> : vector<2x128xf32>
    %563 = tpu.matmul %562, %561, %cst_485 {dimension_numbers = #tpu.dot_dimension_numbers<[1], [0], [0], [1], [0, 0, 1, 1], [], []>} : vector<2x128xf32>, vector<128x128xf32>, vector<2x128xf32> -> vector<2x128xf32>
    %c0_486 = arith.constant 0 : index
    %c0_487 = arith.constant 0 : index
    %564 = vector.load %arg12[%c0_486, %c0_487] : memref<128x128xf32, #tpu.memory_space<vmem>>, vector<128x128xf32>
    %cst_488 = arith.constant dense<0.000000e+00> : vector<2x128xf32>
    %565 = tpu.matmul %563, %564, %cst_488 {dimension_numbers = #tpu.dot_dimension_numbers<[1], [0], [0], [1], [0, 0, 1, 1], [], []>} : vector<2x128xf32>, vector<128x128xf32>, vector<2x128xf32> -> vector<2x128xf32>
    %c0_489 = arith.constant 0 : index
    %c0_490 = arith.constant 0 : index
    %566 = vector.load %arg13[%c0_489, %c0_490] : memref<1x128xf32, #tpu.memory_space<vmem>>, vector<1x128xf32>
    %567 = vector.broadcast %566 : vector<1x128xf32> to vector<2x128xf32>
    %568 = arith.addf %565, %567 : vector<2x128xf32>
    %c0_491 = arith.constant 0 : index
    %c0_492 = arith.constant 0 : index
    %569 = vector.load %arg14[%c0_491, %c0_492] : memref<2x128xf32, #tpu.memory_space<vmem>>, vector<2x128xf32>
    tpu.vector_store %arg14[%c0_491, %c0_492], %568 {strides = array<i32>} : memref<2x128xf32, #tpu.memory_space<vmem>>, vector<2x128xf32>,
    return
  }
  func.func @transform_0(%arg0: i32) -> (i32, i32) {
    %c0_i32 = arith.constant 0 : i32
    %c0_i32_0 = arith.constant 0 : i32
    %c0_i32_1 = arith.constant 0 : i32
    return %c0_i32, %c0_i32_0 : i32, i32
  }
  func.func @transform_1(%arg0: i32) -> (i32, i32) {
    %c0_i32 = arith.constant 0 : i32
    %c0_i32_0 = arith.constant 0 : i32
    %c0_i32_1 = arith.constant 0 : i32
    return %c0_i32, %c0_i32_0 : i32, i32
  }
  func.func @transform_2(%arg0: i32) -> (i32, i32, i32, i32) {
    %c0_i32 = arith.constant 0 : i32
    %c0_i32_0 = arith.constant 0 : i32
    %c0_i32_1 = arith.constant 0 : i32
    %c0_i32_2 = arith.constant 0 : i32
    %c0_i32_3 = arith.constant 0 : i32
    return %c0_i32, %c0_i32_0, %c0_i32_1, %c0_i32_2 : i32, i32, i32, i32
  }
  func.func @transform_3(%arg0: i32) -> (i32, i32, i32) {
    %c0_i32 = arith.constant 0 : i32
    %c0_i32_0 = arith.constant 0 : i32
    %c0_i32_1 = arith.constant 0 : i32
    %c0_i32_2 = arith.constant 0 : i32
    return %c0_i32, %c0_i32_0, %c0_i32_1 : i32, i32, i32
  }
  func.func @transform_4(%arg0: i32) -> (i32, i32, i32) {
    %c0_i32 = arith.constant 0 : i32
    %c0_i32_0 = arith.constant 0 : i32
    %c0_i32_1 = arith.constant 0 : i32
    %c0_i32_2 = arith.constant 0 : i32
    return %c0_i32, %c0_i32_0, %c0_i32_1 : i32, i32, i32
  }
  func.func @transform_5(%arg0: i32) -> (i32, i32, i32) {
    %c0_i32 = arith.constant 0 : i32
    %c0_i32_0 = arith.constant 0 : i32
    %c0_i32_1 = arith.constant 0 : i32
    %c0_i32_2 = arith.constant 0 : i32
    return %c0_i32, %c0_i32_0, %c0_i32_1 : i32, i32, i32
  }
  func.func @transform_6(%arg0: i32) -> (i32, i32, i32, i32) {
    %c0_i32 = arith.constant 0 : i32
    %c0_i32_0 = arith.constant 0 : i32
    %c0_i32_1 = arith.constant 0 : i32
    %c0_i32_2 = arith.constant 0 : i32
    %c0_i32_3 = arith.constant 0 : i32
    return %c0_i32, %c0_i32_0, %c0_i32_1, %c0_i32_2 : i32, i32, i32, i32
  }
  func.func @transform_7(%arg0: i32) -> (i32, i32, i32) {
    %c0_i32 = arith.constant 0 : i32
    %c0_i32_0 = arith.constant 0 : i32
    %c0_i32_1 = arith.constant 0 : i32
    %c0_i32_2 = arith.constant 0 : i32
    return %c0_i32, %c0_i32_0, %c0_i32_1 : i32, i32, i32
  }
  func.func @transform_8(%arg0: i32) -> (i32, i32, i32) {
    %c0_i32 = arith.constant 0 : i32
    %c0_i32_0 = arith.constant 0 : i32
    %c0_i32_1 = arith.constant 0 : i32
    %c0_i32_2 = arith.constant 0 : i32
    return %c0_i32, %c0_i32_0, %c0_i32_1 : i32, i32, i32
  }
  func.func @transform_9(%arg0: i32) -> (i32, i32, i32) {
    %c0_i32 = arith.constant 0 : i32
    %c0_i32_0 = arith.constant 0 : i32
    %c0_i32_1 = arith.constant 0 : i32
    %c0_i32_2 = arith.constant 0 : i32
    return %c0_i32, %c0_i32_0, %c0_i32_1 : i32, i32, i32
  }
  func.func @transform_10(%arg0: i32) -> (i32, i32) {
    %c0_i32 = arith.constant 0 : i32
    %c0_i32_0 = arith.constant 0 : i32
    %c0_i32_1 = arith.constant 0 : i32
    return %c0_i32, %c0_i32_0 : i32, i32
  }
  func.func @transform_11(%arg0: i32) -> (i32, i32) {
    %c0_i32 = arith.constant 0 : i32
    %c0_i32_0 = arith.constant 0 : i32
    %c0_i32_1 = arith.constant 0 : i32
    return %c0_i32, %c0_i32_0 : i32, i32
  }
  func.func @transform_12(%arg0: i32) -> (i32, i32) {
    %c0_i32 = arith.constant 0 : i32
    %c0_i32_0 = arith.constant 0 : i32
    %c0_i32_1 = arith.constant 0 : i32
    return %c0_i32, %c0_i32_0 : i32, i32
  }
  func.func @transform_13(%arg0: i32) -> (i32, i32) {
    %c0_i32 = arith.constant 0 : i32
    %c0_i32_0 = arith.constant 0 : i32
    %c0_i32_1 = arith.constant 0 : i32
    return %c0_i32, %c0_i32_0 : i32, i32
  }
}

</mosaic_0001>

<bundles_post_ra>
// kernel: resnet_forward.2
= control target key start
LH: loop header
LB: loop body
LE: loop exit
PB: predicated region body
PF: predicated region fallthrough
CT: control target
= control target key end

     0   :  { %v1483_v0 = vmov 0   ;;  %s2552_s1 = inlined_call_operand.vmem [shape: bf16[256,128], index: 1, kind: input, shape index: {}]   ;;  %s2553_s0 = inlined_call_operand.vmem [shape: bf16[344,256], index: 0, kind: input, shape index: {}]   ;;  %s2554_s2 = inlined_call_operand.vmem [shape: f32[1,128], index: 2, kind: input, shape index: {}]   ;;  %s2555_s3 = inlined_call_operand.vmem [shape: f32[1,128], index: 3, kind: input, shape index: {}]   ;;  %s2556_s4 = inlined_call_operand.vmem [shape: f32[1,128], index: 4, kind: input, shape index: {}]   ;;  %s2557_s5 = inlined_call_operand.vmem [shape: f32[344,128], index: 5, kind: output, shape index: {}]  }
   0x1   :  { %416 = vmatprep.subr.bf16.mxu0 %v1483_v0  ;;  %v1400_v1 = vld [vmem:[%s2552_s1] sm:$0xff]   ;;  %1366 = vmatprep.subr.bf16.mxu1 %v1483_v0  ;;  %v1401_v2 = vld [vmem:[%s2552_s1 + $0x8] sm:$0xff]   ;;  %v1402_v3 = vld [vmem:[%s2552_s1 + $0x10] sm:$0xff]  }
   0x2   :  { %417 = vmatpush1.bf16.msra.mxu0 %v1400_v1  ;;  %1382 = vmatpush1.bf16.msra.mxu1 %v1400_v1  ;;  %v1403_v4 = vld [vmem:[%s2552_s1 + $0x18] sm:$0xff]   ;;  %v1404_v5 = vld [vmem:[%s2552_s1 + $0x20] sm:$0xff]   ;;  %v1405_v7 = vld [vmem:[%s2552_s1 + $0x28] sm:$0xff]  }
   0x3   :  { %418 = vmatprep.subr.bf16.mxu0 %v1483_v0  ;;  %1367 = vmatprep.subr.bf16.mxu1 %v1483_v0  ;;  %v1418_v6 = vld [vmem:[%s2553_s0 + $0x4] ss:$8 sps:$4 sm:$0xff]   ;;  %v1406_v8 = vld [vmem:[%s2552_s1 + $0x30] sm:$0xff]   ;;  %v1407_v10 = vld [vmem:[%s2552_s1 + $0x38] sm:$0xff]  }
   0x4   :  { %448 = vmatprep.mubr.bf16.mxu0 %v1418_v6  ;;  %v1433_v9 = vld [vmem:[%s2553_s0 + $0xb4] ss:$8 sps:$4 sm:$0xff]   ;;  %v1408_v11 = vld [vmem:[%s2552_s1 + $0x40] sm:$0xff]   ;;  %v1409_v12 = vld [vmem:[%s2552_s1 + $0x48] sm:$0xff]  }
   0x5   :  { %536 = vmatprep.mubr.bf16.mxu1 %v1433_v9  ;;  %v1410_v13 = vld [vmem:[%s2552_s1 + $0x50] sm:$0xff]   ;;  %v1411_v14 = vld [vmem:[%s2552_s1 + $0x58] sm:$0xff]   ;;  %v1412_v15 = vld [vmem:[%s2552_s1 + $0x60] sm:$0xff]  }
   0x6   :  { %419 = vmatpush1.bf16.msra.mxu0 %v1401_v2  ;;  %1383 = vmatpush1.bf16.msra.mxu1 %v1401_v2  ;;  %v1413_v16 = vld [vmem:[%s2552_s1 + $0x68] sm:$0xff]   ;;  %v1414_v17 = vld [vmem:[%s2552_s1 + $0x70] sm:$0xff]   ;;  %v1415_v18 = vld [vmem:[%s2552_s1 + $0x78] sm:$0xff]  }
   0x7   :  { %420 = vmatprep.subr.bf16.mxu0 %v1483_v0  ;;  %1368 = vmatprep.subr.bf16.mxu1 %v1483_v0  ;;  %v1416_v19 = vld [vmem:[%s2553_s0] ss:$8 sps:$4 sm:$0xff]   ;;  %v1431_v20 = vld [vmem:[%s2553_s0 + $0xb0] ss:$8 sps:$4 sm:$0xff]   ;;  %v1419_v21 = vld [vmem:[%s2553_s0 + $0x14] ss:$8 sps:$4 sm:$0xff]  }
   0x8   :  { %v1437_v22 = vld [vmem:[%s2553_s0 + $0xc4] ss:$8 sps:$4 sm:$0xff]   ;;  %v1421_v23 = vld [vmem:[%s2553_s0 + $0x10] ss:$8 sps:$4 sm:$0xff]   ;;  %v1441_v24 = vld [vmem:[%s2553_s0 + $0xc0] ss:$8 sps:$4 sm:$0xff]  }
   0x9   :  { %v1422_v25 = vld [vmem:[%s2553_s0 + $0x24] ss:$8 sps:$4 sm:$0xff]   ;;  %v1443_v26 = vld [vmem:[%s2553_s0 + $0xd4] ss:$8 sps:$4 sm:$0xff]   ;;  %v1424_v27 = vld [vmem:[%s2553_s0 + $0x20] ss:$8 sps:$4 sm:$0xff]  }
   0xa   :  { %421 = vmatpush1.bf16.msra.mxu0 %v1402_v3  ;;  %1384 = vmatpush1.bf16.msra.mxu1 %v1402_v3  ;;  %v1447_v28 = vld [vmem:[%s2553_s0 + $0xd0] ss:$8 sps:$4 sm:$0xff]   ;;  %v1425_v29 = vld [vmem:[%s2553_s0 + $0x34] ss:$8 sps:$4 sm:$0xff]   ;;  %v1449_v30 = vld [vmem:[%s2553_s0 + $0xe4] ss:$8 sps:$4 sm:$0xff]  }
   0xb   :  { %422 = vmatprep.subr.bf16.mxu0 %v1483_v0  ;;  %1369 = vmatprep.subr.bf16.mxu1 %v1483_v0  ;;  %v1427_v31 = vld [vmem:[%s2553_s0 + $0x30] ss:$8 sps:$4 sm:$0xff]   ;;  %v1453_v32 = vld [vmem:[%s2553_s0 + $0xe0] ss:$8 sps:$4 sm:$0xff]   ;;  %v1428_v33 = vld [vmem:[%s2553_s0 + $0x44] ss:$8 sps:$4 sm:$0xff]  }
   0xc   :  { %v1455_v34 = vld [vmem:[%s2553_s0 + $0xf4] ss:$8 sps:$4 sm:$0xff]   ;;  %v1430_v35 = vld [vmem:[%s2553_s0 + $0x40] ss:$8 sps:$4 sm:$0xff]   ;;  %v1459_v36 = vld [vmem:[%s2553_s0 + $0xf0] ss:$8 sps:$4 sm:$0xff]  }
   0xd   :  { %v1434_v37 = vld [vmem:[%s2553_s0 + $0x54] ss:$8 sps:$4 sm:$0xff]   ;;  %v1461_v38 = vld [vmem:[%s2553_s0 + $0x104] ss:$8 sps:$4 sm:$0xff]   ;;  %v1436_v39 = vld [vmem:[%s2553_s0 + $0x50] ss:$8 sps:$4 sm:$0xff]  }
   0xe   :  { %423 = vmatpush1.bf16.msra.mxu0 %v1403_v4  ;;  %1385 = vmatpush1.bf16.msra.mxu1 %v1403_v4  ;;  %v1465_v40 = vld [vmem:[%s2553_s0 + $0x100] ss:$8 sps:$4 sm:$0xff]   ;;  %v1439_v41 = vld [vmem:[%s2553_s0 + $0x64] ss:$8 sps:$4 sm:$0xff]   ;;  %v1467_v42 = vld [vmem:[%s2553_s0 + $0x114] ss:$8 sps:$4 sm:$0xff]  }
   0xf   :  { %424 = vmatprep.subr.bf16.mxu0 %v1483_v0  ;;  %1370 = vmatprep.subr.bf16.mxu1 %v1483_v0  ;;  %v1442_v43 = vld [vmem:[%s2553_s0 + $0x60] ss:$8 sps:$4 sm:$0xff]   ;;  %v1469_v44 = vld [vmem:[%s2553_s0 + $0x110] ss:$8 sps:$4 sm:$0xff]   ;;  %v1445_v45 = vld [vmem:[%s2553_s0 + $0x74] ss:$8 sps:$4 sm:$0xff]  }
  0x10   :  { %v1470_v46 = vld [vmem:[%s2553_s0 + $0x124] ss:$8 sps:$4 sm:$0xff]   ;;  %v1448_v47 = vld [vmem:[%s2553_s0 + $0x70] ss:$8 sps:$4 sm:$0xff]   ;;  %v1472_v48 = vld [vmem:[%s2553_s0 + $0x120] ss:$8 sps:$4 sm:$0xff]  }
  0x11   :  { %v1451_v49 = vld [vmem:[%s2553_s0 + $0x84] ss:$8 sps:$4 sm:$0xff]   ;;  %v1473_v50 = vld [vmem:[%s2553_s0 + $0x134] ss:$8 sps:$4 sm:$0xff]   ;;  %v1454_v51 = vld [vmem:[%s2553_s0 + $0x80] ss:$8 sps:$4 sm:$0xff]  }
  0x12   :  { %425 = vmatpush1.bf16.msra.mxu0 %v1404_v5  ;;  %1386 = vmatpush1.bf16.msra.mxu1 %v1404_v5  ;;  %v1475_v52 = vld [vmem:[%s2553_s0 + $0x130] ss:$8 sps:$4 sm:$0xff]   ;;  %v1457_v53 = vld [vmem:[%s2553_s0 + $0x94] ss:$8 sps:$4 sm:$0xff]   ;;  %v1476_v54 = vld [vmem:[%s2553_s0 + $0x144] ss:$8 sps:$4 sm:$0xff]  }
  0x13   :  { %426 = vmatprep.subr.bf16.mxu0 %v1483_v0  ;;  %1371 = vmatprep.subr.bf16.mxu1 %v1483_v0  ;;  %v63_v55 = vld [vmem:[%s2553_s0 + $0x150] sm:$0xff]  ;;  %v1478_v57 = vld [vmem:[%s2553_s0 + $0x140] ss:$8 sps:$4 sm:$0xff]   ;;  %v1463_v58 = vld [vmem:[%s2553_s0 + $0xa4] ss:$8 sps:$4 sm:$0xff]  }
  0x14   :  { %v1460_v56 = vld [vmem:[%s2553_s0 + $0x90] ss:$8 sps:$4 sm:$0xff]   ;;  %v1346_v59 = vcombine.high %v63_v55, %v63_v55  ;;  %v1466_v60 = vld [vmem:[%s2553_s0 + $0xa0] ss:$8 sps:$4 sm:$0xff]   ;;  %v1345_v61 = vcombine.low %v63_v55, %v63_v55 }
  0x16   :  { %427 = vmatpush1.bf16.msra.mxu0 %v1405_v7  ;;  %1387 = vmatpush1.bf16.msra.mxu1 %v1405_v7 }
  0x17   :  { %428 = vmatprep.subr.bf16.mxu0 %v1483_v0  ;;  %1372 = vmatprep.subr.bf16.mxu1 %v1483_v0 }
  0x1a   :  { %429 = vmatpush1.bf16.msra.mxu0 %v1406_v8  ;;  %1388 = vmatpush1.bf16.msra.mxu1 %v1406_v8 }
  0x1b   :  { %430 = vmatprep.subr.bf16.mxu0 %v1483_v0  ;;  %1373 = vmatprep.subr.bf16.mxu1 %v1483_v0 }
  0x1e   :  { %431 = vmatpush1.bf16.msra.mxu0 %v1407_v10  ;;  %1389 = vmatpush1.bf16.msra.mxu1 %v1407_v10 }
  0x1f   :  { %432 = vmatprep.subr.bf16.mxu0 %v1483_v0  ;;  %1374 = vmatprep.subr.bf16.mxu1 %v1483_v0 }
  0x22   :  { %433 = vmatpush1.bf16.msra.mxu0 %v1408_v11  ;;  %1390 = vmatpush1.bf16.msra.mxu1 %v1408_v11 }
  0x23   :  { %434 = vmatprep.subr.bf16.mxu0 %v1483_v0  ;;  %1375 = vmatprep.subr.bf16.mxu1 %v1483_v0 }
  0x26   :  { %435 = vmatpush1.bf16.msra.mxu0 %v1409_v12  ;;  %1391 = vmatpush1.bf16.msra.mxu1 %v1409_v12 }
  0x27   :  { %436 = vmatprep.subr.bf16.mxu0 %v1483_v0  ;;  %1376 = vmatprep.subr.bf16.mxu1 %v1483_v0 }
  0x2a   :  { %437 = vmatpush1.bf16.msra.mxu0 %v1410_v13  ;;  %1392 = vmatpush1.bf16.msra.mxu1 %v1410_v13 }
  0x2b   :  { %438 = vmatprep.subr.bf16.mxu0 %v1483_v0  ;;  %1377 = vmatprep.subr.bf16.mxu1 %v1483_v0 }
  0x2e   :  { %439 = vmatpush1.bf16.msra.mxu0 %v1411_v14  ;;  %1393 = vmatpush1.bf16.msra.mxu1 %v1411_v14 }
  0x2f   :  { %440 = vmatprep.subr.bf16.mxu0 %v1483_v0  ;;  %1378 = vmatprep.subr.bf16.mxu1 %v1483_v0 }
  0x32   :  { %441 = vmatpush1.bf16.msra.mxu0 %v1412_v15  ;;  %1394 = vmatpush1.bf16.msra.mxu1 %v1412_v15 }
  0x33   :  { %442 = vmatprep.subr.bf16.mxu0 %v1483_v0  ;;  %1379 = vmatprep.subr.bf16.mxu1 %v1483_v0 }
  0x36   :  { %443 = vmatpush1.bf16.msra.mxu0 %v1413_v16  ;;  %1395 = vmatpush1.bf16.msra.mxu1 %v1413_v16 }
  0x37   :  { %444 = vmatprep.subr.bf16.mxu0 %v1483_v0  ;;  %1380 = vmatprep.subr.bf16.mxu1 %v1483_v0 }
  0x3a   :  { %445 = vmatpush1.bf16.msra.mxu0 %v1414_v17  ;;  %1396 = vmatpush1.bf16.msra.mxu1 %v1414_v17 }
  0x3b   :  { %446 = vmatprep.subr.bf16.mxu0 %v1483_v0  ;;  %1381 = vmatprep.subr.bf16.mxu1 %v1483_v0 }
  0x3e   :  { %447 = vmatpush1.bf16.msra.mxu0 %v1415_v18  ;;  %1397 = vmatpush1.bf16.msra.mxu1 %v1415_v18 }
  0x41   :  { %449 = vmatmul.mubr.bf16.vlgmr.msra.gmra.mrb[0].mxu0 %v1416_v19  ;;  %537 = vmatmul.mubr.bf16.vlgmr.msra.gmra.mrb[0].mxu1 %v1431_v20 }
  0x42   :  { %456 = vmatprep.mubr.bf16.mxu0 %v1419_v21  ;;  %544 = vmatprep.mubr.bf16.mxu1 %v1437_v22  ;;  %v1739_v22 = vld [vmem:[%s2554_s2] ss:$0 sm:$0xff] }
  0x49   :  { %457 = vmatmul.mubr.bf16.gmra.mrb[4].mxu0 %v1421_v23  ;;  %545 = vmatmul.mubr.bf16.gmra.mrb[4].mxu1 %v1441_v24 }
  0x4a   :  { %464 = vmatprep.mubr.bf16.mxu0 %v1422_v25  ;;  %552 = vmatprep.mubr.bf16.mxu1 %v1443_v26 }
  0x51   :  { %465 = vmatmul.mubr.bf16.gmra.mrb[8].mxu0 %v1424_v27  ;;  %553 = vmatmul.mubr.bf16.gmra.mrb[8].mxu1 %v1447_v28 }
  0x52   :  { %472 = vmatprep.mubr.bf16.mxu0 %v1425_v29  ;;  %560 = vmatprep.mubr.bf16.mxu1 %v1449_v30 }
  0x59   :  { %473 = vmatmul.mubr.bf16.gmra.mrb[12].mxu0 %v1427_v31  ;;  %561 = vmatmul.mubr.bf16.gmra.mrb[12].mxu1 %v1453_v32 }
  0x5a   :  { %480 = vmatprep.mubr.bf16.mxu0 %v1428_v33  ;;  %568 = vmatprep.mubr.bf16.mxu1 %v1455_v34 }
  0x61   :  { %481 = vmatmul.mubr.bf16.gmra.mrb[16].mxu0 %v1430_v35  ;;  %569 = vmatmul.mubr.bf16.gmra.mrb[16].mxu1 %v1459_v36 }
  0x62   :  { %488 = vmatprep.mubr.bf16.mxu0 %v1434_v37  ;;  %576 = vmatprep.mubr.bf16.mxu1 %v1461_v38 }
  0x69   :  { %489 = vmatmul.mubr.bf16.gmra.mrb[20].mxu0 %v1436_v39  ;;  %577 = vmatmul.mubr.bf16.gmra.mrb[20].mxu1 %v1465_v40 }
  0x6a   :  { %496 = vmatprep.mubr.bf16.mxu0 %v1439_v41  ;;  %584 = vmatprep.mubr.bf16.mxu1 %v1467_v42 }
  0x71   :  { %497 = vmatmul.mubr.bf16.gmra.mrb[24].mxu0 %v1442_v43  ;;  %585 = vmatmul.mubr.bf16.gmra.mrb[24].mxu1 %v1469_v44 }
  0x72   :  { %504 = vmatprep.mubr.bf16.mxu0 %v1445_v45  ;;  %592 = vmatprep.mubr.bf16.mxu1 %v1470_v46 }
  0x79   :  { %505 = vmatmul.mubr.bf16.gmra.mrb[28].mxu0 %v1448_v47  ;;  %593 = vmatmul.mubr.bf16.gmra.mrb[28].mxu1 %v1472_v48 }
  0x7a   :  { %512 = vmatprep.mubr.bf16.mxu0 %v1451_v49  ;;  %600 = vmatprep.mubr.bf16.mxu1 %v1473_v50 }
  0x81   :  { %513 = vmatmul.mubr.bf16.gmra.mrb[32].mxu0 %v1454_v51  ;;  %601 = vmatmul.mubr.bf16.gmra.mrb[32].mxu1 %v1475_v52 }
  0x82   :  { %520 = vmatprep.mubr.bf16.mxu0 %v1457_v53  ;;  %608 = vmatprep.mubr.bf16.mxu1 %v1476_v54 }
  0x89   :  { %521 = vmatmul.mubr.bf16.gmra.mrb[36].mxu0 %v1460_v56  ;;  %609 = vmatmul.mubr.bf16.gmra.mrb[36].mxu1 %v1478_v57 }
  0x8a   :  { %528 = vmatprep.mubr.bf16.mxu0 %v1463_v58  ;;  %616 = vmatprep.mubr.bf16.mxu1 %v1346_v59 }
  0x91   :  { %529 = vmatmul.mubr.bf16.gmra.mrb[40].mxu0 %v1466_v60  ;;  %617 = vmatmul.mubr.bf16.gmra.mrb[40].mxu1 %v1345_v61 }
 0x114   :  { %v450_v62 = vpop.f32.mrb[0].mxu0  ;;  %v1724_v63 = vpop.f32.mrb[0].mxu1 }
 0x115   :  { %v452_v0 = vpop.f32.mrb[1].mxu0  ;;  %v540_v1 = vpop.f32.mrb[1].mxu1  ;;  %v1745_v24 = vadd.f32 %v1739_v22, %v450_v62 }
 0x116   :  { %v453_v2 = vpop.f32.mrb[2].mxu0  ;;  %v1726_v3 = vpop.f32.mrb[2].mxu1 }
 0x117   :  { %v455_v4 = vpop.f32.mrb[3].mxu0  ;;  %v543_v5 = vpop.f32.mrb[3].mxu1  ;;  %v1742_v23 = vadd.f32 %v1739_v22, %v453_v2  ;;  %v2578_v33 = vmax.f32 %v1745_v24, 0.0 }
 0x119   :  { %v2577_v28 = vmax.f32 %v1742_v23, 0.0 }
 0x11b   :  { %v885_v38 = vadd.f32 %v2577_v28, %v2578_v33 }
 0x11c   :  { %v458_v6 = vpop.f32.mrb[4].mxu0  ;;  %v1728_v7 = vpop.f32.mrb[4].mxu1 }
 0x11d   :  { %v460_v8 = vpop.f32.mrb[5].mxu0  ;;  %v548_v9 = vpop.f32.mrb[5].mxu1  ;;  %v1748_v25 = vadd.f32 %v1739_v22, %v458_v6 }
 0x11e   :  { %v461_v10 = vpop.f32.mrb[6].mxu0  ;;  %v1730_v11 = vpop.f32.mrb[6].mxu1 }
 0x11f   :  { %v463_v12 = vpop.f32.mrb[7].mxu0  ;;  %v551_v13 = vpop.f32.mrb[7].mxu1  ;;  %v2576_v34 = vmax.f32 %v1748_v25, 0.0  ;;  %v1758_v35 = vadd.f32 %v1739_v22, %v461_v10 }
 0x121   :  { %v886_v40 = vadd.f32 %v885_v38, %v2576_v34  ;;  %v2575_v41 = vmax.f32 %v1758_v35, 0.0 }
 0x123   :  { %v887_v50 = vadd.f32 %v886_v40, %v2575_v41 }
 0x124   :  { %v466_v14 = vpop.f32.mrb[8].mxu0  ;;  %v1732_v15 = vpop.f32.mrb[8].mxu1 }
 0x125   :  { %v468_v16 = vpop.f32.mrb[9].mxu0  ;;  %v556_v17 = vpop.f32.mrb[9].mxu1  ;;  %v1765_v39 = vadd.f32 %v1739_v22, %v466_v14 }
 0x126   :  { %v469_v18 = vpop.f32.mrb[10].mxu0  ;;  %v1734_v19 = vpop.f32.mrb[10].mxu1 }
 0x127   :  { %v471_v20 = vpop.f32.mrb[11].mxu0  ;;  %v559_v21 = vpop.f32.mrb[11].mxu1  ;;  %v2574_v44 = vmax.f32 %v1765_v39, 0.0  ;;  %v1774_v45 = vadd.f32 %v1739_v22, %v469_v18 }
 0x129   :  { %v888_v54 = vadd.f32 %v887_v50, %v2574_v44  ;;  %v2573_v55 = vmax.f32 %v1774_v45, 0.0 }
 0x12b   :  { %v889_v60 = vadd.f32 %v888_v54, %v2573_v55 }
 0x12c   :  { %v474_v26 = vpop.f32.mrb[12].mxu0  ;;  %v1750_v27 = vpop.f32.mrb[12].mxu1 }
 0x12d   :  { %v476_v29 = vpop.f32.mrb[13].mxu0  ;;  %v564_v30 = vpop.f32.mrb[13].mxu1  ;;  %v1781_v51 = vadd.f32 %v1739_v22, %v474_v26 }
 0x12e   :  { %v477_v31 = vpop.f32.mrb[14].mxu0  ;;  %v1753_v32 = vpop.f32.mrb[14].mxu1 }
 0x12f   :  { %v479_v36 = vpop.f32.mrb[15].mxu0  ;;  %v567_v37 = vpop.f32.mrb[15].mxu1  ;;  %v2572_v56 = vmax.f32 %v1781_v51, 0.0  ;;  %v1788_v57 = vadd.f32 %v1739_v22, %v477_v31 }
 0x131   :  { %v890_v4 = vadd.f32 %v889_v60, %v2572_v56  ;;  %v2571_v5 = vmax.f32 %v1788_v57, 0.0 }
 0x133   :  { %v891_v12 = vadd.f32 %v890_v4, %v2571_v5  ;;  %v1947_v5 = vadd.f32 %v1739_v22, %v1753_v32 }
 0x134   :  { %v482_v42 = vpop.f32.mrb[16].mxu0  ;;  %v1770_v43 = vpop.f32.mrb[16].mxu1 }
 0x135   :  { %v484_v46 = vpop.f32.mrb[17].mxu0  ;;  %v572_v47 = vpop.f32.mrb[17].mxu1  ;;  %v1795_v61 = vadd.f32 %v1739_v22, %v482_v42  ;;  %v1954_v56 = vadd.f32 %v1739_v22, %v1770_v43 }
 0x136   :  { %v485_v48 = vpop.f32.mrb[18].mxu0  ;;  %v1776_v49 = vpop.f32.mrb[18].mxu1 }
 0x137   :  { %v487_v52 = vpop.f32.mrb[19].mxu0  ;;  %v575_v53 = vpop.f32.mrb[19].mxu1  ;;  %v2566_v9 = vmax.f32 %v1795_v61, 0.0  ;;  %v1804_v10 = vadd.f32 %v1739_v22, %v485_v48  ;;  %v1961_v55 = vadd.f32 %v1739_v22, %v1776_v49  ;;  %v669_v49 = vlaneseq }
 0x139   :  { %v892_v17 = vadd.f32 %v891_v12, %v2566_v9  ;;  %v2565_v18 = vmax.f32 %v1804_v10, 0.0 }
 0x13b   :  { %v893_v38 = vadd.f32 %v892_v17, %v2565_v18 }
 0x13c   :  { %v490_v58 = vpop.f32.mrb[20].mxu0  ;;  %v1790_v59 = vpop.f32.mrb[20].mxu1 }
 0x13d   :  { %v492_v62 = vpop.f32.mrb[21].mxu0  ;;  %v580_v0 = vpop.f32.mrb[21].mxu1  ;;  %v1809_v13 = vadd.f32 %v1739_v22, %v490_v58  ;;  %v1968_v44 = vadd.f32 %v1739_v22, %v1790_v59 }
 0x13e   :  { %v493_v1 = vpop.f32.mrb[22].mxu0  ;;  %v1797_v2 = vpop.f32.mrb[22].mxu1 }
 0x13f   :  { %v495_v6 = vpop.f32.mrb[23].mxu0  ;;  %v583_v8 = vpop.f32.mrb[23].mxu1  ;;  %v2564_v30 = vmax.f32 %v1809_v13, 0.0  ;;  %v1820_v31 = vadd.f32 %v1739_v22, %v493_v1  ;;  %v582_v41 = vadd.f32 %v1739_v22, %v1797_v2  ;;  %v656_v28 = vmax.f32 %v1968_v44, 0.0 }
 0x141   :  { %v894_v42 = vadd.f32 %v893_v38, %v2564_v30  ;;  %v2563_v46 = vmax.f32 %v1820_v31, 0.0  ;;  %v657_v33 = vmax.f32 %v582_v41, 0.0 }
 0x143   :  { %v895_v62 = vadd.f32 %v894_v42, %v2563_v46 }
 0x144   :  { %v498_v14 = vpop.f32.mrb[24].mxu0  ;;  %v1811_v16 = vpop.f32.mrb[24].mxu1 }
 0x145   :  { %v500_v20 = vpop.f32.mrb[25].mxu0  ;;  %v588_v21 = vpop.f32.mrb[25].mxu1  ;;  %v1825_v40 = vadd.f32 %v1739_v22, %v498_v14 }
 0x146   :  { %v501_v26 = vpop.f32.mrb[26].mxu0  ;;  %v1816_v29 = vpop.f32.mrb[26].mxu1 }
 0x147   :  { %v503_v36 = vpop.f32.mrb[27].mxu0  ;;  %v591_v37 = vpop.f32.mrb[27].mxu1  ;;  %v2561_v50 = vmax.f32 %v1825_v40, 0.0  ;;  %v1834_v52 = vadd.f32 %v1739_v22, %v501_v26  ;;  %v590_v59 = vadd.f32 %v1739_v22, %v1816_v29 }
 0x149   :  { %v896_v6 = vadd.f32 %v895_v62, %v2561_v50  ;;  %v2559_v8 = vmax.f32 %v1834_v52, 0.0 }
 0x14b   :  { %v897_v21 = vadd.f32 %v896_v6, %v2559_v8 }
 0x14c   :  { %v506_v47 = vpop.f32.mrb[28].mxu0  ;;  %v1830_v48 = vpop.f32.mrb[28].mxu1 }
 0x14d   :  { %v508_v53 = vpop.f32.mrb[29].mxu0  ;;  %v596_v54 = vpop.f32.mrb[29].mxu1  ;;  %v1841_v0 = vadd.f32 %v1739_v22, %v506_v47 }
 0x14e   :  { %v509_v58 = vpop.f32.mrb[30].mxu0  ;;  %v1836_v60 = vpop.f32.mrb[30].mxu1 }
 0x14f   :  { %v511_v1 = vpop.f32.mrb[31].mxu0  ;;  %v599_v4 = vpop.f32.mrb[31].mxu1  ;;  %v2558_v12 = vmax.f32 %v1841_v0, 0.0  ;;  %v1848_v14 = vadd.f32 %v1739_v22, %v509_v58  ;;  %v598_v44 = vadd.f32 %v1739_v22, %v1836_v60 }
 0x151   :  { %v898_v47 = vadd.f32 %v897_v21, %v2558_v12  ;;  %v2560_v53 = vmax.f32 %v1848_v14, 0.0 }
 0x153   :  { %v899_v4 = vadd.f32 %v898_v47, %v2560_v53 }
 0x154   :  { %v514_v17 = vpop.f32.mrb[32].mxu0  ;;  %v1850_v20 = vpop.f32.mrb[32].mxu1 }
 0x155   :  { %v1855_v26 = vadd.f32 %v1739_v22, %v514_v17  ;;  %v516_v36 = vpop.f32.mrb[33].mxu0  ;;  %v604_v37 = vpop.f32.mrb[33].mxu1 }
 0x156   :  { %v517_v38 = vpop.f32.mrb[34].mxu0  ;;  %v1857_v42 = vpop.f32.mrb[34].mxu1 }
 0x157   :  { %v519_v54 = vpop.f32.mrb[35].mxu0  ;;  %v607_v58 = vpop.f32.mrb[35].mxu1  ;;  %v2562_v62 = vmax.f32 %v1855_v26, 0.0  ;;  %v1864_v1 = vadd.f32 %v1739_v22, %v517_v38  ;;  %v606_v29 = vadd.f32 %v1739_v22, %v1857_v42 }
 0x159   :  { %v900_v36 = vadd.f32 %v899_v4, %v2562_v62  ;;  %v2568_v21 = vmax.f32 %v1864_v1, 0.0 }
 0x15b   :  { %v901_v4 = vadd.f32 %v900_v36, %v2568_v21 }
 0x15c   :  { %v522_v6 = vpop.f32.mrb[36].mxu0  ;;  %v1868_v17 = vpop.f32.mrb[36].mxu1 }
 0x15d   :  { %v1874_v37 = vadd.f32 %v1739_v22, %v522_v6  ;;  %v524_v54 = vpop.f32.mrb[37].mxu0  ;;  %v612_v58 = vpop.f32.mrb[37].mxu1  ;;  %v611_v60 = vadd.f32 %v1739_v22, %v1868_v17 }
 0x15e   :  { %v525_v12 = vpop.f32.mrb[38].mxu0  ;;  %v1876_v8 = vpop.f32.mrb[38].mxu1 }
 0x15f   :  { %v2567_v38 = vmax.f32 %v1874_v37, 0.0  ;;  %v1880_v47 = vadd.f32 %v1739_v22, %v525_v12  ;;  %v527_v53 = vpop.f32.mrb[39].mxu0  ;;  %v615_v50 = vpop.f32.mrb[39].mxu1 }
 0x160   :  { %v1894_v50 = vadd.f32 %v1739_v22, %v1724_v63 }
 0x161   :  { %v902_v62 = vadd.f32 %v901_v4, %v2567_v38  ;;  %v2570_v6 = vmax.f32 %v1880_v47, 0.0 }
 0x163   :  { %v903_v53 = vadd.f32 %v902_v62, %v2570_v6  ;;  %v1912_v62 = vadd.f32 %v1739_v22, %v1728_v7  ;;  %v1940_v6 = vadd.f32 %v1739_v22, %v1750_v27 }
 0x164   :  { %v530_v54 = vpop.f32.mrb[40].mxu0  ;;  %v1887_v58 = vpop.f32.mrb[40].mxu1 }
 0x165   :  { %v1890_v46 = vadd.f32 %v1739_v22, %v530_v54  ;;  %v532_v30 = vpop.f32.mrb[41].mxu0  ;;  %v620_v18 = vpop.f32.mrb[41].mxu1 }
 0x166   :  { %v533_v12 = vpop.f32.mrb[42].mxu0  ;;  %v621_v9 = vpop.f32.mrb[42].mxu1  ;;  %v1904_v30 = vadd.f32 %v1739_v22, %v1726_v3  ;;  %v646_v18 = vmax.f32 %v1894_v50, 0.0  ;;  %v1919_v3 = vadd.f32 %v1739_v22, %v1730_v11 }
 0x167   :  { %v2569_v36 = vmax.f32 %v1890_v46, 0.0  ;;  %v1900_v4 = vadd.f32 %v1739_v22, %v533_v12  ;;  %v535_v38 = vpop.f32.mrb[43].mxu0  ;;  %v622_v21 = vpop.f32.mrb[43].mxu1  ;;  %v2584_v12 = vmax.f32 %v1912_v62, 0.0 }
 0x168   :  { %v647_v21 = vmax.f32 %v1904_v30, 0.0 }
 0x169   :  { %v904_v9 = vadd.f32 %v903_v53, %v2569_v36  ;;  %v645_v63 = vmax.f32 %v1900_v4, 0.0  ;;  %v1926_v53 = vadd.f32 %v1739_v22, %v1732_v15  ;;  %v1933_v36 = vadd.f32 %v1739_v22, %v1734_v19 }
 0x16a   :  { %v2586_v4 = vmax.f32 %v1919_v3, 0.0 }
 0x16b   :  { %v905_v54 = vadd.f32 %v904_v9, %v645_v63  ;;  %v2583_v9 = vmax.f32 %v1919_v3, 0.0  ;;  %v2587_v50 = vmax.f32 %v1926_v53, 0.0  ;;  %v2588_v30 = vmax.f32 %v1933_v36, 0.0 }
 0x16c   :  { %v2590_v3 = vmax.f32 %v1947_v5, 0.0 }
 0x16d   :  { %v906_v38 = vadd.f32 %v905_v54, %v646_v18  ;;  %v2582_v54 = vmax.f32 %v1926_v53, 0.0 }
 0x16f   :  { %v907_v7 = vadd.f32 %v906_v38, %v647_v21  ;;  %v2580_v38 = vmax.f32 %v1933_v36, 0.0 }
 0x171   :  { %v908_v11 = vadd.f32 %v907_v7, %v2584_v12  ;;  %v2579_v7 = vmax.f32 %v1940_v6, 0.0 }
 0x173   :  { %v909_v15 = vadd.f32 %v908_v11, %v2583_v9  ;;  %v2581_v11 = vmax.f32 %v1947_v5, 0.0 }
 0x175   :  { %v910_v19 = vadd.f32 %v909_v15, %v2582_v54  ;;  %v654_v15 = vmax.f32 %v1954_v56, 0.0 }
 0x177   :  { %v911_v27 = vadd.f32 %v910_v19, %v2580_v38  ;;  %v655_v19 = vmax.f32 %v1961_v55, 0.0  ;;  %v670_v38 = vshrl.u32 %v669_v49, 7  ;;  %v595_v55 = vadd.f32 %v1739_v22, %v1830_v48 }
 0x178   :  { %v663_v49 = vmax.f32 %v606_v29, 0.0 }
 0x179   :  { %v912_v32 = vadd.f32 %v911_v27, %v2579_v7  ;;  %v587_v27 = vadd.f32 %v1739_v22, %v1811_v16  ;;  %v712_v54 = vadd.s32 336, %v670_v38  ;;  %v660_v16 = vmax.f32 %v595_v55, 0.0 }
 0x17a   :  { %v664_v55 = vmax.f32 %v611_v60, 0.0 }
 0x17b   :  { %v913_v43 = vadd.f32 %v912_v32, %v2581_v11  ;;  %v658_v32 = vmax.f32 %v587_v27, 0.0  ;;  %vm755_vm0 = vcmp.lt.s32.totalorder %v712_v54, 338  ;;  %v1484_v27 = vmov 0.0  }
 0x17d   :  { %v914_v34 = vadd.f32 %v913_v43, %v654_v15  ;;  %v659_v43 = vmax.f32 %v590_v59, 0.0  ;;  %v1997_v59 = vsel %vm755_vm0, 1.0, %v1484_v27  ;;  %v2585_v27 = vmax.f32 %v1912_v62, 0.0 }
 0x17e   :  { %v2589_v62 = vmax.f32 %v1940_v6, 0.0 }
 0x17f   :  { %v915_v56 = vadd.f32 %v914_v34, %v655_v19  ;;  %v603_v34 = vadd.f32 %v1739_v22, %v1850_v20  ;;  %v614_v20 = vadd.f32 %v1739_v22, %v1876_v8 }
 0x181   :  { %v916_v7 = vadd.f32 %v915_v56, %v656_v28  ;;  %v661_v56 = vmax.f32 %v598_v44, 0.0 }
 0x183   :  { %v917_v11 = vadd.f32 %v916_v7, %v657_v33  ;;  %v1990_v7 = vadd.f32 %v1739_v22, %v1887_v58 }
 0x185   :  { %v918_v2 = vadd.f32 %v917_v11, %v658_v32  ;;  %v662_v11 = vmax.f32 %v603_v34, 0.0 }
 0x187   :  { %v919_v9 = vadd.f32 %v918_v2, %v659_v43  ;;  %v665_v2 = vmax.f32 %v614_v20, 0.0 }
 0x189   :  { %v920_v41 = vadd.f32 %v919_v9, %v660_v16  ;;  %v666_v9 = vmax.f32 %v1990_v7, 0.0 }
 0x18b   :  { %v921_v48 = vadd.f32 %v920_v41, %v661_v56  ;;  %v884_v54 = vmul.f32 %v1997_v59, %v666_v9 }
 0x18d   :  { %v922_v38 = vadd.f32 %v921_v48, %v662_v11 }
 0x18f   :  { %v923_v42 = vadd.f32 %v922_v38, %v663_v49 }
 0x191   :  { %v924_v58 = vadd.f32 %v923_v42, %v664_v55 }
 0x193   :  { %v925_v44 = vadd.f32 %v924_v58, %v665_v2 }
 0x195   :  { %v926_v17 = vadd.f32 %v925_v44, %v884_v54 }
 0x197   :  { %v927_v34 = vrot.slane %v926_v17, 4 }
 0x199   :  { %v928_v41 = vadd.f32 %v927_v34, %v926_v17 }
 0x19b   :  { %v929_v29 = vrot.slane %v928_v41, 2 }
 0x19d   :  { %v930_v48 = vadd.f32 %v929_v29, %v928_v41 }
 0x19f   :  { %v931_v22 = vrot.slane %v930_v48, 1 }
 0x1a1   :  { %v932_v8 = vadd.f32 %v931_v22, %v930_v48 }
 0x1a3   :  { %v2002_v12 = vmul.f32 0.00295858, %v932_v8  ;;  %v2596_v8 = vmax.f32 %v1774_v45, 0.0 }
 0x1a5   :  { %v2007_v60 = vsub.f32 %v645_v63, %v2002_v12  ;;  %v2012_v38 = vsub.f32 %v646_v18, %v2002_v12  ;;  %v2017_v20 = vsub.f32 %v647_v21, %v2002_v12  ;;  %v2022_v42 = vsub.f32 %v2585_v27, %v2002_v12 }
 0x1a6   :  { %v2027_v63 = vsub.f32 %v2586_v4, %v2002_v12  ;;  %v2032_v18 = vsub.f32 %v2587_v50, %v2002_v12  ;;  %v2037_v21 = vsub.f32 %v2588_v30, %v2002_v12  ;;  %v2042_v58 = vsub.f32 %v2589_v62, %v2002_v12 }
 0x1a7   :  { %v2047_v54 = vsub.f32 %v2590_v3, %v2002_v12  ;;  %v2050_v44 = vsub.f32 %v654_v15, %v2002_v12  ;;  %v2053_v53 = vsub.f32 %v655_v19, %v2002_v12  ;;  %v2056_v36 = vsub.f32 %v656_v28, %v2002_v12 }
 0x1a8   :  { %v2059_v17 = vsub.f32 %v657_v33, %v2002_v12  ;;  %v2062_v6 = vsub.f32 %v658_v32, %v2002_v12  ;;  %v2065_v34 = vsub.f32 %v659_v43, %v2002_v12  ;;  %v2068_v5 = vsub.f32 %v660_v16, %v2002_v12 }
 0x1a9   :  { %v2071_v15 = vsub.f32 %v661_v56, %v2002_v12  ;;  %v2074_v19 = vsub.f32 %v662_v11, %v2002_v12  ;;  %v2077_v28 = vsub.f32 %v663_v49, %v2002_v12  ;;  %v2080_v33 = vsub.f32 %v664_v55, %v2002_v12 }
 0x1aa   :  { %v2083_v32 = vsub.f32 %v665_v2, %v2002_v12  ;;  %v2591_v43 = vmax.f32 %v1745_v24, 0.0  ;;  %v2592_v56 = vmax.f32 %v1742_v23, 0.0  ;;  %v2593_v11 = vmax.f32 %v1748_v25, 0.0 }
 0x1ab   :  { %v2594_v24 = vmax.f32 %v1758_v35, 0.0  ;;  %v2595_v23 = vmax.f32 %v1765_v39, 0.0  ;;  %v2119_v27 = vsub.f32 %v2596_v8, %v2002_v12  ;;  %v2597_v50 = vmax.f32 %v1781_v51, 0.0 }
 0x1ac   :  { %v2088_v16 = vsub.f32 %v2591_v43, %v2002_v12  ;;  %v2093_v41 = vsub.f32 %v2592_v56, %v2002_v12  ;;  %v2098_v49 = vsub.f32 %v2593_v11, %v2002_v12  ;;  %v2598_v3 = vmax.f32 %v1788_v57, 0.0 }
 0x1ad   :  { %v2107_v29 = vsub.f32 %v2594_v24, %v2002_v12  ;;  %v2112_v48 = vsub.f32 %v2595_v23, %v2002_v12  ;;  %v2126_v30 = vsub.f32 %v2597_v50, %v2002_v12  ;;  %v1025_v45 = vmul.f32 %v2119_v27, %v2119_v27 }
 0x1ae   :  { %v1020_v55 = vmul.f32 %v2088_v16, %v2088_v16  ;;  %v1021_v2 = vmul.f32 %v2093_v41, %v2093_v41  ;;  %v1022_v25 = vmul.f32 %v2098_v49, %v2098_v49  ;;  %v2133_v43 = vsub.f32 %v2598_v3, %v2002_v12 }
 0x1af   :  { %v1023_v4 = vmul.f32 %v2107_v29, %v2107_v29  ;;  %v1024_v39 = vmul.f32 %v2112_v48, %v2112_v48  ;;  %v2599_v11 = vmax.f32 %v1795_v61, 0.0  ;;  %v1026_v51 = vmul.f32 %v2126_v30, %v2126_v30 }
 0x1b0   :  { %v1063_v22 = vadd.f32 %v1021_v2, %v1020_v55  ;;  %v2600_v24 = vmax.f32 %v1804_v10, 0.0  ;;  %v1027_v57 = vmul.f32 %v2133_v43, %v2133_v43  ;;  %v1061_v7 = vmul.f32 %v2083_v32, %v2083_v32 }
 0x1b1   :  { %v2140_v55 = vsub.f32 %v2599_v11, %v2002_v12 }
 0x1b2   :  { %v1064_v35 = vadd.f32 %v1063_v22, %v1022_v25  ;;  %v2147_v23 = vsub.f32 %v2600_v24, %v2002_v12  ;;  %v2601_v22 = vmax.f32 %v1809_v13, 0.0 }
 0x1b3   :  { %v1028_v61 = vmul.f32 %v2140_v55, %v2140_v55 }
 0x1b4   :  { %v1065_v62 = vadd.f32 %v1064_v35, %v1023_v4  ;;  %v2154_v8 = vsub.f32 %v2601_v22, %v2002_v12  ;;  %v2602_v35 = vmax.f32 %v1820_v31, 0.0  ;;  %v1029_v10 = vmul.f32 %v2147_v23, %v2147_v23 }
 0x1b6   :  { %v1066_v56 = vadd.f32 %v1065_v62, %v1024_v39  ;;  %v2161_v50 = vsub.f32 %v2602_v35, %v2002_v12  ;;  %v2603_v62 = vmax.f32 %v1825_v40, 0.0  ;;  %v1030_v13 = vmul.f32 %v2154_v8, %v2154_v8 }
 0x1b8   :  { %v1067_v2 = vadd.f32 %v1066_v56, %v1025_v45  ;;  %v2168_v3 = vsub.f32 %v2603_v62, %v2002_v12  ;;  %v2604_v56 = vmax.f32 %v1834_v52, 0.0  ;;  %v1031_v31 = vmul.f32 %v2161_v50, %v2161_v50 }
 0x1ba   :  { %v1068_v25 = vadd.f32 %v1067_v2, %v1026_v51  ;;  %v2175_v11 = vsub.f32 %v2604_v56, %v2002_v12  ;;  %v2605_v2 = vmax.f32 %v1841_v0, 0.0  ;;  %v1032_v40 = vmul.f32 %v2168_v3, %v2168_v3 }
 0x1bc   :  { %v1069_v4 = vadd.f32 %v1068_v25, %v1027_v57  ;;  %v2182_v24 = vsub.f32 %v2605_v2, %v2002_v12  ;;  %v2606_v25 = vmax.f32 %v1848_v14, 0.0  ;;  %v1033_v52 = vmul.f32 %v2175_v11, %v2175_v11 }
 0x1be   :  { %v1070_v39 = vadd.f32 %v1069_v4, %v1028_v61  ;;  %v2189_v22 = vsub.f32 %v2606_v25, %v2002_v12  ;;  %v2607_v4 = vmax.f32 %v1855_v26, 0.0  ;;  %v1034_v0 = vmul.f32 %v2182_v24, %v2182_v24 }
 0x1c0   :  { %v1071_v45 = vadd.f32 %v1070_v39, %v1029_v10  ;;  %v2196_v35 = vsub.f32 %v2607_v4, %v2002_v12  ;;  %v2608_v39 = vmax.f32 %v1864_v1, 0.0  ;;  %v1035_v14 = vmul.f32 %v2189_v22, %v2189_v22 }
 0x1c2   :  { %v1072_v51 = vadd.f32 %v1071_v45, %v1030_v13  ;;  %v2203_v62 = vsub.f32 %v2608_v39, %v2002_v12  ;;  %v2609_v45 = vmax.f32 %v1874_v37, 0.0  ;;  %v1036_v26 = vmul.f32 %v2196_v35, %v2196_v35 }
 0x1c4   :  { %v1073_v57 = vadd.f32 %v1072_v51, %v1031_v31  ;;  %v2210_v56 = vsub.f32 %v2609_v45, %v2002_v12  ;;  %v2610_v51 = vmax.f32 %v1880_v47, 0.0  ;;  %v1037_v1 = vmul.f32 %v2203_v62, %v2203_v62 }
 0x1c6   :  { %v1074_v61 = vadd.f32 %v1073_v57, %v1032_v40  ;;  %v2217_v2 = vsub.f32 %v2610_v51, %v2002_v12  ;;  %v2611_v57 = vmax.f32 %v1890_v46, 0.0  ;;  %v1038_v37 = vmul.f32 %v2210_v56, %v2210_v56 }
 0x1c7   :  { %v1042_v46 = vmul.f32 %v2012_v38, %v2012_v38  ;;  %v1045_v51 = vmul.f32 %v2027_v63, %v2027_v63 }
 0x1c8   :  { %v1075_v10 = vadd.f32 %v1074_v61, %v1033_v52  ;;  %v2224_v25 = vsub.f32 %v2611_v57, %v2002_v12  ;;  %v1039_v61 = vmul.f32 %v2217_v2, %v2217_v2 }
 0x1ca   :  { %v1076_v13 = vadd.f32 %v1075_v10, %v1034_v0  ;;  %v1040_v47 = vmul.f32 %v2224_v25, %v2224_v25  ;;  %v1041_v10 = vmul.f32 %v2007_v60, %v2007_v60 }
 0x1cc   :  { %v1077_v31 = vadd.f32 %v1076_v13, %v1035_v14  ;;  %v1043_v13 = vmul.f32 %v2017_v20, %v2017_v20 }
 0x1ce   :  { %v1078_v40 = vadd.f32 %v1077_v31, %v1036_v26  ;;  %v1044_v26 = vmul.f32 %v2022_v42, %v2022_v42 }
 0x1d0   :  { %v1079_v52 = vadd.f32 %v1078_v40, %v1037_v1  ;;  %v1046_v40 = vmul.f32 %v2032_v18, %v2032_v18 }
 0x1d2   :  { %v1080_v4 = vadd.f32 %v1079_v52, %v1038_v37  ;;  %v1047_v37 = vmul.f32 %v2037_v21, %v2037_v21 }
 0x1d4   :  { %v1081_v0 = vadd.f32 %v1080_v4, %v1039_v61  ;;  %v1048_v61 = vmul.f32 %v2042_v58, %v2042_v58 }
 0x1d6   :  { %v1082_v39 = vadd.f32 %v1081_v0, %v1040_v47  ;;  %v1049_v47 = vmul.f32 %v2047_v54, %v2047_v54 }
 0x1d8   :  { %v1083_v14 = vadd.f32 %v1082_v39, %v1041_v10  ;;  %v1050_v10 = vmul.f32 %v2050_v44, %v2050_v44 }
 0x1da   :  { %v1084_v45 = vadd.f32 %v1083_v14, %v1042_v46  ;;  %v1051_v46 = vmul.f32 %v2053_v53, %v2053_v53 }
 0x1dc   :  { %v1085_v31 = vadd.f32 %v1084_v45, %v1043_v13  ;;  %v1052_v13 = vmul.f32 %v2056_v36, %v2056_v36 }
 0x1de   :  { %v1086_v1 = vadd.f32 %v1085_v31, %v1044_v26  ;;  %v1053_v26 = vmul.f32 %v2059_v17, %v2059_v17 }
 0x1e0   :  { %v1087_v57 = vadd.f32 %v1086_v1, %v1045_v51  ;;  %v1054_v51 = vmul.f32 %v2062_v6, %v2062_v6 }
 0x1e2   :  { %v1088_v52 = vadd.f32 %v1087_v57, %v1046_v40  ;;  %v1055_v40 = vmul.f32 %v2065_v34, %v2065_v34 }
 0x1e4   :  { %v1089_v4 = vadd.f32 %v1088_v52, %v1047_v37  ;;  %v1056_v37 = vmul.f32 %v2068_v5, %v2068_v5 }
 0x1e6   :  { %v1090_v0 = vadd.f32 %v1089_v4, %v1048_v61  ;;  %v1057_v61 = vmul.f32 %v2071_v15, %v2071_v15 }
 0x1e8   :  { %v1091_v39 = vadd.f32 %v1090_v0, %v1049_v47  ;;  %v2269_v47 = vsub.f32 %v666_v9, %v2002_v12  ;;  %v1058_v0 = vmul.f32 %v2074_v19, %v2074_v19 }
 0x1ea   :  { %v1092_v14 = vadd.f32 %v1091_v39, %v1050_v10  ;;  %v1059_v39 = vmul.f32 %v2077_v28, %v2077_v28 }
 0x1ec   :  { %v1093_v45 = vadd.f32 %v1092_v14, %v1051_v46  ;;  %v1019_v14 = vmul.f32 %v1997_v59, %v2269_v47 }
 0x1ee   :  { %v1094_v31 = vadd.f32 %v1093_v45, %v1052_v13  ;;  %v1060_v13 = vmul.f32 %v2080_v33, %v2080_v33  ;;  %v1062_v9 = vmul.f32 %v1019_v14, %v1019_v14 }
 0x1f0   :  { %v1095_v1 = vadd.f32 %v1094_v31, %v1053_v26 }
 0x1f2   :  { %v1096_v57 = vadd.f32 %v1095_v1, %v1054_v51 }
 0x1f4   :  { %v1097_v52 = vadd.f32 %v1096_v57, %v1055_v40 }
 0x1f6   :  { %v1098_v4 = vadd.f32 %v1097_v52, %v1056_v37 }
 0x1f8   :  { %v1099_v10 = vadd.f32 %v1098_v4, %v1057_v61 }
 0x1fa   :  { %v1100_v46 = vadd.f32 %v1099_v10, %v1058_v0 }
 0x1fc   :  { %v1101_v45 = vadd.f32 %v1100_v46, %v1059_v39 }
 0x1fe   :  { %v1102_v12 = vadd.f32 %v1101_v45, %v1060_v13 }
 0x200   :  { %v1103_v26 = vadd.f32 %v1102_v12, %v1061_v7 }
 0x202   :  { %v1104_v31 = vadd.f32 %v1103_v26, %v1062_v9 }
 0x204   :  { %v1105_v51 = vrot.slane %v1104_v31, 4 }
 0x206   :  { %v1106_v1 = vadd.f32 %v1105_v51, %v1104_v31 }
 0x208   :  { %v1107_v40 = vrot.slane %v1106_v1, 2 }
 0x20a   :  { %v1108_v57 = vadd.f32 %v1107_v40, %v1106_v1 }
 0x20c   :  { %v1109_v37 = vrot.slane %v1108_v57, 1 }
 0x20e   :  { %v1110_v52 = vadd.f32 %v1109_v37, %v1108_v57 }
 0x210   :  { %v1111_v61 = vmul.f32 0.00295858, %v1110_v52 }
 0x212   :  { %v1112_v4 = vadd.f32 1e-05, %v1111_v61 }
 0x214   :  { %1481 = vrsqrt.f32 %v1112_v4 }
 0x21e   :  { %v1482_v59 = vpop.eup %1481 }
 0x21f   :  { %v1114_v0 = vmul.f32 %v1482_v59, %v2088_v16  ;;  %v1115_v10 = vmul.f32 %v1482_v59, %v2093_v41  ;;  %v1116_v39 = vmul.f32 %v1482_v59, %v2098_v49  ;;  %v1117_v46 = vmul.f32 %v1482_v59, %v2107_v29 }
 0x220   :  { %v1118_v14 = vmul.f32 %v1482_v59, %v2112_v48  ;;  %v1119_v13 = vmul.f32 %v1482_v59, %v2119_v27  ;;  %v1120_v45 = vmul.f32 %v1482_v59, %v2126_v30  ;;  %v1121_v7 = vmul.f32 %v1482_v59, %v2133_v43 }
 0x221   :  { %v1122_v12 = vmul.f32 %v1482_v59, %v2140_v55  ;;  %v1123_v9 = vmul.f32 %v1482_v59, %v2147_v23  ;;  %v1124_v16 = vmul.f32 %v1482_v59, %v2154_v8  ;;  %v1125_v41 = vmul.f32 %v1482_v59, %v2161_v50 }
 0x222   :  { %v1126_v49 = vmul.f32 %v1482_v59, %v2168_v3  ;;  %v1127_v29 = vmul.f32 %v1482_v59, %v2175_v11  ;;  %v1128_v48 = vmul.f32 %v1482_v59, %v2182_v24  ;;  %v1129_v27 = vmul.f32 %v1482_v59, %v2189_v22 }
 0x223   :  { %v1130_v30 = vmul.f32 %v1482_v59, %v2196_v35  ;;  %v1131_v43 = vmul.f32 %v1482_v59, %v2203_v62  ;;  %v1132_v55 = vmul.f32 %v1482_v59, %v2210_v56  ;;  %v1133_v23 = vmul.f32 %v1482_v59, %v2217_v2  ;;  %v1364_v56 = vld [vmem:[%s2555_s3] ss:$0 sm:$0xff] }
 0x224   :  { %v1134_v8 = vmul.f32 %v1482_v59, %v2224_v25  ;;  %v1135_v50 = vmul.f32 %v1482_v59, %v2007_v60  ;;  %v1136_v3 = vmul.f32 %v1482_v59, %v2012_v38  ;;  %v1137_v11 = vmul.f32 %v1482_v59, %v2017_v20 }
 0x225   :  { %v1138_v24 = vmul.f32 %v1482_v59, %v2022_v42  ;;  %v1139_v22 = vmul.f32 %v1482_v59, %v2027_v63  ;;  %v1140_v35 = vmul.f32 %v1482_v59, %v2032_v18  ;;  %v1141_v62 = vmul.f32 %v1482_v59, %v2037_v21 }
 0x226   :  { %v1142_v2 = vmul.f32 %v1482_v59, %v2042_v58  ;;  %v1143_v60 = vmul.f32 %v1482_v59, %v2047_v54  ;;  %v1144_v38 = vmul.f32 %v1482_v59, %v2050_v44  ;;  %v1145_v20 = vmul.f32 %v1482_v59, %v2053_v53 }
 0x227   :  { %v1146_v42 = vmul.f32 %v1482_v59, %v2056_v36  ;;  %v1147_v63 = vmul.f32 %v1482_v59, %v2059_v17  ;;  %v1148_v18 = vmul.f32 %v1482_v59, %v2062_v6  ;;  %v1149_v21 = vmul.f32 %v1482_v59, %v2065_v34 }
 0x228   :  { %v1150_v25 = vmul.f32 %v1482_v59, %v2068_v5  ;;  %v1151_v26 = vmul.f32 %v1482_v59, %v2071_v15  ;;  %v1152_v58 = vmul.f32 %v1482_v59, %v2074_v19  ;;  %v1153_v54 = vmul.f32 %v1482_v59, %v2077_v28 }
 0x229   :  { %v1154_v44 = vmul.f32 %v1482_v59, %v2080_v33  ;;  %v1155_v53 = vmul.f32 %v1482_v59, %v2083_v32  ;;  %v1156_v36 = vmul.f32 %v1482_v59, %v2269_v47  ;;  %v1163_v31 = vmul.f32 %v1364_v56, %v1114_v0 }
 0x22a   :  { %v1164_v17 = vmul.f32 %v1364_v56, %v1115_v10  ;;  %v1165_v51 = vmul.f32 %v1364_v56, %v1116_v39  ;;  %v1166_v6 = vmul.f32 %v1364_v56, %v1117_v46  ;;  %v1167_v1 = vmul.f32 %v1364_v56, %v1118_v14 }
 0x22b   :  { %v1168_v34 = vmul.f32 %v1364_v56, %v1119_v13  ;;  %v1169_v40 = vmul.f32 %v1364_v56, %v1120_v45  ;;  %v1170_v5 = vmul.f32 %v1364_v56, %v1121_v7  ;;  %v1171_v57 = vmul.f32 %v1364_v56, %v1122_v12 }
 0x22c   :  { %v1172_v15 = vmul.f32 %v1364_v56, %v1123_v9  ;;  %v1173_v37 = vmul.f32 %v1364_v56, %v1124_v16  ;;  %v1174_v19 = vmul.f32 %v1364_v56, %v1125_v41  ;;  %v1175_v52 = vmul.f32 %v1364_v56, %v1126_v49  ;;  %v2336_v9 = vld [vmem:[%s2556_s4] ss:$0 sm:$0xff] }
 0x22d   :  { %v1176_v28 = vmul.f32 %v1364_v56, %v1127_v29  ;;  %v1177_v61 = vmul.f32 %v1364_v56, %v1128_v48  ;;  %v1178_v33 = vmul.f32 %v1364_v56, %v1129_v27  ;;  %v1179_v4 = vmul.f32 %v1364_v56, %v1130_v30 }
 0x22e   :  { %v1180_v32 = vmul.f32 %v1364_v56, %v1131_v43  ;;  %v1181_v47 = vmul.f32 %v1364_v56, %v1132_v55  ;;  %v1182_v59 = vmul.f32 %v1364_v56, %v1133_v23  ;;  %v1183_v0 = vmul.f32 %v1364_v56, %v1134_v8 }
 0x22f   :  { %v1184_v10 = vmul.f32 %v1364_v56, %v1135_v50  ;;  %v1185_v39 = vmul.f32 %v1364_v56, %v1136_v3  ;;  %v1186_v46 = vmul.f32 %v1364_v56, %v1137_v11  ;;  %v1187_v14 = vmul.f32 %v1364_v56, %v1138_v24 }
 0x230   :  { %v1188_v13 = vmul.f32 %v1364_v56, %v1139_v22  ;;  %v2327_v45 = vmul.f32 %v1364_v56, %v1140_v35  ;;  %v2329_v7 = vmul.f32 %v1364_v56, %v1141_v62  ;;  %v2331_v12 = vmul.f32 %v1364_v56, %v1142_v2 }
 0x231   :  { %v1192_v16 = vmul.f32 %v1364_v56, %v1143_v60  ;;  %v2338_v41 = vmul.f32 %v1364_v56, %v1144_v38  ;;  %v2340_v49 = vmul.f32 %v1364_v56, %v1145_v20  ;;  %v2342_v29 = vmul.f32 %v1364_v56, %v1146_v42 }
 0x232   :  { %v2344_v48 = vmul.f32 %v1364_v56, %v1147_v63  ;;  %v2346_v27 = vmul.f32 %v1364_v56, %v1148_v18  ;;  %v2348_v30 = vmul.f32 %v1364_v56, %v1149_v21  ;;  %v2350_v43 = vmul.f32 %v1364_v56, %v1150_v25 }
 0x233   :  { %v2352_v55 = vmul.f32 %v1364_v56, %v1151_v26  ;;  %v2354_v23 = vmul.f32 %v1364_v56, %v1152_v58  ;;  %v2356_v8 = vmul.f32 %v1364_v56, %v1153_v54  ;;  %v2358_v50 = vmul.f32 %v1364_v56, %v1154_v44 }
 0x234   :  { %v2360_v3 = vmul.f32 %v1364_v56, %v1155_v53  ;;  %v2362_v11 = vmul.f32 %v1364_v56, %v1156_v36  ;;  %v1212_v24 = vadd.f32 %v2336_v9, %v1163_v31  ;;  %v1213_v22 = vadd.f32 %v2336_v9, %v1164_v17 }
 0x235   :  { %v1214_v35 = vadd.f32 %v2336_v9, %v1165_v51  ;;  %v1215_v62 = vadd.f32 %v2336_v9, %v1166_v6  ;;  %v1216_v2 = vadd.f32 %v2336_v9, %v1167_v1  ;;  %v1217_v60 = vadd.f32 %v2336_v9, %v1168_v34 }
 0x236   :  { %v1218_v38 = vadd.f32 %v2336_v9, %v1169_v40  ;;  %v1219_v20 = vadd.f32 %v2336_v9, %v1170_v5  ;;  %v1220_v42 = vadd.f32 %v2336_v9, %v1171_v57  ;;  %v1221_v56 = vadd.f32 %v2336_v9, %v1172_v15  ;;  %1255 = vst [vmem:[%s2557_s5] sm:$0xff] %v1212_v24 }
 0x237   :  { %1256 = vst [vmem:[%s2557_s5 + $0x8] sm:$0xff] %v1213_v22  ;;  %v1222_v63 = vadd.f32 %v2336_v9, %v1173_v37  ;;  %v1223_v18 = vadd.f32 %v2336_v9, %v1174_v19  ;;  %v1224_v21 = vadd.f32 %v2336_v9, %v1175_v52  ;;  %v1225_v25 = vadd.f32 %v2336_v9, %v1176_v28 }
 0x238   :  { %1257 = vst [vmem:[%s2557_s5 + $0x10] sm:$0xff] %v1214_v35  ;;  %1258 = vst [vmem:[%s2557_s5 + $0x18] sm:$0xff] %v1215_v62  ;;  %v1226_v26 = vadd.f32 %v2336_v9, %v1177_v61  ;;  %v1227_v58 = vadd.f32 %v2336_v9, %v1178_v33  ;;  %v1228_v54 = vadd.f32 %v2336_v9, %v1179_v4 }
 0x239   :  { %1259 = vst [vmem:[%s2557_s5 + $0x20] sm:$0xff] %v1216_v2  ;;  %1260 = vst [vmem:[%s2557_s5 + $0x28] sm:$0xff] %v1217_v60  ;;  %v1229_v44 = vadd.f32 %v2336_v9, %v1180_v32  ;;  %v1230_v53 = vadd.f32 %v2336_v9, %v1181_v47  ;;  %v1231_v36 = vadd.f32 %v2336_v9, %v1182_v59 }
 0x23a   :  { %1261 = vst [vmem:[%s2557_s5 + $0x30] sm:$0xff] %v1218_v38  ;;  %1262 = vst [vmem:[%s2557_s5 + $0x38] sm:$0xff] %v1219_v20  ;;  %v1232_v31 = vadd.f32 %v2336_v9, %v1183_v0  ;;  %v1233_v17 = vadd.f32 %v2336_v9, %v1184_v10  ;;  %v1234_v51 = vadd.f32 %v2336_v9, %v1185_v39 }
 0x23b   :  { %1263 = vst [vmem:[%s2557_s5 + $0x40] sm:$0xff] %v1220_v42  ;;  %1264 = vst [vmem:[%s2557_s5 + $0x48] sm:$0xff] %v1221_v56  ;;  %v1235_v6 = vadd.f32 %v2336_v9, %v1186_v46  ;;  %v1236_v1 = vadd.f32 %v2336_v9, %v1187_v14  ;;  %v1237_v34 = vadd.f32 %v2336_v9, %v1188_v13 }
 0x23c   :  { %1265 = vst [vmem:[%s2557_s5 + $0x50] sm:$0xff] %v1222_v63  ;;  %1266 = vst [vmem:[%s2557_s5 + $0x58] sm:$0xff] %v1223_v18  ;;  %v1238_v40 = vadd.f32 %v2336_v9, %v2327_v45  ;;  %v1239_v5 = vadd.f32 %v2336_v9, %v2329_v7  ;;  %v1240_v57 = vadd.f32 %v2336_v9, %v2331_v12 }
 0x23d   :  { %1267 = vst [vmem:[%s2557_s5 + $0x60] sm:$0xff] %v1224_v21  ;;  %1268 = vst [vmem:[%s2557_s5 + $0x68] sm:$0xff] %v1225_v25  ;;  %v1241_v15 = vadd.f32 %v2336_v9, %v1192_v16  ;;  %v1242_v37 = vadd.f32 %v2336_v9, %v2338_v41  ;;  %v1243_v19 = vadd.f32 %v2336_v9, %v2340_v49 }
 0x23e   :  { %1269 = vst [vmem:[%s2557_s5 + $0x70] sm:$0xff] %v1226_v26  ;;  %1270 = vst [vmem:[%s2557_s5 + $0x78] sm:$0xff] %v1227_v58  ;;  %v1244_v52 = vadd.f32 %v2336_v9, %v2342_v29  ;;  %v1245_v28 = vadd.f32 %v2336_v9, %v2344_v48  ;;  %v1246_v61 = vadd.f32 %v2336_v9, %v2346_v27 }
 0x23f   :  { %1271 = vst [vmem:[%s2557_s5 + $0x80] sm:$0xff] %v1228_v54  ;;  %1272 = vst [vmem:[%s2557_s5 + $0x88] sm:$0xff] %v1229_v44  ;;  %v1247_v33 = vadd.f32 %v2336_v9, %v2348_v30  ;;  %v1248_v4 = vadd.f32 %v2336_v9, %v2350_v43  ;;  %v1249_v32 = vadd.f32 %v2336_v9, %v2352_v55 }
 0x240   :  { %1273 = vst [vmem:[%s2557_s5 + $0x90] sm:$0xff] %v1230_v53  ;;  %1274 = vst [vmem:[%s2557_s5 + $0x98] sm:$0xff] %v1231_v36  ;;  %v1250_v47 = vadd.f32 %v2336_v9, %v2354_v23  ;;  %v1251_v59 = vadd.f32 %v2336_v9, %v2356_v8  ;;  %v1252_v0 = vadd.f32 %v2336_v9, %v2358_v50 }
 0x241   :  { %1275 = vst [vmem:[%s2557_s5 + $0xa0] sm:$0xff] %v1232_v31  ;;  %1276 = vst [vmem:[%s2557_s5 + $0xa8] sm:$0xff] %v1233_v17  ;;  %v1253_v10 = vadd.f32 %v2336_v9, %v2360_v3  ;;  %v1254_v39 = vadd.f32 %v2336_v9, %v2362_v11 }
 0x242   :  { %1277 = vst [vmem:[%s2557_s5 + $0xb0] sm:$0xff] %v1234_v51  ;;  %1278 = vst [vmem:[%s2557_s5 + $0xb8] sm:$0xff] %v1235_v6 }
 0x243   :  { %1279 = vst [vmem:[%s2557_s5 + $0xc0] sm:$0xff] %v1236_v1  ;;  %1280 = vst [vmem:[%s2557_s5 + $0xc8] sm:$0xff] %v1237_v34 }
 0x244   :  { %1281 = vst [vmem:[%s2557_s5 + $0xd0] sm:$0xff] %v1238_v40  ;;  %1282 = vst [vmem:[%s2557_s5 + $0xd8] sm:$0xff] %v1239_v5 }
 0x245   :  { %1283 = vst [vmem:[%s2557_s5 + $0xe0] sm:$0xff] %v1240_v57  ;;  %1284 = vst [vmem:[%s2557_s5 + $0xe8] sm:$0xff] %v1241_v15 }
 0x246   :  { %1285 = vst [vmem:[%s2557_s5 + $0xf0] sm:$0xff] %v1242_v37  ;;  %1286 = vst [vmem:[%s2557_s5 + $0xf8] sm:$0xff] %v1243_v19 }
 0x247   :  { %1287 = vst [vmem:[%s2557_s5 + $0x100] sm:$0xff] %v1244_v52  ;;  %1288 = vst [vmem:[%s2557_s5 + $0x108] sm:$0xff] %v1245_v28 }
 0x248   :  { %1289 = vst [vmem:[%s2557_s5 + $0x110] sm:$0xff] %v1246_v61  ;;  %1290 = vst [vmem:[%s2557_s5 + $0x118] sm:$0xff] %v1247_v33 }
 0x249   :  { %1291 = vst [vmem:[%s2557_s5 + $0x120] sm:$0xff] %v1248_v4  ;;  %1292 = vst [vmem:[%s2557_s5 + $0x128] sm:$0xff] %v1249_v32 }
 0x24a   :  { %1293 = vst [vmem:[%s2557_s5 + $0x130] sm:$0xff] %v1250_v47  ;;  %1294 = vst [vmem:[%s2557_s5 + $0x138] sm:$0xff] %v1251_v59 }
 0x24b   :  { %1295 = vst [vmem:[%s2557_s5 + $0x140] sm:$0xff] %v1252_v0  ;;  %1296 = vst [vmem:[%s2557_s5 + $0x148] sm:$0xff] %v1253_v10 }
 0x24c   :  { %1297 = vst [vmem:[%s2557_s5 + $0x150] sm:$0xff] %v1254_v39 }

// kernel: resnet_forward.3
= control target key start
LH: loop header
LB: loop body
LE: loop exit
PB: predicated region body
PF: predicated region fallthrough
CT: control target
= control target key end

     0   :  { %s22368_s0 = inlined_call_operand.vmem [shape: f32[160,128], index: 0, kind: input, shape index: {}]   ;;  %s22369_s1 = inlined_call_operand.vmem [shape: f32[128,1], index: 1, kind: input, shape index: {}]   ;;  %s22370_s2 = inlined_call_operand.vmem [shape: bf16[3,9,128,128], index: 2, kind: input, shape index: {}]   ;;  %s22371_s3 = inlined_call_operand.vmem [shape: f32[3,1,128], index: 3, kind: input, shape index: {}]   ;;  %s22372_s4 = inlined_call_operand.vmem [shape: f32[3,1,128], index: 4, kind: input, shape index: {}]   ;;  %s22373_s5 = inlined_call_operand.vmem [shape: f32[3,1,128], index: 5, kind: input, shape index: {}]   ;;  %s22374_s6 = inlined_call_operand.vmem [shape: bf16[3,9,128,128], index: 6, kind: input, shape index: {}]   ;;  %s22375_s7 = inlined_call_operand.vmem [shape: f32[3,1,128], index: 7, kind: input, shape index: {}]   ;;  %s22376_s8 = inlined_call_operand.vmem [shape: f32[3,1,128], index: 8, kind: input, shape index: {}]   ;;  %s22377_s9 = inlined_call_operand.vmem [shape: f32[3,1,128], index: 9, kind: input, shape index: {}]   ;;  %s22378_s10 = inlined_call_operand.vmem [shape: f32[2,128], index: 10, kind: input, shape index: {}]   ;;  %s22379_s11 = inlined_call_operand.vmem [shape: f32[128,128], index: 11, kind: input, shape index: {}]   ;;  %s22380_s12 = inlined_call_operand.vmem [shape: f32[1,128], index: 12, kind: input, shape index: {}]   ;;  %s22381_s13 = inlined_call_operand.hbm [shape: f32[2,128], index: 13, kind: output, shape index: {}]  }
   0x1   :  { %v17378_v0 = vld [vmem:[%s22370_s2 + $0x40] sm:$0xff]   ;;  %v17379_v1 = vld [vmem:[%s22370_s2 + $0x48] sm:$0xff]   ;;  %v17380_v2 = vld [vmem:[%s22370_s2 + $0x50] sm:$0xff]  }
   0x2   :  { %14757 = vmatprep.subr.bf16.mxu0 %v17378_v0  ;;  %v17381_v3 = vld [vmem:[%s22370_s2 + $0x58] sm:$0xff]   ;;  %v63_v4 = vld [vmem:[%s22368_s0 + $0x8] sm:$0xff]  ;;  %v64_v5 = vld [vmem:[%s22368_s0 + $0x10] sm:$0xff] }
   0x3   :  { %14758 = vmatpush3.bf16.msra.mxu0 %v17378_v0  ;;  %v65_v6 = vld [vmem:[%s22368_s0 + $0x18] sm:$0xff]  ;;  %83 = vst [vmem:[#allocation2 + $0x8] sm:$0xff] %v63_v4  ;;  %84 = vst [vmem:[#allocation2 + $0x10] sm:$0xff] %v64_v5  ;;  %v159_v7 = vpack.c.bf16 %v64_v5, %v63_v4  ;;  %v66_v8 = vld [vmem:[%s22368_s0 + $0x20] sm:$0xff] }
   0x4   :  { %14759 = vmatprep.subr.bf16.mxu0 %v17379_v1  ;;  %85 = vst [vmem:[#allocation2 + $0x18] sm:$0xff] %v65_v6  ;;  %86 = vst [vmem:[#allocation2 + $0x20] sm:$0xff] %v66_v8  ;;  %v17382_v9 = vld [vmem:[%s22370_s2 + $0x60] sm:$0xff]   ;;  %v67_v10 = vld [vmem:[%s22368_s0 + $0x28] sm:$0xff]  ;;  %v160_v27 = vpack.c.bf16 %v66_v8, %v65_v6 }
   0x5   :  { %14773 = vmatprep.mubr.bf16.mxu0 %v159_v7  ;;  %v68_v11 = vld [vmem:[%s22368_s0 + $0x30] sm:$0xff]  ;;  %87 = vst [vmem:[#allocation2 + $0x28] sm:$0xff] %v67_v10  ;;  %v69_v12 = vld [vmem:[%s22368_s0 + $0x38] sm:$0xff]  ;;  %v70_v13 = vld [vmem:[%s22368_s0 + $0x40] sm:$0xff] }
   0x6   :  { %88 = vst [vmem:[#allocation2 + $0x30] sm:$0xff] %v68_v11  ;;  %89 = vst [vmem:[#allocation2 + $0x38] sm:$0xff] %v69_v12  ;;  %v71_v14 = vld [vmem:[%s22368_s0 + $0x48] sm:$0xff]  ;;  %v72_v15 = vld [vmem:[%s22368_s0 + $0x50] sm:$0xff]  ;;  %v18016_v28 = vpack.c.bf16 %v68_v11, %v67_v10  ;;  %v18025_v31 = vpack.c.bf16 %v70_v13, %v69_v12 }
   0x7   :  { %14760 = vmatpush3.bf16.msra.mxu0 %v17379_v1  ;;  %90 = vst [vmem:[#allocation2 + $0x40] sm:$0xff] %v70_v13  ;;  %91 = vst [vmem:[#allocation2 + $0x48] sm:$0xff] %v71_v14  ;;  %v73_v16 = vld [vmem:[%s22368_s0 + $0x58] sm:$0xff]  ;;  %v74_v17 = vld [vmem:[%s22368_s0 + $0x60] sm:$0xff]  ;;  %v18027_v32 = vpack.c.bf16 %v72_v15, %v71_v14 }
   0x8   :  { %14761 = vmatprep.subr.bf16.mxu0 %v17380_v2  ;;  %v17383_v18 = vld [vmem:[%s22370_s2 + $0x68] sm:$0xff]   ;;  %92 = vst [vmem:[#allocation2 + $0x50] sm:$0xff] %v72_v15  ;;  %93 = vst [vmem:[#allocation2 + $0x58] sm:$0xff] %v73_v16  ;;  %v76_v20 = vld [vmem:[%s22368_s0 + $0x70] sm:$0xff]  ;;  %v18040_v36 = vpack.c.bf16 %v74_v17, %v73_v16 }
   0x9   :  { %94 = vst [vmem:[#allocation2 + $0x60] sm:$0xff] %v74_v17  ;;  %v75_v19 = vld [vmem:[%s22368_s0 + $0x68] sm:$0xff]  ;;  %v77_v21 = vld [vmem:[%s22368_s0 + $0x78] sm:$0xff]  ;;  %96 = vst [vmem:[#allocation2 + $0x70] sm:$0xff] %v76_v20 }
   0xa   :  { %95 = vst [vmem:[#allocation2 + $0x68] sm:$0xff] %v75_v19  ;;  %v78_v22 = vld [vmem:[%s22368_s0 + $0x80] sm:$0xff]  ;;  %97 = vst [vmem:[#allocation2 + $0x78] sm:$0xff] %v77_v21  ;;  %v17384_v23 = vld [vmem:[%s22370_s2 + $0x70] sm:$0xff]   ;;  %v18042_v37 = vpack.c.bf16 %v76_v20, %v75_v19 }
   0xb   :  { %14762 = vmatpush3.bf16.msra.mxu0 %v17380_v2  ;;  %98 = vst [vmem:[#allocation2 + $0x80] sm:$0xff] %v78_v22  ;;  %v62_v24 = vld [vmem:[%s22368_s0] sm:$0xff]  ;;  %v17385_v25 = vld [vmem:[%s22370_s2 + $0x78] sm:$0xff]   ;;  %v17387_v29 = vld [vmem:[%s22370_s2 + $0x8] sm:$0xff]   ;;  %v18054_v42 = vpack.c.bf16 %v78_v22, %v77_v21 }
   0xc   :  { %14763 = vmatprep.subr.bf16.mxu0 %v17381_v3  ;;  %82 = vst [vmem:[#allocation2] sm:$0xff] %v62_v24  ;;  %v17386_v26 = vld [vmem:[%s22370_s2] sm:$0xff]   ;;  %v17388_v30 = vld [vmem:[%s22370_s2 + $0x10] sm:$0xff]   ;;  %v17389_v33 = vld [vmem:[%s22370_s2 + $0x18] sm:$0xff]  }
   0xd   :  { %v17390_v34 = vld [vmem:[%s22370_s2 + $0x20] sm:$0xff]   ;;  %v79_v35 = vld [vmem:[%s22368_s0 + $0x88] sm:$0xff]  ;;  %v17392_v39 = vld [vmem:[%s22370_s2 + $0x30] sm:$0xff]  }
   0xe   :  { %99 = vst [vmem:[#allocation2 + $0x88] sm:$0xff] %v79_v35  ;;  %v17391_v38 = vld [vmem:[%s22370_s2 + $0x28] sm:$0xff]   ;;  %v17393_v44 = vld [vmem:[%s22370_s2 + $0x38] sm:$0xff]   ;;  %v17394_v47 = vld [vmem:[%s22370_s2 + $0x80] sm:$0xff]  }
   0xf   :  { %14764 = vmatpush3.bf16.msra.mxu0 %v17381_v3  ;;  %v18052_v40 = vld [vmem:[#allocation2 + $0xf] sm:$0xff]  ;;  %v18060_v45 = vld [vmem:[#allocation2 + $0x17] sm:$0xff]  ;;  %v18062_v46 = vld [vmem:[#allocation2 + $0x1f] sm:$0xff] }
  0x10   :  { %14765 = vmatprep.subr.bf16.mxu0 %v17382_v9  ;;  %v18068_v48 = vld [vmem:[#allocation2 + $0x27] sm:$0xff]  ;;  %v18070_v49 = vld [vmem:[#allocation2 + $0x2f] sm:$0xff]  ;;  %v18074_v50 = vpack.c.bf16 %v18062_v46, %v18060_v45  ;;  %v18083_v53 = vld [vmem:[#allocation2 + $0x37] sm:$0xff] }
  0x11   :  { %v18078_v51 = vpack.c.bf16 %v18070_v49, %v18068_v48  ;;  %v17395_v52 = vld [vmem:[%s22370_s2 + $0x88] sm:$0xff]   ;;  %v18085_v54 = vld [vmem:[#allocation2 + $0x3f] sm:$0xff]  ;;  %v17396_v55 = vld [vmem:[%s22370_s2 + $0x90] sm:$0xff]  }
  0x12   :  { %v18091_v56 = vld [vmem:[#allocation2 + $0x47] sm:$0xff]  ;;  %v18094_v57 = vld [vmem:[#allocation2 + $0x4f] sm:$0xff]  ;;  %v18098_v58 = vpack.c.bf16 %v18085_v54, %v18083_v53  ;;  %v17397_v60 = vld [vmem:[%s22370_s2 + $0x98] sm:$0xff]  }
  0x13   :  { %14766 = vmatpush3.bf16.msra.mxu0 %v17382_v9  ;;  %v118_v41 = vld [vmem:[#allocation2 + $0x7] sm:$0xff]  ;;  %v18102_v59 = vpack.c.bf16 %v18094_v57, %v18091_v56  ;;  %v18107_v61 = vld [vmem:[#allocation2 + $0x57] sm:$0xff]  ;;  %v18109_v62 = vld [vmem:[#allocation2 + $0x5f] sm:$0xff] }
  0x14   :  { %14767 = vmatprep.subr.bf16.mxu0 %v17383_v18  ;;  %v134_v43 = vpack.c.bf16 %v18052_v40, %v118_v41  ;;  %v17398_v63 = vld [vmem:[%s22370_s2 + $0xa0] sm:$0xff]   ;;  %v18118_v1 = vld [vmem:[#allocation2 + $0x6f] sm:$0xff]  ;;  %v18122_v2 = vpack.c.bf16 %v18109_v62, %v18107_v61  ;;  %v18134_v6 = vld [vmem:[#allocation2 + $0x77] sm:$0xff] }
  0x15   :  { %v18115_v0 = vld [vmem:[#allocation2 + $0x67] sm:$0xff]  ;;  %v80_v4 = vld [vmem:[%s22368_s0 + $0x90] sm:$0xff]  ;;  %v18136_v7 = vld [vmem:[#allocation2 + $0x7f] sm:$0xff] }
  0x16   :  { %v18126_v3 = vpack.c.bf16 %v18118_v1, %v18115_v0  ;;  %v17399_v5 = vld [vmem:[%s22370_s2 + $0xa8] sm:$0xff]   ;;  %100 = vst [vmem:[#allocation2 + $0x90] sm:$0xff] %v80_v4  ;;  %v17400_v8 = vld [vmem:[%s22370_s2 + $0xb0] sm:$0xff]   ;;  %v18147_v11 = vpack.c.bf16 %v18136_v7, %v18134_v6  ;;  %v17401_v13 = vld [vmem:[%s22370_s2 + $0xb8] sm:$0xff]  }
  0x17   :  { %14768 = vmatpush3.bf16.msra.mxu0 %v17383_v18  ;;  %v474_v9 = vld [vmem:[#allocation2 + $0x9] sm:$0xff]  ;;  %v18143_v10 = vld [vmem:[#allocation2 + $0x11] sm:$0xff]  ;;  %v18153_v14 = vld [vmem:[#allocation2 + $0x19] sm:$0xff] }
  0x18   :  { %14769 = vmatprep.subr.bf16.mxu0 %v17384_v23  ;;  %v490_v12 = vpack.c.bf16 %v18143_v10, %v474_v9  ;;  %v18155_v15 = vld [vmem:[#allocation2 + $0x21] sm:$0xff]  ;;  %v18161_v17 = vld [vmem:[#allocation2 + $0x29] sm:$0xff]  ;;  %v18163_v18 = vld [vmem:[#allocation2 + $0x31] sm:$0xff] }
  0x19   :  { %v17402_v16 = vld [vmem:[%s22370_s2 + $0xc0] sm:$0xff]   ;;  %v18167_v19 = vpack.c.bf16 %v18155_v15, %v18153_v14  ;;  %v18171_v20 = vpack.c.bf16 %v18163_v18, %v18161_v17  ;;  %v17403_v21 = vld [vmem:[%s22370_s2 + $0xc8] sm:$0xff]   ;;  %v17404_v24 = vld [vmem:[%s22370_s2 + $0xd0] sm:$0xff]  }
  0x1a   :  { %v18176_v22 = vld [vmem:[#allocation2 + $0x39] sm:$0xff]  ;;  %v17412_v9 = vld [vmem:[%s22370_s2 + $0x110] sm:$0xff]  }
  0x1b   :  { %14770 = vmatpush3.bf16.msra.mxu0 %v17384_v23  ;;  %v18178_v23 = vld [vmem:[#allocation2 + $0x41] sm:$0xff]  ;;  %v17409_v4 = vld [vmem:[%s22370_s2 + $0xf8] sm:$0xff]  }
  0x1c   :  { %14771 = vmatprep.subr.bf16.mxu0 %v17385_v25  ;;  %v17406_v35 = vld [vmem:[%s22370_s2 + $0xe0] sm:$0xff]  }
  0x1f   :  { %14772 = vmatpush3.bf16.msra.mxu0 %v17385_v25  ;;  %v18184_v25 = vld [vmem:[#allocation2 + $0x49] sm:$0xff] }
  0x20   :  { %14789 = vmatprep.subr.bf16.mxu0 %v17386_v26 }
  0x22   :  { %14774 = vmatmul.mubr.bf16.vlgmr.msra.gmra.mrb[0].mxu0 %v160_v27  ;;  %v18191_v27 = vpack.c.bf16 %v18178_v23, %v18176_v22 }
  0x23   :  { %14790 = vmatpush3.bf16.msra.mxu0 %v17386_v26  ;;  %14777 = vmatprep.mubr.bf16.mxu0 %v18016_v28  ;;  %v18187_v26 = vld [vmem:[#allocation2 + $0x51] sm:$0xff] }
  0x24   :  { %14791 = vmatprep.subr.bf16.mxu0 %v17387_v29 }
  0x27   :  { %14792 = vmatpush3.bf16.msra.mxu0 %v17387_v29  ;;  %v18195_v29 = vpack.c.bf16 %v18187_v26, %v18184_v25 }
  0x28   :  { %14793 = vmatprep.subr.bf16.mxu0 %v17388_v30 }
  0x2a   :  { %14778 = vmatmul.mubr.bf16.gmra.mrb[4].mxu0 %v18025_v31 }
  0x2b   :  { %14794 = vmatpush3.bf16.msra.mxu0 %v17388_v30  ;;  %14781 = vmatprep.mubr.bf16.mxu0 %v18027_v32  ;;  %v17405_v30 = vld [vmem:[%s22370_s2 + $0xd8] sm:$0xff]  }
  0x2c   :  { %14795 = vmatprep.subr.bf16.mxu0 %v17389_v33 }
  0x2f   :  { %14796 = vmatpush3.bf16.msra.mxu0 %v17389_v33  ;;  %v18200_v33 = vld [vmem:[#allocation2 + $0x59] sm:$0xff] }
  0x30   :  { %14797 = vmatprep.subr.bf16.mxu0 %v17390_v34 }
  0x32   :  { %14782 = vmatmul.mubr.bf16.gmra.mrb[8].mxu0 %v18040_v36 }
  0x33   :  { %14798 = vmatpush3.bf16.msra.mxu0 %v17390_v34  ;;  %14785 = vmatprep.mubr.bf16.mxu0 %v18042_v37  ;;  %v18202_v34 = vld [vmem:[#allocation2 + $0x61] sm:$0xff] }
  0x34   :  { %14799 = vmatprep.subr.bf16.mxu0 %v17391_v38  ;;  %v18215_v41 = vpack.c.bf16 %v18202_v34, %v18200_v33 }
  0x37   :  { %14800 = vmatpush3.bf16.msra.mxu0 %v17391_v38  ;;  %v18208_v38 = vld [vmem:[#allocation2 + $0x69] sm:$0xff] }
  0x38   :  { %14801 = vmatprep.subr.bf16.mxu0 %v17392_v39 }
  0x3a   :  { %14786 = vmatmul.mubr.bf16.gmra.mrb[12].mxu0 %v18054_v42 }
  0x3b   :  { %14802 = vmatpush3.bf16.msra.mxu0 %v17392_v39  ;;  %14805 = vmatprep.mubr.bf16.mxu0 %v134_v43  ;;  %v18211_v39 = vld [vmem:[#allocation2 + $0x71] sm:$0xff] }
  0x3c   :  { %14803 = vmatprep.subr.bf16.mxu0 %v17393_v44  ;;  %v18219_v43 = vpack.c.bf16 %v18211_v39, %v18208_v38 }
  0x3f   :  { %14804 = vmatpush3.bf16.msra.mxu0 %v17393_v44  ;;  %v17407_v44 = vld [vmem:[%s22370_s2 + $0xe8] sm:$0xff]  }
  0x40   :  { %14821 = vmatprep.subr.bf16.mxu0 %v17394_v47 }
  0x42   :  { %14806 = vmatmul.mubr.bf16.vlgmr.msra.gmra.mrb[0].mxu0 %v18074_v50 }
  0x43   :  { %14822 = vmatpush3.bf16.msra.mxu0 %v17394_v47  ;;  %14809 = vmatprep.mubr.bf16.mxu0 %v18078_v51  ;;  %v18224_v47 = vld [vmem:[#allocation2 + $0x79] sm:$0xff] }
  0x44   :  { %14823 = vmatprep.subr.bf16.mxu0 %v17395_v52 }
  0x47   :  { %14824 = vmatpush3.bf16.msra.mxu0 %v17395_v52  ;;  %v17408_v52 = vld [vmem:[%s22370_s2 + $0xf0] sm:$0xff]  }
  0x48   :  { %14825 = vmatprep.subr.bf16.mxu0 %v17396_v55 }
  0x4a   :  { %14810 = vmatmul.mubr.bf16.gmra.mrb[4].mxu0 %v18098_v58 }
  0x4b   :  { %14826 = vmatpush3.bf16.msra.mxu0 %v17396_v55  ;;  %14813 = vmatprep.mubr.bf16.mxu0 %v18102_v59  ;;  %v18231_v55 = vld [vmem:[#allocation2 + $0x81] sm:$0xff] }
  0x4c   :  { %14827 = vmatprep.subr.bf16.mxu0 %v17397_v60 }
  0x4f   :  { %14828 = vmatpush3.bf16.msra.mxu0 %v17397_v60  ;;  %v18235_v60 = vpack.c.bf16 %v18231_v55, %v18224_v47 }
  0x50   :  { %14829 = vmatprep.subr.bf16.mxu0 %v17398_v63 }
  0x52   :  { %14814 = vmatmul.mubr.bf16.gmra.mrb[8].mxu0 %v18122_v2 }
  0x53   :  { %14830 = vmatpush3.bf16.msra.mxu0 %v17398_v63  ;;  %14817 = vmatprep.mubr.bf16.mxu0 %v18126_v3  ;;  %v692_v63 = vpack.c.bf16 %v18060_v45, %v18052_v40  ;;  %v694_v40 = vpack.c.bf16 %v18083_v53, %v18070_v49  ;;  %v17411_v45 = vld [vmem:[%s22370_s2 + $0x108] sm:$0xff]   ;;  %v17413_v49 = vld [vmem:[%s22370_s2 + $0x118] sm:$0xff]   ;;  %v17414_v53 = vld [vmem:[%s22370_s2 + $0x120] sm:$0xff]  }
  0x54   :  { %14831 = vmatprep.subr.bf16.mxu0 %v17399_v5 }
  0x57   :  { %14832 = vmatpush3.bf16.msra.mxu0 %v17399_v5  ;;  %v17410_v5 = vld [vmem:[%s22370_s2 + $0x100] sm:$0xff]  }
  0x58   :  { %14833 = vmatprep.subr.bf16.mxu0 %v17400_v8 }
  0x5a   :  { %14818 = vmatmul.mubr.bf16.gmra.mrb[12].mxu0 %v18147_v11 }
  0x5b   :  { %14834 = vmatpush3.bf16.msra.mxu0 %v17400_v8  ;;  %14837 = vmatprep.mubr.bf16.mxu0 %v490_v12  ;;  %v693_v8 = vpack.c.bf16 %v18068_v48, %v18062_v46  ;;  %v695_v46 = vpack.c.bf16 %v18091_v56, %v18085_v54  ;;  %v696_v48 = vpack.c.bf16 %v18107_v61, %v18094_v57  ;;  %v17415_v57 = vld [vmem:[%s22370_s2 + $0x128] sm:$0xff]   ;;  %v17416_v12 = vld [vmem:[%s22370_s2 + $0x130] sm:$0xff]  }
  0x5c   :  { %14835 = vmatprep.subr.bf16.mxu0 %v17401_v13  ;;  %v697_v54 = vpack.c.bf16 %v18115_v0, %v18109_v62  ;;  %v698_v56 = vpack.c.bf16 %v18134_v6, %v18118_v1  ;;  %v18273_v61 = vld [vmem:[#allocation2 + $0x87] sm:$0xff]  ;;  %v18280_v0 = vld [vmem:[#allocation2 + $0x10] sm:$0xff]  ;;  %v18282_v1 = vld [vmem:[#allocation2 + $0x18] sm:$0xff] }
  0x5d   :  { %v699_v62 = vpack.c.bf16 %v18273_v61, %v18136_v7  ;;  %22556 = vst [vmem:[#allocation6_spill] sm:$0xff] %v18280_v0  ;;  %22557 = vst [vmem:[#allocation7_spill] sm:$0xff] %v18282_v1  ;;  %v878_v6 = vpack.c.bf16 %v18282_v1, %v18280_v0  ;;  %v17418_v7 = vld [vmem:[%s22370_s2 + $0x140] sm:$0xff]  }
  0x5f   :  { %14836 = vmatpush3.bf16.msra.mxu0 %v17401_v13  ;;  %v17417_v13 = vld [vmem:[%s22370_s2 + $0x138] sm:$0xff]  }
  0x60   :  { %14853 = vmatprep.subr.bf16.mxu0 %v17402_v16 }
  0x62   :  { %14838 = vmatmul.mubr.bf16.vlgmr.msra.gmra.mrb[0].mxu0 %v18167_v19 }
  0x63   :  { %14854 = vmatpush3.bf16.msra.mxu0 %v17402_v16  ;;  %14841 = vmatprep.mubr.bf16.mxu0 %v18171_v20  ;;  %v18292_v16 = vld [vmem:[#allocation2 + $0x20] sm:$0xff] }
  0x64   :  { %14855 = vmatprep.subr.bf16.mxu0 %v17403_v21  ;;  %22558 = vst [vmem:[#allocation8_spill] sm:$0xff] %v18292_v16 }
  0x67   :  { %14856 = vmatpush3.bf16.msra.mxu0 %v17403_v21  ;;  %v18294_v21 = vld [vmem:[#allocation2 + $0x28] sm:$0xff] }
  0x68   :  { %14857 = vmatprep.subr.bf16.mxu0 %v17404_v24  ;;  %22559 = vst [vmem:[#allocation9_spill] sm:$0xff] %v18294_v21 }
  0x6a   :  { %14842 = vmatmul.mubr.bf16.gmra.mrb[4].mxu0 %v18191_v27 }
  0x6b   :  { %14858 = vmatpush3.bf16.msra.mxu0 %v17404_v24  ;;  %14845 = vmatprep.mubr.bf16.mxu0 %v18195_v29  ;;  %v879_v24 = vpack.c.bf16 %v18294_v21, %v18292_v16 }
  0x6c   :  { %14859 = vmatprep.subr.bf16.mxu0 %v17405_v30 }
  0x6f   :  { %14860 = vmatpush3.bf16.msra.mxu0 %v17405_v30  ;;  %v17419_v30 = vld [vmem:[%s22370_s2 + $0x148] sm:$0xff]  }
  0x70   :  { %14861 = vmatprep.subr.bf16.mxu0 %v17406_v35 }
  0x72   :  { %14846 = vmatmul.mubr.bf16.gmra.mrb[8].mxu0 %v18215_v41 }
  0x73   :  { %14862 = vmatpush3.bf16.msra.mxu0 %v17406_v35  ;;  %14849 = vmatprep.mubr.bf16.mxu0 %v18219_v43  ;;  %v18301_v35 = vld [vmem:[#allocation2 + $0x30] sm:$0xff] }
  0x74   :  { %14863 = vmatprep.subr.bf16.mxu0 %v17407_v44  ;;  %22560 = vst [vmem:[#allocation10_spill] sm:$0xff] %v18301_v35 }
  0x77   :  { %14864 = vmatpush3.bf16.msra.mxu0 %v17407_v44  ;;  %v18303_v44 = vld [vmem:[#allocation2 + $0x38] sm:$0xff] }
  0x78   :  { %14865 = vmatprep.subr.bf16.mxu0 %v17408_v52  ;;  %22561 = vst [vmem:[#allocation11_spill] sm:$0xff] %v18303_v44 }
  0x7a   :  { %14850 = vmatmul.mubr.bf16.gmra.mrb[12].mxu0 %v18235_v60 }
  0x7b   :  { %14866 = vmatpush3.bf16.msra.mxu0 %v17408_v52  ;;  %14869 = vmatprep.mubr.bf16.mxu0 %v692_v63  ;;  %v880_v52 = vpack.c.bf16 %v18303_v44, %v18301_v35  ;;  %v17420_v63 = vld [vmem:[%s22370_s2 + $0x150] sm:$0xff]  }
  0x7c   :  { %14867 = vmatprep.subr.bf16.mxu0 %v17409_v4 }
  0x7f   :  { %14868 = vmatpush3.bf16.msra.mxu0 %v17409_v4  ;;  %v18310_v4 = vld [vmem:[#allocation2 + $0x40] sm:$0xff] }
  0x80   :  { %14885 = vmatprep.subr.bf16.mxu0 %v17410_v5  ;;  %22562 = vst [vmem:[#allocation12_spill] sm:$0xff] %v18310_v4 }
  0x82   :  { %14870 = vmatmul.mubr.bf16.vlgmr.msra.gmra.mrb[0].mxu0 %v693_v8 }
  0x83   :  { %14886 = vmatpush3.bf16.msra.mxu0 %v17410_v5  ;;  %14873 = vmatprep.mubr.bf16.mxu0 %v694_v40  ;;  %v18312_v5 = vld [vmem:[#allocation2 + $0x48] sm:$0xff]  ;;  %v17421_v40 = vld [vmem:[%s22370_s2 + $0x158] sm:$0xff]  }
  0x84   :  { %14887 = vmatprep.subr.bf16.mxu0 %v17411_v45  ;;  %22563 = vst [vmem:[#allocation13_spill] sm:$0xff] %v18312_v5  ;;  %v881_v8 = vpack.c.bf16 %v18312_v5, %v18310_v4 }
  0x87   :  { %14888 = vmatpush3.bf16.msra.mxu0 %v17411_v45  ;;  %v18319_v45 = vld [vmem:[#allocation2 + $0x50] sm:$0xff] }
  0x88   :  { %14889 = vmatprep.subr.bf16.mxu0 %v17412_v9  ;;  %22564 = vst [vmem:[#allocation14_spill] sm:$0xff] %v18319_v45 }
  0x8a   :  { %14874 = vmatmul.mubr.bf16.gmra.mrb[4].mxu0 %v695_v46 }
  0x8b   :  { %14890 = vmatpush3.bf16.msra.mxu0 %v17412_v9  ;;  %14877 = vmatprep.mubr.bf16.mxu0 %v696_v48  ;;  %v18321_v9 = vld [vmem:[#allocation2 + $0x58] sm:$0xff]  ;;  %v17422_v48 = vld [vmem:[%s22370_s2 + $0x160] sm:$0xff]  }
  0x8c   :  { %14891 = vmatprep.subr.bf16.mxu0 %v17413_v49  ;;  %22565 = vst [vmem:[#allocation15_spill] sm:$0xff] %v18321_v9  ;;  %v882_v46 = vpack.c.bf16 %v18321_v9, %v18319_v45 }
  0x8f   :  { %14892 = vmatpush3.bf16.msra.mxu0 %v17413_v49  ;;  %v18328_v49 = vld [vmem:[#allocation2 + $0x60] sm:$0xff] }
  0x90   :  { %14893 = vmatprep.subr.bf16.mxu0 %v17414_v53  ;;  %22566 = vst [vmem:[#allocation16_spill] sm:$0xff] %v18328_v49 }
  0x92   :  { %14878 = vmatmul.mubr.bf16.gmra.mrb[8].mxu0 %v697_v54 }
  0x93   :  { %14894 = vmatpush3.bf16.msra.mxu0 %v17414_v53  ;;  %14881 = vmatprep.mubr.bf16.mxu0 %v698_v56  ;;  %v18330_v53 = vld [vmem:[#allocation2 + $0x68] sm:$0xff] }
  0x94   :  { %14895 = vmatprep.subr.bf16.mxu0 %v17415_v57  ;;  %22567 = vst [vmem:[#allocation17_spill] sm:$0xff] %v18330_v53  ;;  %v883_v54 = vpack.c.bf16 %v18330_v53, %v18328_v49  ;;  %v17423_v56 = vld [vmem:[%s22370_s2 + $0x168] sm:$0xff]  }
  0x97   :  { %14896 = vmatpush3.bf16.msra.mxu0 %v17415_v57  ;;  %v18337_v57 = vld [vmem:[#allocation2 + $0x70] sm:$0xff] }
  0x98   :  { %14897 = vmatprep.subr.bf16.mxu0 %v17416_v12  ;;  %22568 = vst [vmem:[#allocation18_spill] sm:$0xff] %v18337_v57 }
  0x9a   :  { %14882 = vmatmul.mubr.bf16.gmra.mrb[12].mxu0 %v699_v62 }
  0x9b   :  { %14898 = vmatpush3.bf16.msra.mxu0 %v17416_v12  ;;  %14901 = vmatprep.mubr.bf16.mxu0 %v878_v6  ;;  %v18339_v12 = vld [vmem:[#allocation2 + $0x78] sm:$0xff] }
  0x9c   :  { %14899 = vmatprep.subr.bf16.mxu0 %v17417_v13  ;;  %22569 = vst [vmem:[#allocation19_spill] sm:$0xff] %v18339_v12  ;;  %v884_v62 = vpack.c.bf16 %v18339_v12, %v18337_v57  ;;  %v81_v6 = vld [vmem:[%s22368_s0 + $0x98] sm:$0xff] }
  0x9d   :  { %101 = vst [vmem:[#allocation2 + $0x98] sm:$0xff] %v81_v6  ;;  %v17428_v6 = vld [vmem:[%s22370_s2 + $0x190] sm:$0xff]  }
  0x9f   :  { %14900 = vmatpush3.bf16.msra.mxu0 %v17417_v13  ;;  %v17424_v13 = vld [vmem:[%s22370_s2 + $0x170] sm:$0xff]  }
  0xa0   :  { %14917 = vmatprep.subr.bf16.mxu0 %v17418_v7 }
  0xa2   :  { %14902 = vmatmul.mubr.bf16.vlgmr.msra.gmra.mrb[0].mxu0 %v879_v24  ;;  %v18351_v24 = vld [vmem:[#allocation2 + $0x88] sm:$0xff] }
  0xa3   :  { %14918 = vmatpush3.bf16.msra.mxu0 %v17418_v7  ;;  %14905 = vmatprep.mubr.bf16.mxu0 %v880_v52  ;;  %v18349_v7 = vld [vmem:[#allocation2 + $0x80] sm:$0xff]  ;;  %22571 = vst [vmem:[#allocation21_spill] sm:$0xff] %v18351_v24  ;;  %v17425_v52 = vld [vmem:[%s22370_s2 + $0x178] sm:$0xff]  }
  0xa4   :  { %14919 = vmatprep.subr.bf16.mxu0 %v17419_v30  ;;  %22570 = vst [vmem:[#allocation20_spill] sm:$0xff] %v18349_v7 }
  0xa7   :  { %14920 = vmatpush3.bf16.msra.mxu0 %v17419_v30  ;;  %v885_v30 = vpack.c.bf16 %v18351_v24, %v18349_v7 }
  0xa8   :  { %14921 = vmatprep.subr.bf16.mxu0 %v17420_v63 }
  0xaa   :  { %14906 = vmatmul.mubr.bf16.gmra.mrb[4].mxu0 %v881_v8  ;;  %v46_v8 = vld [vmem:[%s22369_s1] sm:$0xff] }
  0xab   :  { %14922 = vmatpush3.bf16.msra.mxu0 %v17420_v63  ;;  %14909 = vmatprep.mubr.bf16.mxu0 %v882_v46  ;;  %v1080_v63 = vpack.c.bf16 %v18153_v14, %v18143_v10  ;;  %v17426_v46 = vld [vmem:[%s22370_s2 + $0x180] sm:$0xff]   ;;  %v1081_v10 = vpack.c.bf16 %v18161_v17, %v18155_v15  ;;  %v17427_v14 = vld [vmem:[%s22370_s2 + $0x188] sm:$0xff]  }
  0xac   :  { %14923 = vmatprep.subr.bf16.mxu0 %v17421_v40  ;;  %v50_v15 = vld [vmem:[%s22369_s1 + $0x20] sm:$0xff]  ;;  %v51_v17 = vld [vmem:[%s22369_s1 + $0x28] sm:$0xff] }
  0xaf   :  { %14924 = vmatpush3.bf16.msra.mxu0 %v17421_v40  ;;  %v48_v40 = vld [vmem:[%s22369_s1 + $0x10] sm:$0xff] }
  0xb0   :  { %14925 = vmatprep.subr.bf16.mxu0 %v17422_v48 }
  0xb2   :  { %14910 = vmatmul.mubr.bf16.gmra.mrb[8].mxu0 %v883_v54  ;;  %v47_v54 = vld [vmem:[%s22369_s1 + $0x8] sm:$0xff] }
  0xb3   :  { %14926 = vmatpush3.bf16.msra.mxu0 %v17422_v48  ;;  %14913 = vmatprep.mubr.bf16.mxu0 %v884_v62  ;;  %v17863_v48 = vmov 0   ;;  %v49_v62 = vld [vmem:[%s22369_s1 + $0x18] sm:$0xff] }
  0xb4   :  { %14927 = vmatprep.subr.bf16.mxu0 %v17423_v56  ;;  %17376 = vset.pattern.permute.xlu0 %v17863_v48 }
  0xb5   :  { %1915 = vperm.xlu0 %17376, %v46_v8   ;;  %17377 = vset.pattern.permute.xlu1 %v17863_v48  ;;  %v55_v8 = vld [vmem:[%s22369_s1 + $0x48] sm:$0xff]  ;;  %v58_v48 = vld [vmem:[%s22369_s1 + $0x60] sm:$0xff] }
  0xb6   :  { %1925 = vperm.xlu1 %17377, %v48_v40   ;;  %v17431_v40 = vld [vmem:[%s22370_s2 + $0x1a8] sm:$0xff]  }
  0xb7   :  { %14928 = vmatpush3.bf16.msra.mxu0 %v17423_v56  ;;  %v1082_v56 = vpack.c.bf16 %v18176_v22, %v18163_v18  ;;  %v52_v18 = vld [vmem:[%s22369_s1 + $0x30] sm:$0xff]  ;;  %v53_v22 = vld [vmem:[%s22369_s1 + $0x38] sm:$0xff] }
  0xb8   :  { %14929 = vmatprep.subr.bf16.mxu0 %v17424_v13 }
  0xb9   :  { %1920 = vperm.xlu0 %17376, %v47_v54   ;;  %v17433_v54 = vld [vmem:[%s22370_s2 + $0x1b8] sm:$0xff]  }
  0xba   :  { %14914 = vmatmul.mubr.bf16.gmra.mrb[12].mxu0 %v885_v30  ;;  %1930 = vperm.xlu1 %17377, %v49_v62   ;;  %v17429_v30 = vld [vmem:[%s22370_s2 + $0x198] sm:$0xff]   ;;  %v17436_v62 = vld [vmem:[%s22370_s2 + $0x1d0] sm:$0xff]  }
  0xbb   :  { %14930 = vmatpush3.bf16.msra.mxu0 %v17424_v13  ;;  %14933 = vmatprep.mubr.bf16.mxu0 %v1080_v63  ;;  %v1083_v13 = vpack.c.bf16 %v18184_v25, %v18178_v23  ;;  %v54_v63 = vld [vmem:[%s22369_s1 + $0x40] sm:$0xff]  ;;  %v56_v25 = vld [vmem:[%s22369_s1 + $0x50] sm:$0xff] }
  0xbc   :  { %14931 = vmatprep.subr.bf16.mxu0 %v17425_v52  ;;  %v17430_v23 = vld [vmem:[%s22370_s2 + $0x1a0] sm:$0xff]  }
  0xbd   :  { %1935 = vperm.xlu0 %17376, %v50_v15   ;;  %v1281_v15 = vld [vmem:[#allocation2 + $0x8f] sm:$0xff] }
  0xbe   :  { %1940 = vperm.xlu1 %17377, %v51_v17   ;;  %v1468_v17 = vld [vmem:[#allocation2 + $0x18] sm:$0xff] }
  0xbf   :  { %14932 = vmatpush3.bf16.msra.mxu0 %v17425_v52  ;;  %v1084_v52 = vpack.c.bf16 %v18200_v33, %v18187_v26  ;;  %v57_v26 = vld [vmem:[%s22369_s1 + $0x58] sm:$0xff]  ;;  %v1085_v33 = vpack.c.bf16 %v18208_v38, %v18202_v34  ;;  %v59_v34 = vld [vmem:[%s22369_s1 + $0x68] sm:$0xff]  ;;  %v17432_v38 = vld [vmem:[%s22370_s2 + $0x1b0] sm:$0xff]  }
  0xc0   :  { %14949 = vmatprep.subr.bf16.mxu0 %v17426_v46 }
  0xc1   :  { %1945 = vperm.xlu0 %17376, %v52_v18   ;;  %v17441_v18 = vld [vmem:[%s22370_s2 + $0x1f8] sm:$0xff]  }
  0xc2   :  { %14934 = vmatmul.mubr.bf16.vlgmr.msra.gmra.mrb[0].mxu0 %v1081_v10  ;;  %1950 = vperm.xlu1 %17377, %v53_v22   ;;  %v18429_v10 = vld [vmem:[#allocation2 + $0x89] sm:$0xff] }
  0xc3   :  { %14950 = vmatpush3.bf16.msra.mxu0 %v17426_v46  ;;  %14937 = vmatprep.mubr.bf16.mxu0 %v1082_v56  ;;  %v1086_v46 = vpack.c.bf16 %v18224_v47, %v18211_v39  ;;  %v60_v39 = vld [vmem:[%s22369_s1 + $0x70] sm:$0xff]  ;;  %v61_v47 = vld [vmem:[%s22369_s1 + $0x78] sm:$0xff]  ;;  %v17434_v56 = vld [vmem:[%s22370_s2 + $0x1c0] sm:$0xff]  }
  0xc4   :  { %14951 = vmatprep.subr.bf16.mxu0 %v17427_v14 }
  0xc5   :  { %1955 = vperm.xlu0 %17376, %v54_v63  }
  0xc6   :  { %1960 = vperm.xlu1 %17377, %v55_v8  }
  0xc7   :  { %14952 = vmatpush3.bf16.msra.mxu0 %v17427_v14  ;;  %v1087_v14 = vpack.c.bf16 %v18429_v10, %v18231_v55  ;;  %v17435_v55 = vld [vmem:[%s22370_s2 + $0x1c8] sm:$0xff]  }
  0xc8   :  { %14953 = vmatprep.subr.bf16.mxu0 %v17428_v6 }
  0xc9   :  { %1965 = vperm.xlu0 %17376, %v56_v25  }
  0xca   :  { %14938 = vmatmul.mubr.bf16.gmra.mrb[4].mxu0 %v1083_v13  ;;  %1970 = vperm.xlu1 %17377, %v57_v26   ;;  %v17445_v13 = vld [vmem:[%s22370_s2 + $0x218] sm:$0xff]  }
  0xcb   :  { %14954 = vmatpush3.bf16.msra.mxu0 %v17428_v6  ;;  %14941 = vmatprep.mubr.bf16.mxu0 %v1084_v52  ;;  %v1469_v6 = vld [vmem:[#allocation2 + $0x20] sm:$0xff]  ;;  %v17449_v52 = vld [vmem:[%s22370_s2 + $0x238] sm:$0xff]  }
  0xcc   :  { %14955 = vmatprep.subr.bf16.mxu0 %v17429_v30  ;;  %v1484_v22 = vpack.c.bf16 %v1469_v6, %v1468_v17 }
  0xcd   :  { %1975 = vperm.xlu0 %17376, %v58_v48  }
  0xce   :  { %1980 = vperm.xlu1 %17377, %v59_v34  }
  0xcf   :  { %14956 = vmatpush3.bf16.msra.mxu0 %v17429_v30  ;;  %v17838_v30 = vld [vmem:[#allocation2 + $0x90] sm:$0xff] }
  0xd0   :  { %14957 = vmatprep.subr.bf16.mxu0 %v17430_v23 }
  0xd1   :  { %1985 = vperm.xlu0 %17376, %v60_v39  }
  0xd2   :  { %14942 = vmatmul.mubr.bf16.gmra.mrb[8].mxu0 %v1085_v33  ;;  %1990 = vperm.xlu1 %17377, %v61_v47  }
  0xd3   :  { %14958 = vmatpush3.bf16.msra.mxu0 %v17430_v23  ;;  %14945 = vmatprep.mubr.bf16.mxu0 %v1086_v46 }
  0xd4   :  { %14959 = vmatprep.subr.bf16.mxu0 %v17431_v40 }
  0xd7   :  { %14960 = vmatpush3.bf16.msra.mxu0 %v17431_v40 }
  0xd8   :  { %14961 = vmatprep.subr.bf16.mxu0 %v17432_v38 }
  0xda   :  { %14946 = vmatmul.mubr.bf16.gmra.mrb[12].mxu0 %v1087_v14 }
  0xdb   :  { %14962 = vmatpush3.bf16.msra.mxu0 %v17432_v38  ;;  %14965 = vmatprep.mubr.bf16.mxu0 %v18074_v50  ;;  %v17437_v50 = vld [vmem:[%s22370_s2 + $0x1d8] sm:$0xff]  }
  0xdc   :  { %14963 = vmatprep.subr.bf16.mxu0 %v17433_v54 }
  0xdf   :  { %14964 = vmatpush3.bf16.msra.mxu0 %v17433_v54 }
  0xe0   :  { %14981 = vmatprep.subr.bf16.mxu0 %v17434_v56 }
  0xe2   :  { %14966 = vmatmul.mubr.bf16.vlgmr.msra.gmra.mrb[0].mxu0 %v18078_v51  ;;  %v17438_v51 = vld [vmem:[%s22370_s2 + $0x1e0] sm:$0xff]  }
  0xe3   :  { %14982 = vmatpush3.bf16.msra.mxu0 %v17434_v56  ;;  %14969 = vmatprep.mubr.bf16.mxu0 %v18098_v58  ;;  %v17439_v58 = vld [vmem:[%s22370_s2 + $0x1e8] sm:$0xff]  }
  0xe4   :  { %14983 = vmatprep.subr.bf16.mxu0 %v17435_v55 }
  0xe7   :  { %14984 = vmatpush3.bf16.msra.mxu0 %v17435_v55 }
  0xe8   :  { %14985 = vmatprep.subr.bf16.mxu0 %v17436_v62 }
  0xea   :  { %14970 = vmatmul.mubr.bf16.gmra.mrb[4].mxu0 %v18102_v59  ;;  %v17440_v59 = vld [vmem:[%s22370_s2 + $0x1f0] sm:$0xff]  }
  0xeb   :  { %14986 = vmatpush3.bf16.msra.mxu0 %v17436_v62  ;;  %14973 = vmatprep.mubr.bf16.mxu0 %v18122_v2  ;;  %v1289_v2 = vpack.c.bf16 %v1281_v15, %v18273_v61  ;;  %v17444_v61 = vld [vmem:[%s22370_s2 + $0x210] sm:$0xff]  }
  0xec   :  { %14987 = vmatprep.subr.bf16.mxu0 %v17437_v50 }
  0xef   :  { %14988 = vmatpush3.bf16.msra.mxu0 %v17437_v50 }
  0xf0   :  { %14989 = vmatprep.subr.bf16.mxu0 %v17438_v51 }
  0xf2   :  { %14974 = vmatmul.mubr.bf16.gmra.mrb[8].mxu0 %v18126_v3  ;;  %v17442_v3 = vld [vmem:[%s22370_s2 + $0x200] sm:$0xff]  }
  0xf3   :  { %14990 = vmatpush3.bf16.msra.mxu0 %v17438_v51  ;;  %14977 = vmatprep.mubr.bf16.mxu0 %v18147_v11  ;;  %v17443_v11 = vld [vmem:[%s22370_s2 + $0x208] sm:$0xff]  }
  0xf4   :  { %14991 = vmatprep.subr.bf16.mxu0 %v17439_v58 }
  0xf7   :  { %14992 = vmatpush3.bf16.msra.mxu0 %v17439_v58 }
  0xf8   :  { %14993 = vmatprep.subr.bf16.mxu0 %v17440_v59 }
  0xfa   :  { %14978 = vmatmul.mubr.bf16.gmra.mrb[12].mxu0 %v1289_v2 }
  0xfb   :  { %14994 = vmatpush3.bf16.msra.mxu0 %v17440_v59  ;;  %14997 = vmatprep.mubr.bf16.mxu0 %v1484_v22 }
  0xfc   :  { %14995 = vmatprep.subr.bf16.mxu0 %v17441_v18 }
  0xff   :  { %14996 = vmatpush3.bf16.msra.mxu0 %v17441_v18 }
 0x100   :  { %15013 = vmatprep.subr.bf16.mxu0 %v17442_v3 }
 0x102   :  { %14998 = vmatmul.mubr.bf16.vlgmr.msra.gmra.mrb[0].mxu0 %v18016_v28  ;;  %v17446_v28 = vld [vmem:[%s22370_s2 + $0x220] sm:$0xff]  }
 0x103   :  { %15014 = vmatpush3.bf16.msra.mxu0 %v17442_v3  ;;  %15001 = vmatprep.mubr.bf16.mxu0 %v18025_v31  ;;  %v17447_v31 = vld [vmem:[%s22370_s2 + $0x228] sm:$0xff]  }
 0x104   :  { %15015 = vmatprep.subr.bf16.mxu0 %v17443_v11 }
 0x107   :  { %15016 = vmatpush3.bf16.msra.mxu0 %v17443_v11 }
 0x108   :  { %15017 = vmatprep.subr.bf16.mxu0 %v17444_v61 }
 0x10a   :  { %15002 = vmatmul.mubr.bf16.gmra.mrb[4].mxu0 %v18027_v32  ;;  %v17448_v32 = vld [vmem:[%s22370_s2 + $0x230] sm:$0xff]  }
 0x10b   :  { %15018 = vmatpush3.bf16.msra.mxu0 %v17444_v61  ;;  %15005 = vmatprep.mubr.bf16.mxu0 %v18040_v36  ;;  %v1491_v36 = vpack.c.bf16 %v17838_v30, %v18351_v24 }
 0x10c   :  { %15019 = vmatprep.subr.bf16.mxu0 %v17445_v13 }
 0x10f   :  { %15020 = vmatpush3.bf16.msra.mxu0 %v17445_v13 }
 0x110   :  { %15021 = vmatprep.subr.bf16.mxu0 %v17446_v28 }
 0x112   :  { %15006 = vmatmul.mubr.bf16.gmra.mrb[8].mxu0 %v18042_v37  ;;  %v1685_v37 = vld [vmem:[#allocation2 + $0x91] sm:$0xff] }
 0x113   :  { %15022 = vmatpush3.bf16.msra.mxu0 %v17446_v28  ;;  %15009 = vmatprep.mubr.bf16.mxu0 %v18054_v42  ;;  %v1693_v42 = vpack.c.bf16 %v1685_v37, %v18429_v10 }
 0x114   :  { %15023 = vmatprep.subr.bf16.mxu0 %v17447_v31 }
 0x117   :  { %15024 = vmatpush3.bf16.msra.mxu0 %v17447_v31 }
 0x118   :  { %15025 = vmatprep.subr.bf16.mxu0 %v17448_v32 }
 0x11a   :  { %15010 = vmatmul.mubr.bf16.gmra.mrb[12].mxu0 %v1491_v36 }
 0x11b   :  { %15026 = vmatpush3.bf16.msra.mxu0 %v17448_v32  ;;  %15029 = vmatprep.mubr.bf16.mxu0 %v18167_v19 }
 0x11c   :  { %15027 = vmatprep.subr.bf16.mxu0 %v17449_v52 }
 0x11f   :  { %15028 = vmatpush3.bf16.msra.mxu0 %v17449_v52 }
 0x122   :  { %15030 = vmatmul.mubr.bf16.vlgmr.msra.gmra.mrb[0].mxu0 %v18171_v20 }
 0x123   :  { %15033 = vmatprep.mubr.bf16.mxu0 %v18191_v27 }
 0x12a   :  { %15034 = vmatmul.mubr.bf16.gmra.mrb[4].mxu0 %v18195_v29 }
 0x12b   :  { %15037 = vmatprep.mubr.bf16.mxu0 %v18215_v41 }
 0x132   :  { %15038 = vmatmul.mubr.bf16.gmra.mrb[8].mxu0 %v18219_v43 }
 0x133   :  { %15041 = vmatprep.mubr.bf16.mxu0 %v18235_v60 }
 0x13a   :  { %15042 = vmatmul.mubr.bf16.gmra.mrb[12].mxu0 %v1693_v42 }
 0x13b   :  { %18 = vsyncpa [#allocation4], 0  ;;  %v17450_v19 = vld [vmem:[%s22374_s6 + $0x40] sm:$0xff]   ;;  %v17451_v20 = vld [vmem:[%s22374_s6 + $0x48] sm:$0xff]   ;;  %v18528_v29 = vpop.permute.xlu0 %1915  ;;  %v18530_v41 = vpop.permute.xlu1 %1925  ;;  %vm17865_vm0 = vmmov 0  }
 0x13c   :  { %15045 = vmatprep.subr.bf16.mxu1 %v17450_v19  ;;  %v17452_v27 = vld [vmem:[%s22374_s6 + $0x50] sm:$0xff]   ;;  %22572 = vst [vmem:[#allocation22_spill] sm:$0xff] %v18528_v29  ;;  %22573 = vst [vmem:[#allocation23_spill] sm:$0xff] %v18530_v41  ;;  %v17453_v43 = vld [vmem:[%s22374_s6 + $0x58] sm:$0xff]  }
 0x13d   :  { %15046 = vmatpush3.bf16.msra.mxu1 %v17450_v19  ;;  %v17454_v63 = vld [vmem:[%s22374_s6 + $0x60] sm:$0xff]   ;;  %v17455_v33 = vld [vmem:[%s22374_s6 + $0x68] sm:$0xff]   ;;  %v17456_v54 = vld [vmem:[%s22374_s6 + $0x70] sm:$0xff]  }
 0x13e   :  { %15047 = vmatprep.subr.bf16.mxu1 %v17451_v20  ;;  %v18545_v23 = vld [vmem:[%s22371_s3] ss:$0 sm:$0xff]  ;;  %v17457_v17 = vld [vmem:[%s22374_s6 + $0x78] sm:$0xff]  }
 0x13f   :  { %v18535_v60 = vpop.permute.xlu0 %1920  ;;  %v18540_v8 = vpop.permute.xlu1 %1930  ;;  %v18608_v36 = vld [vmem:[%s22374_s6] sm:$0xff]   ;;  %v17481_v16 = vld [vmem:[%s22374_s6 + $0xf8] sm:$0xff]  }
 0x140   :  { %22574 = vst [vmem:[#allocation24_spill] sm:$0xff] %v18535_v60  ;;  %22575 = vst [vmem:[#allocation25_spill] sm:$0xff] %v18540_v8 }
 0x141   :  { %15048 = vmatpush3.bf16.msra.mxu1 %v17451_v20 }
 0x142   :  { %15049 = vmatprep.subr.bf16.mxu1 %v17452_v27 }
 0x143   :  { %v18556_v10 = vpop.permute.xlu0 %1935  ;;  %v18565_v14 = vpop.permute.xlu1 %1940 }
 0x144   :  { %22576 = vst [vmem:[#allocation26_spill] sm:$0xff] %v18556_v10  ;;  %22577 = vst [vmem:[#allocation27_spill] sm:$0xff] %v18565_v14 }
 0x145   :  { %15050 = vmatpush3.bf16.msra.mxu1 %v17452_v27 }
 0x146   :  { %15051 = vmatprep.subr.bf16.mxu1 %v17453_v43 }
 0x147   :  { %v18579_v15 = vpop.permute.xlu0 %1945  ;;  %v18593_v11 = vpop.permute.xlu1 %1950 }
 0x148   :  { %22578 = vst [vmem:[#allocation28_spill] sm:$0xff] %v18579_v15  ;;  %22579 = vst [vmem:[#allocation29_spill] sm:$0xff] %v18593_v11 }
 0x149   :  { %15052 = vmatpush3.bf16.msra.mxu1 %v17453_v43 }
 0x14a   :  { %15053 = vmatprep.subr.bf16.mxu1 %v17454_v63 }
 0x14b   :  { %v18615_v20 = vpop.permute.xlu0 %1955 }
 0x14c   :  { %22580 = vst [vmem:[#allocation30_spill] sm:$0xff] %v18615_v20 }
 0x14d   :  { %15054 = vmatpush3.bf16.msra.mxu1 %v17454_v63 }
 0x14e   :  { %15055 = vmatprep.subr.bf16.mxu1 %v17455_v33 }
 0x151   :  { %15056 = vmatpush3.bf16.msra.mxu1 %v17455_v33 }
 0x152   :  { %15057 = vmatprep.subr.bf16.mxu1 %v17456_v54 }
 0x155   :  { %15058 = vmatpush3.bf16.msra.mxu1 %v17456_v54 }
 0x156   :  { %15059 = vmatprep.subr.bf16.mxu1 %v17457_v17 }
 0x159   :  { %15060 = vmatpush3.bf16.msra.mxu1 %v17457_v17 }
 0x15a   :  { %15077 = vmatprep.subr.bf16.mxu1 %v18608_v36 }
 0x1f5   :  { %v15031_v25 = vpop.f32.mrb[0].mxu0 }
 0x1f6   :  { %v1793_v26 = vpop.f32.mrb[1].mxu0  ;;  %v18551_v40 = vadd.f32 %v15031_v25, %v18545_v23 }
 0x1f7   :  { %v18554_v46 = vadd.f32 %v18545_v23, %v1793_v26  ;;  %v15032_v48 = vpop.f32.mrb[2].mxu0  ;;  %v18622_v26 = vpop.permute.xlu1 %1960 }
 0x1f8   :  { %v18559_v34 = vadd.f32 %v15032_v48, %v18545_v23  ;;  %v1796_v38 = vpop.f32.mrb[3].mxu0  ;;  %v22387_v56 = vmax.f32 %v18551_v40, 0.0  ;;  %22581 = vst [vmem:[#allocation31_spill] sm:$0xff] %v18622_v26 }
 0x1f9   :  { %v22389_v39 = vmax.f32 %v18554_v46, 0.0  ;;  %v18563_v47 = vadd.f32 %v18545_v23, %v1796_v38 }
 0x1fa   :  { %v22386_v62 = vmax.f32 %v18559_v34, 0.0  ;;  %v1995_v6 = vmul.f32 %v18530_v41, %v22387_v56 }
 0x1fb   :  { %v22388_v55 = vmax.f32 %v18563_v47, 0.0  ;;  %v1993_v50 = vmul.f32 %v18528_v29, %v22389_v39  ;;  %v22589_v24 = vmax.f32 %v18563_v47, 0.0 }
 0x1fc   :  { %v1996_v61 = vmul.f32 %v18540_v8, %v22386_v62 }
 0x1fd   :  { %v1994_v51 = vmul.f32 %v18535_v60, %v22388_v55  ;;  %v15035_v58 = vpop.f32.mrb[4].mxu0 }
 0x1fe   :  { %v1809_v59 = vpop.f32.mrb[5].mxu0  ;;  %v18588_v18 = vadd.f32 %v15035_v58, %v18545_v23 }
 0x1ff   :  { %v2009_v2 = vadd.f32 %v1994_v51, %v1993_v50  ;;  %v18591_v22 = vadd.f32 %v18545_v23, %v1809_v59  ;;  %v15036_v3 = vpop.f32.mrb[6].mxu0 }
 0x200   :  { %v1812_v13 = vpop.f32.mrb[7].mxu0  ;;  %v18600_v32 = vadd.f32 %v15036_v3, %v18545_v23  ;;  %v22383_v52 = vmax.f32 %v18588_v18, 0.0  ;;  %v22594_v47 = vmax.f32 %v18588_v18, 0.0 }
 0x201   :  { %v2010_v28 = vadd.f32 %v2009_v2, %v1995_v6  ;;  %v22385_v31 = vmax.f32 %v18591_v22, 0.0  ;;  %v18603_v30 = vadd.f32 %v18545_v23, %v1812_v13 }
 0x202   :  { %v22382_v43 = vmax.f32 %v18600_v32, 0.0  ;;  %v1999_v48 = vmul.f32 %v18579_v15, %v22383_v52 }
 0x203   :  { %v1997_v37 = vmul.f32 %v18556_v10, %v22385_v31  ;;  %v2011_v42 = vadd.f32 %v2010_v28, %v1996_v61  ;;  %v22384_v19 = vmax.f32 %v18603_v30, 0.0  ;;  %v18638_v61 = vpop.permute.xlu0 %1965 }
 0x204   :  { %v2000_v17 = vmul.f32 %v18593_v11, %v22382_v43  ;;  %22582 = vst [vmem:[#allocation32_spill] sm:$0xff] %v18638_v61 }
 0x205   :  { %v2012_v27 = vadd.f32 %v2011_v42, %v1997_v37  ;;  %v1998_v63 = vmul.f32 %v18565_v14, %v22384_v19  ;;  %v15039_v25 = vpop.f32.mrb[8].mxu0 }
 0x206   :  { %v1825_v33 = vpop.f32.mrb[9].mxu0  ;;  %v18628_v54 = vadd.f32 %v15039_v25, %v18545_v23 }
 0x207   :  { %v2013_v38 = vadd.f32 %v2012_v27, %v1998_v63  ;;  %v1887_v50 = vadd.f32 %v18545_v23, %v1825_v33  ;;  %v15040_v51 = vpop.f32.mrb[10].mxu0  ;;  %v18642_v27 = vpop.permute.xlu1 %1970 }
 0x208   :  { %v18632_v58 = vadd.f32 %v15040_v51, %v18545_v23  ;;  %v1828_v59 = vpop.f32.mrb[11].mxu0  ;;  %v1905_v13 = vmax.f32 %v18628_v54, 0.0  ;;  %22583 = vst [vmem:[#allocation33_spill] sm:$0xff] %v18642_v27  ;;  %v18649_v52 = vpop.permute.xlu0 %1975 }
 0x209   :  { %v2014_v6 = vadd.f32 %v2013_v38, %v1999_v48  ;;  %v1903_v2 = vmax.f32 %v1887_v50, 0.0  ;;  %v1888_v3 = vadd.f32 %v18545_v23, %v1828_v59  ;;  %22584 = vst [vmem:[#allocation34_spill] sm:$0xff] %v18649_v52 }
 0x20a   :  { %v1906_v63 = vmax.f32 %v18632_v58, 0.0  ;;  %v2003_v38 = vmul.f32 %v18638_v61, %v1905_v13 }
 0x20b   :  { %v2001_v28 = vmul.f32 %v18615_v20, %v1903_v2  ;;  %v2015_v37 = vadd.f32 %v2014_v6, %v2000_v17  ;;  %v1904_v42 = vmax.f32 %v1888_v3, 0.0  ;;  %v18654_v19 = vpop.permute.xlu1 %1980 }
 0x20c   :  { %v2004_v17 = vmul.f32 %v18642_v27, %v1906_v63  ;;  %22585 = vst [vmem:[#allocation35_spill] sm:$0xff] %v18654_v19  ;;  %v18658_v55 = vpop.permute.xlu0 %1985 }
 0x20d   :  { %v2016_v25 = vadd.f32 %v2015_v37, %v2001_v28  ;;  %v2002_v33 = vmul.f32 %v18622_v26, %v1904_v42  ;;  %v15043_v51 = vpop.f32.mrb[12].mxu0  ;;  %22586 = vst [vmem:[#allocation36_spill] sm:$0xff] %v18658_v55 }
 0x20e   :  { %v1841_v48 = vpop.f32.mrb[13].mxu0  ;;  %v1893_v59 = vadd.f32 %v15043_v51, %v18545_v23 }
 0x20f   :  { %v2017_v50 = vadd.f32 %v2016_v25, %v2002_v33  ;;  %v1891_v54 = vadd.f32 %v18545_v23, %v1841_v48  ;;  %v15044_v43 = vpop.f32.mrb[14].mxu0 }
 0x210   :  { %v1844_v6 = vpop.f32.mrb[15].mxu0  ;;  %v1894_v28 = vadd.f32 %v15044_v43, %v18545_v23  ;;  %v1909_v31 = vmax.f32 %v1893_v59, 0.0 }
 0x211   :  { %v2018_v3 = vadd.f32 %v2017_v50, %v2003_v38  ;;  %v1907_v58 = vmax.f32 %v1891_v54, 0.0  ;;  %v1892_v37 = vadd.f32 %v18545_v23, %v1844_v6  ;;  %v18661_v54 = vpop.permute.xlu1 %1990 }
 0x212   :  { %v1910_v62 = vmax.f32 %v1894_v28, 0.0  ;;  %v2007_v38 = vmul.f32 %v18658_v55, %v1909_v31  ;;  %22587 = vst [vmem:[#allocation37_spill] sm:$0xff] %v18661_v54 }
 0x213   :  { %v2005_v25 = vmul.f32 %v18649_v52, %v1907_v58  ;;  %v2019_v33 = vadd.f32 %v2018_v3, %v2004_v17  ;;  %v1908_v51 = vmax.f32 %v1892_v37, 0.0 }
 0x214   :  { %v2008_v23 = vmul.f32 %v18661_v54, %v1910_v62 }
 0x215   :  { %v2020_v48 = vadd.f32 %v2019_v33, %v2005_v25  ;;  %v2006_v56 = vmul.f32 %v18654_v19, %v1908_v51  ;;  %v22588_v25 = vmax.f32 %v18554_v46, 0.0  ;;  %v22593_v46 = vmax.f32 %v18603_v30, 0.0 }
 0x217   :  { %v2021_v50 = vadd.f32 %v2020_v48, %v2006_v56  ;;  %v22590_v48 = vmax.f32 %v18551_v40, 0.0  ;;  %v22595_v40 = vmax.f32 %v18600_v32, 0.0 }
 0x219   :  { %v2022_v43 = vadd.f32 %v2021_v50, %v2007_v38  ;;  %v22591_v38 = vmax.f32 %v18559_v34, 0.0 }
 0x21b   :  { %v2023_v6 = vadd.f32 %v2022_v43, %v2008_v23 }
 0x21d   :  { %v2024_v59 = vrot.slane %v2023_v6, 4 }
 0x21f   :  { %v2025_v39 = vadd.f32 %v2024_v59, %v2023_v6 }
 0x221   :  { %v2026_v12 = vrot.slane %v2025_v39, 2 }
 0x223   :  { %v2027_v17 = vadd.f32 %v2026_v12, %v2025_v39  ;;  %v22592_v12 = vmax.f32 %v18591_v22, 0.0 }
 0x225   :  { %v2028_v3 = vrot.slane %v2027_v17, 1 }
 0x227   :  { %v2029_v37 = vadd.f32 %v2028_v3, %v2027_v17 }
 0x229   :  { %v2030_v28 = vmul.f32 0.013888889, %v2029_v37 }
 0x22b   :  { %v18666_v33 = vsub.f32 %v22588_v25, %v2030_v28  ;;  %v18670_v56 = vsub.f32 %v22589_v24, %v2030_v28  ;;  %v18674_v57 = vsub.f32 %v22590_v48, %v2030_v28  ;;  %v18678_v50 = vsub.f32 %v22591_v38, %v2030_v28 }
 0x22c   :  { %v18682_v39 = vsub.f32 %v22592_v12, %v2030_v28  ;;  %v18686_v23 = vsub.f32 %v22593_v46, %v2030_v28  ;;  %v18690_v24 = vsub.f32 %v22594_v47, %v2030_v28  ;;  %v18694_v43 = vsub.f32 %v22595_v40, %v2030_v28 }
 0x22d   :  { %v18696_v6 = vsub.f32 %v1903_v2, %v2030_v28  ;;  %v18698_v34 = vsub.f32 %v1904_v42, %v2030_v28  ;;  %v18700_v59 = vsub.f32 %v1905_v13, %v2030_v28  ;;  %v18702_v22 = vsub.f32 %v1906_v63, %v2030_v28 }
 0x22e   :  { %v18704_v17 = vsub.f32 %v1907_v58, %v2030_v28  ;;  %v18706_v30 = vsub.f32 %v1908_v51, %v2030_v28  ;;  %v18708_v3 = vsub.f32 %v1909_v31, %v2030_v28  ;;  %v18710_v18 = vsub.f32 %v1910_v62, %v2030_v28 }
 0x22f   :  { %v2047_v32 = vmul.f32 %v18666_v33, %v18528_v29  ;;  %v2048_v2 = vmul.f32 %v18670_v56, %v18535_v60  ;;  %v2049_v13 = vmul.f32 %v18674_v57, %v18530_v41  ;;  %v2050_v58 = vmul.f32 %v18678_v50, %v18540_v8 }
 0x230   :  { %v2051_v31 = vmul.f32 %v18682_v39, %v18556_v10  ;;  %v2052_v37 = vmul.f32 %v18686_v23, %v18565_v14  ;;  %v2053_v48 = vmul.f32 %v18690_v24, %v18579_v15  ;;  %v2054_v46 = vmul.f32 %v18694_v43, %v18593_v11 }
 0x231   :  { %v2063_v42 = vmul.f32 %v2047_v32, %v2047_v32  ;;  %v2064_v63 = vmul.f32 %v2048_v2, %v2048_v2  ;;  %v2065_v51 = vmul.f32 %v2049_v13, %v2049_v13  ;;  %v2066_v28 = vmul.f32 %v2050_v58, %v2050_v58 }
 0x232   :  { %v2067_v38 = vmul.f32 %v2051_v31, %v2051_v31  ;;  %v2068_v47 = vmul.f32 %v2052_v37, %v2052_v37  ;;  %v2055_v32 = vmul.f32 %v18696_v6, %v18615_v20  ;;  %v2069_v2 = vmul.f32 %v2053_v48, %v2053_v48 }
 0x233   :  { %v2079_v62 = vadd.f32 %v2064_v63, %v2063_v42  ;;  %v2056_v42 = vmul.f32 %v18698_v34, %v18622_v26  ;;  %v2070_v63 = vmul.f32 %v2054_v46, %v2054_v46 }
 0x234   :  { %v2071_v31 = vmul.f32 %v2055_v32, %v2055_v32 }
 0x235   :  { %v2080_v25 = vadd.f32 %v2079_v62, %v2065_v51  ;;  %v2057_v51 = vmul.f32 %v18700_v59, %v18638_v61  ;;  %v2072_v37 = vmul.f32 %v2056_v42, %v2056_v42 }
 0x237   :  { %v2081_v12 = vadd.f32 %v2080_v25, %v2066_v28  ;;  %v2058_v28 = vmul.f32 %v18702_v22, %v18642_v27  ;;  %v2073_v48 = vmul.f32 %v2057_v51, %v2057_v51 }
 0x239   :  { %v2082_v40 = vadd.f32 %v2081_v12, %v2067_v38  ;;  %v2059_v38 = vmul.f32 %v18704_v17, %v18649_v52  ;;  %v2074_v46 = vmul.f32 %v2058_v28, %v2058_v28 }
 0x23b   :  { %v2083_v13 = vadd.f32 %v2082_v40, %v2068_v47  ;;  %v2060_v47 = vmul.f32 %v18706_v30, %v18654_v19  ;;  %v2075_v32 = vmul.f32 %v2059_v38, %v2059_v38 }
 0x23d   :  { %v2084_v58 = vadd.f32 %v2083_v13, %v2069_v2  ;;  %v2061_v2 = vmul.f32 %v18708_v3, %v18658_v55  ;;  %v2076_v42 = vmul.f32 %v2060_v47, %v2060_v47 }
 0x23f   :  { %v2085_v62 = vadd.f32 %v2084_v58, %v2070_v63  ;;  %v2062_v63 = vmul.f32 %v18710_v18, %v18661_v54 }
 0x241   :  { %v2086_v25 = vadd.f32 %v2085_v62, %v2071_v31  ;;  %v2077_v31 = vmul.f32 %v2061_v2, %v2061_v2  ;;  %v2078_v7 = vmul.f32 %v2062_v63, %v2062_v63 }
 0x243   :  { %v2087_v12 = vadd.f32 %v2086_v25, %v2072_v37 }
 0x245   :  { %v2088_v40 = vadd.f32 %v2087_v12, %v2073_v48 }
 0x247   :  { %v2089_v13 = vadd.f32 %v2088_v40, %v2074_v46 }
 0x249   :  { %v2090_v58 = vadd.f32 %v2089_v13, %v2075_v32 }
 0x24b   :  { %v2091_v62 = vadd.f32 %v2090_v58, %v2076_v42 }
 0x24d   :  { %v2092_v51 = vadd.f32 %v2091_v62, %v2077_v31 }
 0x24f   :  { %v2093_v37 = vadd.f32 %v2092_v51, %v2078_v7  ;;  %v12765_v7 = vld [vmem:[%s22372_s4] ss:$0 sm:$0xff] }
 0x251   :  { %v2094_v25 = vrot.slane %v2093_v37, 4 }
 0x253   :  { %v2095_v9 = vadd.f32 %v2094_v25, %v2093_v37 }
 0x255   :  { %v2096_v53 = vrot.slane %v2095_v9, 2 }
 0x257   :  { %v2097_v28 = vadd.f32 %v2096_v53, %v2095_v9 }
 0x259   :  { %v2098_v48 = vrot.slane %v2097_v28, 1 }
 0x25b   :  { %v2099_v12 = vadd.f32 %v2098_v48, %v2097_v28 }
 0x25d   :  { %v2100_v45 = vmul.f32 0.013888889, %v2099_v12 }
 0x25f   :  { %v2101_v49 = vadd.f32 1e-05, %v2100_v45 }
 0x261   :  { %17810 = vrsqrt.f32 %v2101_v49 }
 0x26b   :  { %v17811_v38 = vpop.eup %17810 }
 0x26c   :  { %v2103_v46 = vmul.f32 %v17811_v38, %v18666_v33  ;;  %v2104_v47 = vmul.f32 %v17811_v38, %v18670_v56  ;;  %v2105_v40 = vmul.f32 %v17811_v38, %v18674_v57  ;;  %v2106_v2 = vmul.f32 %v17811_v38, %v18678_v50 }
 0x26d   :  { %v2107_v9 = vmul.f32 %v17811_v38, %v18682_v39  ;;  %v2108_v53 = vmul.f32 %v17811_v38, %v18686_v23  ;;  %v2109_v45 = vmul.f32 %v17811_v38, %v18690_v24  ;;  %v2110_v49 = vmul.f32 %v17811_v38, %v18694_v43 }
 0x26e   :  { %v2111_v33 = vmul.f32 %v17811_v38, %v18696_v6  ;;  %v2112_v56 = vmul.f32 %v17811_v38, %v18698_v34  ;;  %v2113_v57 = vmul.f32 %v17811_v38, %v18700_v59  ;;  %v2114_v50 = vmul.f32 %v17811_v38, %v18702_v22  ;;  %v12766_v6 = vld [vmem:[%s22373_s5] ss:$0 sm:$0xff] }
 0x26f   :  { %v2115_v32 = vmul.f32 %v17811_v38, %v18704_v17  ;;  %v2116_v13 = vmul.f32 %v17811_v38, %v18706_v30  ;;  %v2117_v39 = vmul.f32 %v17811_v38, %v18708_v3  ;;  %v2118_v23 = vmul.f32 %v17811_v38, %v18710_v18 }
 0x270   :  { %v2125_v63 = vmul.f32 %v12765_v7, %v2103_v46  ;;  %v2126_v24 = vmul.f32 %v12765_v7, %v2104_v47  ;;  %v2127_v42 = vmul.f32 %v12765_v7, %v2105_v40  ;;  %v2128_v43 = vmul.f32 %v12765_v7, %v2106_v2 }
 0x271   :  { %v2129_v34 = vmul.f32 %v12765_v7, %v2107_v9  ;;  %v2130_v59 = vmul.f32 %v12765_v7, %v2108_v53  ;;  %v2131_v58 = vmul.f32 %v12765_v7, %v2109_v45  ;;  %v2132_v22 = vmul.f32 %v12765_v7, %v2110_v49 }
 0x272   :  { %v2133_v31 = vmul.f32 %v12765_v7, %v2111_v33  ;;  %v2134_v17 = vmul.f32 %v12765_v7, %v2112_v56  ;;  %v2135_v62 = vmul.f32 %v12765_v7, %v2113_v57  ;;  %v2136_v30 = vmul.f32 %v12765_v7, %v2114_v50 }
 0x273   :  { %v2137_v51 = vmul.f32 %v12765_v7, %v2115_v32  ;;  %v2138_v3 = vmul.f32 %v12765_v7, %v2116_v13  ;;  %v2139_v37 = vmul.f32 %v12765_v7, %v2117_v39  ;;  %v2140_v18 = vmul.f32 %v12765_v7, %v2118_v23 }
 0x274   :  { %v2147_v25 = vadd.f32 %v12766_v6, %v2125_v63  ;;  %v2148_v28 = vadd.f32 %v12766_v6, %v2126_v24  ;;  %v2149_v48 = vadd.f32 %v12766_v6, %v2127_v42  ;;  %v2150_v12 = vadd.f32 %v12766_v6, %v2128_v43  ;;  %v2235_v42 = vld [vmem:[#allocation2 + $0x8] sm:$0xff] }
 0x275   :  { %v2151_v38 = vadd.f32 %v12766_v6, %v2129_v34  ;;  %v2152_v46 = vadd.f32 %v12766_v6, %v2130_v59  ;;  %v2153_v47 = vadd.f32 %v12766_v6, %v2131_v58  ;;  %v2154_v40 = vadd.f32 %v12766_v6, %v2132_v22 }
 0x276   :  { %v2155_v2 = vadd.f32 %v12766_v6, %v2133_v31  ;;  %v2156_v9 = vadd.f32 %v12766_v6, %v2134_v17  ;;  %v2157_v53 = vadd.f32 %v12766_v6, %v2135_v62  ;;  %v2158_v45 = vadd.f32 %v12766_v6, %v2136_v30 }
 0x277   :  { %v2159_v49 = vadd.f32 %v12766_v6, %v2137_v51  ;;  %v2160_v33 = vadd.f32 %v12766_v6, %v2138_v3  ;;  %v2161_v56 = vadd.f32 %v12766_v6, %v2139_v37  ;;  %v2162_v57 = vadd.f32 %v12766_v6, %v2140_v18  ;;  %v17459_v37 = vld [vmem:[%s22374_s6 + $0x8] sm:$0xff]  }
 0x278   :  { %v18767_v50 = vmul.f32 %v2147_v25, %v18528_v29  ;;  %v18770_v7 = vmul.f32 %v2148_v28, %v18535_v60  ;;  %v18773_v32 = vmul.f32 %v2149_v48, %v18530_v41  ;;  %v18776_v13 = vmul.f32 %v2150_v12, %v18540_v8 }
 0x279   :  { %v18779_v39 = vmul.f32 %v2151_v38, %v18556_v10  ;;  %v18782_v23 = vmul.f32 %v2152_v46, %v18565_v14  ;;  %v18785_v63 = vmul.f32 %v2153_v47, %v18579_v15  ;;  %v18788_v24 = vmul.f32 %v2154_v40, %v18593_v11 }
 0x27a   :  { %v18791_v43 = vmul.f32 %v2155_v2, %v18615_v20  ;;  %v18794_v6 = vmul.f32 %v2156_v9, %v18622_v26  ;;  %v18797_v34 = vmul.f32 %v2157_v53, %v18638_v61  ;;  %v18800_v59 = vmul.f32 %v2158_v45, %v18642_v27  ;;  %2179 = vst [vmem:[#allocation2 + $0x10] sm:$0xff] %v18767_v50  ;;  %v17460_v45 = vld [vmem:[%s22374_s6 + $0x10] sm:$0xff]  }
 0x27b   :  { %2180 = vst [vmem:[#allocation2 + $0x18] sm:$0xff] %v18770_v7  ;;  %2181 = vst [vmem:[#allocation2 + $0x20] sm:$0xff] %v18773_v32  ;;  %v18807_v58 = vmul.f32 %v2159_v49, %v18649_v52  ;;  %v18810_v22 = vmul.f32 %v2160_v33, %v18654_v19  ;;  %v18813_v31 = vmul.f32 %v2161_v56, %v18658_v55  ;;  %v17461_v49 = vld [vmem:[%s22374_s6 + $0x18] sm:$0xff]   ;;  %v17462_v33 = vld [vmem:[%s22374_s6 + $0x20] sm:$0xff]  }
 0x27c   :  { %2182 = vst [vmem:[#allocation2 + $0x28] sm:$0xff] %v18776_v13  ;;  %v18816_v17 = vmul.f32 %v2162_v57, %v18661_v54  ;;  %2183 = vst [vmem:[#allocation2 + $0x30] sm:$0xff] %v18779_v39  ;;  %v2251_v62 = vpack.c.bf16 %v18767_v50, %v2235_v42  ;;  %v2252_v30 = vpack.c.bf16 %v18773_v32, %v18770_v7  ;;  %v17464_v56 = vld [vmem:[%s22374_s6 + $0x30] sm:$0xff]   ;;  %v2195_v57 = vld [vmem:[#allocation2 + $0x7] sm:$0xff] }
 0x27d   :  { %2184 = vst [vmem:[#allocation2 + $0x38] sm:$0xff] %v18782_v23  ;;  %2185 = vst [vmem:[#allocation2 + $0x40] sm:$0xff] %v18785_v63  ;;  %v2253_v51 = vpack.c.bf16 %v18779_v39, %v18776_v13  ;;  %v2254_v3 = vpack.c.bf16 %v18785_v63, %v18782_v23  ;;  %v2255_v18 = vpack.c.bf16 %v18791_v43, %v18788_v24 }
 0x27e   :  { %2186 = vst [vmem:[#allocation2 + $0x48] sm:$0xff] %v18788_v24  ;;  %2187 = vst [vmem:[#allocation2 + $0x50] sm:$0xff] %v18791_v43  ;;  %v2256_v25 = vpack.c.bf16 %v18797_v34, %v18794_v6  ;;  %v2257_v28 = vpack.c.bf16 %v18807_v58, %v18800_v59  ;;  %v2258_v48 = vpack.c.bf16 %v18813_v31, %v18810_v22  ;;  %15061 = vmatprep.mubr.bf16.mxu1 %v2251_v62  ;;  %v17465_v62 = vld [vmem:[%s22374_s6 + $0x38] sm:$0xff]  }
 0x27f   :  { %2188 = vst [vmem:[#allocation2 + $0x58] sm:$0xff] %v18794_v6  ;;  %2189 = vst [vmem:[#allocation2 + $0x60] sm:$0xff] %v18797_v34  ;;  %15062 = vmatmul.mubr.bf16.vlgmr.msra.gmra.mrb[0].mxu1 %v2252_v30 }
 0x280   :  { %2190 = vst [vmem:[#allocation2 + $0x68] sm:$0xff] %v18800_v59  ;;  %2191 = vst [vmem:[#allocation2 + $0x70] sm:$0xff] %v18807_v58  ;;  %15065 = vmatprep.mubr.bf16.mxu1 %v2253_v51  ;;  %15078 = vmatpush3.bf16.msra.mxu1 %v18608_v36  ;;  %v17463_v36 = vld [vmem:[%s22374_s6 + $0x28] sm:$0xff]   ;;  %v17466_v51 = vld [vmem:[%s22374_s6 + $0x80] sm:$0xff]  }
 0x281   :  { %2192 = vst [vmem:[#allocation2 + $0x78] sm:$0xff] %v18810_v22  ;;  %2193 = vst [vmem:[#allocation2 + $0x80] sm:$0xff] %v18813_v31  ;;  %15079 = vmatprep.subr.bf16.mxu1 %v17459_v37  ;;  %v18880_v42 = vld [vmem:[#allocation2 + $0xf] sm:$0xff] }
 0x282   :  { %2194 = vst [vmem:[#allocation2 + $0x88] sm:$0xff] %v18816_v17  ;;  %v2211_v30 = vpack.c.bf16 %v18880_v42, %v2195_v57  ;;  %v2566_v54 = vld [vmem:[#allocation2 + $0x9] sm:$0xff]  ;;  %v18965_v55 = vld [vmem:[#allocation2 + $0x11] sm:$0xff]  ;;  %v18979_v27 = vld [vmem:[#allocation2 + $0x19] sm:$0xff] }
 0x283   :  { %v2582_v52 = vpack.c.bf16 %v18965_v55, %v2566_v54  ;;  %v18981_v61 = vld [vmem:[#allocation2 + $0x21] sm:$0xff]  ;;  %v18983_v26 = vld [vmem:[#allocation2 + $0x29] sm:$0xff] }
 0x284   :  { %15080 = vmatpush3.bf16.msra.mxu1 %v17459_v37  ;;  %v18891_v37 = vld [vmem:[#allocation2 + $0x1f] sm:$0xff]  ;;  %v18985_v20 = vld [vmem:[#allocation2 + $0x31] sm:$0xff]  ;;  %v18989_v54 = vpack.c.bf16 %v18981_v61, %v18979_v27 }
 0x285   :  { %15081 = vmatprep.subr.bf16.mxu1 %v17460_v45  ;;  %v18919_v57 = vld [vmem:[#allocation2 + $0x4f] sm:$0xff]  ;;  %v19003_v11 = vld [vmem:[#allocation2 + $0x39] sm:$0xff]  ;;  %v19005_v15 = vld [vmem:[#allocation2 + $0x41] sm:$0xff] }
 0x286   :  { %v18937_v53 = vld [vmem:[#allocation2 + $0x57] sm:$0xff]  ;;  %v18939_v9 = vld [vmem:[#allocation2 + $0x5f] sm:$0xff]  ;;  %v19007_v14 = vld [vmem:[#allocation2 + $0x49] sm:$0xff]  ;;  %v19013_v44 = vpack.c.bf16 %v19005_v15, %v19003_v11 }
 0x287   :  { %15066 = vmatmul.mubr.bf16.gmra.mrb[4].mxu1 %v2254_v3  ;;  %v18889_v3 = vld [vmem:[#allocation2 + $0x17] sm:$0xff]  ;;  %v18941_v2 = vld [vmem:[#allocation2 + $0x67] sm:$0xff]  ;;  %v18943_v40 = vld [vmem:[#allocation2 + $0x6f] sm:$0xff]  ;;  %v18947_v47 = vpack.c.bf16 %v18939_v9, %v18937_v53 }
 0x288   :  { %15069 = vmatprep.mubr.bf16.mxu1 %v2255_v18  ;;  %15082 = vmatpush3.bf16.msra.mxu1 %v17460_v45  ;;  %v18893_v18 = vld [vmem:[#allocation2 + $0x27] sm:$0xff]  ;;  %v18954_v46 = vpack.c.bf16 %v18943_v40, %v18941_v2  ;;  %v18961_v38 = vld [vmem:[#allocation2 + $0x77] sm:$0xff]  ;;  %v18963_v12 = vld [vmem:[#allocation2 + $0x7f] sm:$0xff] }
 0x289   :  { %15083 = vmatprep.subr.bf16.mxu1 %v17461_v49  ;;  %v18969_v19 = vpack.c.bf16 %v18963_v12, %v18961_v38  ;;  %v19009_v10 = vld [vmem:[#allocation2 + $0x51] sm:$0xff]  ;;  %v19027_v8 = vld [vmem:[#allocation2 + $0x59] sm:$0xff]  ;;  %v19029_v35 = vld [vmem:[#allocation2 + $0x61] sm:$0xff] }
 0x28a   :  { %v19020_v5 = vpack.c.bf16 %v19009_v10, %v19007_v14  ;;  %v19031_v4 = vld [vmem:[#allocation2 + $0x69] sm:$0xff]  ;;  %v19033_v41 = vld [vmem:[#allocation2 + $0x71] sm:$0xff]  ;;  %v19037_v60 = vpack.c.bf16 %v19029_v35, %v19027_v8  ;;  %v19051_v1 = vld [vmem:[#allocation2 + $0x79] sm:$0xff] }
 0x28b   :  { %v19044_v29 = vpack.c.bf16 %v19033_v41, %v19031_v4  ;;  %v19053_v21 = vld [vmem:[#allocation2 + $0x81] sm:$0xff] }
 0x28c   :  { %15084 = vmatpush3.bf16.msra.mxu1 %v17461_v49  ;;  %v17468_v49 = vld [vmem:[%s22374_s6 + $0x90] sm:$0xff]   ;;  %22596 = vst [vmem:[#allocation38_spill] sm:$0xff] %v19037_v60  ;;  %v19057_v0 = vpack.c.bf16 %v19053_v21, %v19051_v1 }
 0x28d   :  { %15085 = vmatprep.subr.bf16.mxu1 %v17462_v33  ;;  %22597 = vst [vmem:[#allocation39_spill] sm:$0xff] %v19044_v29 }
 0x28f   :  { %15070 = vmatmul.mubr.bf16.gmra.mrb[8].mxu1 %v2256_v25  ;;  %v18895_v25 = vld [vmem:[#allocation2 + $0x2f] sm:$0xff] }
 0x290   :  { %15073 = vmatprep.mubr.bf16.mxu1 %v2257_v28  ;;  %15086 = vmatpush3.bf16.msra.mxu1 %v17462_v33  ;;  %v18899_v28 = vpack.c.bf16 %v18891_v37, %v18889_v3  ;;  %v18906_v45 = vpack.c.bf16 %v18895_v25, %v18893_v18  ;;  %v18913_v33 = vld [vmem:[#allocation2 + $0x37] sm:$0xff] }
 0x291   :  { %15087 = vmatprep.subr.bf16.mxu1 %v17463_v36 }
 0x294   :  { %15088 = vmatpush3.bf16.msra.mxu1 %v17463_v36  ;;  %v18915_v36 = vld [vmem:[#allocation2 + $0x3f] sm:$0xff] }
 0x295   :  { %15089 = vmatprep.subr.bf16.mxu1 %v17464_v56 }
 0x297   :  { %15074 = vmatmul.mubr.bf16.gmra.mrb[12].mxu1 %v2258_v48  ;;  %v17467_v48 = vld [vmem:[%s22374_s6 + $0x88] sm:$0xff]  }
 0x298   :  { %15090 = vmatpush3.bf16.msra.mxu1 %v17464_v56  ;;  %15093 = vmatprep.mubr.bf16.mxu1 %v2211_v30  ;;  %v18917_v56 = vld [vmem:[#allocation2 + $0x47] sm:$0xff]  ;;  %v17469_v30 = vld [vmem:[%s22374_s6 + $0x98] sm:$0xff]  }
 0x299   :  { %15091 = vmatprep.subr.bf16.mxu1 %v17465_v62 }
 0x29c   :  { %15092 = vmatpush3.bf16.msra.mxu1 %v17465_v62  ;;  %v18923_v62 = vpack.c.bf16 %v18915_v36, %v18913_v33 }
 0x29d   :  { %15109 = vmatprep.subr.bf16.mxu1 %v17466_v51 }
 0x29f   :  { %15094 = vmatmul.mubr.bf16.vlgmr.msra.gmra.mrb[0].mxu1 %v18899_v28 }
 0x2a0   :  { %15097 = vmatprep.mubr.bf16.mxu1 %v18906_v45  ;;  %15110 = vmatpush3.bf16.msra.mxu1 %v17466_v51  ;;  %v18930_v51 = vpack.c.bf16 %v18919_v57, %v18917_v56 }
 0x2a1   :  { %15111 = vmatprep.subr.bf16.mxu1 %v17467_v48 }
 0x2a4   :  { %15112 = vmatpush3.bf16.msra.mxu1 %v17467_v48  ;;  %v17470_v48 = vld [vmem:[%s22374_s6 + $0xa0] sm:$0xff]  }
 0x2a5   :  { %15113 = vmatprep.subr.bf16.mxu1 %v17468_v49 }
 0x2a7   :  { %15098 = vmatmul.mubr.bf16.gmra.mrb[4].mxu1 %v18923_v62 }
 0x2a8   :  { %15101 = vmatprep.mubr.bf16.mxu1 %v18930_v51  ;;  %15114 = vmatpush3.bf16.msra.mxu1 %v17468_v49  ;;  %v17471_v49 = vld [vmem:[%s22374_s6 + $0xa8] sm:$0xff]  }
 0x2a9   :  { %15115 = vmatprep.subr.bf16.mxu1 %v17469_v30 }
 0x2ac   :  { %15116 = vmatpush3.bf16.msra.mxu1 %v17469_v30  ;;  %v17472_v30 = vld [vmem:[%s22374_s6 + $0xb0] sm:$0xff]  }
 0x2ad   :  { %15117 = vmatprep.subr.bf16.mxu1 %v17470_v48 }
 0x2af   :  { %15102 = vmatmul.mubr.bf16.gmra.mrb[8].mxu1 %v18947_v47 }
 0x2b0   :  { %15105 = vmatprep.mubr.bf16.mxu1 %v18954_v46  ;;  %15118 = vmatpush3.bf16.msra.mxu1 %v17470_v48  ;;  %v17473_v48 = vld [vmem:[%s22374_s6 + $0xb8] sm:$0xff]  }
 0x2b1   :  { %15119 = vmatprep.subr.bf16.mxu1 %v17471_v49 }
 0x2b4   :  { %15120 = vmatpush3.bf16.msra.mxu1 %v17471_v49  ;;  %v17474_v49 = vld [vmem:[%s22374_s6 + $0xc0] sm:$0xff]  }
 0x2b5   :  { %15121 = vmatprep.subr.bf16.mxu1 %v17472_v30 }
 0x2b7   :  { %15106 = vmatmul.mubr.bf16.gmra.mrb[12].mxu1 %v18969_v19 }
 0x2b8   :  { %15122 = vmatpush3.bf16.msra.mxu1 %v17472_v30  ;;  %15125 = vmatprep.mubr.bf16.mxu1 %v2582_v52  ;;  %v17475_v52 = vld [vmem:[%s22374_s6 + $0xc8] sm:$0xff]   ;;  %v18996_v30 = vpack.c.bf16 %v18985_v20, %v18983_v26 }
 0x2b9   :  { %15123 = vmatprep.subr.bf16.mxu1 %v17473_v48 }
 0x2bc   :  { %15124 = vmatpush3.bf16.msra.mxu1 %v17473_v48  ;;  %v17476_v48 = vld [vmem:[%s22374_s6 + $0xd0] sm:$0xff]  }
 0x2bd   :  { %15141 = vmatprep.subr.bf16.mxu1 %v17474_v49 }
 0x2bf   :  { %15126 = vmatmul.mubr.bf16.vlgmr.msra.gmra.mrb[0].mxu1 %v18989_v54 }
 0x2c0   :  { %15129 = vmatprep.mubr.bf16.mxu1 %v18996_v30  ;;  %15142 = vmatpush3.bf16.msra.mxu1 %v17474_v49  ;;  %v17477_v49 = vld [vmem:[%s22374_s6 + $0xd8] sm:$0xff]  }
 0x2c1   :  { %15143 = vmatprep.subr.bf16.mxu1 %v17475_v52 }
 0x2c4   :  { %15144 = vmatpush3.bf16.msra.mxu1 %v17475_v52  ;;  %v17478_v52 = vld [vmem:[%s22374_s6 + $0xe0] sm:$0xff]  }
 0x2c5   :  { %15145 = vmatprep.subr.bf16.mxu1 %v17476_v48 }
 0x2c7   :  { %15130 = vmatmul.mubr.bf16.gmra.mrb[4].mxu1 %v19013_v44 }
 0x2c8   :  { %15133 = vmatprep.mubr.bf16.mxu1 %v19020_v5  ;;  %15146 = vmatpush3.bf16.msra.mxu1 %v17476_v48  ;;  %v17479_v48 = vld [vmem:[%s22374_s6 + $0xe8] sm:$0xff]  }
 0x2c9   :  { %15147 = vmatprep.subr.bf16.mxu1 %v17477_v49 }
 0x2cc   :  { %15148 = vmatpush3.bf16.msra.mxu1 %v17477_v49  ;;  %v17480_v49 = vld [vmem:[%s22374_s6 + $0xf0] sm:$0xff]  }
 0x2cd   :  { %15149 = vmatprep.subr.bf16.mxu1 %v17478_v52 }
 0x2cf   :  { %15134 = vmatmul.mubr.bf16.gmra.mrb[8].mxu1 %v19037_v60  ;;  %v17483_v60 = vld [vmem:[%s22374_s6 + $0x108] sm:$0xff]  }
 0x2d0   :  { %15137 = vmatprep.mubr.bf16.mxu1 %v19044_v29  ;;  %15150 = vmatpush3.bf16.msra.mxu1 %v17478_v52  ;;  %v2784_v52 = vpack.c.bf16 %v18889_v3, %v18880_v42  ;;  %v2785_v29 = vpack.c.bf16 %v18893_v18, %v18891_v37  ;;  %v2786_v42 = vpack.c.bf16 %v18913_v33, %v18895_v25  ;;  %v17484_v3 = vld [vmem:[%s22374_s6 + $0x110] sm:$0xff]   ;;  %v17485_v37 = vld [vmem:[%s22374_s6 + $0x118] sm:$0xff]   ;;  %v17487_v25 = vld [vmem:[%s22374_s6 + $0x128] sm:$0xff]  }
 0x2d1   :  { %15151 = vmatprep.subr.bf16.mxu1 %v17479_v48  ;;  %v2788_v18 = vpack.c.bf16 %v18937_v53, %v18919_v57  ;;  %v2790_v53 = vpack.c.bf16 %v18961_v38, %v18943_v40  ;;  %v17488_v33 = vld [vmem:[%s22374_s6 + $0x130] sm:$0xff]   ;;  %v22598_v38 = vpack.c.bf16 %v18770_v7, %v18767_v50  ;;  %v17490_v40 = vld [vmem:[%s22374_s6 + $0x140] sm:$0xff]   ;;  %v22600_v57 = vpack.c.bf16 %v18782_v23, %v18779_v39  ;;  %v17493_v7 = vld [vmem:[%s22374_s6 + $0x158] sm:$0xff]  }
 0x2d2   :  { %v17492_v50 = vld [vmem:[%s22374_s6 + $0x150] sm:$0xff]   ;;  %v17494_v39 = vld [vmem:[%s22374_s6 + $0x160] sm:$0xff]   ;;  %v17495_v23 = vld [vmem:[%s22374_s6 + $0x168] sm:$0xff]  }
 0x2d4   :  { %15152 = vmatpush3.bf16.msra.mxu1 %v17479_v48  ;;  %v17482_v48 = vld [vmem:[%s22374_s6 + $0x100] sm:$0xff]  }
 0x2d5   :  { %15153 = vmatprep.subr.bf16.mxu1 %v17480_v49 }
 0x2d7   :  { %15138 = vmatmul.mubr.bf16.gmra.mrb[12].mxu1 %v19057_v0 }
 0x2d8   :  { %15154 = vmatpush3.bf16.msra.mxu1 %v17480_v49  ;;  %15157 = vmatprep.mubr.bf16.mxu1 %v2784_v52  ;;  %v3576_v49 = vld [vmem:[#allocation2 + $0x18] sm:$0xff]  ;;  %v3577_v52 = vld [vmem:[#allocation2 + $0x20] sm:$0xff] }
 0x2d9   :  { %15155 = vmatprep.subr.bf16.mxu1 %v17481_v16 }
 0x2dc   :  { %15156 = vmatpush3.bf16.msra.mxu1 %v17481_v16  ;;  %v2787_v16 = vpack.c.bf16 %v18917_v56, %v18915_v36  ;;  %v19098_v36 = vld [vmem:[#allocation2 + $0x87] sm:$0xff]  ;;  %v22599_v56 = vpack.c.bf16 %v18776_v13, %v18773_v32  ;;  %v22601_v32 = vpack.c.bf16 %v18788_v24, %v18785_v63  ;;  %v22602_v13 = vpack.c.bf16 %v18794_v6, %v18791_v43  ;;  %v17496_v43 = vld [vmem:[%s22374_s6 + $0x170] sm:$0xff]   ;;  %v17497_v6 = vld [vmem:[%s22374_s6 + $0x178] sm:$0xff]  }
 0x2dd   :  { %15173 = vmatprep.subr.bf16.mxu1 %v17482_v48  ;;  %v22603_v63 = vpack.c.bf16 %v18800_v59, %v18797_v34  ;;  %v22604_v24 = vpack.c.bf16 %v18810_v22, %v18807_v58  ;;  %v3188_v34 = vpack.c.bf16 %v18979_v27, %v18965_v55  ;;  %v22605_v59 = vpack.c.bf16 %v18816_v17, %v18813_v31  ;;  %v17498_v58 = vld [vmem:[%s22374_s6 + $0x180] sm:$0xff]   ;;  %v17499_v55 = vld [vmem:[%s22374_s6 + $0x188] sm:$0xff]   ;;  %v17500_v31 = vld [vmem:[%s22374_s6 + $0x190] sm:$0xff]  }
 0x2de   :  { %v3189_v22 = vpack.c.bf16 %v18983_v26, %v18981_v61  ;;  %v3190_v27 = vpack.c.bf16 %v19003_v11, %v18985_v20  ;;  %v3191_v26 = vpack.c.bf16 %v19007_v14, %v19005_v15  ;;  %v17501_v61 = vld [vmem:[%s22374_s6 + $0x198] sm:$0xff]   ;;  %v3192_v11 = vpack.c.bf16 %v19027_v8, %v19009_v10  ;;  %v17502_v20 = vld [vmem:[%s22374_s6 + $0x1a0] sm:$0xff]   ;;  %v17503_v15 = vld [vmem:[%s22374_s6 + $0x1a8] sm:$0xff]  }
 0x2df   :  { %15158 = vmatmul.mubr.bf16.vlgmr.msra.gmra.mrb[0].mxu1 %v2785_v29  ;;  %v17486_v29 = vld [vmem:[%s22374_s6 + $0x120] sm:$0xff]   ;;  %v3193_v14 = vpack.c.bf16 %v19031_v4, %v19029_v35  ;;  %v3194_v8 = vpack.c.bf16 %v19051_v1, %v19033_v41  ;;  %v17504_v10 = vld [vmem:[%s22374_s6 + $0x1b0] sm:$0xff]   ;;  %v17505_v4 = vld [vmem:[%s22374_s6 + $0x1b8] sm:$0xff]  }
 0x2e0   :  { %15161 = vmatprep.mubr.bf16.mxu1 %v2786_v42  ;;  %15174 = vmatpush3.bf16.msra.mxu1 %v17482_v48  ;;  %v19188_v17 = vld [vmem:[#allocation2 + $0x89] sm:$0xff]  ;;  %v17506_v1 = vld [vmem:[%s22374_s6 + $0x1c0] sm:$0xff]   ;;  %v17513_v42 = vld [vmem:[%s22374_s6 + $0x1f8] sm:$0xff]  }
 0x2e1   :  { %15175 = vmatprep.subr.bf16.mxu1 %v17483_v60  ;;  %v3195_v35 = vpack.c.bf16 %v19188_v17, %v19053_v21  ;;  %v17507_v21 = vld [vmem:[%s22374_s6 + $0x1c8] sm:$0xff]   ;;  %v17508_v41 = vld [vmem:[%s22374_s6 + $0x1d0] sm:$0xff]  }
 0x2e4   :  { %15176 = vmatpush3.bf16.msra.mxu1 %v17483_v60  ;;  %v2789_v60 = vpack.c.bf16 %v18941_v2, %v18939_v9  ;;  %v2791_v2 = vpack.c.bf16 %v19098_v36, %v18963_v12  ;;  %v17489_v9 = vld [vmem:[%s22374_s6 + $0x138] sm:$0xff]   ;;  %v17491_v12 = vld [vmem:[%s22374_s6 + $0x148] sm:$0xff]  }
 0x2e5   :  { %15177 = vmatprep.subr.bf16.mxu1 %v17484_v3 }
 0x2e7   :  { %15162 = vmatmul.mubr.bf16.gmra.mrb[4].mxu1 %v2787_v16  ;;  %v3579_v16 = vld [vmem:[#allocation2 + $0x30] sm:$0xff] }
 0x2e8   :  { %15165 = vmatprep.mubr.bf16.mxu1 %v2788_v18  ;;  %15178 = vmatpush3.bf16.msra.mxu1 %v17484_v3  ;;  %v3578_v3 = vld [vmem:[#allocation2 + $0x28] sm:$0xff]  ;;  %v3581_v18 = vld [vmem:[#allocation2 + $0x40] sm:$0xff] }
 0x2e9   :  { %15179 = vmatprep.subr.bf16.mxu1 %v17485_v37 }
 0x2ec   :  { %15180 = vmatpush3.bf16.msra.mxu1 %v17485_v37  ;;  %v3580_v37 = vld [vmem:[#allocation2 + $0x38] sm:$0xff] }
 0x2ed   :  { %15181 = vmatprep.subr.bf16.mxu1 %v17486_v29 }
 0x2ef   :  { %15166 = vmatmul.mubr.bf16.gmra.mrb[8].mxu1 %v2789_v60  ;;  %v17515_v60 = vld [vmem:[%s22374_s6 + $0x208] sm:$0xff]  }
 0x2f0   :  { %15169 = vmatprep.mubr.bf16.mxu1 %v2790_v53  ;;  %15182 = vmatpush3.bf16.msra.mxu1 %v17486_v29  ;;  %v3593_v29 = vpack.c.bf16 %v3579_v16, %v3578_v3  ;;  %v17516_v53 = vld [vmem:[%s22374_s6 + $0x210] sm:$0xff]  }
 0x2f1   :  { %15183 = vmatprep.subr.bf16.mxu1 %v17487_v25  ;;  %v22613_v16 = vld [vmem:[#allocation24_spill] sm:$0xff] }
 0x2f4   :  { %15184 = vmatpush3.bf16.msra.mxu1 %v17487_v25  ;;  %v3594_v25 = vpack.c.bf16 %v3581_v18, %v3580_v37 }
 0x2f5   :  { %15185 = vmatprep.subr.bf16.mxu1 %v17488_v33 }
 0x2f7   :  { %15170 = vmatmul.mubr.bf16.gmra.mrb[12].mxu1 %v2791_v2  ;;  %v3584_v2 = vld [vmem:[#allocation2 + $0x58] sm:$0xff] }
 0x2f8   :  { %15186 = vmatpush3.bf16.msra.mxu1 %v17488_v33  ;;  %15189 = vmatprep.mubr.bf16.mxu1 %v22598_v38  ;;  %v3582_v33 = vld [vmem:[#allocation2 + $0x48] sm:$0xff] }
 0x2f9   :  { %15187 = vmatprep.subr.bf16.mxu1 %v17489_v9 }
 0x2fc   :  { %15188 = vmatpush3.bf16.msra.mxu1 %v17489_v9  ;;  %v3585_v9 = vld [vmem:[#allocation2 + $0x60] sm:$0xff] }
 0x2fd   :  { %15205 = vmatprep.subr.bf16.mxu1 %v17490_v40 }
 0x2ff   :  { %15190 = vmatmul.mubr.bf16.vlgmr.msra.gmra.mrb[0].mxu1 %v22599_v56  ;;  %v17518_v56 = vld [vmem:[%s22374_s6 + $0x220] sm:$0xff]  }
 0x300   :  { %15193 = vmatprep.mubr.bf16.mxu1 %v22600_v57  ;;  %15206 = vmatpush3.bf16.msra.mxu1 %v17490_v40  ;;  %v17517_v40 = vld [vmem:[%s22374_s6 + $0x218] sm:$0xff]   ;;  %v3586_v57 = vld [vmem:[#allocation2 + $0x68] sm:$0xff] }
 0x301   :  { %15207 = vmatprep.subr.bf16.mxu1 %v17491_v12 }
 0x304   :  { %15208 = vmatpush3.bf16.msra.mxu1 %v17491_v12  ;;  %v3596_v12 = vpack.c.bf16 %v3585_v9, %v3584_v2  ;;  %v22615_v9 = vld [vmem:[#allocation12_spill] sm:$0xff] }
 0x305   :  { %15209 = vmatprep.subr.bf16.mxu1 %v17492_v50 }
 0x307   :  { %15194 = vmatmul.mubr.bf16.gmra.mrb[4].mxu1 %v22601_v32  ;;  %v3589_v32 = vld [vmem:[#allocation2 + $0x80] sm:$0xff] }
 0x308   :  { %15197 = vmatprep.mubr.bf16.mxu1 %v22602_v13  ;;  %15210 = vmatpush3.bf16.msra.mxu1 %v17492_v50  ;;  %v3587_v50 = vld [vmem:[#allocation2 + $0x70] sm:$0xff] }
 0x309   :  { %15211 = vmatprep.subr.bf16.mxu1 %v17493_v7  ;;  %v3597_v13 = vpack.c.bf16 %v3587_v50, %v3586_v57  ;;  %v22617_v57 = vld [vmem:[#allocation25_spill] sm:$0xff] }
 0x30c   :  { %15212 = vmatpush3.bf16.msra.mxu1 %v17493_v7  ;;  %v3588_v7 = vld [vmem:[#allocation2 + $0x78] sm:$0xff] }
 0x30d   :  { %15213 = vmatprep.subr.bf16.mxu1 %v17494_v39 }
 0x30f   :  { %15198 = vmatmul.mubr.bf16.gmra.mrb[8].mxu1 %v22603_v63  ;;  %v17520_v63 = vld [vmem:[%s22374_s6 + $0x230] sm:$0xff]  }
 0x310   :  { %15201 = vmatprep.mubr.bf16.mxu1 %v22604_v24  ;;  %15214 = vmatpush3.bf16.msra.mxu1 %v17494_v39  ;;  %v17519_v39 = vld [vmem:[%s22374_s6 + $0x228] sm:$0xff]  }
 0x311   :  { %15215 = vmatprep.subr.bf16.mxu1 %v17495_v23  ;;  %v3590_v24 = vld [vmem:[#allocation2 + $0x88] sm:$0xff] }
 0x314   :  { %15216 = vmatpush3.bf16.msra.mxu1 %v17495_v23  ;;  %v3598_v23 = vpack.c.bf16 %v3589_v32, %v3588_v7 }
 0x315   :  { %15217 = vmatprep.subr.bf16.mxu1 %v17496_v43 }
 0x317   :  { %15202 = vmatmul.mubr.bf16.gmra.mrb[12].mxu1 %v22605_v59  ;;  %v22606_v59 = vld [vmem:[#allocation38_spill] sm:$0xff] }
 0x318   :  { %15218 = vmatpush3.bf16.msra.mxu1 %v17496_v43  ;;  %15221 = vmatprep.mubr.bf16.mxu1 %v3188_v34  ;;  %v3591_v43 = vld [vmem:[#allocation2 + $0x90] sm:$0xff]  ;;  %v17521_v34 = vld [vmem:[%s22374_s6 + $0x238] sm:$0xff]  }
 0x319   :  { %15219 = vmatprep.subr.bf16.mxu1 %v17497_v6 }
 0x31c   :  { %15220 = vmatpush3.bf16.msra.mxu1 %v17497_v6  ;;  %v3599_v6 = vpack.c.bf16 %v3591_v43, %v3590_v24  ;;  %v19340_v24 = vld [vmem:[%s22370_s2 + $0x240] sm:$0xff]  }
 0x31d   :  { %15237 = vmatprep.subr.bf16.mxu1 %v17498_v58 }
 0x31f   :  { %15222 = vmatmul.mubr.bf16.vlgmr.msra.gmra.mrb[0].mxu1 %v3189_v22  ;;  %v3793_v22 = vld [vmem:[#allocation2 + $0x91] sm:$0xff] }
 0x320   :  { %15225 = vmatprep.mubr.bf16.mxu1 %v3190_v27  ;;  %15238 = vmatpush3.bf16.msra.mxu1 %v17498_v58  ;;  %v22607_v58 = vld [vmem:[#allocation39_spill] sm:$0xff]  ;;  %v17526_v27 = vld [vmem:[%s22370_s2 + $0x2a0] sm:$0xff]  }
 0x321   :  { %15239 = vmatprep.subr.bf16.mxu1 %v17499_v55 }
 0x324   :  { %15240 = vmatpush3.bf16.msra.mxu1 %v17499_v55  ;;  %v3801_v55 = vpack.c.bf16 %v3793_v22, %v19188_v17  ;;  %v17527_v17 = vld [vmem:[%s22370_s2 + $0x2a8] sm:$0xff]  }
 0x325   :  { %15241 = vmatprep.subr.bf16.mxu1 %v17500_v31 }
 0x327   :  { %15226 = vmatmul.mubr.bf16.gmra.mrb[4].mxu1 %v3191_v26 }
 0x328   :  { %15229 = vmatprep.mubr.bf16.mxu1 %v3192_v11  ;;  %15242 = vmatpush3.bf16.msra.mxu1 %v17500_v31 }
 0x329   :  { %15243 = vmatprep.subr.bf16.mxu1 %v17501_v61 }
 0x32c   :  { %15244 = vmatpush3.bf16.msra.mxu1 %v17501_v61 }
 0x32d   :  { %15245 = vmatprep.subr.bf16.mxu1 %v17502_v20 }
 0x32f   :  { %15230 = vmatmul.mubr.bf16.gmra.mrb[8].mxu1 %v3193_v14  ;;  %v22608_v14 = vld [vmem:[#allocation8_spill] sm:$0xff] }
 0x330   :  { %15233 = vmatprep.mubr.bf16.mxu1 %v3194_v8  ;;  %15246 = vmatpush3.bf16.msra.mxu1 %v17502_v20 }
 0x331   :  { %15247 = vmatprep.subr.bf16.mxu1 %v17503_v15 }
 0x334   :  { %15248 = vmatpush3.bf16.msra.mxu1 %v17503_v15 }
 0x335   :  { %15249 = vmatprep.subr.bf16.mxu1 %v17504_v10 }
 0x337   :  { %15234 = vmatmul.mubr.bf16.gmra.mrb[12].mxu1 %v3195_v35  ;;  %v22609_v35 = vld [vmem:[#allocation6_spill] sm:$0xff] }
 0x338   :  { %15250 = vmatpush3.bf16.msra.mxu1 %v17504_v10  ;;  %15253 = vmatprep.mubr.bf16.mxu1 %v18899_v28  ;;  %v17509_v28 = vld [vmem:[%s22374_s6 + $0x1d8] sm:$0xff]  }
 0x339   :  { %15251 = vmatprep.subr.bf16.mxu1 %v17505_v4 }
 0x33c   :  { %15252 = vmatpush3.bf16.msra.mxu1 %v17505_v4 }
 0x33d   :  { %15269 = vmatprep.subr.bf16.mxu1 %v17506_v1 }
 0x33f   :  { %15254 = vmatmul.mubr.bf16.vlgmr.msra.gmra.mrb[0].mxu1 %v18906_v45  ;;  %v17510_v45 = vld [vmem:[%s22374_s6 + $0x1e0] sm:$0xff]  }
 0x340   :  { %15257 = vmatprep.mubr.bf16.mxu1 %v18923_v62  ;;  %15270 = vmatpush3.bf16.msra.mxu1 %v17506_v1  ;;  %v17511_v62 = vld [vmem:[%s22374_s6 + $0x1e8] sm:$0xff]  }
 0x341   :  { %15271 = vmatprep.subr.bf16.mxu1 %v17507_v21 }
 0x344   :  { %15272 = vmatpush3.bf16.msra.mxu1 %v17507_v21  ;;  %v22610_v21 = vld [vmem:[#allocation9_spill] sm:$0xff] }
 0x345   :  { %15273 = vmatprep.subr.bf16.mxu1 %v17508_v41 }
 0x347   :  { %15258 = vmatmul.mubr.bf16.gmra.mrb[4].mxu1 %v18930_v51  ;;  %v3389_v51 = vld [vmem:[#allocation2 + $0x8f] sm:$0xff] }
 0x348   :  { %15261 = vmatprep.mubr.bf16.mxu1 %v18947_v47  ;;  %15274 = vmatpush3.bf16.msra.mxu1 %v17508_v41  ;;  %v17512_v47 = vld [vmem:[%s22374_s6 + $0x1f0] sm:$0xff]   ;;  %v3397_v48 = vpack.c.bf16 %v3389_v51, %v19098_v36 }
 0x349   :  { %15275 = vmatprep.subr.bf16.mxu1 %v17509_v28  ;;  %v3583_v36 = vld [vmem:[#allocation2 + $0x50] sm:$0xff] }
 0x34a   :  { %v3595_v38 = vpack.c.bf16 %v3583_v36, %v3582_v33  ;;  %v17528_v51 = vld [vmem:[%s22370_s2 + $0x2b0] sm:$0xff]   ;;  %v17529_v36 = vld [vmem:[%s22370_s2 + $0x2b8] sm:$0xff]  }
 0x34c   :  { %15276 = vmatpush3.bf16.msra.mxu1 %v17509_v28 }
 0x34d   :  { %15277 = vmatprep.subr.bf16.mxu1 %v17510_v45 }
 0x34f   :  { %15262 = vmatmul.mubr.bf16.gmra.mrb[8].mxu1 %v18954_v46  ;;  %v3592_v46 = vpack.c.bf16 %v3577_v52, %v3576_v49 }
 0x350   :  { %15265 = vmatprep.mubr.bf16.mxu1 %v18969_v19  ;;  %15278 = vmatpush3.bf16.msra.mxu1 %v17510_v45  ;;  %v17514_v19 = vld [vmem:[%s22374_s6 + $0x200] sm:$0xff]   ;;  %v22611_v45 = vld [vmem:[#allocation7_spill] sm:$0xff] }
 0x351   :  { %15279 = vmatprep.subr.bf16.mxu1 %v17511_v62 }
 0x354   :  { %15280 = vmatpush3.bf16.msra.mxu1 %v17511_v62 }
 0x355   :  { %15281 = vmatprep.subr.bf16.mxu1 %v17512_v47 }
 0x357   :  { %15266 = vmatmul.mubr.bf16.gmra.mrb[12].mxu1 %v3397_v48 }
 0x358   :  { %15282 = vmatpush3.bf16.msra.mxu1 %v17512_v47  ;;  %15285 = vmatprep.mubr.bf16.mxu1 %v3592_v46 }
 0x359   :  { %15283 = vmatprep.subr.bf16.mxu1 %v17513_v42 }
 0x35c   :  { %15284 = vmatpush3.bf16.msra.mxu1 %v17513_v42 }
 0x35d   :  { %15301 = vmatprep.subr.bf16.mxu1 %v17514_v19 }
 0x35f   :  { %15286 = vmatmul.mubr.bf16.vlgmr.msra.gmra.mrb[0].mxu1 %v3593_v29 }
 0x360   :  { %15289 = vmatprep.mubr.bf16.mxu1 %v3594_v25  ;;  %15302 = vmatpush3.bf16.msra.mxu1 %v17514_v19  ;;  %v22612_v19 = vld [vmem:[#allocation22_spill] sm:$0xff] }
 0x361   :  { %15303 = vmatprep.subr.bf16.mxu1 %v17515_v60 }
 0x364   :  { %15304 = vmatpush3.bf16.msra.mxu1 %v17515_v60  ;;  %v22614_v60 = vld [vmem:[#allocation23_spill] sm:$0xff] }
 0x365   :  { %15305 = vmatprep.subr.bf16.mxu1 %v17516_v53 }
 0x367   :  { %15290 = vmatmul.mubr.bf16.gmra.mrb[4].mxu1 %v3595_v38 }
 0x368   :  { %15293 = vmatprep.mubr.bf16.mxu1 %v3596_v12  ;;  %15306 = vmatpush3.bf16.msra.mxu1 %v17516_v53 }
 0x369   :  { %15307 = vmatprep.subr.bf16.mxu1 %v17517_v40 }
 0x36c   :  { %15308 = vmatpush3.bf16.msra.mxu1 %v17517_v40  ;;  %v22616_v40 = vld [vmem:[#allocation10_spill] sm:$0xff] }
 0x36d   :  { %15309 = vmatprep.subr.bf16.mxu1 %v17518_v56 }
 0x36f   :  { %15294 = vmatmul.mubr.bf16.gmra.mrb[8].mxu1 %v3597_v13  ;;  %v22618_v13 = vld [vmem:[#allocation13_spill] sm:$0xff] }
 0x370   :  { %15297 = vmatprep.mubr.bf16.mxu1 %v3598_v23  ;;  %15310 = vmatpush3.bf16.msra.mxu1 %v17518_v56  ;;  %v22619_v23 = vld [vmem:[#allocation11_spill] sm:$0xff] }
 0x371   :  { %15311 = vmatprep.subr.bf16.mxu1 %v17519_v39 }
 0x374   :  { %15312 = vmatpush3.bf16.msra.mxu1 %v17519_v39 }
 0x375   :  { %15313 = vmatprep.subr.bf16.mxu1 %v17520_v63 }
 0x377   :  { %15298 = vmatmul.mubr.bf16.gmra.mrb[12].mxu1 %v3599_v6  ;;  %v22620_v6 = vld [vmem:[#allocation26_spill] sm:$0xff] }
 0x378   :  { %15314 = vmatpush3.bf16.msra.mxu1 %v17520_v63  ;;  %15317 = vmatprep.mubr.bf16.mxu1 %v18989_v54  ;;  %v17522_v54 = vld [vmem:[%s22370_s2 + $0x280] sm:$0xff]  }
 0x379   :  { %15315 = vmatprep.subr.bf16.mxu1 %v17521_v34  ;;  %15333 = vmatprep.subr.bf16.mxu0 %v17522_v54 }
 0x37a   :  { %15334 = vmatpush3.bf16.msra.mxu0 %v17522_v54 }
 0x37c   :  { %15316 = vmatpush3.bf16.msra.mxu1 %v17521_v34 }
 0x37f   :  { %15318 = vmatmul.mubr.bf16.vlgmr.msra.gmra.mrb[0].mxu1 %v18996_v30  ;;  %v19274_v30 = vld [vmem:[%s22375_s7] ss:$0 sm:$0xff] }
 0x380   :  { %15321 = vmatprep.mubr.bf16.mxu1 %v19013_v44  ;;  %v17523_v44 = vld [vmem:[%s22370_s2 + $0x288] sm:$0xff]  }
 0x381   :  { %15335 = vmatprep.subr.bf16.mxu0 %v17523_v44 }
 0x382   :  { %15336 = vmatpush3.bf16.msra.mxu0 %v17523_v44 }
 0x387   :  { %15322 = vmatmul.mubr.bf16.gmra.mrb[4].mxu1 %v19020_v5  ;;  %v17525_v5 = vld [vmem:[%s22370_s2 + $0x298] sm:$0xff]  }
 0x388   :  { %15325 = vmatprep.mubr.bf16.mxu1 %v22606_v59 }
 0x38f   :  { %15326 = vmatmul.mubr.bf16.gmra.mrb[8].mxu1 %v22607_v58 }
 0x390   :  { %15329 = vmatprep.mubr.bf16.mxu1 %v19057_v0  ;;  %v17524_v0 = vld [vmem:[%s22370_s2 + $0x290] sm:$0xff]  }
 0x391   :  { %15337 = vmatprep.subr.bf16.mxu0 %v17524_v0 }
 0x392   :  { %15338 = vmatpush3.bf16.msra.mxu0 %v17524_v0 }
 0x393   :  { %15339 = vmatprep.subr.bf16.mxu0 %v17525_v5 }
 0x396   :  { %15340 = vmatpush3.bf16.msra.mxu0 %v17525_v5  ;;  %v22621_v5 = vld [vmem:[#allocation27_spill] sm:$0xff] }
 0x397   :  { %15330 = vmatmul.mubr.bf16.gmra.mrb[12].mxu1 %v3801_v55  ;;  %15341 = vmatprep.subr.bf16.mxu0 %v17526_v27 }
 0x39a   :  { %15342 = vmatpush3.bf16.msra.mxu0 %v17526_v27 }
 0x39b   :  { %15343 = vmatprep.subr.bf16.mxu0 %v17527_v17 }
 0x39e   :  { %15344 = vmatpush3.bf16.msra.mxu0 %v17527_v17 }
 0x39f   :  { %15345 = vmatprep.subr.bf16.mxu0 %v17528_v51 }
 0x3a2   :  { %15346 = vmatpush3.bf16.msra.mxu0 %v17528_v51 }
 0x3a3   :  { %15347 = vmatprep.subr.bf16.mxu0 %v17529_v36 }
 0x3a6   :  { %15348 = vmatpush3.bf16.msra.mxu0 %v17529_v36 }
 0x3a7   :  { %15365 = vmatprep.subr.bf16.mxu0 %v19340_v24 }
 0x452   :  { %v15319_v31 = vpop.f32.mrb[0].mxu1 }
 0x453   :  { %v3989_v26 = vadd.f32 %v15319_v31, %v19274_v30  ;;  %v3901_v61 = vpop.f32.mrb[1].mxu1 }
 0x454   :  { %v3987_v11 = vadd.f32 %v19274_v30, %v3901_v61  ;;  %v15320_v20 = vpop.f32.mrb[2].mxu1  ;;  %v22622_v61 = vld [vmem:[#allocation16_spill] sm:$0xff] }
 0x455   :  { %v19282_v15 = vadd.f32 %v22608_v14, %v3989_v26  ;;  %v3990_v8 = vadd.f32 %v15320_v20, %v19274_v30  ;;  %v3904_v10 = vpop.f32.mrb[3].mxu1 }
 0x456   :  { %v19289_v4 = vadd.f32 %v22609_v35, %v3987_v11  ;;  %v3988_v1 = vadd.f32 %v19274_v30, %v3904_v10  ;;  %v22624_v35 = vld [vmem:[#allocation14_spill] sm:$0xff] }
 0x457   :  { %v19293_v41 = vadd.f32 %v22610_v21, %v3990_v8  ;;  %v4021_v47 = vmax.f32 %v19282_v15, 0.0  ;;  %v22623_v8 = vld [vmem:[#allocation28_spill] sm:$0xff] }
 0x458   :  { %v4019_v28 = vmax.f32 %v19289_v4, 0.0  ;;  %v19297_v62 = vadd.f32 %v22611_v45, %v3988_v1  ;;  %v22625_v45 = vld [vmem:[#allocation17_spill] sm:$0xff] }
 0x459   :  { %v4022_v48 = vmax.f32 %v19293_v41, 0.0  ;;  %v4039_v25 = vmul.f32 %v4021_v47, %v22614_v60 }
 0x45a   :  { %v4020_v49 = vmax.f32 %v19297_v62, 0.0  ;;  %v15323_v52 = vpop.f32.mrb[4].mxu1  ;;  %v4037_v3 = vmul.f32 %v4019_v28, %v22612_v19 }
 0x45b   :  { %v3993_v42 = vadd.f32 %v15323_v52, %v19274_v30  ;;  %v3917_v46 = vpop.f32.mrb[5].mxu1  ;;  %v4040_v50 = vmul.f32 %v4022_v48, %v22617_v57  ;;  %v22626_v52 = vld [vmem:[#allocation29_spill] sm:$0xff] }
 0x45c   :  { %v4038_v37 = vmul.f32 %v4020_v49, %v22613_v16  ;;  %v3991_v18 = vadd.f32 %v19274_v30, %v3917_v46  ;;  %v15324_v29 = vpop.f32.mrb[6].mxu1 }
 0x45d   :  { %v3994_v53 = vadd.f32 %v15324_v29, %v19274_v30  ;;  %v3920_v33 = vpop.f32.mrb[7].mxu1  ;;  %v19321_v38 = vadd.f32 %v22615_v9, %v3993_v42 }
 0x45e   :  { %v4053_v2 = vadd.f32 %v4038_v37, %v4037_v3  ;;  %v19324_v12 = vadd.f32 %v22616_v40, %v3991_v18  ;;  %v3992_v56 = vadd.f32 %v19274_v30, %v3920_v33  ;;  %v22627_v37 = vld [vmem:[#allocation15_spill] sm:$0xff] }
 0x45f   :  { %v19332_v39 = vadd.f32 %v22618_v13, %v3994_v53  ;;  %v4025_v43 = vmax.f32 %v19321_v38, 0.0 }
 0x460   :  { %v4054_v7 = vadd.f32 %v4053_v2, %v4039_v25  ;;  %v4023_v32 = vmax.f32 %v19324_v12, 0.0  ;;  %v19335_v63 = vadd.f32 %v22619_v23, %v3992_v56  ;;  %v22628_v25 = vld [vmem:[#allocation30_spill] sm:$0xff] }
 0x461   :  { %v4026_v0 = vmax.f32 %v19332_v39, 0.0  ;;  %v4043_v10 = vmul.f32 %v4025_v43, %v22623_v8 }
 0x462   :  { %v4041_v34 = vmul.f32 %v4023_v32, %v22620_v6  ;;  %v4055_v59 = vadd.f32 %v4054_v7, %v4040_v50  ;;  %v4024_v58 = vmax.f32 %v19335_v63, 0.0  ;;  %v15327_v22 = vpop.f32.mrb[8].mxu1  ;;  %v22629_v7 = vld [vmem:[#allocation31_spill] sm:$0xff] }
 0x463   :  { %v3997_v55 = vadd.f32 %v15327_v22, %v19274_v30  ;;  %v3933_v54 = vpop.f32.mrb[9].mxu1  ;;  %v4044_v42 = vmul.f32 %v4026_v0, %v22626_v52 }
 0x464   :  { %v4056_v44 = vadd.f32 %v4055_v59, %v4041_v34  ;;  %v4042_v27 = vmul.f32 %v4024_v58, %v22621_v5  ;;  %v3995_v31 = vadd.f32 %v19274_v30, %v3933_v54  ;;  %v15328_v26 = vpop.f32.mrb[10].mxu1  ;;  %v22630_v59 = vld [vmem:[#allocation32_spill] sm:$0xff] }
 0x465   :  { %v19355_v11 = vadd.f32 %v22622_v61, %v3997_v55  ;;  %v3998_v20 = vadd.f32 %v15328_v26, %v19274_v30  ;;  %v3936_v14 = vpop.f32.mrb[11].mxu1  ;;  %v22632_v26 = vld [vmem:[#allocation18_spill] sm:$0xff] }
 0x466   :  { %v4057_v17 = vadd.f32 %v4056_v44, %v4042_v27  ;;  %v4011_v1 = vadd.f32 %v22624_v35, %v3995_v31  ;;  %v3996_v21 = vadd.f32 %v19274_v30, %v3936_v14  ;;  %v22631_v27 = vld [vmem:[#allocation20_spill] sm:$0xff]  ;;  %v22634_v35 = vld [vmem:[#allocation21_spill] sm:$0xff] }
 0x467   :  { %v4014_v51 = vadd.f32 %v22625_v45, %v3998_v20  ;;  %v4029_v29 = vmax.f32 %v19355_v11, 0.0  ;;  %v22633_v20 = vld [vmem:[#allocation33_spill] sm:$0xff] }
 0x468   :  { %v4058_v46 = vadd.f32 %v4057_v17, %v4043_v10  ;;  %v4027_v3 = vmax.f32 %v4011_v1, 0.0  ;;  %v4012_v18 = vadd.f32 %v22627_v37, %v3996_v21  ;;  %v22635_v21 = vld [vmem:[#allocation19_spill] sm:$0xff] }
 0x469   :  { %v4030_v9 = vmax.f32 %v4014_v51, 0.0  ;;  %v4047_v22 = vmul.f32 %v4029_v29, %v22630_v59 }
 0x46a   :  { %v4045_v53 = vmul.f32 %v4027_v3, %v22628_v25  ;;  %v4059_v33 = vadd.f32 %v4058_v46, %v4044_v42  ;;  %v4028_v36 = vmax.f32 %v4012_v18, 0.0  ;;  %v15331_v2 = vpop.f32.mrb[12].mxu1  ;;  %v22636_v42 = vld [vmem:[#allocation34_spill] sm:$0xff] }
 0x46b   :  { %v4001_v40 = vadd.f32 %v15331_v2, %v19274_v30  ;;  %v3949_v56 = vpop.f32.mrb[13].mxu1  ;;  %v4048_v14 = vmul.f32 %v4030_v9, %v22633_v20  ;;  %v22637_v2 = vld [vmem:[#allocation35_spill] sm:$0xff] }
 0x46c   :  { %v4060_v50 = vadd.f32 %v4059_v33, %v4045_v53  ;;  %v4046_v13 = vmul.f32 %v4028_v36, %v22629_v7  ;;  %v3999_v23 = vadd.f32 %v19274_v30, %v3949_v56  ;;  %v15332_v34 = vpop.f32.mrb[14].mxu1  ;;  %v22638_v56 = vld [vmem:[#allocation36_spill] sm:$0xff] }
 0x46d   :  { %v4002_v55 = vadd.f32 %v15332_v34, %v19274_v30  ;;  %v3952_v54 = vpop.f32.mrb[15].mxu1  ;;  %v4017_v31 = vadd.f32 %v22631_v27, %v4001_v40 }
 0x46e   :  { %v4061_v44 = vadd.f32 %v4060_v50, %v4046_v13  ;;  %v4015_v61 = vadd.f32 %v22632_v26, %v3999_v23  ;;  %v4000_v11 = vadd.f32 %v19274_v30, %v3952_v54  ;;  %v22639_v13 = vld [vmem:[#allocation37_spill] sm:$0xff] }
 0x46f   :  { %v4018_v1 = vadd.f32 %v22634_v35, %v4002_v55  ;;  %v4033_v51 = vmax.f32 %v4017_v31, 0.0 }
 0x470   :  { %v4062_v10 = vadd.f32 %v4061_v44, %v4047_v22  ;;  %v4031_v17 = vmax.f32 %v4015_v61, 0.0  ;;  %v4016_v45 = vadd.f32 %v22635_v21, %v4000_v11 }
 0x471   :  { %v4034_v33 = vmax.f32 %v4018_v1, 0.0  ;;  %v4051_v50 = vmul.f32 %v4033_v51, %v22638_v56 }
 0x472   :  { %v4049_v46 = vmul.f32 %v4031_v17, %v22636_v42  ;;  %v4063_v37 = vadd.f32 %v4062_v10, %v4048_v14  ;;  %v4032_v18 = vmax.f32 %v4016_v45, 0.0 }
 0x473   :  { %v4052_v23 = vmul.f32 %v4034_v33, %v22639_v13 }
 0x474   :  { %v4064_v53 = vadd.f32 %v4063_v37, %v4049_v46  ;;  %v4050_v40 = vmul.f32 %v4032_v18, %v22637_v2 }
 0x476   :  { %v4065_v30 = vadd.f32 %v4064_v53, %v4050_v40 }
 0x478   :  { %v4066_v34 = vadd.f32 %v4065_v30, %v4051_v50 }
 0x47a   :  { %v4067_v22 = vadd.f32 %v4066_v34, %v4052_v23 }
 0x47c   :  { %v4068_v54 = vrot.slane %v4067_v22, 4 }
 0x47e   :  { %v4069_v55 = vadd.f32 %v4068_v54, %v4067_v22 }
 0x480   :  { %v4070_v44 = vrot.slane %v4069_v55, 2 }
 0x482   :  { %v4071_v27 = vadd.f32 %v4070_v44, %v4069_v55 }
 0x484   :  { %v4072_v31 = vrot.slane %v4071_v27, 1 }
 0x486   :  { %v4073_v26 = vadd.f32 %v4072_v31, %v4071_v27 }
 0x488   :  { %v4074_v61 = vmul.f32 0.013888889, %v4073_v26 }
 0x48a   :  { %v19387_v11 = vsub.f32 %v4019_v28, %v4074_v61  ;;  %v19391_v14 = vsub.f32 %v4020_v49, %v4074_v61  ;;  %v19395_v10 = vsub.f32 %v4021_v47, %v4074_v61  ;;  %v19399_v35 = vsub.f32 %v4022_v48, %v4074_v61 }
 0x48b   :  { %v19403_v1 = vsub.f32 %v4023_v32, %v4074_v61  ;;  %v19407_v4 = vsub.f32 %v4024_v58, %v4074_v61  ;;  %v19411_v28 = vsub.f32 %v4025_v43, %v4074_v61  ;;  %v19415_v15 = vsub.f32 %v4026_v0, %v4074_v61 }
 0x48c   :  { %v19417_v62 = vsub.f32 %v4027_v3, %v4074_v61  ;;  %v19419_v41 = vsub.f32 %v4028_v36, %v4074_v61  ;;  %v19421_v47 = vsub.f32 %v4029_v29, %v4074_v61  ;;  %v19423_v49 = vsub.f32 %v4030_v9, %v4074_v61 }
 0x48d   :  { %v19425_v48 = vsub.f32 %v4031_v17, %v4074_v61  ;;  %v19427_v12 = vsub.f32 %v4032_v18, %v4074_v61  ;;  %v19429_v32 = vsub.f32 %v4033_v51, %v4074_v61  ;;  %v19431_v38 = vsub.f32 %v4034_v33, %v4074_v61 }
 0x48e   :  { %v4091_v39 = vmul.f32 %v19387_v11, %v22612_v19  ;;  %v4092_v63 = vmul.f32 %v19391_v14, %v22613_v16  ;;  %v4093_v43 = vmul.f32 %v19395_v10, %v22614_v60  ;;  %v4094_v3 = vmul.f32 %v19399_v35, %v22617_v57 }
 0x48f   :  { %v4095_v29 = vmul.f32 %v19403_v1, %v22620_v6  ;;  %v4096_v17 = vmul.f32 %v19407_v4, %v22621_v5  ;;  %v4097_v51 = vmul.f32 %v19411_v28, %v22623_v8  ;;  %v4098_v18 = vmul.f32 %v19415_v15, %v22626_v52 }
 0x490   :  { %v4107_v58 = vmul.f32 %v4091_v39, %v4091_v39  ;;  %v4108_v0 = vmul.f32 %v4092_v63, %v4092_v63  ;;  %v4109_v36 = vmul.f32 %v4093_v43, %v4093_v43  ;;  %v4110_v21 = vmul.f32 %v4094_v3, %v4094_v3 }
 0x491   :  { %v4111_v46 = vmul.f32 %v4095_v29, %v4095_v29  ;;  %v4112_v53 = vmul.f32 %v4096_v17, %v4096_v17  ;;  %v4099_v40 = vmul.f32 %v19417_v62, %v22628_v25  ;;  %v4113_v50 = vmul.f32 %v4097_v51, %v4097_v51 }
 0x492   :  { %v4123_v9 = vadd.f32 %v4108_v0, %v4107_v58  ;;  %v4100_v23 = vmul.f32 %v19419_v41, %v22629_v7  ;;  %v4114_v34 = vmul.f32 %v4098_v18, %v4098_v18  ;;  %v4101_v54 = vmul.f32 %v19421_v47, %v22630_v59 }
 0x493   :  { %v4115_v55 = vmul.f32 %v4099_v40, %v4099_v40  ;;  %v4102_v27 = vmul.f32 %v19423_v49, %v22633_v20  ;;  %v4103_v61 = vmul.f32 %v19425_v48, %v22636_v42  ;;  %v4104_v43 = vmul.f32 %v19427_v12, %v22637_v2 }
 0x494   :  { %v4124_v45 = vadd.f32 %v4123_v9, %v4109_v36  ;;  %v4116_v31 = vmul.f32 %v4100_v23, %v4100_v23  ;;  %v4117_v39 = vmul.f32 %v4101_v54, %v4101_v54  ;;  %v4105_v3 = vmul.f32 %v19429_v32, %v22638_v56 }
 0x495   :  { %v4118_v58 = vmul.f32 %v4102_v27, %v4102_v27  ;;  %v4119_v29 = vmul.f32 %v4103_v61, %v4103_v61  ;;  %v4106_v9 = vmul.f32 %v19431_v38, %v22639_v13  ;;  %v4120_v17 = vmul.f32 %v4104_v43, %v4104_v43 }
 0x496   :  { %v4125_v37 = vadd.f32 %v4124_v45, %v4110_v21  ;;  %v4121_v45 = vmul.f32 %v4105_v3, %v4105_v3 }
 0x498   :  { %v4126_v33 = vadd.f32 %v4125_v37, %v4111_v46  ;;  %v4122_v46 = vmul.f32 %v4106_v9, %v4106_v9 }
 0x49a   :  { %v4127_v30 = vadd.f32 %v4126_v33, %v4112_v53 }
 0x49c   :  { %v4128_v22 = vadd.f32 %v4127_v30, %v4113_v50 }
 0x49e   :  { %v4129_v44 = vadd.f32 %v4128_v22, %v4114_v34 }
 0x4a0   :  { %v4130_v26 = vadd.f32 %v4129_v44, %v4115_v55 }
 0x4a2   :  { %v4131_v63 = vadd.f32 %v4130_v26, %v4116_v31  ;;  %v12968_v26 = vld [vmem:[%s22376_s8] ss:$0 sm:$0xff] }
 0x4a4   :  { %v4132_v0 = vadd.f32 %v4131_v63, %v4117_v39 }
 0x4a6   :  { %v4133_v36 = vadd.f32 %v4132_v0, %v4118_v58 }
 0x4a8   :  { %v4134_v21 = vadd.f32 %v4133_v36, %v4119_v29 }
 0x4aa   :  { %v4135_v51 = vadd.f32 %v4134_v21, %v4120_v17 }
 0x4ac   :  { %v4136_v37 = vadd.f32 %v4135_v51, %v4121_v45 }
 0x4ae   :  { %v4137_v18 = vadd.f32 %v4136_v37, %v4122_v46 }
 0x4b0   :  { %v4138_v53 = vrot.slane %v4137_v18, 4 }
 0x4b2   :  { %v4139_v33 = vadd.f32 %v4138_v53, %v4137_v18 }
 0x4b4   :  { %v4140_v40 = vrot.slane %v4139_v33, 2 }
 0x4b6   :  { %v4141_v50 = vadd.f32 %v4140_v40, %v4139_v33 }
 0x4b8   :  { %v4142_v30 = vrot.slane %v4141_v50, 1 }
 0x4ba   :  { %v4143_v23 = vadd.f32 %v4142_v30, %v4141_v50 }
 0x4bc   :  { %v4144_v34 = vmul.f32 0.013888889, %v4143_v23 }
 0x4be   :  { %v4145_v22 = vadd.f32 1e-05, %v4144_v34 }
 0x4c0   :  { %17812 = vrsqrt.f32 %v4145_v22 }
 0x4ca   :  { %v17813_v54 = vpop.eup %17812 }
 0x4cb   :  { %v4147_v55 = vmul.f32 %v17813_v54, %v19387_v11  ;;  %v4148_v44 = vmul.f32 %v17813_v54, %v19391_v14  ;;  %v4149_v27 = vmul.f32 %v17813_v54, %v19395_v10  ;;  %v4150_v31 = vmul.f32 %v17813_v54, %v19399_v35 }
 0x4cc   :  { %v4151_v61 = vmul.f32 %v17813_v54, %v19403_v1  ;;  %v4152_v39 = vmul.f32 %v17813_v54, %v19407_v4  ;;  %v4153_v63 = vmul.f32 %v17813_v54, %v19411_v28  ;;  %v4154_v43 = vmul.f32 %v17813_v54, %v19415_v15 }
 0x4cd   :  { %v4155_v11 = vmul.f32 %v17813_v54, %v19417_v62  ;;  %v4156_v14 = vmul.f32 %v17813_v54, %v19419_v41  ;;  %v4157_v10 = vmul.f32 %v17813_v54, %v19421_v47  ;;  %v4158_v35 = vmul.f32 %v17813_v54, %v19423_v49  ;;  %v12969_v62 = vld [vmem:[%s22377_s9] ss:$0 sm:$0xff] }
 0x4ce   :  { %v4159_v58 = vmul.f32 %v17813_v54, %v19425_v48  ;;  %v4160_v0 = vmul.f32 %v17813_v54, %v19427_v12  ;;  %v4161_v1 = vmul.f32 %v17813_v54, %v19429_v32  ;;  %v4162_v4 = vmul.f32 %v17813_v54, %v19431_v38 }
 0x4cf   :  { %v4169_v3 = vmul.f32 %v12968_v26, %v4147_v55  ;;  %v4170_v28 = vmul.f32 %v12968_v26, %v4148_v44  ;;  %v4171_v29 = vmul.f32 %v12968_v26, %v4149_v27  ;;  %v4172_v15 = vmul.f32 %v12968_v26, %v4150_v31 }
 0x4d0   :  { %v4173_v41 = vmul.f32 %v12968_v26, %v4151_v61  ;;  %v4174_v47 = vmul.f32 %v12968_v26, %v4152_v39  ;;  %v4175_v36 = vmul.f32 %v12968_v26, %v4153_v63  ;;  %v4176_v49 = vmul.f32 %v12968_v26, %v4154_v43 }
 0x4d1   :  { %v4177_v9 = vmul.f32 %v12968_v26, %v4155_v11  ;;  %v4178_v48 = vmul.f32 %v12968_v26, %v4156_v14  ;;  %v4179_v17 = vmul.f32 %v12968_v26, %v4157_v10  ;;  %v4180_v12 = vmul.f32 %v12968_v26, %v4158_v35  ;;  %v4296_v10 = vld [vmem:[#allocation2 + $0x8] sm:$0xff] }
 0x4d2   :  { %v4181_v21 = vmul.f32 %v12968_v26, %v4159_v58  ;;  %v4182_v32 = vmul.f32 %v12968_v26, %v4160_v0  ;;  %v4183_v45 = vmul.f32 %v12968_v26, %v4161_v1  ;;  %v4184_v38 = vmul.f32 %v12968_v26, %v4162_v4 }
 0x4d3   :  { %v4191_v51 = vadd.f32 %v12969_v62, %v4169_v3  ;;  %v4192_v46 = vadd.f32 %v12969_v62, %v4170_v28  ;;  %v4193_v37 = vadd.f32 %v12969_v62, %v4171_v29  ;;  %v4194_v18 = vadd.f32 %v12969_v62, %v4172_v15 }
 0x4d4   :  { %v4195_v53 = vadd.f32 %v12969_v62, %v4173_v41  ;;  %v4196_v33 = vadd.f32 %v12969_v62, %v4174_v47  ;;  %v4197_v40 = vadd.f32 %v12969_v62, %v4175_v36  ;;  %v4198_v50 = vadd.f32 %v12969_v62, %v4176_v49  ;;  %v17531_v41 = vld [vmem:[%s22370_s2 + $0x248] sm:$0xff]   ;;  %v17532_v36 = vld [vmem:[%s22370_s2 + $0x250] sm:$0xff]  }
 0x4d5   :  { %v4199_v30 = vadd.f32 %v12969_v62, %v4177_v9  ;;  %v4200_v23 = vadd.f32 %v12969_v62, %v4178_v48  ;;  %v4201_v34 = vadd.f32 %v12969_v62, %v4179_v17  ;;  %v4202_v22 = vadd.f32 %v12969_v62, %v4180_v12  ;;  %v17533_v9 = vld [vmem:[%s22370_s2 + $0x258] sm:$0xff]   ;;  %v17535_v12 = vld [vmem:[%s22370_s2 + $0x268] sm:$0xff]  }
 0x4d6   :  { %v4203_v54 = vadd.f32 %v12969_v62, %v4181_v21  ;;  %v4204_v55 = vadd.f32 %v12969_v62, %v4182_v32  ;;  %v4205_v44 = vadd.f32 %v12969_v62, %v4183_v45  ;;  %v4206_v27 = vadd.f32 %v12969_v62, %v4184_v38  ;;  %v17536_v32 = vld [vmem:[%s22370_s2 + $0x270] sm:$0xff]   ;;  %v4255_v45 = vld [vmem:[#allocation2 + $0x7] sm:$0xff] }
 0x4d7   :  { %v19488_v31 = vmul.f32 %v4191_v51, %v22612_v19  ;;  %v19491_v26 = vmul.f32 %v4192_v46, %v22613_v16  ;;  %v19494_v61 = vmul.f32 %v4193_v37, %v22614_v60  ;;  %v19497_v39 = vmul.f32 %v4194_v18, %v22617_v57  ;;  %v17537_v46 = vld [vmem:[%s22370_s2 + $0x278] sm:$0xff]   ;;  %v17538_v18 = vld [vmem:[%s22370_s2 + $0x2c0] sm:$0xff]  }
 0x4d8   :  { %v19500_v63 = vmul.f32 %v4195_v53, %v22620_v6  ;;  %v19503_v43 = vmul.f32 %v4196_v33, %v22621_v5  ;;  %v19506_v11 = vmul.f32 %v4197_v40, %v22623_v8  ;;  %v19509_v14 = vmul.f32 %v4198_v50, %v22626_v52  ;;  %v17553_v19 = vld [vmem:[%s22370_s2 + $0x338] sm:$0xff]  }
 0x4d9   :  { %22640 = vst [vmem:[#allocation38_spill] sm:$0xff] %v19488_v31  ;;  %22641 = vst [vmem:[#allocation39_spill] sm:$0xff] %v19491_v26  ;;  %v19512_v35 = vmul.f32 %v4199_v30, %v22628_v25  ;;  %v19515_v58 = vmul.f32 %v4200_v23, %v22629_v7  ;;  %v19518_v0 = vmul.f32 %v4201_v34, %v22630_v59  ;;  %v17539_v23 = vld [vmem:[%s22370_s2 + $0x2c8] sm:$0xff]  }
 0x4da   :  { %22642 = vst [vmem:[#allocation8_spill] sm:$0xff] %v19494_v61  ;;  %22643 = vst [vmem:[#allocation6_spill] sm:$0xff] %v19497_v39  ;;  %v19521_v1 = vmul.f32 %v4202_v22, %v22633_v20  ;;  %v19528_v4 = vmul.f32 %v4203_v54, %v22636_v42  ;;  %v19531_v3 = vmul.f32 %v4204_v55, %v22637_v2  ;;  %v17540_v22 = vld [vmem:[%s22370_s2 + $0x2d0] sm:$0xff]  }
 0x4db   :  { %22644 = vst [vmem:[#allocation9_spill] sm:$0xff] %v19500_v63  ;;  %22645 = vst [vmem:[#allocation7_spill] sm:$0xff] %v19503_v43  ;;  %v19534_v28 = vmul.f32 %v4205_v44, %v22638_v56  ;;  %v19537_v29 = vmul.f32 %v4206_v27, %v22639_v13  ;;  %v4297_v15 = vpack.c.bf16 %v19488_v31, %v4296_v10 }
 0x4dc   :  { %22646 = vst [vmem:[#allocation12_spill] sm:$0xff] %v19506_v11  ;;  %22647 = vst [vmem:[#allocation10_spill] sm:$0xff] %v19509_v14  ;;  %v4298_v62 = vpack.c.bf16 %v19494_v61, %v19491_v26  ;;  %v4299_v47 = vpack.c.bf16 %v19500_v63, %v19497_v39  ;;  %v4300_v49 = vpack.c.bf16 %v19506_v11, %v19503_v43 }
 0x4dd   :  { %22648 = vst [vmem:[#allocation13_spill] sm:$0xff] %v19512_v35  ;;  %22649 = vst [vmem:[#allocation11_spill] sm:$0xff] %v19515_v58  ;;  %15349 = vmatprep.mubr.bf16.mxu0 %v4297_v15  ;;  %v4301_v48 = vpack.c.bf16 %v19512_v35, %v19509_v14  ;;  %v4302_v17 = vpack.c.bf16 %v19518_v0, %v19515_v58  ;;  %v4303_v21 = vpack.c.bf16 %v19528_v4, %v19521_v1  ;;  %v17541_v15 = vld [vmem:[%s22370_s2 + $0x2d8] sm:$0xff]  }
 0x4de   :  { %22650 = vst [vmem:[#allocation16_spill] sm:$0xff] %v19518_v0  ;;  %22651 = vst [vmem:[#allocation14_spill] sm:$0xff] %v19521_v1  ;;  %15350 = vmatmul.mubr.bf16.vlgmr.msra.gmra.mrb[16].mxu0 %v4298_v62  ;;  %v4304_v51 = vpack.c.bf16 %v19534_v28, %v19531_v3 }
 0x4df   :  { %4223 = vst [vmem:[#allocation2 + $0x10] sm:$0xff] %v19488_v31  ;;  %4224 = vst [vmem:[#allocation2 + $0x18] sm:$0xff] %v19491_v26  ;;  %15353 = vmatprep.mubr.bf16.mxu0 %v4299_v47  ;;  %15366 = vmatpush3.bf16.msra.mxu0 %v19340_v24  ;;  %v17534_v24 = vld [vmem:[%s22370_s2 + $0x260] sm:$0xff]  }
 0x4e0   :  { %4225 = vst [vmem:[#allocation2 + $0x20] sm:$0xff] %v19494_v61  ;;  %4226 = vst [vmem:[#allocation2 + $0x28] sm:$0xff] %v19497_v39  ;;  %15367 = vmatprep.subr.bf16.mxu0 %v17531_v41 }
 0x4e1   :  { %22652 = vst [vmem:[#allocation17_spill] sm:$0xff] %v19528_v4  ;;  %22653 = vst [vmem:[#allocation15_spill] sm:$0xff] %v19531_v3 }
 0x4e2   :  { %22654 = vst [vmem:[#allocation20_spill] sm:$0xff] %v19534_v28  ;;  %22655 = vst [vmem:[#allocation18_spill] sm:$0xff] %v19537_v29 }
 0x4e3   :  { %4227 = vst [vmem:[#allocation2 + $0x30] sm:$0xff] %v19500_v63  ;;  %4228 = vst [vmem:[#allocation2 + $0x38] sm:$0xff] %v19503_v43  ;;  %15368 = vmatpush3.bf16.msra.mxu0 %v17531_v41  ;;  %v17542_v41 = vld [vmem:[%s22370_s2 + $0x2e0] sm:$0xff]  }
 0x4e4   :  { %4229 = vst [vmem:[#allocation2 + $0x40] sm:$0xff] %v19506_v11  ;;  %4230 = vst [vmem:[#allocation2 + $0x48] sm:$0xff] %v19509_v14  ;;  %15369 = vmatprep.subr.bf16.mxu0 %v17532_v36 }
 0x4e5   :  { %4231 = vst [vmem:[#allocation2 + $0x50] sm:$0xff] %v19512_v35  ;;  %4232 = vst [vmem:[#allocation2 + $0x58] sm:$0xff] %v19515_v58 }
 0x4e6   :  { %4233 = vst [vmem:[#allocation2 + $0x60] sm:$0xff] %v19518_v0  ;;  %4234 = vst [vmem:[#allocation2 + $0x68] sm:$0xff] %v19521_v1  ;;  %15354 = vmatmul.mubr.bf16.gmra.mrb[20].mxu0 %v4300_v49  ;;  %v19583_v38 = vld [vmem:[#allocation2 + $0xf] sm:$0xff]  ;;  %v19594_v53 = vld [vmem:[#allocation2 + $0x17] sm:$0xff] }
 0x4e7   :  { %4235 = vst [vmem:[#allocation2 + $0x70] sm:$0xff] %v19528_v4  ;;  %4236 = vst [vmem:[#allocation2 + $0x78] sm:$0xff] %v19531_v3  ;;  %15357 = vmatprep.mubr.bf16.mxu0 %v4301_v48  ;;  %15370 = vmatpush3.bf16.msra.mxu0 %v17532_v36  ;;  %v4271_v37 = vpack.c.bf16 %v19583_v38, %v4255_v45  ;;  %v19596_v33 = vld [vmem:[#allocation2 + $0x1f] sm:$0xff]  ;;  %v19598_v40 = vld [vmem:[#allocation2 + $0x27] sm:$0xff] }
 0x4e8   :  { %4237 = vst [vmem:[#allocation2 + $0x80] sm:$0xff] %v19534_v28  ;;  %4238 = vst [vmem:[#allocation2 + $0x88] sm:$0xff] %v19537_v29  ;;  %15371 = vmatprep.subr.bf16.mxu0 %v17533_v9  ;;  %v19604_v30 = vpack.c.bf16 %v19596_v33, %v19594_v53  ;;  %v4612_v45 = vld [vmem:[#allocation2 + $0x9] sm:$0xff] }
 0x4ea   :  { %v19600_v50 = vld [vmem:[#allocation2 + $0x2f] sm:$0xff]  ;;  %v19618_v54 = vld [vmem:[#allocation2 + $0x37] sm:$0xff] }
 0x4eb   :  { %15372 = vmatpush3.bf16.msra.mxu0 %v17533_v9  ;;  %v19611_v34 = vpack.c.bf16 %v19600_v50, %v19598_v40  ;;  %v19620_v55 = vld [vmem:[#allocation2 + $0x3f] sm:$0xff]  ;;  %v19622_v44 = vld [vmem:[#allocation2 + $0x47] sm:$0xff] }
 0x4ec   :  { %15373 = vmatprep.subr.bf16.mxu0 %v17534_v24  ;;  %v19624_v27 = vld [vmem:[#allocation2 + $0x4f] sm:$0xff]  ;;  %v19628_v10 = vpack.c.bf16 %v19620_v55, %v19618_v54  ;;  %v19642_v47 = vld [vmem:[#allocation2 + $0x57] sm:$0xff]  ;;  %v19710_v56 = vld [vmem:[#allocation2 + $0x41] sm:$0xff] }
 0x4ed   :  { %v19635_v62 = vpack.c.bf16 %v19624_v27, %v19622_v44  ;;  %v19644_v36 = vld [vmem:[#allocation2 + $0x5f] sm:$0xff]  ;;  %v19646_v49 = vld [vmem:[#allocation2 + $0x67] sm:$0xff]  ;;  %v19714_v42 = vld [vmem:[#allocation2 + $0x51] sm:$0xff] }
 0x4ee   :  { %15358 = vmatmul.mubr.bf16.gmra.mrb[24].mxu0 %v4302_v17  ;;  %v19648_v9 = vld [vmem:[#allocation2 + $0x6f] sm:$0xff]  ;;  %v19652_v48 = vpack.c.bf16 %v19644_v36, %v19642_v47  ;;  %v19708_v13 = vld [vmem:[#allocation2 + $0x39] sm:$0xff]  ;;  %v19734_v25 = vld [vmem:[#allocation2 + $0x61] sm:$0xff] }
 0x4ef   :  { %15361 = vmatprep.mubr.bf16.mxu0 %v4303_v21  ;;  %15374 = vmatpush3.bf16.msra.mxu0 %v17534_v24  ;;  %v17543_v24 = vld [vmem:[%s22370_s2 + $0x2e8] sm:$0xff]   ;;  %v19659_v17 = vpack.c.bf16 %v19648_v9, %v19646_v49  ;;  %v19666_v21 = vld [vmem:[#allocation2 + $0x77] sm:$0xff]  ;;  %v19718_v20 = vpack.c.bf16 %v19710_v56, %v19708_v13 }
 0x4f0   :  { %15375 = vmatprep.subr.bf16.mxu0 %v17535_v12  ;;  %v19712_v2 = vld [vmem:[#allocation2 + $0x49] sm:$0xff]  ;;  %v19732_v7 = vld [vmem:[#allocation2 + $0x59] sm:$0xff]  ;;  %v19738_v8 = vld [vmem:[#allocation2 + $0x71] sm:$0xff] }
 0x4f1   :  { %v19725_v59 = vpack.c.bf16 %v19714_v42, %v19712_v2  ;;  %v19736_v52 = vld [vmem:[#allocation2 + $0x69] sm:$0xff]  ;;  %v19742_v5 = vpack.c.bf16 %v19734_v25, %v19732_v7  ;;  %v19756_v57 = vld [vmem:[#allocation2 + $0x79] sm:$0xff]  ;;  %v19758_v60 = vld [vmem:[#allocation2 + $0x81] sm:$0xff] }
 0x4f2   :  { %v19749_v6 = vpack.c.bf16 %v19738_v8, %v19736_v52  ;;  %v19762_v16 = vpack.c.bf16 %v19758_v60, %v19756_v57 }
 0x4f3   :  { %15376 = vmatpush3.bf16.msra.mxu0 %v17535_v12  ;;  %v17544_v12 = vld [vmem:[%s22370_s2 + $0x2f0] sm:$0xff]   ;;  %22656 = vst [vmem:[#allocation21_spill] sm:$0xff] %v19742_v5 }
 0x4f4   :  { %15377 = vmatprep.subr.bf16.mxu0 %v17536_v32  ;;  %22657 = vst [vmem:[#allocation19_spill] sm:$0xff] %v19749_v6 }
 0x4f6   :  { %15362 = vmatmul.mubr.bf16.gmra.mrb[28].mxu0 %v4304_v51  ;;  %v19670_v51 = vld [vmem:[#allocation2 + $0x11] sm:$0xff] }
 0x4f7   :  { %15378 = vmatpush3.bf16.msra.mxu0 %v17536_v32  ;;  %15381 = vmatprep.mubr.bf16.mxu0 %v4271_v37  ;;  %v19668_v32 = vld [vmem:[#allocation2 + $0x7f] sm:$0xff] }
 0x4f8   :  { %15379 = vmatprep.subr.bf16.mxu0 %v17537_v46  ;;  %v17545_v37 = vld [vmem:[%s22370_s2 + $0x2f8] sm:$0xff]  }
 0x4fb   :  { %15380 = vmatpush3.bf16.msra.mxu0 %v17537_v46  ;;  %v19674_v46 = vpack.c.bf16 %v19668_v32, %v19666_v21 }
 0x4fc   :  { %15397 = vmatprep.subr.bf16.mxu0 %v17538_v18 }
 0x4fe   :  { %15382 = vmatmul.mubr.bf16.vlgmr.msra.gmra.mrb[16].mxu0 %v19604_v30 }
 0x4ff   :  { %15385 = vmatprep.mubr.bf16.mxu0 %v19611_v34  ;;  %15398 = vmatpush3.bf16.msra.mxu0 %v17538_v18  ;;  %v4628_v18 = vpack.c.bf16 %v19670_v51, %v4612_v45 }
 0x500   :  { %15399 = vmatprep.subr.bf16.mxu0 %v17539_v23 }
 0x503   :  { %15400 = vmatpush3.bf16.msra.mxu0 %v17539_v23  ;;  %v17546_v23 = vld [vmem:[%s22370_s2 + $0x300] sm:$0xff]  }
 0x504   :  { %15401 = vmatprep.subr.bf16.mxu0 %v17540_v22 }
 0x506   :  { %15386 = vmatmul.mubr.bf16.gmra.mrb[20].mxu0 %v19628_v10 }
 0x507   :  { %15389 = vmatprep.mubr.bf16.mxu0 %v19635_v62  ;;  %15402 = vmatpush3.bf16.msra.mxu0 %v17540_v22  ;;  %v19684_v22 = vld [vmem:[#allocation2 + $0x19] sm:$0xff] }
 0x508   :  { %15403 = vmatprep.subr.bf16.mxu0 %v17541_v15 }
 0x50b   :  { %15404 = vmatpush3.bf16.msra.mxu0 %v17541_v15  ;;  %v19686_v15 = vld [vmem:[#allocation2 + $0x21] sm:$0xff] }
 0x50c   :  { %15405 = vmatprep.subr.bf16.mxu0 %v17542_v41  ;;  %v19694_v45 = vpack.c.bf16 %v19686_v15, %v19684_v22 }
 0x50e   :  { %15390 = vmatmul.mubr.bf16.gmra.mrb[24].mxu0 %v19652_v48 }
 0x50f   :  { %15393 = vmatprep.mubr.bf16.mxu0 %v19659_v17  ;;  %15406 = vmatpush3.bf16.msra.mxu0 %v17542_v41  ;;  %v19688_v41 = vld [vmem:[#allocation2 + $0x29] sm:$0xff] }
 0x510   :  { %15407 = vmatprep.subr.bf16.mxu0 %v17543_v24 }
 0x513   :  { %15408 = vmatpush3.bf16.msra.mxu0 %v17543_v24  ;;  %v19690_v24 = vld [vmem:[#allocation2 + $0x31] sm:$0xff] }
 0x514   :  { %15409 = vmatprep.subr.bf16.mxu0 %v17544_v12 }
 0x516   :  { %15394 = vmatmul.mubr.bf16.gmra.mrb[28].mxu0 %v19674_v46 }
 0x517   :  { %15410 = vmatpush3.bf16.msra.mxu0 %v17544_v12  ;;  %15413 = vmatprep.mubr.bf16.mxu0 %v4628_v18  ;;  %v17547_v12 = vld [vmem:[%s22370_s2 + $0x308] sm:$0xff]   ;;  %v19701_v18 = vpack.c.bf16 %v19690_v24, %v19688_v41 }
 0x518   :  { %15411 = vmatprep.subr.bf16.mxu0 %v17545_v37 }
 0x51b   :  { %15412 = vmatpush3.bf16.msra.mxu0 %v17545_v37  ;;  %v17548_v37 = vld [vmem:[%s22370_s2 + $0x310] sm:$0xff]  }
 0x51c   :  { %15429 = vmatprep.subr.bf16.mxu0 %v17546_v23 }
 0x51e   :  { %15414 = vmatmul.mubr.bf16.vlgmr.msra.gmra.mrb[16].mxu0 %v19694_v45 }
 0x51f   :  { %15417 = vmatprep.mubr.bf16.mxu0 %v19701_v18  ;;  %15430 = vmatpush3.bf16.msra.mxu0 %v17546_v23  ;;  %v17549_v23 = vld [vmem:[%s22370_s2 + $0x318] sm:$0xff]  }
 0x520   :  { %15431 = vmatprep.subr.bf16.mxu0 %v17547_v12 }
 0x523   :  { %15432 = vmatpush3.bf16.msra.mxu0 %v17547_v12  ;;  %v17550_v12 = vld [vmem:[%s22370_s2 + $0x320] sm:$0xff]  }
 0x524   :  { %15433 = vmatprep.subr.bf16.mxu0 %v17548_v37 }
 0x526   :  { %15418 = vmatmul.mubr.bf16.gmra.mrb[20].mxu0 %v19718_v20 }
 0x527   :  { %15421 = vmatprep.mubr.bf16.mxu0 %v19725_v59  ;;  %15434 = vmatpush3.bf16.msra.mxu0 %v17548_v37  ;;  %v17551_v37 = vld [vmem:[%s22370_s2 + $0x328] sm:$0xff]  }
 0x528   :  { %15435 = vmatprep.subr.bf16.mxu0 %v17549_v23 }
 0x52b   :  { %15436 = vmatpush3.bf16.msra.mxu0 %v17549_v23  ;;  %v17552_v23 = vld [vmem:[%s22370_s2 + $0x330] sm:$0xff]  }
 0x52c   :  { %15437 = vmatprep.subr.bf16.mxu0 %v17550_v12 }
 0x52e   :  { %15422 = vmatmul.mubr.bf16.gmra.mrb[24].mxu0 %v19742_v5  ;;  %v17555_v5 = vld [vmem:[%s22370_s2 + $0x348] sm:$0xff]  }
 0x52f   :  { %15425 = vmatprep.mubr.bf16.mxu0 %v19749_v6  ;;  %15438 = vmatpush3.bf16.msra.mxu0 %v17550_v12  ;;  %v4830_v12 = vpack.c.bf16 %v19594_v53, %v19583_v38  ;;  %v4831_v6 = vpack.c.bf16 %v19598_v40, %v19596_v33  ;;  %v4832_v38 = vpack.c.bf16 %v19618_v54, %v19600_v50  ;;  %v17556_v53 = vld [vmem:[%s22370_s2 + $0x350] sm:$0xff]   ;;  %v17557_v33 = vld [vmem:[%s22370_s2 + $0x358] sm:$0xff]   ;;  %v17559_v50 = vld [vmem:[%s22370_s2 + $0x368] sm:$0xff]  }
 0x530   :  { %15439 = vmatprep.subr.bf16.mxu0 %v17551_v37  ;;  %v4834_v40 = vpack.c.bf16 %v19642_v47, %v19624_v27  ;;  %v4836_v54 = vpack.c.bf16 %v19666_v21, %v19648_v9  ;;  %v17561_v47 = vld [vmem:[%s22370_s2 + $0x378] sm:$0xff]   ;;  %v5017_v9 = vpack.c.bf16 %v19497_v39, %v19494_v61  ;;  %v17563_v21 = vld [vmem:[%s22370_s2 + $0x388] sm:$0xff]  }
 0x531   :  { %v17625_v61 = vld [vmem:[%s22374_s6 + $0x338] sm:$0xff]  }
 0x533   :  { %15440 = vmatpush3.bf16.msra.mxu0 %v17551_v37  ;;  %v17554_v37 = vld [vmem:[%s22370_s2 + $0x340] sm:$0xff]  }
 0x534   :  { %15441 = vmatprep.subr.bf16.mxu0 %v17552_v23 }
 0x536   :  { %15426 = vmatmul.mubr.bf16.gmra.mrb[28].mxu0 %v19762_v16 }
 0x537   :  { %15442 = vmatpush3.bf16.msra.mxu0 %v17552_v23  ;;  %15445 = vmatprep.mubr.bf16.mxu0 %v4830_v12  ;;  %v17564_v23 = vld [vmem:[%s22370_s2 + $0x390] sm:$0xff]   ;;  %v5019_v12 = vpack.c.bf16 %v19509_v14, %v19506_v11 }
 0x538   :  { %15443 = vmatprep.subr.bf16.mxu0 %v17553_v19 }
 0x53b   :  { %15444 = vmatpush3.bf16.msra.mxu0 %v17553_v19  ;;  %v4833_v19 = vpack.c.bf16 %v19622_v44, %v19620_v55  ;;  %v17560_v55 = vld [vmem:[%s22370_s2 + $0x370] sm:$0xff]   ;;  %v19803_v44 = vld [vmem:[#allocation2 + $0x87] sm:$0xff] }
 0x53c   :  { %15461 = vmatprep.subr.bf16.mxu0 %v17554_v37  ;;  %v4837_v27 = vpack.c.bf16 %v19803_v44, %v19668_v32  ;;  %v5018_v32 = vpack.c.bf16 %v19503_v43, %v19500_v63 }
 0x53e   :  { %15446 = vmatmul.mubr.bf16.vlgmr.msra.gmra.mrb[16].mxu0 %v4831_v6  ;;  %v17558_v6 = vld [vmem:[%s22370_s2 + $0x360] sm:$0xff]  }
 0x53f   :  { %15449 = vmatprep.mubr.bf16.mxu0 %v4832_v38  ;;  %15462 = vmatpush3.bf16.msra.mxu0 %v17554_v37  ;;  %v17565_v37 = vld [vmem:[%s22370_s2 + $0x398] sm:$0xff]   ;;  %v5020_v38 = vpack.c.bf16 %v19515_v58, %v19512_v35 }
 0x540   :  { %15463 = vmatprep.subr.bf16.mxu0 %v17555_v5 }
 0x543   :  { %15464 = vmatpush3.bf16.msra.mxu0 %v17555_v5  ;;  %v4835_v5 = vpack.c.bf16 %v19646_v49, %v19644_v36  ;;  %v5016_v36 = vpack.c.bf16 %v19491_v26, %v19488_v31  ;;  %v17562_v49 = vld [vmem:[%s22370_s2 + $0x380] sm:$0xff]  }
 0x544   :  { %15465 = vmatprep.subr.bf16.mxu0 %v17556_v53 }
 0x546   :  { %15450 = vmatmul.mubr.bf16.gmra.mrb[20].mxu0 %v4833_v19  ;;  %v5021_v19 = vpack.c.bf16 %v19521_v1, %v19518_v0 }
 0x547   :  { %15453 = vmatprep.mubr.bf16.mxu0 %v4834_v40  ;;  %15466 = vmatpush3.bf16.msra.mxu0 %v17556_v53  ;;  %v17566_v53 = vld [vmem:[%s22370_s2 + $0x3a0] sm:$0xff]   ;;  %v5022_v40 = vpack.c.bf16 %v19531_v3, %v19528_v4 }
 0x548   :  { %15467 = vmatprep.subr.bf16.mxu0 %v17557_v33 }
 0x54b   :  { %15468 = vmatpush3.bf16.msra.mxu0 %v17557_v33  ;;  %v17567_v33 = vld [vmem:[%s22370_s2 + $0x3a8] sm:$0xff]  }
 0x54c   :  { %15469 = vmatprep.subr.bf16.mxu0 %v17558_v6 }
 0x54e   :  { %15454 = vmatmul.mubr.bf16.gmra.mrb[24].mxu0 %v4835_v5  ;;  %v5023_v5 = vpack.c.bf16 %v19537_v29, %v19534_v28  ;;  %v22675_v29 = vld [vmem:[#allocation37_spill] sm:$0xff] }
 0x54f   :  { %15457 = vmatprep.mubr.bf16.mxu0 %v4836_v54  ;;  %15470 = vmatpush3.bf16.msra.mxu0 %v17558_v6  ;;  %v17568_v6 = vld [vmem:[%s22370_s2 + $0x3b0] sm:$0xff]   ;;  %v5218_v54 = vpack.c.bf16 %v19684_v22, %v19670_v51  ;;  %v5220_v51 = vpack.c.bf16 %v19708_v13, %v19690_v24  ;;  %v5222_v13 = vpack.c.bf16 %v19732_v7, %v19714_v42  ;;  %v17574_v24 = vld [vmem:[%s22370_s2 + $0x3e0] sm:$0xff]  }
 0x550   :  { %15471 = vmatprep.subr.bf16.mxu0 %v17559_v50  ;;  %v17572_v22 = vld [vmem:[%s22370_s2 + $0x3d0] sm:$0xff]   ;;  %v5224_v7 = vpack.c.bf16 %v19756_v57, %v19738_v8  ;;  %v17578_v57 = vld [vmem:[%s22370_s2 + $0x400] sm:$0xff]  }
 0x551   :  { %v17576_v42 = vld [vmem:[%s22370_s2 + $0x3f0] sm:$0xff]  }
 0x552   :  { %v17580_v8 = vld [vmem:[%s22370_s2 + $0x410] sm:$0xff]  }
 0x553   :  { %15472 = vmatpush3.bf16.msra.mxu0 %v17559_v50  ;;  %v17569_v50 = vld [vmem:[%s22370_s2 + $0x3b8] sm:$0xff]  }
 0x554   :  { %15473 = vmatprep.subr.bf16.mxu0 %v17560_v55 }
 0x556   :  { %15458 = vmatmul.mubr.bf16.gmra.mrb[28].mxu0 %v4837_v27  ;;  %v5219_v27 = vpack.c.bf16 %v19688_v41, %v19686_v15  ;;  %v5221_v15 = vpack.c.bf16 %v19712_v2, %v19710_v56  ;;  %v17573_v41 = vld [vmem:[%s22370_s2 + $0x3d8] sm:$0xff]   ;;  %v5223_v2 = vpack.c.bf16 %v19736_v52, %v19734_v25  ;;  %v17575_v56 = vld [vmem:[%s22370_s2 + $0x3e8] sm:$0xff]  }
 0x557   :  { %15474 = vmatpush3.bf16.msra.mxu0 %v17560_v55  ;;  %15477 = vmatprep.mubr.bf16.mxu0 %v5016_v36  ;;  %v17570_v55 = vld [vmem:[%s22370_s2 + $0x3c0] sm:$0xff]   ;;  %v19885_v36 = vld [vmem:[#allocation2 + $0x89] sm:$0xff]  ;;  %v17577_v25 = vld [vmem:[%s22370_s2 + $0x3f8] sm:$0xff]  }
 0x558   :  { %15475 = vmatprep.subr.bf16.mxu0 %v17561_v47  ;;  %v5225_v52 = vpack.c.bf16 %v19885_v36, %v19758_v60  ;;  %v17579_v60 = vld [vmem:[%s22370_s2 + $0x408] sm:$0xff]  }
 0x55b   :  { %15476 = vmatpush3.bf16.msra.mxu0 %v17561_v47  ;;  %v17571_v47 = vld [vmem:[%s22370_s2 + $0x3c8] sm:$0xff]  }
 0x55c   :  { %15493 = vmatprep.subr.bf16.mxu0 %v17562_v49 }
 0x55e   :  { %15478 = vmatmul.mubr.bf16.vlgmr.msra.gmra.mrb[16].mxu0 %v5017_v9  ;;  %v5607_v9 = vld [vmem:[#allocation2 + $0x20] sm:$0xff] }
 0x55f   :  { %15481 = vmatprep.mubr.bf16.mxu0 %v5018_v32  ;;  %15494 = vmatpush3.bf16.msra.mxu0 %v17562_v49  ;;  %v5606_v49 = vld [vmem:[#allocation2 + $0x18] sm:$0xff] }
 0x560   :  { %15495 = vmatprep.subr.bf16.mxu0 %v17563_v21  ;;  %v17585_v32 = vld [vmem:[%s22370_s2 + $0x438] sm:$0xff]  }
 0x563   :  { %15496 = vmatpush3.bf16.msra.mxu0 %v17563_v21 }
 0x564   :  { %15497 = vmatprep.subr.bf16.mxu0 %v17564_v23 }
 0x566   :  { %15482 = vmatmul.mubr.bf16.gmra.mrb[20].mxu0 %v5019_v12  ;;  %v5609_v12 = vld [vmem:[#allocation2 + $0x30] sm:$0xff] }
 0x567   :  { %15485 = vmatprep.mubr.bf16.mxu0 %v5020_v38  ;;  %15498 = vmatpush3.bf16.msra.mxu0 %v17564_v23  ;;  %v5608_v23 = vld [vmem:[#allocation2 + $0x28] sm:$0xff]  ;;  %v5611_v38 = vld [vmem:[#allocation2 + $0x40] sm:$0xff] }
 0x568   :  { %15499 = vmatprep.subr.bf16.mxu0 %v17565_v37 }
 0x56b   :  { %15500 = vmatpush3.bf16.msra.mxu0 %v17565_v37  ;;  %v5610_v37 = vld [vmem:[#allocation2 + $0x38] sm:$0xff] }
 0x56c   :  { %15501 = vmatprep.subr.bf16.mxu0 %v17566_v53 }
 0x56e   :  { %15486 = vmatmul.mubr.bf16.gmra.mrb[24].mxu0 %v5021_v19  ;;  %v5624_v19 = vpack.c.bf16 %v5611_v38, %v5610_v37 }
 0x56f   :  { %15489 = vmatprep.mubr.bf16.mxu0 %v5022_v40  ;;  %15502 = vmatpush3.bf16.msra.mxu0 %v17566_v53  ;;  %v17587_v53 = vld [vmem:[%s22370_s2 + $0x448] sm:$0xff]  }
 0x570   :  { %15503 = vmatprep.subr.bf16.mxu0 %v17567_v33  ;;  %v5612_v40 = vld [vmem:[#allocation2 + $0x48] sm:$0xff] }
 0x573   :  { %15504 = vmatpush3.bf16.msra.mxu0 %v17567_v33  ;;  %v17588_v33 = vld [vmem:[%s22370_s2 + $0x450] sm:$0xff]  }
 0x574   :  { %15505 = vmatprep.subr.bf16.mxu0 %v17568_v6 }
 0x576   :  { %15490 = vmatmul.mubr.bf16.gmra.mrb[28].mxu0 %v5023_v5  ;;  %v5614_v5 = vld [vmem:[#allocation2 + $0x58] sm:$0xff] }
 0x577   :  { %15506 = vmatpush3.bf16.msra.mxu0 %v17568_v6  ;;  %15509 = vmatprep.mubr.bf16.mxu0 %v5218_v54  ;;  %v5613_v6 = vld [vmem:[#allocation2 + $0x50] sm:$0xff] }
 0x578   :  { %15507 = vmatprep.subr.bf16.mxu0 %v17569_v50  ;;  %v5625_v54 = vpack.c.bf16 %v5613_v6, %v5612_v40 }
 0x57b   :  { %15508 = vmatpush3.bf16.msra.mxu0 %v17569_v50  ;;  %v5615_v50 = vld [vmem:[#allocation2 + $0x60] sm:$0xff] }
 0x57c   :  { %15525 = vmatprep.subr.bf16.mxu0 %v17570_v55 }
 0x57e   :  { %15510 = vmatmul.mubr.bf16.vlgmr.msra.gmra.mrb[16].mxu0 %v5219_v27  ;;  %v5626_v27 = vpack.c.bf16 %v5615_v50, %v5614_v5  ;;  %v17601_v5 = vld [vmem:[%s22374_s6 + $0x2b8] sm:$0xff]   ;;  %v22662_v50 = vld [vmem:[#allocation23_spill] sm:$0xff] }
 0x57f   :  { %15513 = vmatprep.mubr.bf16.mxu0 %v5220_v51  ;;  %15526 = vmatpush3.bf16.msra.mxu0 %v17570_v55  ;;  %v17589_v55 = vld [vmem:[%s22370_s2 + $0x458] sm:$0xff]   ;;  %v5616_v51 = vld [vmem:[#allocation2 + $0x68] sm:$0xff] }
 0x580   :  { %15527 = vmatprep.subr.bf16.mxu0 %v17571_v47 }
 0x583   :  { %15528 = vmatpush3.bf16.msra.mxu0 %v17571_v47  ;;  %v17590_v47 = vld [vmem:[%s22370_s2 + $0x460] sm:$0xff]  }
 0x584   :  { %15529 = vmatprep.subr.bf16.mxu0 %v17572_v22 }
 0x586   :  { %15514 = vmatmul.mubr.bf16.gmra.mrb[20].mxu0 %v5221_v15  ;;  %v5618_v15 = vld [vmem:[#allocation2 + $0x78] sm:$0xff] }
 0x587   :  { %15517 = vmatprep.mubr.bf16.mxu0 %v5222_v13  ;;  %15530 = vmatpush3.bf16.msra.mxu0 %v17572_v22  ;;  %v5617_v22 = vld [vmem:[#allocation2 + $0x70] sm:$0xff] }
 0x588   :  { %15531 = vmatprep.subr.bf16.mxu0 %v17573_v41  ;;  %v5627_v13 = vpack.c.bf16 %v5617_v22, %v5616_v51  ;;  %v22663_v22 = vld [vmem:[#allocation25_spill] sm:$0xff] }
 0x58b   :  { %15532 = vmatpush3.bf16.msra.mxu0 %v17573_v41  ;;  %v5619_v41 = vld [vmem:[#allocation2 + $0x80] sm:$0xff] }
 0x58c   :  { %15533 = vmatprep.subr.bf16.mxu0 %v17574_v24 }
 0x58e   :  { %15518 = vmatmul.mubr.bf16.gmra.mrb[24].mxu0 %v5223_v2  ;;  %v5628_v2 = vpack.c.bf16 %v5619_v41, %v5618_v15 }
 0x58f   :  { %15521 = vmatprep.mubr.bf16.mxu0 %v5224_v7  ;;  %15534 = vmatpush3.bf16.msra.mxu0 %v17574_v24  ;;  %v17591_v24 = vld [vmem:[%s22370_s2 + $0x468] sm:$0xff]  }
 0x590   :  { %15535 = vmatprep.subr.bf16.mxu0 %v17575_v56  ;;  %v5620_v7 = vld [vmem:[#allocation2 + $0x88] sm:$0xff] }
 0x593   :  { %15536 = vmatpush3.bf16.msra.mxu0 %v17575_v56  ;;  %v17592_v56 = vld [vmem:[%s22370_s2 + $0x470] sm:$0xff]  }
 0x594   :  { %15537 = vmatprep.subr.bf16.mxu0 %v17576_v42 }
 0x596   :  { %15522 = vmatmul.mubr.bf16.gmra.mrb[28].mxu0 %v5225_v52 }
 0x597   :  { %15538 = vmatpush3.bf16.msra.mxu0 %v17576_v42  ;;  %15541 = vmatprep.mubr.bf16.mxu0 %v19604_v30  ;;  %v17581_v30 = vld [vmem:[%s22370_s2 + $0x418] sm:$0xff]   ;;  %v5621_v42 = vld [vmem:[#allocation2 + $0x90] sm:$0xff] }
 0x598   :  { %15539 = vmatprep.subr.bf16.mxu0 %v17577_v25  ;;  %v5629_v52 = vpack.c.bf16 %v5621_v42, %v5620_v7  ;;  %v20029_v7 = vld [vmem:[%s22374_s6 + $0x240] sm:$0xff]  }
 0x59b   :  { %15540 = vmatpush3.bf16.msra.mxu0 %v17577_v25  ;;  %v17593_v25 = vld [vmem:[%s22370_s2 + $0x478] sm:$0xff]  }
 0x59c   :  { %15557 = vmatprep.subr.bf16.mxu0 %v17578_v57 }
 0x59e   :  { %15542 = vmatmul.mubr.bf16.vlgmr.msra.gmra.mrb[16].mxu0 %v19611_v34  ;;  %v17582_v34 = vld [vmem:[%s22370_s2 + $0x420] sm:$0xff]  }
 0x59f   :  { %15545 = vmatprep.mubr.bf16.mxu0 %v19628_v10  ;;  %15558 = vmatpush3.bf16.msra.mxu0 %v17578_v57  ;;  %v17583_v10 = vld [vmem:[%s22370_s2 + $0x428] sm:$0xff]   ;;  %v22658_v57 = vld [vmem:[#allocation21_spill] sm:$0xff] }
 0x5a0   :  { %15559 = vmatprep.subr.bf16.mxu0 %v17579_v60 }
 0x5a3   :  { %15560 = vmatpush3.bf16.msra.mxu0 %v17579_v60  ;;  %v22659_v60 = vld [vmem:[#allocation19_spill] sm:$0xff] }
 0x5a4   :  { %15561 = vmatprep.subr.bf16.mxu0 %v17580_v8 }
 0x5a6   :  { %15546 = vmatmul.mubr.bf16.gmra.mrb[20].mxu0 %v19635_v62  ;;  %v17584_v62 = vld [vmem:[%s22370_s2 + $0x430] sm:$0xff]  }
 0x5a7   :  { %15549 = vmatprep.mubr.bf16.mxu0 %v19652_v48  ;;  %15562 = vmatpush3.bf16.msra.mxu0 %v17580_v8  ;;  %v5419_v48 = vld [vmem:[#allocation2 + $0x8f] sm:$0xff] }
 0x5a8   :  { %15563 = vmatprep.subr.bf16.mxu0 %v17581_v30  ;;  %v5427_v21 = vpack.c.bf16 %v5419_v48, %v19803_v44  ;;  %v5623_v44 = vpack.c.bf16 %v5609_v12, %v5608_v23  ;;  %v5823_v8 = vld [vmem:[#allocation2 + $0x91] sm:$0xff] }
 0x5a9   :  { %v17600_v23 = vld [vmem:[%s22374_s6 + $0x2b0] sm:$0xff]  }
 0x5ab   :  { %15564 = vmatpush3.bf16.msra.mxu0 %v17581_v30  ;;  %v5831_v30 = vpack.c.bf16 %v5823_v8, %v19885_v36  ;;  %v19974_v36 = vld [vmem:[%s22371_s3 + $0x1] ss:$0 sm:$0xff] }
 0x5ac   :  { %15565 = vmatprep.subr.bf16.mxu0 %v17582_v34 }
 0x5ae   :  { %15550 = vmatmul.mubr.bf16.gmra.mrb[24].mxu0 %v19659_v17  ;;  %v5622_v17 = vpack.c.bf16 %v5607_v9, %v5606_v49 }
 0x5af   :  { %15553 = vmatprep.mubr.bf16.mxu0 %v19674_v46  ;;  %15566 = vmatpush3.bf16.msra.mxu0 %v17582_v34  ;;  %v17586_v46 = vld [vmem:[%s22370_s2 + $0x440] sm:$0xff]  }
 0x5b0   :  { %15567 = vmatprep.subr.bf16.mxu0 %v17583_v10 }
 0x5b3   :  { %15568 = vmatpush3.bf16.msra.mxu0 %v17583_v10 }
 0x5b4   :  { %15569 = vmatprep.subr.bf16.mxu0 %v17584_v62 }
 0x5b6   :  { %15554 = vmatmul.mubr.bf16.gmra.mrb[28].mxu0 %v5427_v21 }
 0x5b7   :  { %15570 = vmatpush3.bf16.msra.mxu0 %v17584_v62  ;;  %15573 = vmatprep.mubr.bf16.mxu0 %v5622_v17  ;;  %v17599_v62 = vld [vmem:[%s22374_s6 + $0x2a8] sm:$0xff]  }
 0x5b8   :  { %15571 = vmatprep.subr.bf16.mxu0 %v17585_v32 }
 0x5bb   :  { %15572 = vmatpush3.bf16.msra.mxu0 %v17585_v32 }
 0x5bc   :  { %15589 = vmatprep.subr.bf16.mxu0 %v17586_v46 }
 0x5be   :  { %15574 = vmatmul.mubr.bf16.vlgmr.msra.gmra.mrb[16].mxu0 %v5623_v44  ;;  %v22660_v44 = vld [vmem:[#allocation22_spill] sm:$0xff] }
 0x5bf   :  { %15577 = vmatprep.mubr.bf16.mxu0 %v5624_v19  ;;  %15590 = vmatpush3.bf16.msra.mxu0 %v17586_v46  ;;  %v22661_v19 = vld [vmem:[#allocation24_spill] sm:$0xff] }
 0x5c0   :  { %15591 = vmatprep.subr.bf16.mxu0 %v17587_v53 }
 0x5c3   :  { %15592 = vmatpush3.bf16.msra.mxu0 %v17587_v53 }
 0x5c4   :  { %15593 = vmatprep.subr.bf16.mxu0 %v17588_v33 }
 0x5c6   :  { %15578 = vmatmul.mubr.bf16.gmra.mrb[20].mxu0 %v5625_v54 }
 0x5c7   :  { %15581 = vmatprep.mubr.bf16.mxu0 %v5626_v27  ;;  %15594 = vmatpush3.bf16.msra.mxu0 %v17588_v33 }
 0x5c8   :  { %15595 = vmatprep.subr.bf16.mxu0 %v17589_v55 }
 0x5cb   :  { %15596 = vmatpush3.bf16.msra.mxu0 %v17589_v55 }
 0x5cc   :  { %15597 = vmatprep.subr.bf16.mxu0 %v17590_v47 }
 0x5ce   :  { %15582 = vmatmul.mubr.bf16.gmra.mrb[24].mxu0 %v5627_v13 }
 0x5cf   :  { %15585 = vmatprep.mubr.bf16.mxu0 %v5628_v2  ;;  %15598 = vmatpush3.bf16.msra.mxu0 %v17590_v47 }
 0x5d0   :  { %15599 = vmatprep.subr.bf16.mxu0 %v17591_v24 }
 0x5d3   :  { %15600 = vmatpush3.bf16.msra.mxu0 %v17591_v24 }
 0x5d4   :  { %15601 = vmatprep.subr.bf16.mxu0 %v17592_v56 }
 0x5d6   :  { %15586 = vmatmul.mubr.bf16.gmra.mrb[28].mxu0 %v5629_v52  ;;  %v22664_v52 = vld [vmem:[#allocation26_spill] sm:$0xff] }
 0x5d7   :  { %15602 = vmatpush3.bf16.msra.mxu0 %v17592_v56  ;;  %15605 = vmatprep.mubr.bf16.mxu0 %v19694_v45  ;;  %v17594_v45 = vld [vmem:[%s22374_s6 + $0x280] sm:$0xff]  }
 0x5d8   :  { %15603 = vmatprep.subr.bf16.mxu0 %v17593_v25  ;;  %15621 = vmatprep.subr.bf16.mxu1 %v17594_v45 }
 0x5d9   :  { %15622 = vmatpush3.bf16.msra.mxu1 %v17594_v45  ;;  %v22665_v45 = vld [vmem:[#allocation27_spill] sm:$0xff] }
 0x5db   :  { %15604 = vmatpush3.bf16.msra.mxu0 %v17593_v25 }
 0x5de   :  { %15606 = vmatmul.mubr.bf16.vlgmr.msra.gmra.mrb[16].mxu0 %v19701_v18  ;;  %v17598_v18 = vld [vmem:[%s22374_s6 + $0x2a0] sm:$0xff]  }
 0x5df   :  { %15609 = vmatprep.mubr.bf16.mxu0 %v19718_v20  ;;  %v17597_v20 = vld [vmem:[%s22374_s6 + $0x298] sm:$0xff]  }
 0x5e6   :  { %15610 = vmatmul.mubr.bf16.gmra.mrb[20].mxu0 %v19725_v59  ;;  %v17595_v59 = vld [vmem:[%s22374_s6 + $0x288] sm:$0xff]  }
 0x5e7   :  { %15613 = vmatprep.mubr.bf16.mxu0 %v22658_v57  ;;  %15623 = vmatprep.subr.bf16.mxu1 %v17595_v59 }
 0x5e8   :  { %15624 = vmatpush3.bf16.msra.mxu1 %v17595_v59 }
 0x5ee   :  { %15614 = vmatmul.mubr.bf16.gmra.mrb[24].mxu0 %v22659_v60 }
 0x5ef   :  { %15617 = vmatprep.mubr.bf16.mxu0 %v19762_v16  ;;  %v17596_v16 = vld [vmem:[%s22374_s6 + $0x290] sm:$0xff]  }
 0x5f0   :  { %15625 = vmatprep.subr.bf16.mxu1 %v17596_v16 }
 0x5f1   :  { %15626 = vmatpush3.bf16.msra.mxu1 %v17596_v16 }
 0x5f2   :  { %15627 = vmatprep.subr.bf16.mxu1 %v17597_v20 }
 0x5f5   :  { %15628 = vmatpush3.bf16.msra.mxu1 %v17597_v20 }
 0x5f6   :  { %15618 = vmatmul.mubr.bf16.gmra.mrb[28].mxu0 %v5831_v30  ;;  %15629 = vmatprep.subr.bf16.mxu1 %v17598_v18 }
 0x5f9   :  { %15630 = vmatpush3.bf16.msra.mxu1 %v17598_v18  ;;  %v22666_v18 = vld [vmem:[#allocation28_spill] sm:$0xff] }
 0x5fa   :  { %15631 = vmatprep.subr.bf16.mxu1 %v17599_v62 }
 0x5fd   :  { %15632 = vmatpush3.bf16.msra.mxu1 %v17599_v62 }
 0x5fe   :  { %15633 = vmatprep.subr.bf16.mxu1 %v17600_v23 }
 0x601   :  { %15634 = vmatpush3.bf16.msra.mxu1 %v17600_v23 }
 0x602   :  { %15635 = vmatprep.subr.bf16.mxu1 %v17601_v5 }
 0x605   :  { %15636 = vmatpush3.bf16.msra.mxu1 %v17601_v5 }
 0x606   :  { %15653 = vmatprep.subr.bf16.mxu1 %v20029_v7 }
 0x6b1   :  { %v15607_v34 = vpop.f32.mrb[16].mxu0 }
 0x6b2   :  { %v5931_v10 = vpop.f32.mrb[17].mxu0  ;;  %v19980_v48 = vadd.f32 %v15607_v34, %v19974_v36 }
 0x6b3   :  { %v19983_v49 = vadd.f32 %v19974_v36, %v5931_v10  ;;  %v15608_v9 = vpop.f32.mrb[18].mxu0 }
 0x6b4   :  { %v19986_v21 = vadd.f32 %v15608_v9, %v19974_v36  ;;  %v5934_v32 = vpop.f32.mrb[19].mxu0  ;;  %v22461_v12 = vmax.f32 %v19980_v48, 0.0 }
 0x6b5   :  { %v22463_v17 = vmax.f32 %v19983_v49, 0.0  ;;  %v19990_v46 = vadd.f32 %v19974_v36, %v5934_v32 }
 0x6b6   :  { %v22460_v38 = vmax.f32 %v19986_v21, 0.0  ;;  %v6056_v54 = vmul.f32 %v22461_v12, %v22662_v50 }
 0x6b7   :  { %v22462_v37 = vmax.f32 %v19990_v46, 0.0  ;;  %v6054_v53 = vmul.f32 %v22463_v17, %v22660_v44 }
 0x6b8   :  { %v6057_v15 = vmul.f32 %v22460_v38, %v22663_v22 }
 0x6b9   :  { %v6055_v33 = vmul.f32 %v22462_v37, %v22661_v19  ;;  %v15611_v40 = vpop.f32.mrb[20].mxu0 }
 0x6ba   :  { %v5947_v6 = vpop.f32.mrb[21].mxu0  ;;  %v20011_v27 = vadd.f32 %v15611_v40, %v19974_v36 }
 0x6bb   :  { %v6070_v55 = vadd.f32 %v6055_v33, %v6054_v53  ;;  %v20014_v47 = vadd.f32 %v19974_v36, %v5947_v6  ;;  %v15612_v51 = vpop.f32.mrb[22].mxu0  ;;  %v22667_v33 = vld [vmem:[#allocation29_spill] sm:$0xff] }
 0x6bc   :  { %v5950_v41 = vpop.f32.mrb[23].mxu0  ;;  %v20021_v2 = vadd.f32 %v15612_v51, %v19974_v36  ;;  %v22458_v42 = vmax.f32 %v20011_v27, 0.0  ;;  %v22668_v51 = vld [vmem:[#allocation30_spill] sm:$0xff] }
 0x6bd   :  { %v6071_v13 = vadd.f32 %v6070_v55, %v6056_v54  ;;  %v22459_v24 = vmax.f32 %v20014_v47, 0.0  ;;  %v20024_v56 = vadd.f32 %v19974_v36, %v5950_v41 }
 0x6be   :  { %v6041_v30 = vmax.f32 %v20021_v2, 0.0  ;;  %v6060_v34 = vmul.f32 %v22458_v42, %v22666_v18 }
 0x6bf   :  { %v6058_v25 = vmul.f32 %v22459_v24, %v22664_v52  ;;  %v6072_v57 = vadd.f32 %v6071_v13, %v6057_v15  ;;  %v6039_v60 = vmax.f32 %v20024_v56, 0.0 }
 0x6c0   :  { %v6061_v40 = vmul.f32 %v6041_v30, %v22667_v33 }
 0x6c1   :  { %v6073_v8 = vadd.f32 %v6072_v57, %v6058_v25  ;;  %v6059_v59 = vmul.f32 %v6039_v60, %v22665_v45  ;;  %v15615_v16 = vpop.f32.mrb[24].mxu0  ;;  %v22669_v25 = vld [vmem:[#allocation31_spill] sm:$0xff] }
 0x6c2   :  { %v5963_v20 = vpop.f32.mrb[25].mxu0  ;;  %v6028_v62 = vadd.f32 %v15615_v16, %v19974_v36  ;;  %v22670_v16 = vld [vmem:[#allocation32_spill] sm:$0xff] }
 0x6c3   :  { %v6074_v10 = vadd.f32 %v6073_v8, %v6059_v59  ;;  %v6026_v9 = vadd.f32 %v19974_v36, %v5963_v20  ;;  %v15616_v32 = vpop.f32.mrb[26].mxu0 }
 0x6c4   :  { %v6029_v23 = vadd.f32 %v15616_v32, %v19974_v36  ;;  %v5966_v53 = vpop.f32.mrb[27].mxu0  ;;  %v6044_v55 = vmax.f32 %v6028_v62, 0.0 }
 0x6c5   :  { %v6075_v6 = vadd.f32 %v6074_v10, %v6060_v34  ;;  %v6042_v5 = vmax.f32 %v6026_v9, 0.0  ;;  %v6027_v54 = vadd.f32 %v19974_v36, %v5966_v53  ;;  %v22671_v9 = vld [vmem:[#allocation33_spill] sm:$0xff] }
 0x6c6   :  { %v6045_v2 = vmax.f32 %v6029_v23, 0.0  ;;  %v6064_v20 = vmul.f32 %v6044_v55, %v22670_v16 }
 0x6c7   :  { %v6062_v15 = vmul.f32 %v6042_v5, %v22668_v51  ;;  %v6076_v41 = vadd.f32 %v6075_v6, %v6061_v40  ;;  %v6043_v13 = vmax.f32 %v6027_v54, 0.0 }
 0x6c8   :  { %v6065_v62 = vmul.f32 %v6045_v2, %v22671_v9 }
 0x6c9   :  { %v6077_v56 = vadd.f32 %v6076_v41, %v6062_v15  ;;  %v6063_v57 = vmul.f32 %v6043_v13, %v22669_v25  ;;  %v15619_v8 = vpop.f32.mrb[28].mxu0  ;;  %v22672_v15 = vld [vmem:[#allocation34_spill] sm:$0xff] }
 0x6ca   :  { %v5979_v59 = vpop.f32.mrb[29].mxu0  ;;  %v6032_v42 = vadd.f32 %v15619_v8, %v19974_v36  ;;  %v22673_v8 = vld [vmem:[#allocation35_spill] sm:$0xff] }
 0x6cb   :  { %v6078_v32 = vadd.f32 %v6077_v56, %v6063_v57  ;;  %v6030_v34 = vadd.f32 %v19974_v36, %v5979_v59  ;;  %v15620_v10 = vpop.f32.mrb[30].mxu0  ;;  %v22674_v59 = vld [vmem:[#allocation36_spill] sm:$0xff] }
 0x6cc   :  { %v5982_v53 = vpop.f32.mrb[31].mxu0  ;;  %v6033_v23 = vadd.f32 %v15620_v10, %v19974_v36  ;;  %v6048_v54 = vmax.f32 %v6032_v42, 0.0 }
 0x6cd   :  { %v6079_v24 = vadd.f32 %v6078_v32, %v6064_v20  ;;  %v6046_v40 = vmax.f32 %v6030_v34, 0.0  ;;  %v6031_v6 = vadd.f32 %v19974_v36, %v5982_v53 }
 0x6ce   :  { %v6049_v57 = vmax.f32 %v6033_v23, 0.0  ;;  %v6068_v17 = vmul.f32 %v6048_v54, %v22674_v59 }
 0x6cf   :  { %v6066_v41 = vmul.f32 %v6046_v40, %v22672_v15  ;;  %v6080_v38 = vadd.f32 %v6079_v24, %v6065_v62  ;;  %v6047_v12 = vmax.f32 %v6031_v6, 0.0  ;;  %v22676_v24 = vmax.f32 %v19983_v49, 0.0 }
 0x6d0   :  { %v6069_v4 = vmul.f32 %v6049_v57, %v22675_v29  ;;  %v22677_v62 = vmax.f32 %v19990_v46, 0.0  ;;  %v22681_v49 = vmax.f32 %v20011_v27, 0.0 }
 0x6d1   :  { %v6081_v56 = vadd.f32 %v6080_v38, %v6066_v41  ;;  %v6067_v37 = vmul.f32 %v6047_v12, %v22673_v8 }
 0x6d3   :  { %v6082_v3 = vadd.f32 %v6081_v56, %v6067_v37  ;;  %v22678_v37 = vmax.f32 %v19980_v48, 0.0 }
 0x6d5   :  { %v6083_v20 = vadd.f32 %v6082_v3, %v6068_v17 }
 0x6d7   :  { %v6084_v32 = vadd.f32 %v6083_v20, %v6069_v4  ;;  %v22679_v4 = vmax.f32 %v19986_v21, 0.0 }
 0x6d9   :  { %v6085_v34 = vrot.slane %v6084_v32, 4 }
 0x6db   :  { %v6086_v10 = vadd.f32 %v6085_v34, %v6084_v32 }
 0x6dd   :  { %v6087_v28 = vrot.slane %v6086_v10, 2 }
 0x6df   :  { %v6088_v36 = vadd.f32 %v6087_v28, %v6086_v10  ;;  %v22680_v28 = vmax.f32 %v20014_v47, 0.0 }
 0x6e1   :  { %v6089_v42 = vrot.slane %v6088_v36, 1 }
 0x6e3   :  { %v6090_v53 = vadd.f32 %v6089_v42, %v6088_v36 }
 0x6e5   :  { %v6091_v58 = vmul.f32 0.013888889, %v6090_v53 }
 0x6e7   :  { %v20061_v38 = vsub.f32 %v22676_v24, %v6091_v58  ;;  %v20065_v23 = vsub.f32 %v22677_v62, %v6091_v58  ;;  %v20069_v6 = vsub.f32 %v22678_v37, %v6091_v58  ;;  %v20073_v3 = vsub.f32 %v22679_v4, %v6091_v58 }
 0x6e8   :  { %v20077_v17 = vsub.f32 %v22680_v28, %v6091_v58  ;;  %v20079_v41 = vsub.f32 %v6039_v60, %v6091_v58  ;;  %v20083_v56 = vsub.f32 %v22681_v49, %v6091_v58  ;;  %v20085_v46 = vsub.f32 %v6041_v30, %v6091_v58 }
 0x6e9   :  { %v20087_v20 = vsub.f32 %v6042_v5, %v6091_v58  ;;  %v20089_v48 = vsub.f32 %v6043_v13, %v6091_v58  ;;  %v20091_v32 = vsub.f32 %v6044_v55, %v6091_v58  ;;  %v20093_v21 = vsub.f32 %v6045_v2, %v6091_v58 }
 0x6ea   :  { %v20095_v34 = vsub.f32 %v6046_v40, %v6091_v58  ;;  %v20097_v47 = vsub.f32 %v6047_v12, %v6091_v58  ;;  %v20099_v60 = vsub.f32 %v6048_v54, %v6091_v58  ;;  %v20101_v10 = vsub.f32 %v6049_v57, %v6091_v58 }
 0x6eb   :  { %v6108_v27 = vmul.f32 %v20061_v38, %v22660_v44  ;;  %v6109_v30 = vmul.f32 %v20065_v23, %v22661_v19  ;;  %v6110_v5 = vmul.f32 %v20069_v6, %v22662_v50  ;;  %v6111_v2 = vmul.f32 %v20073_v3, %v22663_v22 }
 0x6ec   :  { %v6112_v12 = vmul.f32 %v20077_v17, %v22664_v52  ;;  %v6113_v54 = vmul.f32 %v20079_v41, %v22665_v45  ;;  %v6114_v42 = vmul.f32 %v20083_v56, %v22666_v18  ;;  %v6115_v62 = vmul.f32 %v20085_v46, %v22667_v33 }
 0x6ed   :  { %v6124_v55 = vmul.f32 %v6108_v27, %v6108_v27  ;;  %v6125_v13 = vmul.f32 %v6109_v30, %v6109_v30  ;;  %v6126_v40 = vmul.f32 %v6110_v5, %v6110_v5  ;;  %v6127_v57 = vmul.f32 %v6111_v2, %v6111_v2 }
 0x6ee   :  { %v6128_v53 = vmul.f32 %v6112_v12, %v6112_v12  ;;  %v6129_v37 = vmul.f32 %v6113_v54, %v6113_v54  ;;  %v6116_v28 = vmul.f32 %v20087_v20, %v22668_v51  ;;  %v6130_v49 = vmul.f32 %v6114_v42, %v6114_v42 }
 0x6ef   :  { %v6140_v58 = vadd.f32 %v6125_v13, %v6124_v55  ;;  %v6117_v30 = vmul.f32 %v20089_v48, %v22669_v25  ;;  %v6131_v5 = vmul.f32 %v6115_v62, %v6115_v62  ;;  %v6118_v13 = vmul.f32 %v20091_v32, %v22670_v16 }
 0x6f0   :  { %v6132_v2 = vmul.f32 %v6116_v28, %v6116_v28 }
 0x6f1   :  { %v6141_v36 = vadd.f32 %v6140_v58, %v6126_v40  ;;  %v6119_v40 = vmul.f32 %v20093_v21, %v22671_v9  ;;  %v6133_v58 = vmul.f32 %v6117_v30, %v6117_v30 }
 0x6f3   :  { %v6142_v24 = vadd.f32 %v6141_v36, %v6127_v57  ;;  %v6120_v57 = vmul.f32 %v20095_v34, %v22672_v15  ;;  %v6134_v36 = vmul.f32 %v6118_v13, %v6118_v13 }
 0x6f5   :  { %v6143_v4 = vadd.f32 %v6142_v24, %v6128_v53  ;;  %v6121_v53 = vmul.f32 %v20097_v47, %v22673_v8  ;;  %v6135_v24 = vmul.f32 %v6119_v40, %v6119_v40 }
 0x6f7   :  { %v6144_v27 = vadd.f32 %v6143_v4, %v6129_v37  ;;  %v6122_v37 = vmul.f32 %v20099_v60, %v22674_v59  ;;  %v6136_v4 = vmul.f32 %v6120_v57, %v6120_v57 }
 0x6f9   :  { %v6145_v55 = vadd.f32 %v6144_v27, %v6130_v49  ;;  %v6123_v49 = vmul.f32 %v20101_v10, %v22675_v29  ;;  %v6137_v27 = vmul.f32 %v6121_v53, %v6121_v53 }
 0x6fb   :  { %v6146_v12 = vadd.f32 %v6145_v55, %v6131_v5  ;;  %v6138_v5 = vmul.f32 %v6122_v37, %v6122_v37 }
 0x6fd   :  { %v6147_v54 = vadd.f32 %v6146_v12, %v6132_v2  ;;  %v6139_v2 = vmul.f32 %v6123_v49, %v6123_v49 }
 0x6ff   :  { %v6148_v42 = vadd.f32 %v6147_v54, %v6133_v58 }
 0x701   :  { %v6149_v62 = vadd.f32 %v6148_v42, %v6134_v36 }
 0x703   :  { %v6150_v28 = vadd.f32 %v6149_v62, %v6135_v24 }
 0x705   :  { %v6151_v30 = vadd.f32 %v6150_v28, %v6136_v4  ;;  %v13190_v4 = vld [vmem:[%s22372_s4 + $0x1] ss:$0 sm:$0xff] }
 0x707   :  { %v6152_v55 = vadd.f32 %v6151_v30, %v6137_v27 }
 0x709   :  { %v6153_v13 = vadd.f32 %v6152_v55, %v6138_v5 }
 0x70b   :  { %v6154_v12 = vadd.f32 %v6153_v13, %v6139_v2 }
 0x70d   :  { %v6155_v58 = vrot.slane %v6154_v12, 4 }
 0x70f   :  { %v6156_v54 = vadd.f32 %v6155_v58, %v6154_v12 }
 0x711   :  { %v6157_v1 = vrot.slane %v6156_v54, 2 }
 0x713   :  { %v6158_v40 = vadd.f32 %v6157_v1, %v6156_v54 }
 0x715   :  { %v6159_v36 = vrot.slane %v6158_v40, 1 }
 0x717   :  { %v6160_v42 = vadd.f32 %v6159_v36, %v6158_v40 }
 0x719   :  { %v6161_v35 = vmul.f32 0.013888889, %v6160_v42 }
 0x71b   :  { %v6162_v0 = vadd.f32 1e-05, %v6161_v35 }
 0x71d   :  { %17814 = vrsqrt.f32 %v6162_v0 }
 0x727   :  { %v17815_v57 = vpop.eup %17814 }
 0x728   :  { %v6164_v24 = vmul.f32 %v17815_v57, %v20061_v38  ;;  %v6165_v53 = vmul.f32 %v17815_v57, %v20065_v23  ;;  %v6166_v62 = vmul.f32 %v17815_v57, %v20069_v6  ;;  %v6167_v37 = vmul.f32 %v17815_v57, %v20073_v3 }
 0x729   :  { %v6168_v1 = vmul.f32 %v17815_v57, %v20077_v17  ;;  %v6169_v28 = vmul.f32 %v17815_v57, %v20079_v41  ;;  %v6170_v35 = vmul.f32 %v17815_v57, %v20083_v56  ;;  %v6171_v0 = vmul.f32 %v17815_v57, %v20085_v46 }
 0x72a   :  { %v6172_v38 = vmul.f32 %v17815_v57, %v20087_v20  ;;  %v6173_v23 = vmul.f32 %v17815_v57, %v20089_v48  ;;  %v6174_v6 = vmul.f32 %v17815_v57, %v20091_v32  ;;  %v6175_v3 = vmul.f32 %v17815_v57, %v20093_v21  ;;  %v13191_v20 = vld [vmem:[%s22373_s5 + $0x1] ss:$0 sm:$0xff] }
 0x72b   :  { %v6176_v49 = vmul.f32 %v17815_v57, %v20095_v34  ;;  %v6177_v27 = vmul.f32 %v17815_v57, %v20097_v47  ;;  %v6178_v17 = vmul.f32 %v17815_v57, %v20099_v60  ;;  %v6179_v41 = vmul.f32 %v17815_v57, %v20101_v10 }
 0x72c   :  { %v6186_v30 = vmul.f32 %v13190_v4, %v6164_v24  ;;  %v6187_v56 = vmul.f32 %v13190_v4, %v6165_v53  ;;  %v6188_v5 = vmul.f32 %v13190_v4, %v6166_v62  ;;  %v6189_v46 = vmul.f32 %v13190_v4, %v6167_v37 }
 0x72d   :  { %v6190_v48 = vmul.f32 %v13190_v4, %v6168_v1  ;;  %v6191_v32 = vmul.f32 %v13190_v4, %v6169_v28  ;;  %v6192_v55 = vmul.f32 %v13190_v4, %v6170_v35  ;;  %v6193_v21 = vmul.f32 %v13190_v4, %v6171_v0 }
 0x72e   :  { %v6194_v2 = vmul.f32 %v13190_v4, %v6172_v38  ;;  %v6195_v34 = vmul.f32 %v13190_v4, %v6173_v23  ;;  %v6196_v13 = vmul.f32 %v13190_v4, %v6174_v6  ;;  %v6197_v47 = vmul.f32 %v13190_v4, %v6175_v3 }
 0x72f   :  { %v6198_v12 = vmul.f32 %v13190_v4, %v6176_v49  ;;  %v6199_v60 = vmul.f32 %v13190_v4, %v6177_v27  ;;  %v6200_v58 = vmul.f32 %v13190_v4, %v6178_v17  ;;  %v6201_v10 = vmul.f32 %v13190_v4, %v6179_v41 }
 0x730   :  { %v6208_v54 = vadd.f32 %v13191_v20, %v6186_v30  ;;  %v6209_v40 = vadd.f32 %v13191_v20, %v6187_v56  ;;  %v6210_v36 = vadd.f32 %v13191_v20, %v6188_v5  ;;  %v6211_v42 = vadd.f32 %v13191_v20, %v6189_v46  ;;  %v6297_v5 = vld [vmem:[#allocation2 + $0x8] sm:$0xff] }
 0x731   :  { %v6212_v57 = vadd.f32 %v13191_v20, %v6190_v48  ;;  %v6213_v24 = vadd.f32 %v13191_v20, %v6191_v32  ;;  %v6214_v53 = vadd.f32 %v13191_v20, %v6192_v55  ;;  %v6215_v62 = vadd.f32 %v13191_v20, %v6193_v21 }
 0x732   :  { %v6216_v37 = vadd.f32 %v13191_v20, %v6194_v2  ;;  %v6217_v1 = vadd.f32 %v13191_v20, %v6195_v34  ;;  %v6218_v28 = vadd.f32 %v13191_v20, %v6196_v13  ;;  %v6219_v35 = vadd.f32 %v13191_v20, %v6197_v47 }
 0x733   :  { %v6220_v0 = vadd.f32 %v13191_v20, %v6198_v12  ;;  %v6221_v38 = vadd.f32 %v13191_v20, %v6199_v60  ;;  %v6222_v23 = vadd.f32 %v13191_v20, %v6200_v58  ;;  %v6223_v6 = vadd.f32 %v13191_v20, %v6201_v10  ;;  %v17603_v58 = vld [vmem:[%s22374_s6 + $0x248] sm:$0xff]  }
 0x734   :  { %v20158_v3 = vmul.f32 %v6208_v54, %v22660_v44  ;;  %v20161_v4 = vmul.f32 %v6209_v40, %v22661_v19  ;;  %v20164_v49 = vmul.f32 %v6210_v36, %v22662_v50  ;;  %v20167_v27 = vmul.f32 %v6211_v42, %v22663_v22 }
 0x735   :  { %v20170_v17 = vmul.f32 %v6212_v57, %v22664_v52  ;;  %v20173_v41 = vmul.f32 %v6213_v24, %v22665_v45  ;;  %v20176_v30 = vmul.f32 %v6214_v53, %v22666_v18  ;;  %v20179_v56 = vmul.f32 %v6215_v62, %v22667_v33 }
 0x736   :  { %v20182_v46 = vmul.f32 %v6216_v37, %v22668_v51  ;;  %v20185_v20 = vmul.f32 %v6217_v1, %v22669_v25  ;;  %v20188_v48 = vmul.f32 %v6218_v28, %v22670_v16  ;;  %v20191_v32 = vmul.f32 %v6219_v35, %v22671_v9  ;;  %6240 = vst [vmem:[#allocation2 + $0x10] sm:$0xff] %v20158_v3  ;;  %v17604_v35 = vld [vmem:[%s22374_s6 + $0x250] sm:$0xff]  }
 0x737   :  { %6241 = vst [vmem:[#allocation2 + $0x18] sm:$0xff] %v20161_v4  ;;  %6242 = vst [vmem:[#allocation2 + $0x20] sm:$0xff] %v20164_v49  ;;  %v20198_v55 = vmul.f32 %v6220_v0, %v22672_v15  ;;  %v20201_v21 = vmul.f32 %v6221_v38, %v22673_v8  ;;  %v20204_v2 = vmul.f32 %v6222_v23, %v22674_v59  ;;  %v17605_v0 = vld [vmem:[%s22374_s6 + $0x258] sm:$0xff]   ;;  %v17606_v38 = vld [vmem:[%s22374_s6 + $0x260] sm:$0xff]  }
 0x738   :  { %6243 = vst [vmem:[#allocation2 + $0x28] sm:$0xff] %v20167_v27  ;;  %v20207_v34 = vmul.f32 %v6223_v6, %v22675_v29  ;;  %6244 = vst [vmem:[#allocation2 + $0x30] sm:$0xff] %v20170_v17  ;;  %v6313_v13 = vpack.c.bf16 %v20158_v3, %v6297_v5  ;;  %v6314_v47 = vpack.c.bf16 %v20164_v49, %v20161_v4  ;;  %v17608_v23 = vld [vmem:[%s22374_s6 + $0x270] sm:$0xff]   ;;  %v6256_v6 = vld [vmem:[#allocation2 + $0x7] sm:$0xff] }
 0x739   :  { %6245 = vst [vmem:[#allocation2 + $0x38] sm:$0xff] %v20173_v41  ;;  %6246 = vst [vmem:[#allocation2 + $0x40] sm:$0xff] %v20176_v30  ;;  %v6315_v12 = vpack.c.bf16 %v20170_v17, %v20167_v27  ;;  %v6316_v60 = vpack.c.bf16 %v20176_v30, %v20173_v41  ;;  %v6317_v10 = vpack.c.bf16 %v20182_v46, %v20179_v56 }
 0x73a   :  { %6247 = vst [vmem:[#allocation2 + $0x48] sm:$0xff] %v20179_v56  ;;  %6248 = vst [vmem:[#allocation2 + $0x50] sm:$0xff] %v20182_v46  ;;  %v6318_v54 = vpack.c.bf16 %v20188_v48, %v20185_v20  ;;  %v6319_v40 = vpack.c.bf16 %v20198_v55, %v20191_v32  ;;  %v6320_v36 = vpack.c.bf16 %v20204_v2, %v20201_v21  ;;  %15637 = vmatprep.mubr.bf16.mxu1 %v6313_v13  ;;  %v17609_v13 = vld [vmem:[%s22374_s6 + $0x278] sm:$0xff]  }
 0x73b   :  { %6249 = vst [vmem:[#allocation2 + $0x58] sm:$0xff] %v20185_v20  ;;  %6250 = vst [vmem:[#allocation2 + $0x60] sm:$0xff] %v20188_v48  ;;  %15638 = vmatmul.mubr.bf16.vlgmr.msra.gmra.mrb[16].mxu1 %v6314_v47 }
 0x73c   :  { %6251 = vst [vmem:[#allocation2 + $0x68] sm:$0xff] %v20191_v32  ;;  %6252 = vst [vmem:[#allocation2 + $0x70] sm:$0xff] %v20198_v55  ;;  %15641 = vmatprep.mubr.bf16.mxu1 %v6315_v12  ;;  %15654 = vmatpush3.bf16.msra.mxu1 %v20029_v7  ;;  %v17607_v7 = vld [vmem:[%s22374_s6 + $0x268] sm:$0xff]   ;;  %v17610_v12 = vld [vmem:[%s22374_s6 + $0x2c0] sm:$0xff]  }
 0x73d   :  { %6253 = vst [vmem:[#allocation2 + $0x78] sm:$0xff] %v20201_v21  ;;  %6254 = vst [vmem:[#allocation2 + $0x80] sm:$0xff] %v20204_v2  ;;  %15655 = vmatprep.subr.bf16.mxu1 %v17603_v58  ;;  %v20271_v5 = vld [vmem:[#allocation2 + $0xf] sm:$0xff] }
 0x73e   :  { %6255 = vst [vmem:[#allocation2 + $0x88] sm:$0xff] %v20207_v34  ;;  %v6272_v47 = vpack.c.bf16 %v20271_v5, %v6256_v6  ;;  %v6628_v29 = vld [vmem:[#allocation2 + $0x9] sm:$0xff]  ;;  %v20356_v59 = vld [vmem:[#allocation2 + $0x11] sm:$0xff]  ;;  %v20370_v9 = vld [vmem:[#allocation2 + $0x19] sm:$0xff] }
 0x73f   :  { %v6644_v15 = vpack.c.bf16 %v20356_v59, %v6628_v29  ;;  %v20372_v16 = vld [vmem:[#allocation2 + $0x21] sm:$0xff]  ;;  %v20374_v25 = vld [vmem:[#allocation2 + $0x29] sm:$0xff] }
 0x740   :  { %15656 = vmatpush3.bf16.msra.mxu1 %v17603_v58  ;;  %v20282_v58 = vld [vmem:[#allocation2 + $0x1f] sm:$0xff]  ;;  %v20376_v51 = vld [vmem:[#allocation2 + $0x31] sm:$0xff]  ;;  %v20380_v29 = vpack.c.bf16 %v20372_v16, %v20370_v9 }
 0x741   :  { %15657 = vmatprep.subr.bf16.mxu1 %v17604_v35  ;;  %v20310_v6 = vld [vmem:[#allocation2 + $0x4f] sm:$0xff]  ;;  %v20394_v33 = vld [vmem:[#allocation2 + $0x39] sm:$0xff]  ;;  %v20396_v18 = vld [vmem:[#allocation2 + $0x41] sm:$0xff] }
 0x742   :  { %v20328_v28 = vld [vmem:[#allocation2 + $0x57] sm:$0xff]  ;;  %v20330_v1 = vld [vmem:[#allocation2 + $0x5f] sm:$0xff]  ;;  %v20398_v45 = vld [vmem:[#allocation2 + $0x49] sm:$0xff]  ;;  %v20404_v43 = vpack.c.bf16 %v20396_v18, %v20394_v33 }
 0x743   :  { %15642 = vmatmul.mubr.bf16.gmra.mrb[20].mxu1 %v6316_v60  ;;  %v20280_v60 = vld [vmem:[#allocation2 + $0x17] sm:$0xff]  ;;  %v20332_v37 = vld [vmem:[#allocation2 + $0x67] sm:$0xff]  ;;  %v20334_v62 = vld [vmem:[#allocation2 + $0x6f] sm:$0xff]  ;;  %v20338_v53 = vpack.c.bf16 %v20330_v1, %v20328_v28 }
 0x744   :  { %15645 = vmatprep.mubr.bf16.mxu1 %v6317_v10  ;;  %15658 = vmatpush3.bf16.msra.mxu1 %v17604_v35  ;;  %v20284_v10 = vld [vmem:[#allocation2 + $0x27] sm:$0xff]  ;;  %v20345_v24 = vpack.c.bf16 %v20334_v62, %v20332_v37  ;;  %v20352_v57 = vld [vmem:[#allocation2 + $0x77] sm:$0xff]  ;;  %v20354_v42 = vld [vmem:[#allocation2 + $0x7f] sm:$0xff] }
 0x745   :  { %15659 = vmatprep.subr.bf16.mxu1 %v17605_v0  ;;  %v20360_v8 = vpack.c.bf16 %v20354_v42, %v20352_v57  ;;  %v20400_v52 = vld [vmem:[#allocation2 + $0x51] sm:$0xff]  ;;  %v20418_v22 = vld [vmem:[#allocation2 + $0x59] sm:$0xff]  ;;  %v20420_v63 = vld [vmem:[#allocation2 + $0x61] sm:$0xff] }
 0x746   :  { %v20411_v14 = vpack.c.bf16 %v20400_v52, %v20398_v45  ;;  %v20422_v11 = vld [vmem:[#allocation2 + $0x69] sm:$0xff]  ;;  %v20424_v50 = vld [vmem:[#allocation2 + $0x71] sm:$0xff]  ;;  %v20428_v19 = vpack.c.bf16 %v20420_v63, %v20418_v22  ;;  %v20442_v26 = vld [vmem:[#allocation2 + $0x79] sm:$0xff] }
 0x747   :  { %v20435_v44 = vpack.c.bf16 %v20424_v50, %v20422_v11  ;;  %v20444_v39 = vld [vmem:[#allocation2 + $0x81] sm:$0xff] }
 0x748   :  { %15660 = vmatpush3.bf16.msra.mxu1 %v17605_v0  ;;  %v17612_v0 = vld [vmem:[%s22374_s6 + $0x2d0] sm:$0xff]   ;;  %22682 = vst [vmem:[#allocation21_spill] sm:$0xff] %v20428_v19  ;;  %v20448_v31 = vpack.c.bf16 %v20444_v39, %v20442_v26 }
 0x749   :  { %15661 = vmatprep.subr.bf16.mxu1 %v17606_v38  ;;  %22683 = vst [vmem:[#allocation19_spill] sm:$0xff] %v20435_v44 }
 0x74b   :  { %15646 = vmatmul.mubr.bf16.gmra.mrb[24].mxu1 %v6318_v54  ;;  %v20286_v54 = vld [vmem:[#allocation2 + $0x2f] sm:$0xff] }
 0x74c   :  { %15649 = vmatprep.mubr.bf16.mxu1 %v6319_v40  ;;  %15662 = vmatpush3.bf16.msra.mxu1 %v17606_v38  ;;  %v20290_v40 = vpack.c.bf16 %v20282_v58, %v20280_v60  ;;  %v20297_v35 = vpack.c.bf16 %v20286_v54, %v20284_v10  ;;  %v20304_v38 = vld [vmem:[#allocation2 + $0x37] sm:$0xff] }
 0x74d   :  { %15663 = vmatprep.subr.bf16.mxu1 %v17607_v7 }
 0x750   :  { %15664 = vmatpush3.bf16.msra.mxu1 %v17607_v7  ;;  %v20306_v7 = vld [vmem:[#allocation2 + $0x3f] sm:$0xff] }
 0x751   :  { %15665 = vmatprep.subr.bf16.mxu1 %v17608_v23 }
 0x753   :  { %15650 = vmatmul.mubr.bf16.gmra.mrb[28].mxu1 %v6320_v36  ;;  %v17611_v36 = vld [vmem:[%s22374_s6 + $0x2c8] sm:$0xff]  }
 0x754   :  { %15666 = vmatpush3.bf16.msra.mxu1 %v17608_v23  ;;  %15669 = vmatprep.mubr.bf16.mxu1 %v6272_v47  ;;  %v20308_v23 = vld [vmem:[#allocation2 + $0x47] sm:$0xff]  ;;  %v17613_v47 = vld [vmem:[%s22374_s6 + $0x2d8] sm:$0xff]  }
 0x755   :  { %15667 = vmatprep.subr.bf16.mxu1 %v17609_v13 }
 0x758   :  { %15668 = vmatpush3.bf16.msra.mxu1 %v17609_v13  ;;  %v20314_v13 = vpack.c.bf16 %v20306_v7, %v20304_v38 }
 0x759   :  { %15685 = vmatprep.subr.bf16.mxu1 %v17610_v12 }
 0x75b   :  { %15670 = vmatmul.mubr.bf16.vlgmr.msra.gmra.mrb[16].mxu1 %v20290_v40 }
 0x75c   :  { %15673 = vmatprep.mubr.bf16.mxu1 %v20297_v35  ;;  %15686 = vmatpush3.bf16.msra.mxu1 %v17610_v12  ;;  %v20321_v12 = vpack.c.bf16 %v20310_v6, %v20308_v23 }
 0x75d   :  { %15687 = vmatprep.subr.bf16.mxu1 %v17611_v36 }
 0x760   :  { %15688 = vmatpush3.bf16.msra.mxu1 %v17611_v36  ;;  %v17614_v36 = vld [vmem:[%s22374_s6 + $0x2e0] sm:$0xff]  }
 0x761   :  { %15689 = vmatprep.subr.bf16.mxu1 %v17612_v0 }
 0x763   :  { %15674 = vmatmul.mubr.bf16.gmra.mrb[20].mxu1 %v20314_v13 }
 0x764   :  { %15677 = vmatprep.mubr.bf16.mxu1 %v20321_v12  ;;  %15690 = vmatpush3.bf16.msra.mxu1 %v17612_v0  ;;  %v17615_v0 = vld [vmem:[%s22374_s6 + $0x2e8] sm:$0xff]  }
 0x765   :  { %15691 = vmatprep.subr.bf16.mxu1 %v17613_v47 }
 0x768   :  { %15692 = vmatpush3.bf16.msra.mxu1 %v17613_v47  ;;  %v17616_v47 = vld [vmem:[%s22374_s6 + $0x2f0] sm:$0xff]  }
 0x769   :  { %15693 = vmatprep.subr.bf16.mxu1 %v17614_v36 }
 0x76b   :  { %15678 = vmatmul.mubr.bf16.gmra.mrb[24].mxu1 %v20338_v53 }
 0x76c   :  { %15681 = vmatprep.mubr.bf16.mxu1 %v20345_v24  ;;  %15694 = vmatpush3.bf16.msra.mxu1 %v17614_v36  ;;  %v17617_v36 = vld [vmem:[%s22374_s6 + $0x2f8] sm:$0xff]  }
 0x76d   :  { %15695 = vmatprep.subr.bf16.mxu1 %v17615_v0 }
 0x770   :  { %15696 = vmatpush3.bf16.msra.mxu1 %v17615_v0  ;;  %v17618_v0 = vld [vmem:[%s22374_s6 + $0x300] sm:$0xff]  }
 0x771   :  { %15697 = vmatprep.subr.bf16.mxu1 %v17616_v47 }
 0x773   :  { %15682 = vmatmul.mubr.bf16.gmra.mrb[28].mxu1 %v20360_v8 }
 0x774   :  { %15698 = vmatpush3.bf16.msra.mxu1 %v17616_v47  ;;  %15701 = vmatprep.mubr.bf16.mxu1 %v6644_v15  ;;  %v17619_v15 = vld [vmem:[%s22374_s6 + $0x308] sm:$0xff]   ;;  %v20387_v47 = vpack.c.bf16 %v20376_v51, %v20374_v25 }
 0x775   :  { %15699 = vmatprep.subr.bf16.mxu1 %v17617_v36 }
 0x778   :  { %15700 = vmatpush3.bf16.msra.mxu1 %v17617_v36  ;;  %v17620_v36 = vld [vmem:[%s22374_s6 + $0x310] sm:$0xff]  }
 0x779   :  { %15717 = vmatprep.subr.bf16.mxu1 %v17618_v0 }
 0x77b   :  { %15702 = vmatmul.mubr.bf16.vlgmr.msra.gmra.mrb[16].mxu1 %v20380_v29 }
 0x77c   :  { %15705 = vmatprep.mubr.bf16.mxu1 %v20387_v47  ;;  %15718 = vmatpush3.bf16.msra.mxu1 %v17618_v0  ;;  %v17621_v0 = vld [vmem:[%s22374_s6 + $0x318] sm:$0xff]  }
 0x77d   :  { %15719 = vmatprep.subr.bf16.mxu1 %v17619_v15 }
 0x780   :  { %15720 = vmatpush3.bf16.msra.mxu1 %v17619_v15  ;;  %v17622_v15 = vld [vmem:[%s22374_s6 + $0x320] sm:$0xff]  }
 0x781   :  { %15721 = vmatprep.subr.bf16.mxu1 %v17620_v36 }
 0x783   :  { %15706 = vmatmul.mubr.bf16.gmra.mrb[20].mxu1 %v20404_v43 }
 0x784   :  { %15709 = vmatprep.mubr.bf16.mxu1 %v20411_v14  ;;  %15722 = vmatpush3.bf16.msra.mxu1 %v17620_v36  ;;  %v17623_v36 = vld [vmem:[%s22374_s6 + $0x328] sm:$0xff]  }
 0x785   :  { %15723 = vmatprep.subr.bf16.mxu1 %v17621_v0 }
 0x788   :  { %15724 = vmatpush3.bf16.msra.mxu1 %v17621_v0  ;;  %v17624_v0 = vld [vmem:[%s22374_s6 + $0x330] sm:$0xff]  }
 0x789   :  { %15725 = vmatprep.subr.bf16.mxu1 %v17622_v15 }
 0x78b   :  { %15710 = vmatmul.mubr.bf16.gmra.mrb[24].mxu1 %v20428_v19  ;;  %v17627_v19 = vld [vmem:[%s22374_s6 + $0x348] sm:$0xff]  }
 0x78c   :  { %15713 = vmatprep.mubr.bf16.mxu1 %v20435_v44  ;;  %15726 = vmatpush3.bf16.msra.mxu1 %v17622_v15  ;;  %v6846_v15 = vpack.c.bf16 %v20280_v60, %v20271_v5  ;;  %v6847_v44 = vpack.c.bf16 %v20284_v10, %v20282_v58  ;;  %v6848_v5 = vpack.c.bf16 %v20304_v38, %v20286_v54  ;;  %v17628_v60 = vld [vmem:[%s22374_s6 + $0x350] sm:$0xff]   ;;  %v17629_v58 = vld [vmem:[%s22374_s6 + $0x358] sm:$0xff]   ;;  %v17631_v54 = vld [vmem:[%s22374_s6 + $0x368] sm:$0xff]  }
 0x78d   :  { %15727 = vmatprep.subr.bf16.mxu1 %v17623_v36  ;;  %v6850_v10 = vpack.c.bf16 %v20328_v28, %v20310_v6  ;;  %v6852_v28 = vpack.c.bf16 %v20352_v57, %v20334_v62  ;;  %v17632_v38 = vld [vmem:[%s22374_s6 + $0x370] sm:$0xff]   ;;  %v22684_v57 = vpack.c.bf16 %v20161_v4, %v20158_v3  ;;  %v17634_v62 = vld [vmem:[%s22374_s6 + $0x380] sm:$0xff]   ;;  %v22686_v6 = vpack.c.bf16 %v20173_v41, %v20170_v17  ;;  %v17637_v4 = vld [vmem:[%s22374_s6 + $0x398] sm:$0xff]  }
 0x78e   :  { %v17636_v3 = vld [vmem:[%s22374_s6 + $0x390] sm:$0xff]   ;;  %v17638_v17 = vld [vmem:[%s22374_s6 + $0x3a0] sm:$0xff]   ;;  %v17639_v41 = vld [vmem:[%s22374_s6 + $0x3a8] sm:$0xff]  }
 0x790   :  { %15728 = vmatpush3.bf16.msra.mxu1 %v17623_v36  ;;  %v17626_v36 = vld [vmem:[%s22374_s6 + $0x340] sm:$0xff]  }
 0x791   :  { %15729 = vmatprep.subr.bf16.mxu1 %v17624_v0 }
 0x793   :  { %15714 = vmatmul.mubr.bf16.gmra.mrb[28].mxu1 %v20448_v31 }
 0x794   :  { %15730 = vmatpush3.bf16.msra.mxu1 %v17624_v0  ;;  %15733 = vmatprep.mubr.bf16.mxu1 %v6846_v15  ;;  %v7638_v0 = vld [vmem:[#allocation2 + $0x18] sm:$0xff]  ;;  %v7639_v15 = vld [vmem:[#allocation2 + $0x20] sm:$0xff] }
 0x795   :  { %15731 = vmatprep.subr.bf16.mxu1 %v17625_v61 }
 0x798   :  { %15732 = vmatpush3.bf16.msra.mxu1 %v17625_v61  ;;  %v6849_v61 = vpack.c.bf16 %v20308_v23, %v20306_v7  ;;  %v20489_v7 = vld [vmem:[#allocation2 + $0x87] sm:$0xff]  ;;  %v22685_v23 = vpack.c.bf16 %v20167_v27, %v20164_v49  ;;  %v22687_v49 = vpack.c.bf16 %v20179_v56, %v20176_v30  ;;  %v22688_v27 = vpack.c.bf16 %v20185_v20, %v20182_v46  ;;  %v17640_v46 = vld [vmem:[%s22374_s6 + $0x3b0] sm:$0xff]   ;;  %v17641_v20 = vld [vmem:[%s22374_s6 + $0x3b8] sm:$0xff]  }
 0x799   :  { %15749 = vmatprep.subr.bf16.mxu1 %v17626_v36  ;;  %v22689_v30 = vpack.c.bf16 %v20191_v32, %v20188_v48  ;;  %v22690_v56 = vpack.c.bf16 %v20201_v21, %v20198_v55  ;;  %v7250_v48 = vpack.c.bf16 %v20370_v9, %v20356_v59  ;;  %v22691_v32 = vpack.c.bf16 %v20207_v34, %v20204_v2  ;;  %v17642_v55 = vld [vmem:[%s22374_s6 + $0x3c0] sm:$0xff]   ;;  %v17643_v9 = vld [vmem:[%s22374_s6 + $0x3c8] sm:$0xff]   ;;  %v17644_v2 = vld [vmem:[%s22374_s6 + $0x3d0] sm:$0xff]  }
 0x79a   :  { %v7251_v21 = vpack.c.bf16 %v20374_v25, %v20372_v16  ;;  %v7252_v59 = vpack.c.bf16 %v20394_v33, %v20376_v51  ;;  %v7253_v25 = vpack.c.bf16 %v20398_v45, %v20396_v18  ;;  %v17645_v16 = vld [vmem:[%s22374_s6 + $0x3d8] sm:$0xff]   ;;  %v7254_v33 = vpack.c.bf16 %v20418_v22, %v20400_v52  ;;  %v17646_v51 = vld [vmem:[%s22374_s6 + $0x3e0] sm:$0xff]   ;;  %v17647_v18 = vld [vmem:[%s22374_s6 + $0x3e8] sm:$0xff]  }
 0x79b   :  { %15734 = vmatmul.mubr.bf16.vlgmr.msra.gmra.mrb[16].mxu1 %v6847_v44  ;;  %v17630_v44 = vld [vmem:[%s22374_s6 + $0x360] sm:$0xff]   ;;  %v7255_v45 = vpack.c.bf16 %v20422_v11, %v20420_v63  ;;  %v7256_v22 = vpack.c.bf16 %v20442_v26, %v20424_v50  ;;  %v17648_v52 = vld [vmem:[%s22374_s6 + $0x3f0] sm:$0xff]   ;;  %v17649_v11 = vld [vmem:[%s22374_s6 + $0x3f8] sm:$0xff]  }
 0x79c   :  { %15737 = vmatprep.mubr.bf16.mxu1 %v6848_v5  ;;  %15750 = vmatpush3.bf16.msra.mxu1 %v17626_v36  ;;  %v20579_v34 = vld [vmem:[#allocation2 + $0x89] sm:$0xff]  ;;  %v17650_v26 = vld [vmem:[%s22374_s6 + $0x400] sm:$0xff]   ;;  %v17657_v5 = vld [vmem:[%s22374_s6 + $0x438] sm:$0xff]  }
 0x79d   :  { %15751 = vmatprep.subr.bf16.mxu1 %v17627_v19  ;;  %v7257_v63 = vpack.c.bf16 %v20579_v34, %v20444_v39  ;;  %v17651_v39 = vld [vmem:[%s22374_s6 + $0x408] sm:$0xff]   ;;  %v17652_v50 = vld [vmem:[%s22374_s6 + $0x410] sm:$0xff]  }
 0x7a0   :  { %15752 = vmatpush3.bf16.msra.mxu1 %v17627_v19  ;;  %v6851_v19 = vpack.c.bf16 %v20332_v37, %v20330_v1  ;;  %v6853_v37 = vpack.c.bf16 %v20489_v7, %v20354_v42  ;;  %v17633_v1 = vld [vmem:[%s22374_s6 + $0x378] sm:$0xff]   ;;  %v17635_v42 = vld [vmem:[%s22374_s6 + $0x388] sm:$0xff]  }
 0x7a1   :  { %15753 = vmatprep.subr.bf16.mxu1 %v17628_v60 }
 0x7a3   :  { %15738 = vmatmul.mubr.bf16.gmra.mrb[20].mxu1 %v6849_v61  ;;  %v7641_v61 = vld [vmem:[#allocation2 + $0x30] sm:$0xff] }
 0x7a4   :  { %15741 = vmatprep.mubr.bf16.mxu1 %v6850_v10  ;;  %15754 = vmatpush3.bf16.msra.mxu1 %v17628_v60  ;;  %v7640_v60 = vld [vmem:[#allocation2 + $0x28] sm:$0xff]  ;;  %v7643_v10 = vld [vmem:[#allocation2 + $0x40] sm:$0xff] }
 0x7a5   :  { %15755 = vmatprep.subr.bf16.mxu1 %v17629_v58 }
 0x7a8   :  { %15756 = vmatpush3.bf16.msra.mxu1 %v17629_v58  ;;  %v7642_v58 = vld [vmem:[#allocation2 + $0x38] sm:$0xff] }
 0x7a9   :  { %15757 = vmatprep.subr.bf16.mxu1 %v17630_v44 }
 0x7ab   :  { %15742 = vmatmul.mubr.bf16.gmra.mrb[24].mxu1 %v6851_v19  ;;  %v17659_v19 = vld [vmem:[%s22374_s6 + $0x448] sm:$0xff]  }
 0x7ac   :  { %15745 = vmatprep.mubr.bf16.mxu1 %v6852_v28  ;;  %15758 = vmatpush3.bf16.msra.mxu1 %v17630_v44  ;;  %v7655_v44 = vpack.c.bf16 %v7641_v61, %v7640_v60  ;;  %v17660_v28 = vld [vmem:[%s22374_s6 + $0x450] sm:$0xff]  }
 0x7ad   :  { %15759 = vmatprep.subr.bf16.mxu1 %v17631_v54  ;;  %v22699_v61 = vld [vmem:[#allocation24_spill] sm:$0xff] }
 0x7b0   :  { %15760 = vmatpush3.bf16.msra.mxu1 %v17631_v54  ;;  %v7656_v54 = vpack.c.bf16 %v7643_v10, %v7642_v58 }
 0x7b1   :  { %15761 = vmatprep.subr.bf16.mxu1 %v17632_v38 }
 0x7b3   :  { %15746 = vmatmul.mubr.bf16.gmra.mrb[28].mxu1 %v6853_v37  ;;  %v7646_v37 = vld [vmem:[#allocation2 + $0x58] sm:$0xff] }
 0x7b4   :  { %15762 = vmatpush3.bf16.msra.mxu1 %v17632_v38  ;;  %15765 = vmatprep.mubr.bf16.mxu1 %v22684_v57  ;;  %v7644_v38 = vld [vmem:[#allocation2 + $0x48] sm:$0xff] }
 0x7b5   :  { %15763 = vmatprep.subr.bf16.mxu1 %v17633_v1 }
 0x7b8   :  { %15764 = vmatpush3.bf16.msra.mxu1 %v17633_v1  ;;  %v7647_v1 = vld [vmem:[#allocation2 + $0x60] sm:$0xff] }
 0x7b9   :  { %15781 = vmatprep.subr.bf16.mxu1 %v17634_v62 }
 0x7bb   :  { %15766 = vmatmul.mubr.bf16.vlgmr.msra.gmra.mrb[16].mxu1 %v22685_v23  ;;  %v17662_v23 = vld [vmem:[%s22374_s6 + $0x460] sm:$0xff]  }
 0x7bc   :  { %15769 = vmatprep.mubr.bf16.mxu1 %v22686_v6  ;;  %15782 = vmatpush3.bf16.msra.mxu1 %v17634_v62  ;;  %v17661_v62 = vld [vmem:[%s22374_s6 + $0x458] sm:$0xff]   ;;  %v7648_v6 = vld [vmem:[#allocation2 + $0x68] sm:$0xff] }
 0x7bd   :  { %15783 = vmatprep.subr.bf16.mxu1 %v17635_v42 }
 0x7c0   :  { %15784 = vmatpush3.bf16.msra.mxu1 %v17635_v42  ;;  %v7658_v42 = vpack.c.bf16 %v7647_v1, %v7646_v37  ;;  %v22701_v1 = vld [vmem:[#allocation12_spill] sm:$0xff] }
 0x7c1   :  { %15785 = vmatprep.subr.bf16.mxu1 %v17636_v3 }
 0x7c3   :  { %15770 = vmatmul.mubr.bf16.gmra.mrb[20].mxu1 %v22687_v49  ;;  %v7651_v49 = vld [vmem:[#allocation2 + $0x80] sm:$0xff] }
 0x7c4   :  { %15773 = vmatprep.mubr.bf16.mxu1 %v22688_v27  ;;  %15786 = vmatpush3.bf16.msra.mxu1 %v17636_v3  ;;  %v7649_v3 = vld [vmem:[#allocation2 + $0x70] sm:$0xff] }
 0x7c5   :  { %15787 = vmatprep.subr.bf16.mxu1 %v17637_v4  ;;  %v7659_v27 = vpack.c.bf16 %v7649_v3, %v7648_v6  ;;  %v22703_v6 = vld [vmem:[#allocation25_spill] sm:$0xff] }
 0x7c8   :  { %15788 = vmatpush3.bf16.msra.mxu1 %v17637_v4  ;;  %v7650_v4 = vld [vmem:[#allocation2 + $0x78] sm:$0xff] }
 0x7c9   :  { %15789 = vmatprep.subr.bf16.mxu1 %v17638_v17 }
 0x7cb   :  { %15774 = vmatmul.mubr.bf16.gmra.mrb[24].mxu1 %v22689_v30  ;;  %v17664_v30 = vld [vmem:[%s22374_s6 + $0x470] sm:$0xff]  }
 0x7cc   :  { %15777 = vmatprep.mubr.bf16.mxu1 %v22690_v56  ;;  %15790 = vmatpush3.bf16.msra.mxu1 %v17638_v17  ;;  %v17663_v17 = vld [vmem:[%s22374_s6 + $0x468] sm:$0xff]  }
 0x7cd   :  { %15791 = vmatprep.subr.bf16.mxu1 %v17639_v41  ;;  %v7652_v56 = vld [vmem:[#allocation2 + $0x88] sm:$0xff] }
 0x7d0   :  { %15792 = vmatpush3.bf16.msra.mxu1 %v17639_v41  ;;  %v7660_v41 = vpack.c.bf16 %v7651_v49, %v7650_v4 }
 0x7d1   :  { %15793 = vmatprep.subr.bf16.mxu1 %v17640_v46 }
 0x7d3   :  { %15778 = vmatmul.mubr.bf16.gmra.mrb[28].mxu1 %v22691_v32  ;;  %v22692_v32 = vld [vmem:[#allocation21_spill] sm:$0xff] }
 0x7d4   :  { %15794 = vmatpush3.bf16.msra.mxu1 %v17640_v46  ;;  %15797 = vmatprep.mubr.bf16.mxu1 %v7250_v48  ;;  %v7653_v46 = vld [vmem:[#allocation2 + $0x90] sm:$0xff]  ;;  %v17665_v48 = vld [vmem:[%s22374_s6 + $0x478] sm:$0xff]  }
 0x7d5   :  { %15795 = vmatprep.subr.bf16.mxu1 %v17641_v20 }
 0x7d8   :  { %15796 = vmatpush3.bf16.msra.mxu1 %v17641_v20  ;;  %v7661_v20 = vpack.c.bf16 %v7653_v46, %v7652_v56  ;;  %v20731_v56 = vld [vmem:[%s22370_s2 + $0x480] sm:$0xff]  }
 0x7d9   :  { %15813 = vmatprep.subr.bf16.mxu1 %v17642_v55 }
 0x7db   :  { %15798 = vmatmul.mubr.bf16.vlgmr.msra.gmra.mrb[16].mxu1 %v7251_v21  ;;  %v7855_v21 = vld [vmem:[#allocation2 + $0x91] sm:$0xff] }
 0x7dc   :  { %15801 = vmatprep.mubr.bf16.mxu1 %v7252_v59  ;;  %15814 = vmatpush3.bf16.msra.mxu1 %v17642_v55  ;;  %v22693_v55 = vld [vmem:[#allocation19_spill] sm:$0xff]  ;;  %v17670_v59 = vld [vmem:[%s22370_s2 + $0x4e0] sm:$0xff]  }
 0x7dd   :  { %15815 = vmatprep.subr.bf16.mxu1 %v17643_v9 }
 0x7e0   :  { %15816 = vmatpush3.bf16.msra.mxu1 %v17643_v9  ;;  %v7863_v9 = vpack.c.bf16 %v7855_v21, %v20579_v34  ;;  %v17671_v34 = vld [vmem:[%s22370_s2 + $0x4e8] sm:$0xff]  }
 0x7e1   :  { %15817 = vmatprep.subr.bf16.mxu1 %v17644_v2 }
 0x7e3   :  { %15802 = vmatmul.mubr.bf16.gmra.mrb[20].mxu1 %v7253_v25 }
 0x7e4   :  { %15805 = vmatprep.mubr.bf16.mxu1 %v7254_v33  ;;  %15818 = vmatpush3.bf16.msra.mxu1 %v17644_v2 }
 0x7e5   :  { %15819 = vmatprep.subr.bf16.mxu1 %v17645_v16 }
 0x7e8   :  { %15820 = vmatpush3.bf16.msra.mxu1 %v17645_v16 }
 0x7e9   :  { %15821 = vmatprep.subr.bf16.mxu1 %v17646_v51 }
 0x7eb   :  { %15806 = vmatmul.mubr.bf16.gmra.mrb[24].mxu1 %v7255_v45  ;;  %v22694_v45 = vld [vmem:[#allocation8_spill] sm:$0xff] }
 0x7ec   :  { %15809 = vmatprep.mubr.bf16.mxu1 %v7256_v22  ;;  %15822 = vmatpush3.bf16.msra.mxu1 %v17646_v51 }
 0x7ed   :  { %15823 = vmatprep.subr.bf16.mxu1 %v17647_v18 }
 0x7f0   :  { %15824 = vmatpush3.bf16.msra.mxu1 %v17647_v18 }
 0x7f1   :  { %15825 = vmatprep.subr.bf16.mxu1 %v17648_v52 }
 0x7f3   :  { %15810 = vmatmul.mubr.bf16.gmra.mrb[28].mxu1 %v7257_v63  ;;  %v22695_v63 = vld [vmem:[#allocation38_spill] sm:$0xff] }
 0x7f4   :  { %15826 = vmatpush3.bf16.msra.mxu1 %v17648_v52  ;;  %15829 = vmatprep.mubr.bf16.mxu1 %v20290_v40  ;;  %v17653_v40 = vld [vmem:[%s22374_s6 + $0x418] sm:$0xff]  }
 0x7f5   :  { %15827 = vmatprep.subr.bf16.mxu1 %v17649_v11 }
 0x7f8   :  { %15828 = vmatpush3.bf16.msra.mxu1 %v17649_v11 }
 0x7f9   :  { %15845 = vmatprep.subr.bf16.mxu1 %v17650_v26 }
 0x7fb   :  { %15830 = vmatmul.mubr.bf16.vlgmr.msra.gmra.mrb[16].mxu1 %v20297_v35  ;;  %v17654_v35 = vld [vmem:[%s22374_s6 + $0x420] sm:$0xff]  }
 0x7fc   :  { %15833 = vmatprep.mubr.bf16.mxu1 %v20314_v13  ;;  %15846 = vmatpush3.bf16.msra.mxu1 %v17650_v26  ;;  %v17655_v13 = vld [vmem:[%s22374_s6 + $0x428] sm:$0xff]  }
 0x7fd   :  { %15847 = vmatprep.subr.bf16.mxu1 %v17651_v39 }
 0x800   :  { %15848 = vmatpush3.bf16.msra.mxu1 %v17651_v39  ;;  %v22696_v39 = vld [vmem:[#allocation6_spill] sm:$0xff] }
 0x801   :  { %15849 = vmatprep.subr.bf16.mxu1 %v17652_v50 }
 0x803   :  { %15834 = vmatmul.mubr.bf16.gmra.mrb[20].mxu1 %v20321_v12  ;;  %v7451_v12 = vld [vmem:[#allocation2 + $0x8f] sm:$0xff] }
 0x804   :  { %15837 = vmatprep.mubr.bf16.mxu1 %v20338_v53  ;;  %15850 = vmatpush3.bf16.msra.mxu1 %v17652_v50  ;;  %v17656_v53 = vld [vmem:[%s22374_s6 + $0x430] sm:$0xff]   ;;  %v7459_v36 = vpack.c.bf16 %v7451_v12, %v20489_v7 }
 0x805   :  { %15851 = vmatprep.subr.bf16.mxu1 %v17653_v40  ;;  %v7645_v7 = vld [vmem:[#allocation2 + $0x50] sm:$0xff] }
 0x806   :  { %v7657_v57 = vpack.c.bf16 %v7645_v7, %v7644_v38  ;;  %v17672_v12 = vld [vmem:[%s22370_s2 + $0x4f0] sm:$0xff]   ;;  %v17673_v7 = vld [vmem:[%s22370_s2 + $0x4f8] sm:$0xff]  }
 0x808   :  { %15852 = vmatpush3.bf16.msra.mxu1 %v17653_v40 }
 0x809   :  { %15853 = vmatprep.subr.bf16.mxu1 %v17654_v35 }
 0x80b   :  { %15838 = vmatmul.mubr.bf16.gmra.mrb[24].mxu1 %v20345_v24  ;;  %v7654_v24 = vpack.c.bf16 %v7639_v15, %v7638_v0 }
 0x80c   :  { %15841 = vmatprep.mubr.bf16.mxu1 %v20360_v8  ;;  %15854 = vmatpush3.bf16.msra.mxu1 %v17654_v35  ;;  %v17658_v8 = vld [vmem:[%s22374_s6 + $0x440] sm:$0xff]   ;;  %v22697_v35 = vld [vmem:[#allocation39_spill] sm:$0xff] }
 0x80d   :  { %15855 = vmatprep.subr.bf16.mxu1 %v17655_v13 }
 0x810   :  { %15856 = vmatpush3.bf16.msra.mxu1 %v17655_v13 }
 0x811   :  { %15857 = vmatprep.subr.bf16.mxu1 %v17656_v53 }
 0x813   :  { %15842 = vmatmul.mubr.bf16.gmra.mrb[28].mxu1 %v7459_v36 }
 0x814   :  { %15858 = vmatpush3.bf16.msra.mxu1 %v17656_v53  ;;  %15861 = vmatprep.mubr.bf16.mxu1 %v7654_v24 }
 0x815   :  { %15859 = vmatprep.subr.bf16.mxu1 %v17657_v5 }
 0x818   :  { %15860 = vmatpush3.bf16.msra.mxu1 %v17657_v5 }
 0x819   :  { %15877 = vmatprep.subr.bf16.mxu1 %v17658_v8 }
 0x81b   :  { %15862 = vmatmul.mubr.bf16.vlgmr.msra.gmra.mrb[16].mxu1 %v7655_v44 }
 0x81c   :  { %15865 = vmatprep.mubr.bf16.mxu1 %v7656_v54  ;;  %15878 = vmatpush3.bf16.msra.mxu1 %v17658_v8  ;;  %v22698_v8 = vld [vmem:[#allocation22_spill] sm:$0xff] }
 0x81d   :  { %15879 = vmatprep.subr.bf16.mxu1 %v17659_v19 }
 0x820   :  { %15880 = vmatpush3.bf16.msra.mxu1 %v17659_v19  ;;  %v22700_v19 = vld [vmem:[#allocation23_spill] sm:$0xff] }
 0x821   :  { %15881 = vmatprep.subr.bf16.mxu1 %v17660_v28 }
 0x823   :  { %15866 = vmatmul.mubr.bf16.gmra.mrb[20].mxu1 %v7657_v57 }
 0x824   :  { %15869 = vmatprep.mubr.bf16.mxu1 %v7658_v42  ;;  %15882 = vmatpush3.bf16.msra.mxu1 %v17660_v28 }
 0x825   :  { %15883 = vmatprep.subr.bf16.mxu1 %v17661_v62 }
 0x828   :  { %15884 = vmatpush3.bf16.msra.mxu1 %v17661_v62  ;;  %v22702_v62 = vld [vmem:[#allocation9_spill] sm:$0xff] }
 0x829   :  { %15885 = vmatprep.subr.bf16.mxu1 %v17662_v23 }
 0x82b   :  { %15870 = vmatmul.mubr.bf16.gmra.mrb[24].mxu1 %v7659_v27  ;;  %v22704_v27 = vld [vmem:[#allocation10_spill] sm:$0xff] }
 0x82c   :  { %15873 = vmatprep.mubr.bf16.mxu1 %v7660_v41  ;;  %15886 = vmatpush3.bf16.msra.mxu1 %v17662_v23  ;;  %v22705_v41 = vld [vmem:[#allocation7_spill] sm:$0xff] }
 0x82d   :  { %15887 = vmatprep.subr.bf16.mxu1 %v17663_v17 }
 0x830   :  { %15888 = vmatpush3.bf16.msra.mxu1 %v17663_v17 }
 0x831   :  { %15889 = vmatprep.subr.bf16.mxu1 %v17664_v30 }
 0x833   :  { %15874 = vmatmul.mubr.bf16.gmra.mrb[28].mxu1 %v7661_v20  ;;  %v22706_v20 = vld [vmem:[#allocation26_spill] sm:$0xff] }
 0x834   :  { %15890 = vmatpush3.bf16.msra.mxu1 %v17664_v30  ;;  %15893 = vmatprep.mubr.bf16.mxu1 %v20380_v29  ;;  %v17666_v29 = vld [vmem:[%s22370_s2 + $0x4c0] sm:$0xff]  }
 0x835   :  { %15891 = vmatprep.subr.bf16.mxu1 %v17665_v48  ;;  %15909 = vmatprep.subr.bf16.mxu0 %v17666_v29 }
 0x836   :  { %15910 = vmatpush3.bf16.msra.mxu0 %v17666_v29 }
 0x838   :  { %15892 = vmatpush3.bf16.msra.mxu1 %v17665_v48 }
 0x83b   :  { %15894 = vmatmul.mubr.bf16.vlgmr.msra.gmra.mrb[16].mxu1 %v20387_v47  ;;  %v20665_v47 = vld [vmem:[%s22375_s7 + $0x1] ss:$0 sm:$0xff] }
 0x83c   :  { %15897 = vmatprep.mubr.bf16.mxu1 %v20404_v43  ;;  %v17667_v43 = vld [vmem:[%s22370_s2 + $0x4c8] sm:$0xff]  }
 0x83d   :  { %15911 = vmatprep.subr.bf16.mxu0 %v17667_v43 }
 0x83e   :  { %15912 = vmatpush3.bf16.msra.mxu0 %v17667_v43 }
 0x843   :  { %15898 = vmatmul.mubr.bf16.gmra.mrb[20].mxu1 %v20411_v14  ;;  %v17669_v14 = vld [vmem:[%s22370_s2 + $0x4d8] sm:$0xff]  }
 0x844   :  { %15901 = vmatprep.mubr.bf16.mxu1 %v22692_v32 }
 0x84b   :  { %15902 = vmatmul.mubr.bf16.gmra.mrb[24].mxu1 %v22693_v55 }
 0x84c   :  { %15905 = vmatprep.mubr.bf16.mxu1 %v20448_v31  ;;  %v17668_v31 = vld [vmem:[%s22370_s2 + $0x4d0] sm:$0xff]  }
 0x84d   :  { %15913 = vmatprep.subr.bf16.mxu0 %v17668_v31 }
 0x84e   :  { %15914 = vmatpush3.bf16.msra.mxu0 %v17668_v31 }
 0x84f   :  { %15915 = vmatprep.subr.bf16.mxu0 %v17669_v14 }
 0x852   :  { %15916 = vmatpush3.bf16.msra.mxu0 %v17669_v14  ;;  %v22707_v14 = vld [vmem:[#allocation27_spill] sm:$0xff] }
 0x853   :  { %15906 = vmatmul.mubr.bf16.gmra.mrb[28].mxu1 %v7863_v9  ;;  %15917 = vmatprep.subr.bf16.mxu0 %v17670_v59 }
 0x856   :  { %15918 = vmatpush3.bf16.msra.mxu0 %v17670_v59 }
 0x857   :  { %15919 = vmatprep.subr.bf16.mxu0 %v17671_v34 }
 0x85a   :  { %15920 = vmatpush3.bf16.msra.mxu0 %v17671_v34 }
 0x85b   :  { %15921 = vmatprep.subr.bf16.mxu0 %v17672_v12 }
 0x85e   :  { %15922 = vmatpush3.bf16.msra.mxu0 %v17672_v12 }
 0x85f   :  { %15923 = vmatprep.subr.bf16.mxu0 %v17673_v7 }
 0x862   :  { %15924 = vmatpush3.bf16.msra.mxu0 %v17673_v7 }
 0x863   :  { %15941 = vmatprep.subr.bf16.mxu0 %v20731_v56 }
 0x90e   :  { %v15895_v2 = vpop.f32.mrb[16].mxu1 }
 0x90f   :  { %v8052_v25 = vadd.f32 %v15895_v2, %v20665_v47  ;;  %v7963_v16 = vpop.f32.mrb[17].mxu1 }
 0x910   :  { %v8050_v33 = vadd.f32 %v20665_v47, %v7963_v16  ;;  %v15896_v51 = vpop.f32.mrb[18].mxu1  ;;  %v22708_v16 = vld [vmem:[#allocation16_spill] sm:$0xff] }
 0x911   :  { %v20673_v18 = vadd.f32 %v8052_v25, %v22694_v45  ;;  %v8053_v22 = vadd.f32 %v15896_v51, %v20665_v47  ;;  %v7966_v52 = vpop.f32.mrb[19].mxu1 }
 0x912   :  { %v20680_v11 = vadd.f32 %v8050_v33, %v22695_v63  ;;  %v8051_v26 = vadd.f32 %v20665_v47, %v7966_v52  ;;  %v22710_v63 = vld [vmem:[#allocation13_spill] sm:$0xff] }
 0x913   :  { %v20684_v50 = vadd.f32 %v8053_v22, %v22696_v39  ;;  %v8084_v53 = vmax.f32 %v20673_v18, 0.0  ;;  %v22709_v22 = vld [vmem:[#allocation28_spill] sm:$0xff] }
 0x914   :  { %v8082_v40 = vmax.f32 %v20680_v11, 0.0  ;;  %v20688_v13 = vadd.f32 %v8051_v26, %v22697_v35  ;;  %v22711_v35 = vld [vmem:[#allocation14_spill] sm:$0xff] }
 0x915   :  { %v8085_v36 = vmax.f32 %v20684_v50, 0.0  ;;  %v8104_v54 = vmul.f32 %v8084_v53, %v22700_v19 }
 0x916   :  { %v8083_v0 = vmax.f32 %v20688_v13, 0.0  ;;  %v15899_v15 = vpop.f32.mrb[20].mxu1  ;;  %v8102_v60 = vmul.f32 %v8082_v40, %v22698_v8 }
 0x917   :  { %v8056_v5 = vadd.f32 %v15899_v15, %v20665_v47  ;;  %v7979_v24 = vpop.f32.mrb[21].mxu1  ;;  %v8105_v3 = vmul.f32 %v8085_v36, %v22703_v6  ;;  %v22712_v15 = vld [vmem:[#allocation29_spill] sm:$0xff] }
 0x918   :  { %v8103_v58 = vmul.f32 %v8083_v0, %v22699_v61  ;;  %v8054_v10 = vadd.f32 %v20665_v47, %v7979_v24  ;;  %v15900_v44 = vpop.f32.mrb[22].mxu1 }
 0x919   :  { %v8057_v28 = vadd.f32 %v15900_v44, %v20665_v47  ;;  %v7982_v38 = vpop.f32.mrb[23].mxu1  ;;  %v20712_v57 = vadd.f32 %v8056_v5, %v22701_v1 }
 0x91a   :  { %v8118_v37 = vadd.f32 %v8103_v58, %v8102_v60  ;;  %v20715_v42 = vadd.f32 %v8054_v10, %v22702_v62  ;;  %v8055_v23 = vadd.f32 %v20665_v47, %v7982_v38  ;;  %v22713_v58 = vld [vmem:[#allocation11_spill] sm:$0xff] }
 0x91b   :  { %v20723_v17 = vadd.f32 %v8057_v28, %v22704_v27  ;;  %v8088_v46 = vmax.f32 %v20712_v57, 0.0 }
 0x91c   :  { %v8119_v4 = vadd.f32 %v8118_v37, %v8104_v54  ;;  %v8086_v49 = vmax.f32 %v20715_v42, 0.0  ;;  %v20726_v30 = vadd.f32 %v8055_v23, %v22705_v41  ;;  %v22714_v54 = vld [vmem:[#allocation30_spill] sm:$0xff] }
 0x91d   :  { %v8089_v31 = vmax.f32 %v20723_v17, 0.0  ;;  %v8108_v52 = vmul.f32 %v8088_v46, %v22709_v22 }
 0x91e   :  { %v8106_v48 = vmul.f32 %v8086_v49, %v22706_v20  ;;  %v8120_v32 = vadd.f32 %v8119_v4, %v8105_v3  ;;  %v8087_v55 = vmax.f32 %v20726_v30, 0.0  ;;  %v15903_v21 = vpop.f32.mrb[24].mxu1  ;;  %v22715_v4 = vld [vmem:[#allocation31_spill] sm:$0xff] }
 0x91f   :  { %v8060_v9 = vadd.f32 %v15903_v21, %v20665_v47  ;;  %v7995_v29 = vpop.f32.mrb[25].mxu1  ;;  %v8109_v5 = vmul.f32 %v8089_v31, %v22712_v15 }
 0x920   :  { %v8121_v43 = vadd.f32 %v8120_v32, %v8106_v48  ;;  %v8107_v59 = vmul.f32 %v8087_v55, %v22707_v14  ;;  %v8058_v2 = vadd.f32 %v20665_v47, %v7995_v29  ;;  %v15904_v25 = vpop.f32.mrb[26].mxu1  ;;  %v22716_v32 = vld [vmem:[#allocation32_spill] sm:$0xff] }
 0x921   :  { %v20746_v33 = vadd.f32 %v8060_v9, %v22708_v16  ;;  %v8061_v51 = vadd.f32 %v15904_v25, %v20665_v47  ;;  %v7998_v45 = vpop.f32.mrb[27].mxu1  ;;  %v22718_v25 = vld [vmem:[#allocation17_spill] sm:$0xff] }
 0x922   :  { %v8122_v34 = vadd.f32 %v8121_v43, %v8107_v59  ;;  %v8074_v26 = vadd.f32 %v8058_v2, %v22710_v63  ;;  %v8059_v39 = vadd.f32 %v20665_v47, %v7998_v45  ;;  %v22717_v59 = vld [vmem:[#allocation20_spill] sm:$0xff]  ;;  %v22720_v63 = vld [vmem:[#allocation18_spill] sm:$0xff] }
 0x923   :  { %v8077_v12 = vadd.f32 %v8061_v51, %v22711_v35  ;;  %v8092_v44 = vmax.f32 %v20746_v33, 0.0  ;;  %v22719_v51 = vld [vmem:[#allocation33_spill] sm:$0xff] }
 0x924   :  { %v8123_v24 = vadd.f32 %v8122_v34, %v8108_v52  ;;  %v8090_v60 = vmax.f32 %v8074_v26, 0.0  ;;  %v8075_v10 = vadd.f32 %v8059_v39, %v22713_v58  ;;  %v22721_v39 = vld [vmem:[#allocation15_spill] sm:$0xff] }
 0x925   :  { %v8093_v1 = vmax.f32 %v8077_v12, 0.0  ;;  %v8112_v21 = vmul.f32 %v8092_v44, %v22716_v32 }
 0x926   :  { %v8110_v28 = vmul.f32 %v8090_v60, %v22714_v54  ;;  %v8124_v38 = vadd.f32 %v8123_v24, %v8109_v5  ;;  %v8091_v7 = vmax.f32 %v8075_v10, 0.0  ;;  %v15907_v37 = vpop.f32.mrb[28].mxu1  ;;  %v22722_v5 = vld [vmem:[#allocation34_spill] sm:$0xff] }
 0x927   :  { %v8064_v62 = vadd.f32 %v15907_v37, %v20665_v47  ;;  %v8011_v23 = vpop.f32.mrb[29].mxu1  ;;  %v8113_v45 = vmul.f32 %v8093_v1, %v22719_v51  ;;  %v22723_v37 = vld [vmem:[#allocation35_spill] sm:$0xff] }
 0x928   :  { %v8125_v3 = vadd.f32 %v8124_v38, %v8110_v28  ;;  %v8111_v27 = vmul.f32 %v8091_v7, %v22715_v4  ;;  %v8062_v41 = vadd.f32 %v20665_v47, %v8011_v23  ;;  %v15908_v48 = vpop.f32.mrb[30].mxu1  ;;  %v22724_v23 = vld [vmem:[#allocation36_spill] sm:$0xff] }
 0x929   :  { %v8065_v9 = vadd.f32 %v15908_v48, %v20665_v47  ;;  %v8014_v29 = vpop.f32.mrb[31].mxu1  ;;  %v8080_v2 = vadd.f32 %v8064_v62, %v22717_v59 }
 0x92a   :  { %v8126_v43 = vadd.f32 %v8125_v3, %v8111_v27  ;;  %v8078_v16 = vadd.f32 %v8062_v41, %v22718_v25  ;;  %v8063_v33 = vadd.f32 %v20665_v47, %v8014_v29  ;;  %v22725_v27 = vld [vmem:[#allocation37_spill] sm:$0xff] }
 0x92b   :  { %v8081_v26 = vadd.f32 %v8065_v9, %v22720_v63  ;;  %v8096_v12 = vmax.f32 %v8080_v2, 0.0 }
 0x92c   :  { %v8127_v52 = vadd.f32 %v8126_v43, %v8112_v21  ;;  %v8094_v34 = vmax.f32 %v8078_v16, 0.0  ;;  %v8079_v35 = vadd.f32 %v8063_v33, %v22721_v39 }
 0x92d   :  { %v8097_v38 = vmax.f32 %v8081_v26, 0.0  ;;  %v8116_v3 = vmul.f32 %v8096_v12, %v22724_v23 }
 0x92e   :  { %v8114_v24 = vmul.f32 %v8094_v34, %v22722_v5  ;;  %v8128_v58 = vadd.f32 %v8127_v52, %v8113_v45  ;;  %v8095_v10 = vmax.f32 %v8079_v35, 0.0 }
 0x92f   :  { %v8117_v41 = vmul.f32 %v8097_v38, %v22725_v27 }
 0x930   :  { %v8129_v28 = vadd.f32 %v8128_v58, %v8114_v24  ;;  %v8115_v62 = vmul.f32 %v8095_v10, %v22723_v37 }
 0x932   :  { %v8130_v47 = vadd.f32 %v8129_v28, %v8115_v62 }
 0x934   :  { %v8131_v48 = vadd.f32 %v8130_v47, %v8116_v3 }
 0x936   :  { %v8132_v21 = vadd.f32 %v8131_v48, %v8117_v41 }
 0x938   :  { %v8133_v29 = vrot.slane %v8132_v21, 4 }
 0x93a   :  { %v8134_v9 = vadd.f32 %v8133_v29, %v8132_v21 }
 0x93c   :  { %v8135_v43 = vrot.slane %v8134_v9, 2 }
 0x93e   :  { %v8136_v59 = vadd.f32 %v8135_v43, %v8134_v9 }
 0x940   :  { %v8137_v2 = vrot.slane %v8136_v59, 1 }
 0x942   :  { %v8138_v25 = vadd.f32 %v8137_v2, %v8136_v59 }
 0x944   :  { %v8139_v16 = vmul.f32 0.013888889, %v8138_v25 }
 0x946   :  { %v20778_v33 = vsub.f32 %v8082_v40, %v8139_v16  ;;  %v20782_v45 = vsub.f32 %v8083_v0, %v8139_v16  ;;  %v20786_v52 = vsub.f32 %v8084_v53, %v8139_v16  ;;  %v20790_v63 = vsub.f32 %v8085_v36, %v8139_v16 }
 0x947   :  { %v20794_v26 = vsub.f32 %v8086_v49, %v8139_v16  ;;  %v20798_v11 = vsub.f32 %v8087_v55, %v8139_v16  ;;  %v20802_v40 = vsub.f32 %v8088_v46, %v8139_v16  ;;  %v20806_v18 = vsub.f32 %v8089_v31, %v8139_v16 }
 0x948   :  { %v20808_v13 = vsub.f32 %v8090_v60, %v8139_v16  ;;  %v20810_v50 = vsub.f32 %v8091_v7, %v8139_v16  ;;  %v20812_v53 = vsub.f32 %v8092_v44, %v8139_v16  ;;  %v20814_v0 = vsub.f32 %v8093_v1, %v8139_v16 }
 0x949   :  { %v20816_v36 = vsub.f32 %v8094_v34, %v8139_v16  ;;  %v20818_v42 = vsub.f32 %v8095_v10, %v8139_v16  ;;  %v20820_v49 = vsub.f32 %v8096_v12, %v8139_v16  ;;  %v20822_v57 = vsub.f32 %v8097_v38, %v8139_v16 }
 0x94a   :  { %v8156_v17 = vmul.f32 %v20778_v33, %v22698_v8  ;;  %v8157_v30 = vmul.f32 %v20782_v45, %v22699_v61  ;;  %v8158_v46 = vmul.f32 %v20786_v52, %v22700_v19  ;;  %v8159_v60 = vmul.f32 %v20790_v63, %v22703_v6 }
 0x94b   :  { %v8160_v44 = vmul.f32 %v20794_v26, %v22706_v20  ;;  %v8161_v34 = vmul.f32 %v20798_v11, %v22707_v14  ;;  %v8162_v12 = vmul.f32 %v20802_v40, %v22709_v22  ;;  %v8163_v10 = vmul.f32 %v20806_v18, %v22712_v15 }
 0x94c   :  { %v8172_v55 = vmul.f32 %v8156_v17, %v8156_v17  ;;  %v8173_v31 = vmul.f32 %v8157_v30, %v8157_v30  ;;  %v8174_v7 = vmul.f32 %v8158_v46, %v8158_v46  ;;  %v8175_v39 = vmul.f32 %v8159_v60, %v8159_v60 }
 0x94d   :  { %v8176_v24 = vmul.f32 %v8160_v44, %v8160_v44  ;;  %v8177_v28 = vmul.f32 %v8161_v34, %v8161_v34  ;;  %v8164_v62 = vmul.f32 %v20808_v13, %v22714_v54  ;;  %v8178_v3 = vmul.f32 %v8162_v12, %v8162_v12 }
 0x94e   :  { %v8188_v1 = vadd.f32 %v8173_v31, %v8172_v55  ;;  %v8165_v41 = vmul.f32 %v20810_v50, %v22715_v4  ;;  %v8179_v48 = vmul.f32 %v8163_v10, %v8163_v10  ;;  %v8166_v29 = vmul.f32 %v20812_v53, %v22716_v32 }
 0x94f   :  { %v8180_v9 = vmul.f32 %v8164_v62, %v8164_v62  ;;  %v8167_v59 = vmul.f32 %v20814_v0, %v22719_v51  ;;  %v8168_v16 = vmul.f32 %v20816_v36, %v22722_v5  ;;  %v8169_v46 = vmul.f32 %v20818_v42, %v22723_v37 }
 0x950   :  { %v8189_v35 = vadd.f32 %v8188_v1, %v8174_v7  ;;  %v8181_v2 = vmul.f32 %v8165_v41, %v8165_v41  ;;  %v8182_v17 = vmul.f32 %v8166_v29, %v8166_v29  ;;  %v8170_v60 = vmul.f32 %v20820_v49, %v22724_v23 }
 0x951   :  { %v8183_v55 = vmul.f32 %v8167_v59, %v8167_v59  ;;  %v8184_v44 = vmul.f32 %v8168_v16, %v8168_v16  ;;  %v8171_v1 = vmul.f32 %v20822_v57, %v22725_v27  ;;  %v8185_v34 = vmul.f32 %v8169_v46, %v8169_v46 }
 0x952   :  { %v8190_v58 = vadd.f32 %v8189_v35, %v8175_v39  ;;  %v8186_v35 = vmul.f32 %v8170_v60, %v8170_v60 }
 0x954   :  { %v8191_v38 = vadd.f32 %v8190_v58, %v8176_v24  ;;  %v8187_v24 = vmul.f32 %v8171_v1, %v8171_v1 }
 0x956   :  { %v8192_v47 = vadd.f32 %v8191_v38, %v8177_v28 }
 0x958   :  { %v8193_v21 = vadd.f32 %v8192_v47, %v8178_v3 }
 0x95a   :  { %v8194_v43 = vadd.f32 %v8193_v21, %v8179_v48 }
 0x95c   :  { %v8195_v25 = vadd.f32 %v8194_v43, %v8180_v9 }
 0x95e   :  { %v8196_v30 = vadd.f32 %v8195_v25, %v8181_v2  ;;  %v13412_v25 = vld [vmem:[%s22376_s8 + $0x1] ss:$0 sm:$0xff] }
 0x960   :  { %v8197_v31 = vadd.f32 %v8196_v30, %v8182_v17 }
 0x962   :  { %v8198_v7 = vadd.f32 %v8197_v31, %v8183_v55 }
 0x964   :  { %v8199_v39 = vadd.f32 %v8198_v7, %v8184_v44 }
 0x966   :  { %v8200_v12 = vadd.f32 %v8199_v39, %v8185_v34 }
 0x968   :  { %v8201_v58 = vadd.f32 %v8200_v12, %v8186_v35 }
 0x96a   :  { %v8202_v10 = vadd.f32 %v8201_v58, %v8187_v24 }
 0x96c   :  { %v8203_v28 = vrot.slane %v8202_v10, 4 }
 0x96e   :  { %v8204_v38 = vadd.f32 %v8203_v28, %v8202_v10 }
 0x970   :  { %v8205_v62 = vrot.slane %v8204_v38, 2 }
 0x972   :  { %v8206_v3 = vadd.f32 %v8205_v62, %v8204_v38 }
 0x974   :  { %v8207_v47 = vrot.slane %v8206_v3, 1 }
 0x976   :  { %v8208_v41 = vadd.f32 %v8207_v47, %v8206_v3 }
 0x978   :  { %v8209_v48 = vmul.f32 0.013888889, %v8208_v41 }
 0x97a   :  { %v8210_v21 = vadd.f32 1e-05, %v8209_v48 }
 0x97c   :  { %17816 = vrsqrt.f32 %v8210_v21 }
 0x986   :  { %v17817_v29 = vpop.eup %17816 }
 0x987   :  { %v8212_v9 = vmul.f32 %v17817_v29, %v20778_v33  ;;  %v8213_v43 = vmul.f32 %v17817_v29, %v20782_v45  ;;  %v8214_v59 = vmul.f32 %v17817_v29, %v20786_v52  ;;  %v8215_v2 = vmul.f32 %v17817_v29, %v20790_v63 }
 0x988   :  { %v8216_v16 = vmul.f32 %v17817_v29, %v20794_v26  ;;  %v8217_v17 = vmul.f32 %v17817_v29, %v20798_v11  ;;  %v8218_v30 = vmul.f32 %v17817_v29, %v20802_v40  ;;  %v8219_v46 = vmul.f32 %v17817_v29, %v20806_v18 }
 0x989   :  { %v8220_v33 = vmul.f32 %v17817_v29, %v20808_v13  ;;  %v8221_v45 = vmul.f32 %v17817_v29, %v20810_v50  ;;  %v8222_v52 = vmul.f32 %v17817_v29, %v20812_v53  ;;  %v8223_v63 = vmul.f32 %v17817_v29, %v20814_v0  ;;  %v13413_v13 = vld [vmem:[%s22377_s9 + $0x1] ss:$0 sm:$0xff] }
 0x98a   :  { %v8224_v55 = vmul.f32 %v17817_v29, %v20816_v36  ;;  %v8225_v31 = vmul.f32 %v17817_v29, %v20818_v42  ;;  %v8226_v26 = vmul.f32 %v17817_v29, %v20820_v49  ;;  %v8227_v11 = vmul.f32 %v17817_v29, %v20822_v57 }
 0x98b   :  { %v8234_v60 = vmul.f32 %v13412_v25, %v8212_v9  ;;  %v8235_v40 = vmul.f32 %v13412_v25, %v8213_v43  ;;  %v8236_v44 = vmul.f32 %v13412_v25, %v8214_v59  ;;  %v8237_v18 = vmul.f32 %v13412_v25, %v8215_v2 }
 0x98c   :  { %v8238_v50 = vmul.f32 %v13412_v25, %v8216_v16  ;;  %v8239_v53 = vmul.f32 %v13412_v25, %v8217_v17  ;;  %v8240_v7 = vmul.f32 %v13412_v25, %v8218_v30  ;;  %v8241_v0 = vmul.f32 %v13412_v25, %v8219_v46 }
 0x98d   :  { %v8242_v1 = vmul.f32 %v13412_v25, %v8220_v33  ;;  %v8243_v36 = vmul.f32 %v13412_v25, %v8221_v45  ;;  %v8244_v34 = vmul.f32 %v13412_v25, %v8222_v52  ;;  %v8245_v42 = vmul.f32 %v13412_v25, %v8223_v63  ;;  %v8361_v52 = vld [vmem:[#allocation2 + $0x8] sm:$0xff] }
 0x98e   :  { %v8246_v39 = vmul.f32 %v13412_v25, %v8224_v55  ;;  %v8247_v49 = vmul.f32 %v13412_v25, %v8225_v31  ;;  %v8248_v35 = vmul.f32 %v13412_v25, %v8226_v26  ;;  %v8249_v57 = vmul.f32 %v13412_v25, %v8227_v11 }
 0x98f   :  { %v8256_v12 = vadd.f32 %v13413_v13, %v8234_v60  ;;  %v8257_v24 = vadd.f32 %v13413_v13, %v8235_v40  ;;  %v8258_v58 = vadd.f32 %v13413_v13, %v8236_v44  ;;  %v8259_v10 = vadd.f32 %v13413_v13, %v8237_v18 }
 0x990   :  { %v8260_v28 = vadd.f32 %v13413_v13, %v8238_v50  ;;  %v8261_v38 = vadd.f32 %v13413_v13, %v8239_v53  ;;  %v8262_v62 = vadd.f32 %v13413_v13, %v8240_v7  ;;  %v8263_v3 = vadd.f32 %v13413_v13, %v8241_v0  ;;  %v17675_v50 = vld [vmem:[%s22370_s2 + $0x488] sm:$0xff]   ;;  %v17676_v7 = vld [vmem:[%s22370_s2 + $0x490] sm:$0xff]  }
 0x991   :  { %v8264_v47 = vadd.f32 %v13413_v13, %v8242_v1  ;;  %v8265_v41 = vadd.f32 %v13413_v13, %v8243_v36  ;;  %v8266_v48 = vadd.f32 %v13413_v13, %v8244_v34  ;;  %v8267_v21 = vadd.f32 %v13413_v13, %v8245_v42  ;;  %v17677_v1 = vld [vmem:[%s22370_s2 + $0x498] sm:$0xff]   ;;  %v17679_v42 = vld [vmem:[%s22370_s2 + $0x4a8] sm:$0xff]  }
 0x992   :  { %v8268_v29 = vadd.f32 %v13413_v13, %v8246_v39  ;;  %v8269_v9 = vadd.f32 %v13413_v13, %v8247_v49  ;;  %v8270_v43 = vadd.f32 %v13413_v13, %v8248_v35  ;;  %v8271_v59 = vadd.f32 %v13413_v13, %v8249_v57  ;;  %v17680_v49 = vld [vmem:[%s22370_s2 + $0x4b0] sm:$0xff]   ;;  %v8320_v35 = vld [vmem:[#allocation2 + $0x7] sm:$0xff] }
 0x993   :  { %v20879_v2 = vmul.f32 %v8256_v12, %v22698_v8  ;;  %v20882_v25 = vmul.f32 %v8257_v24, %v22699_v61  ;;  %v20885_v16 = vmul.f32 %v8258_v58, %v22700_v19  ;;  %v20888_v17 = vmul.f32 %v8259_v10, %v22703_v6  ;;  %v17681_v24 = vld [vmem:[%s22370_s2 + $0x4b8] sm:$0xff]   ;;  %v17682_v10 = vld [vmem:[%s22370_s2 + $0x500] sm:$0xff]  }
 0x994   :  { %v20891_v30 = vmul.f32 %v8260_v28, %v22706_v20  ;;  %v20894_v46 = vmul.f32 %v8261_v38, %v22707_v14  ;;  %v20897_v33 = vmul.f32 %v8262_v62, %v22709_v22  ;;  %v20900_v45 = vmul.f32 %v8263_v3, %v22712_v15  ;;  %v17697_v8 = vld [vmem:[%s22370_s2 + $0x578] sm:$0xff]  }
 0x995   :  { %22726 = vst [vmem:[#allocation21_spill] sm:$0xff] %v20879_v2  ;;  %22727 = vst [vmem:[#allocation19_spill] sm:$0xff] %v20882_v25  ;;  %v20903_v63 = vmul.f32 %v8264_v47, %v22714_v54  ;;  %v20906_v55 = vmul.f32 %v8265_v41, %v22715_v4  ;;  %v20909_v31 = vmul.f32 %v8266_v48, %v22716_v32  ;;  %v17683_v41 = vld [vmem:[%s22370_s2 + $0x508] sm:$0xff]  }
 0x996   :  { %22728 = vst [vmem:[#allocation8_spill] sm:$0xff] %v20885_v16  ;;  %22729 = vst [vmem:[#allocation38_spill] sm:$0xff] %v20888_v17  ;;  %v20912_v26 = vmul.f32 %v8267_v21, %v22719_v51  ;;  %v20919_v11 = vmul.f32 %v8268_v29, %v22722_v5  ;;  %v20922_v60 = vmul.f32 %v8269_v9, %v22723_v37  ;;  %v17684_v21 = vld [vmem:[%s22370_s2 + $0x510] sm:$0xff]  }
 0x997   :  { %22730 = vst [vmem:[#allocation6_spill] sm:$0xff] %v20891_v30  ;;  %22731 = vst [vmem:[#allocation39_spill] sm:$0xff] %v20894_v46  ;;  %v20925_v40 = vmul.f32 %v8270_v43, %v22724_v23  ;;  %v20928_v44 = vmul.f32 %v8271_v59, %v22725_v27  ;;  %v8362_v18 = vpack.c.bf16 %v20879_v2, %v8361_v52 }
 0x998   :  { %22732 = vst [vmem:[#allocation12_spill] sm:$0xff] %v20897_v33  ;;  %22733 = vst [vmem:[#allocation9_spill] sm:$0xff] %v20900_v45  ;;  %v8363_v13 = vpack.c.bf16 %v20885_v16, %v20882_v25  ;;  %v8364_v53 = vpack.c.bf16 %v20891_v30, %v20888_v17  ;;  %v8365_v0 = vpack.c.bf16 %v20897_v33, %v20894_v46 }
 0x999   :  { %22734 = vst [vmem:[#allocation10_spill] sm:$0xff] %v20903_v63  ;;  %22735 = vst [vmem:[#allocation7_spill] sm:$0xff] %v20906_v55  ;;  %15925 = vmatprep.mubr.bf16.mxu0 %v8362_v18  ;;  %v8366_v36 = vpack.c.bf16 %v20903_v63, %v20900_v45  ;;  %v8367_v34 = vpack.c.bf16 %v20909_v31, %v20906_v55  ;;  %v8368_v39 = vpack.c.bf16 %v20919_v11, %v20912_v26  ;;  %v17685_v18 = vld [vmem:[%s22370_s2 + $0x518] sm:$0xff]  }
 0x99a   :  { %22736 = vst [vmem:[#allocation16_spill] sm:$0xff] %v20909_v31  ;;  %22737 = vst [vmem:[#allocation13_spill] sm:$0xff] %v20912_v26  ;;  %15926 = vmatmul.mubr.bf16.vlgmr.msra.gmra.mrb[32].mxu0 %v8363_v13  ;;  %v8369_v12 = vpack.c.bf16 %v20925_v40, %v20922_v60 }
 0x99b   :  { %8288 = vst [vmem:[#allocation2 + $0x10] sm:$0xff] %v20879_v2  ;;  %8289 = vst [vmem:[#allocation2 + $0x18] sm:$0xff] %v20882_v25  ;;  %15929 = vmatprep.mubr.bf16.mxu0 %v8364_v53  ;;  %15942 = vmatpush3.bf16.msra.mxu0 %v20731_v56  ;;  %v17678_v56 = vld [vmem:[%s22370_s2 + $0x4a0] sm:$0xff]  }
 0x99c   :  { %8290 = vst [vmem:[#allocation2 + $0x20] sm:$0xff] %v20885_v16  ;;  %8291 = vst [vmem:[#allocation2 + $0x28] sm:$0xff] %v20888_v17  ;;  %15943 = vmatprep.subr.bf16.mxu0 %v17675_v50 }
 0x99d   :  { %22738 = vst [vmem:[#allocation14_spill] sm:$0xff] %v20919_v11  ;;  %22739 = vst [vmem:[#allocation11_spill] sm:$0xff] %v20922_v60 }
 0x99e   :  { %22740 = vst [vmem:[#allocation20_spill] sm:$0xff] %v20925_v40  ;;  %22741 = vst [vmem:[#allocation17_spill] sm:$0xff] %v20928_v44 }
 0x99f   :  { %8292 = vst [vmem:[#allocation2 + $0x30] sm:$0xff] %v20891_v30  ;;  %8293 = vst [vmem:[#allocation2 + $0x38] sm:$0xff] %v20894_v46  ;;  %15944 = vmatpush3.bf16.msra.mxu0 %v17675_v50  ;;  %v17686_v50 = vld [vmem:[%s22370_s2 + $0x520] sm:$0xff]  }
 0x9a0   :  { %8294 = vst [vmem:[#allocation2 + $0x40] sm:$0xff] %v20897_v33  ;;  %8295 = vst [vmem:[#allocation2 + $0x48] sm:$0xff] %v20900_v45  ;;  %15945 = vmatprep.subr.bf16.mxu0 %v17676_v7 }
 0x9a1   :  { %8296 = vst [vmem:[#allocation2 + $0x50] sm:$0xff] %v20903_v63  ;;  %8297 = vst [vmem:[#allocation2 + $0x58] sm:$0xff] %v20906_v55 }
 0x9a2   :  { %8298 = vst [vmem:[#allocation2 + $0x60] sm:$0xff] %v20909_v31  ;;  %8299 = vst [vmem:[#allocation2 + $0x68] sm:$0xff] %v20912_v26  ;;  %15930 = vmatmul.mubr.bf16.gmra.mrb[36].mxu0 %v8365_v0  ;;  %v20974_v57 = vld [vmem:[#allocation2 + $0xf] sm:$0xff]  ;;  %v20985_v28 = vld [vmem:[#allocation2 + $0x17] sm:$0xff] }
 0x9a3   :  { %8300 = vst [vmem:[#allocation2 + $0x70] sm:$0xff] %v20919_v11  ;;  %8301 = vst [vmem:[#allocation2 + $0x78] sm:$0xff] %v20922_v60  ;;  %15933 = vmatprep.mubr.bf16.mxu0 %v8366_v36  ;;  %15946 = vmatpush3.bf16.msra.mxu0 %v17676_v7  ;;  %v8336_v58 = vpack.c.bf16 %v20974_v57, %v8320_v35  ;;  %v20987_v38 = vld [vmem:[#allocation2 + $0x1f] sm:$0xff]  ;;  %v20989_v62 = vld [vmem:[#allocation2 + $0x27] sm:$0xff] }
 0x9a4   :  { %8302 = vst [vmem:[#allocation2 + $0x80] sm:$0xff] %v20925_v40  ;;  %8303 = vst [vmem:[#allocation2 + $0x88] sm:$0xff] %v20928_v44  ;;  %15947 = vmatprep.subr.bf16.mxu0 %v17677_v1  ;;  %v20995_v47 = vpack.c.bf16 %v20987_v38, %v20985_v28  ;;  %v8677_v35 = vld [vmem:[#allocation2 + $0x9] sm:$0xff] }
 0x9a6   :  { %v20991_v3 = vld [vmem:[#allocation2 + $0x2f] sm:$0xff]  ;;  %v21009_v29 = vld [vmem:[#allocation2 + $0x37] sm:$0xff] }
 0x9a7   :  { %15948 = vmatpush3.bf16.msra.mxu0 %v17677_v1  ;;  %v21002_v48 = vpack.c.bf16 %v20991_v3, %v20989_v62  ;;  %v21011_v9 = vld [vmem:[#allocation2 + $0x3f] sm:$0xff]  ;;  %v21013_v43 = vld [vmem:[#allocation2 + $0x47] sm:$0xff] }
 0x9a8   :  { %15949 = vmatprep.subr.bf16.mxu0 %v17678_v56  ;;  %v21015_v59 = vld [vmem:[#allocation2 + $0x4f] sm:$0xff]  ;;  %v21019_v52 = vpack.c.bf16 %v21011_v9, %v21009_v29  ;;  %v21033_v53 = vld [vmem:[#allocation2 + $0x57] sm:$0xff]  ;;  %v21101_v23 = vld [vmem:[#allocation2 + $0x41] sm:$0xff] }
 0x9a9   :  { %v21026_v13 = vpack.c.bf16 %v21015_v59, %v21013_v43  ;;  %v21035_v7 = vld [vmem:[#allocation2 + $0x5f] sm:$0xff]  ;;  %v21037_v0 = vld [vmem:[#allocation2 + $0x67] sm:$0xff]  ;;  %v21105_v5 = vld [vmem:[#allocation2 + $0x51] sm:$0xff] }
 0x9aa   :  { %15934 = vmatmul.mubr.bf16.gmra.mrb[40].mxu0 %v8367_v34  ;;  %v21039_v1 = vld [vmem:[#allocation2 + $0x6f] sm:$0xff]  ;;  %v21043_v36 = vpack.c.bf16 %v21035_v7, %v21033_v53  ;;  %v21099_v27 = vld [vmem:[#allocation2 + $0x39] sm:$0xff]  ;;  %v21125_v54 = vld [vmem:[#allocation2 + $0x61] sm:$0xff] }
 0x9ab   :  { %15937 = vmatprep.mubr.bf16.mxu0 %v8368_v39  ;;  %15950 = vmatpush3.bf16.msra.mxu0 %v17678_v56  ;;  %v17687_v56 = vld [vmem:[%s22370_s2 + $0x528] sm:$0xff]   ;;  %v21050_v34 = vpack.c.bf16 %v21039_v1, %v21037_v0  ;;  %v21057_v39 = vld [vmem:[#allocation2 + $0x77] sm:$0xff]  ;;  %v21109_v51 = vpack.c.bf16 %v21101_v23, %v21099_v27 }
 0x9ac   :  { %15951 = vmatprep.subr.bf16.mxu0 %v17679_v42  ;;  %v21103_v37 = vld [vmem:[#allocation2 + $0x49] sm:$0xff]  ;;  %v21123_v4 = vld [vmem:[#allocation2 + $0x59] sm:$0xff]  ;;  %v21129_v22 = vld [vmem:[#allocation2 + $0x71] sm:$0xff] }
 0x9ad   :  { %v21116_v32 = vpack.c.bf16 %v21105_v5, %v21103_v37  ;;  %v21127_v15 = vld [vmem:[#allocation2 + $0x69] sm:$0xff]  ;;  %v21133_v14 = vpack.c.bf16 %v21125_v54, %v21123_v4  ;;  %v21147_v6 = vld [vmem:[#allocation2 + $0x79] sm:$0xff]  ;;  %v21149_v19 = vld [vmem:[#allocation2 + $0x81] sm:$0xff] }
 0x9ae   :  { %v21140_v20 = vpack.c.bf16 %v21129_v22, %v21127_v15  ;;  %v21153_v61 = vpack.c.bf16 %v21149_v19, %v21147_v6 }
 0x9af   :  { %15952 = vmatpush3.bf16.msra.mxu0 %v17679_v42  ;;  %v17688_v42 = vld [vmem:[%s22370_s2 + $0x530] sm:$0xff]   ;;  %22742 = vst [vmem:[#allocation18_spill] sm:$0xff] %v21133_v14 }
 0x9b0   :  { %15953 = vmatprep.subr.bf16.mxu0 %v17680_v49  ;;  %22743 = vst [vmem:[#allocation15_spill] sm:$0xff] %v21140_v20 }
 0x9b2   :  { %15938 = vmatmul.mubr.bf16.gmra.mrb[44].mxu0 %v8369_v12  ;;  %v21061_v12 = vld [vmem:[#allocation2 + $0x11] sm:$0xff] }
 0x9b3   :  { %15954 = vmatpush3.bf16.msra.mxu0 %v17680_v49  ;;  %15957 = vmatprep.mubr.bf16.mxu0 %v8336_v58  ;;  %v21059_v49 = vld [vmem:[#allocation2 + $0x7f] sm:$0xff] }
 0x9b4   :  { %15955 = vmatprep.subr.bf16.mxu0 %v17681_v24  ;;  %v17689_v58 = vld [vmem:[%s22370_s2 + $0x538] sm:$0xff]  }
 0x9b7   :  { %15956 = vmatpush3.bf16.msra.mxu0 %v17681_v24  ;;  %v21065_v24 = vpack.c.bf16 %v21059_v49, %v21057_v39 }
 0x9b8   :  { %15973 = vmatprep.subr.bf16.mxu0 %v17682_v10 }
 0x9ba   :  { %15958 = vmatmul.mubr.bf16.vlgmr.msra.gmra.mrb[32].mxu0 %v20995_v47 }
 0x9bb   :  { %15961 = vmatprep.mubr.bf16.mxu0 %v21002_v48  ;;  %15974 = vmatpush3.bf16.msra.mxu0 %v17682_v10  ;;  %v8693_v10 = vpack.c.bf16 %v21061_v12, %v8677_v35 }
 0x9bc   :  { %15975 = vmatprep.subr.bf16.mxu0 %v17683_v41 }
 0x9bf   :  { %15976 = vmatpush3.bf16.msra.mxu0 %v17683_v41  ;;  %v17690_v41 = vld [vmem:[%s22370_s2 + $0x540] sm:$0xff]  }
 0x9c0   :  { %15977 = vmatprep.subr.bf16.mxu0 %v17684_v21 }
 0x9c2   :  { %15962 = vmatmul.mubr.bf16.gmra.mrb[36].mxu0 %v21019_v52 }
 0x9c3   :  { %15965 = vmatprep.mubr.bf16.mxu0 %v21026_v13  ;;  %15978 = vmatpush3.bf16.msra.mxu0 %v17684_v21  ;;  %v21075_v21 = vld [vmem:[#allocation2 + $0x19] sm:$0xff] }
 0x9c4   :  { %15979 = vmatprep.subr.bf16.mxu0 %v17685_v18 }
 0x9c7   :  { %15980 = vmatpush3.bf16.msra.mxu0 %v17685_v18  ;;  %v21077_v18 = vld [vmem:[#allocation2 + $0x21] sm:$0xff] }
 0x9c8   :  { %15981 = vmatprep.subr.bf16.mxu0 %v17686_v50  ;;  %v21085_v35 = vpack.c.bf16 %v21077_v18, %v21075_v21 }
 0x9ca   :  { %15966 = vmatmul.mubr.bf16.gmra.mrb[40].mxu0 %v21043_v36 }
 0x9cb   :  { %15969 = vmatprep.mubr.bf16.mxu0 %v21050_v34  ;;  %15982 = vmatpush3.bf16.msra.mxu0 %v17686_v50  ;;  %v21079_v50 = vld [vmem:[#allocation2 + $0x29] sm:$0xff] }
 0x9cc   :  { %15983 = vmatprep.subr.bf16.mxu0 %v17687_v56 }
 0x9cf   :  { %15984 = vmatpush3.bf16.msra.mxu0 %v17687_v56  ;;  %v21081_v56 = vld [vmem:[#allocation2 + $0x31] sm:$0xff] }
 0x9d0   :  { %15985 = vmatprep.subr.bf16.mxu0 %v17688_v42 }
 0x9d2   :  { %15970 = vmatmul.mubr.bf16.gmra.mrb[44].mxu0 %v21065_v24 }
 0x9d3   :  { %15986 = vmatpush3.bf16.msra.mxu0 %v17688_v42  ;;  %15989 = vmatprep.mubr.bf16.mxu0 %v8693_v10  ;;  %v17691_v42 = vld [vmem:[%s22370_s2 + $0x548] sm:$0xff]   ;;  %v21092_v10 = vpack.c.bf16 %v21081_v56, %v21079_v50 }
 0x9d4   :  { %15987 = vmatprep.subr.bf16.mxu0 %v17689_v58 }
 0x9d7   :  { %15988 = vmatpush3.bf16.msra.mxu0 %v17689_v58  ;;  %v17692_v58 = vld [vmem:[%s22370_s2 + $0x550] sm:$0xff]  }
 0x9d8   :  { %16005 = vmatprep.subr.bf16.mxu0 %v17690_v41 }
 0x9da   :  { %15990 = vmatmul.mubr.bf16.vlgmr.msra.gmra.mrb[32].mxu0 %v21085_v35 }
 0x9db   :  { %15993 = vmatprep.mubr.bf16.mxu0 %v21092_v10  ;;  %16006 = vmatpush3.bf16.msra.mxu0 %v17690_v41  ;;  %v17693_v41 = vld [vmem:[%s22370_s2 + $0x558] sm:$0xff]  }
 0x9dc   :  { %16007 = vmatprep.subr.bf16.mxu0 %v17691_v42 }
 0x9df   :  { %16008 = vmatpush3.bf16.msra.mxu0 %v17691_v42  ;;  %v17694_v42 = vld [vmem:[%s22370_s2 + $0x560] sm:$0xff]  }
 0x9e0   :  { %16009 = vmatprep.subr.bf16.mxu0 %v17692_v58 }
 0x9e2   :  { %15994 = vmatmul.mubr.bf16.gmra.mrb[36].mxu0 %v21109_v51 }
 0x9e3   :  { %15997 = vmatprep.mubr.bf16.mxu0 %v21116_v32  ;;  %16010 = vmatpush3.bf16.msra.mxu0 %v17692_v58  ;;  %v17695_v58 = vld [vmem:[%s22370_s2 + $0x568] sm:$0xff]  }
 0x9e4   :  { %16011 = vmatprep.subr.bf16.mxu0 %v17693_v41 }
 0x9e7   :  { %16012 = vmatpush3.bf16.msra.mxu0 %v17693_v41  ;;  %v17696_v41 = vld [vmem:[%s22370_s2 + $0x570] sm:$0xff]  }
 0x9e8   :  { %16013 = vmatprep.subr.bf16.mxu0 %v17694_v42 }
 0x9ea   :  { %15998 = vmatmul.mubr.bf16.gmra.mrb[40].mxu0 %v21133_v14  ;;  %v17699_v14 = vld [vmem:[%s22370_s2 + $0x588] sm:$0xff]  }
 0x9eb   :  { %16001 = vmatprep.mubr.bf16.mxu0 %v21140_v20  ;;  %16014 = vmatpush3.bf16.msra.mxu0 %v17694_v42  ;;  %v8895_v42 = vpack.c.bf16 %v20985_v28, %v20974_v57  ;;  %v8896_v20 = vpack.c.bf16 %v20989_v62, %v20987_v38  ;;  %v8897_v57 = vpack.c.bf16 %v21009_v29, %v20991_v3  ;;  %v17700_v28 = vld [vmem:[%s22370_s2 + $0x590] sm:$0xff]   ;;  %v17701_v38 = vld [vmem:[%s22370_s2 + $0x598] sm:$0xff]   ;;  %v17703_v3 = vld [vmem:[%s22370_s2 + $0x5a8] sm:$0xff]  }
 0x9ec   :  { %16015 = vmatprep.subr.bf16.mxu0 %v17695_v58  ;;  %v8899_v62 = vpack.c.bf16 %v21033_v53, %v21015_v59  ;;  %v8901_v29 = vpack.c.bf16 %v21057_v39, %v21039_v1  ;;  %v17705_v53 = vld [vmem:[%s22370_s2 + $0x5b8] sm:$0xff]   ;;  %v9082_v1 = vpack.c.bf16 %v20888_v17, %v20885_v16  ;;  %v17707_v39 = vld [vmem:[%s22370_s2 + $0x5c8] sm:$0xff]  }
 0x9ed   :  { %v17769_v16 = vld [vmem:[%s22374_s6 + $0x578] sm:$0xff]  }
 0x9ef   :  { %16016 = vmatpush3.bf16.msra.mxu0 %v17695_v58  ;;  %v17698_v58 = vld [vmem:[%s22370_s2 + $0x580] sm:$0xff]  }
 0x9f0   :  { %16017 = vmatprep.subr.bf16.mxu0 %v17696_v41 }
 0x9f2   :  { %16002 = vmatmul.mubr.bf16.gmra.mrb[44].mxu0 %v21153_v61 }
 0x9f3   :  { %16018 = vmatpush3.bf16.msra.mxu0 %v17696_v41  ;;  %16021 = vmatprep.mubr.bf16.mxu0 %v8895_v42  ;;  %v17708_v41 = vld [vmem:[%s22370_s2 + $0x5d0] sm:$0xff]   ;;  %v9084_v42 = vpack.c.bf16 %v20900_v45, %v20897_v33 }
 0x9f4   :  { %16019 = vmatprep.subr.bf16.mxu0 %v17697_v8 }
 0x9f7   :  { %16020 = vmatpush3.bf16.msra.mxu0 %v17697_v8  ;;  %v8898_v8 = vpack.c.bf16 %v21013_v43, %v21011_v9  ;;  %v17704_v9 = vld [vmem:[%s22370_s2 + $0x5b0] sm:$0xff]   ;;  %v21194_v43 = vld [vmem:[#allocation2 + $0x87] sm:$0xff] }
 0x9f8   :  { %16037 = vmatprep.subr.bf16.mxu0 %v17698_v58  ;;  %v8902_v59 = vpack.c.bf16 %v21194_v43, %v21059_v49  ;;  %v9083_v49 = vpack.c.bf16 %v20894_v46, %v20891_v30 }
 0x9fa   :  { %16022 = vmatmul.mubr.bf16.vlgmr.msra.gmra.mrb[32].mxu0 %v8896_v20  ;;  %v17702_v20 = vld [vmem:[%s22370_s2 + $0x5a0] sm:$0xff]  }
 0x9fb   :  { %16025 = vmatprep.mubr.bf16.mxu0 %v8897_v57  ;;  %16038 = vmatpush3.bf16.msra.mxu0 %v17698_v58  ;;  %v17709_v58 = vld [vmem:[%s22370_s2 + $0x5d8] sm:$0xff]   ;;  %v9085_v57 = vpack.c.bf16 %v20906_v55, %v20903_v63 }
 0x9fc   :  { %16039 = vmatprep.subr.bf16.mxu0 %v17699_v14 }
 0x9ff   :  { %16040 = vmatpush3.bf16.msra.mxu0 %v17699_v14  ;;  %v8900_v14 = vpack.c.bf16 %v21037_v0, %v21035_v7  ;;  %v9081_v7 = vpack.c.bf16 %v20882_v25, %v20879_v2  ;;  %v17706_v0 = vld [vmem:[%s22370_s2 + $0x5c0] sm:$0xff]  }
 0xa00   :  { %16041 = vmatprep.subr.bf16.mxu0 %v17700_v28 }
 0xa02   :  { %16026 = vmatmul.mubr.bf16.gmra.mrb[36].mxu0 %v8898_v8  ;;  %v9086_v8 = vpack.c.bf16 %v20912_v26, %v20909_v31 }
 0xa03   :  { %16029 = vmatprep.mubr.bf16.mxu0 %v8899_v62  ;;  %16042 = vmatpush3.bf16.msra.mxu0 %v17700_v28  ;;  %v17710_v28 = vld [vmem:[%s22370_s2 + $0x5e0] sm:$0xff]   ;;  %v9087_v62 = vpack.c.bf16 %v20922_v60, %v20919_v11 }
 0xa04   :  { %16043 = vmatprep.subr.bf16.mxu0 %v17701_v38 }
 0xa07   :  { %16044 = vmatpush3.bf16.msra.mxu0 %v17701_v38  ;;  %v17711_v38 = vld [vmem:[%s22370_s2 + $0x5e8] sm:$0xff]  }
 0xa08   :  { %16045 = vmatprep.subr.bf16.mxu0 %v17702_v20 }
 0xa0a   :  { %16030 = vmatmul.mubr.bf16.gmra.mrb[40].mxu0 %v8900_v14  ;;  %v9088_v14 = vpack.c.bf16 %v20928_v44, %v20925_v40  ;;  %v22761_v44 = vld [vmem:[#allocation37_spill] sm:$0xff] }
 0xa0b   :  { %16033 = vmatprep.mubr.bf16.mxu0 %v8901_v29  ;;  %16046 = vmatpush3.bf16.msra.mxu0 %v17702_v20  ;;  %v17712_v20 = vld [vmem:[%s22370_s2 + $0x5f0] sm:$0xff]   ;;  %v9283_v29 = vpack.c.bf16 %v21075_v21, %v21061_v12  ;;  %v9285_v12 = vpack.c.bf16 %v21099_v27, %v21081_v56  ;;  %v9287_v27 = vpack.c.bf16 %v21123_v4, %v21105_v5  ;;  %v17718_v56 = vld [vmem:[%s22370_s2 + $0x620] sm:$0xff]  }
 0xa0c   :  { %16047 = vmatprep.subr.bf16.mxu0 %v17703_v3  ;;  %v17716_v21 = vld [vmem:[%s22370_s2 + $0x610] sm:$0xff]   ;;  %v9289_v4 = vpack.c.bf16 %v21147_v6, %v21129_v22  ;;  %v17722_v6 = vld [vmem:[%s22370_s2 + $0x640] sm:$0xff]  }
 0xa0d   :  { %v17720_v5 = vld [vmem:[%s22370_s2 + $0x630] sm:$0xff]  }
 0xa0e   :  { %v17724_v22 = vld [vmem:[%s22370_s2 + $0x650] sm:$0xff]  }
 0xa0f   :  { %16048 = vmatpush3.bf16.msra.mxu0 %v17703_v3  ;;  %v17713_v3 = vld [vmem:[%s22370_s2 + $0x5f8] sm:$0xff]  }
 0xa10   :  { %16049 = vmatprep.subr.bf16.mxu0 %v17704_v9 }
 0xa12   :  { %16034 = vmatmul.mubr.bf16.gmra.mrb[44].mxu0 %v8902_v59  ;;  %v9284_v59 = vpack.c.bf16 %v21079_v50, %v21077_v18  ;;  %v9286_v18 = vpack.c.bf16 %v21103_v37, %v21101_v23  ;;  %v17717_v50 = vld [vmem:[%s22370_s2 + $0x618] sm:$0xff]   ;;  %v9288_v37 = vpack.c.bf16 %v21127_v15, %v21125_v54  ;;  %v17719_v23 = vld [vmem:[%s22370_s2 + $0x628] sm:$0xff]  }
 0xa13   :  { %16050 = vmatpush3.bf16.msra.mxu0 %v17704_v9  ;;  %16053 = vmatprep.mubr.bf16.mxu0 %v9081_v7  ;;  %v17714_v9 = vld [vmem:[%s22370_s2 + $0x600] sm:$0xff]   ;;  %v21276_v7 = vld [vmem:[#allocation2 + $0x89] sm:$0xff]  ;;  %v17721_v54 = vld [vmem:[%s22370_s2 + $0x638] sm:$0xff]  }
 0xa14   :  { %16051 = vmatprep.subr.bf16.mxu0 %v17705_v53  ;;  %v9290_v15 = vpack.c.bf16 %v21276_v7, %v21149_v19  ;;  %v17723_v19 = vld [vmem:[%s22370_s2 + $0x648] sm:$0xff]  }
 0xa17   :  { %16052 = vmatpush3.bf16.msra.mxu0 %v17705_v53  ;;  %v17715_v53 = vld [vmem:[%s22370_s2 + $0x608] sm:$0xff]  }
 0xa18   :  { %16069 = vmatprep.subr.bf16.mxu0 %v17706_v0 }
 0xa1a   :  { %16054 = vmatmul.mubr.bf16.vlgmr.msra.gmra.mrb[32].mxu0 %v9082_v1  ;;  %v9672_v1 = vld [vmem:[#allocation2 + $0x20] sm:$0xff] }
 0xa1b   :  { %16057 = vmatprep.mubr.bf16.mxu0 %v9083_v49  ;;  %16070 = vmatpush3.bf16.msra.mxu0 %v17706_v0  ;;  %v9671_v0 = vld [vmem:[#allocation2 + $0x18] sm:$0xff] }
 0xa1c   :  { %16071 = vmatprep.subr.bf16.mxu0 %v17707_v39  ;;  %v17729_v49 = vld [vmem:[%s22370_s2 + $0x678] sm:$0xff]  }
 0xa1f   :  { %16072 = vmatpush3.bf16.msra.mxu0 %v17707_v39 }
 0xa20   :  { %16073 = vmatprep.subr.bf16.mxu0 %v17708_v41 }
 0xa22   :  { %16058 = vmatmul.mubr.bf16.gmra.mrb[36].mxu0 %v9084_v42  ;;  %v9674_v42 = vld [vmem:[#allocation2 + $0x30] sm:$0xff] }
 0xa23   :  { %16061 = vmatprep.mubr.bf16.mxu0 %v9085_v57  ;;  %16074 = vmatpush3.bf16.msra.mxu0 %v17708_v41  ;;  %v9673_v41 = vld [vmem:[#allocation2 + $0x28] sm:$0xff]  ;;  %v9676_v57 = vld [vmem:[#allocation2 + $0x40] sm:$0xff] }
 0xa24   :  { %16075 = vmatprep.subr.bf16.mxu0 %v17709_v58 }
 0xa27   :  { %16076 = vmatpush3.bf16.msra.mxu0 %v17709_v58  ;;  %v9675_v58 = vld [vmem:[#allocation2 + $0x38] sm:$0xff] }
 0xa28   :  { %16077 = vmatprep.subr.bf16.mxu0 %v17710_v28 }
 0xa2a   :  { %16062 = vmatmul.mubr.bf16.gmra.mrb[40].mxu0 %v9086_v8  ;;  %v9689_v8 = vpack.c.bf16 %v9676_v57, %v9675_v58 }
 0xa2b   :  { %16065 = vmatprep.mubr.bf16.mxu0 %v9087_v62  ;;  %16078 = vmatpush3.bf16.msra.mxu0 %v17710_v28  ;;  %v17731_v28 = vld [vmem:[%s22370_s2 + $0x688] sm:$0xff]  }
 0xa2c   :  { %16079 = vmatprep.subr.bf16.mxu0 %v17711_v38  ;;  %v9677_v62 = vld [vmem:[#allocation2 + $0x48] sm:$0xff] }
 0xa2f   :  { %16080 = vmatpush3.bf16.msra.mxu0 %v17711_v38  ;;  %v17732_v38 = vld [vmem:[%s22370_s2 + $0x690] sm:$0xff]  }
 0xa30   :  { %16081 = vmatprep.subr.bf16.mxu0 %v17712_v20 }
 0xa32   :  { %16066 = vmatmul.mubr.bf16.gmra.mrb[44].mxu0 %v9088_v14  ;;  %v9679_v14 = vld [vmem:[#allocation2 + $0x58] sm:$0xff] }
 0xa33   :  { %16082 = vmatpush3.bf16.msra.mxu0 %v17712_v20  ;;  %16085 = vmatprep.mubr.bf16.mxu0 %v9283_v29  ;;  %v9678_v20 = vld [vmem:[#allocation2 + $0x50] sm:$0xff] }
 0xa34   :  { %16083 = vmatprep.subr.bf16.mxu0 %v17713_v3  ;;  %v9690_v29 = vpack.c.bf16 %v9678_v20, %v9677_v62 }
 0xa37   :  { %16084 = vmatpush3.bf16.msra.mxu0 %v17713_v3  ;;  %v9680_v3 = vld [vmem:[#allocation2 + $0x60] sm:$0xff] }
 0xa38   :  { %16101 = vmatprep.subr.bf16.mxu0 %v17714_v9 }
 0xa3a   :  { %16086 = vmatmul.mubr.bf16.vlgmr.msra.gmra.mrb[32].mxu0 %v9284_v59  ;;  %v9691_v59 = vpack.c.bf16 %v9680_v3, %v9679_v14  ;;  %v17745_v14 = vld [vmem:[%s22374_s6 + $0x4f8] sm:$0xff]   ;;  %v22748_v3 = vld [vmem:[#allocation23_spill] sm:$0xff] }
 0xa3b   :  { %16089 = vmatprep.mubr.bf16.mxu0 %v9285_v12  ;;  %16102 = vmatpush3.bf16.msra.mxu0 %v17714_v9  ;;  %v17733_v9 = vld [vmem:[%s22370_s2 + $0x698] sm:$0xff]   ;;  %v9681_v12 = vld [vmem:[#allocation2 + $0x68] sm:$0xff] }
 0xa3c   :  { %16103 = vmatprep.subr.bf16.mxu0 %v17715_v53 }
 0xa3f   :  { %16104 = vmatpush3.bf16.msra.mxu0 %v17715_v53  ;;  %v17734_v53 = vld [vmem:[%s22370_s2 + $0x6a0] sm:$0xff]  }
 0xa40   :  { %16105 = vmatprep.subr.bf16.mxu0 %v17716_v21 }
 0xa42   :  { %16090 = vmatmul.mubr.bf16.gmra.mrb[36].mxu0 %v9286_v18  ;;  %v9683_v18 = vld [vmem:[#allocation2 + $0x78] sm:$0xff] }
 0xa43   :  { %16093 = vmatprep.mubr.bf16.mxu0 %v9287_v27  ;;  %16106 = vmatpush3.bf16.msra.mxu0 %v17716_v21  ;;  %v9682_v21 = vld [vmem:[#allocation2 + $0x70] sm:$0xff] }
 0xa44   :  { %16107 = vmatprep.subr.bf16.mxu0 %v17717_v50  ;;  %v9692_v27 = vpack.c.bf16 %v9682_v21, %v9681_v12  ;;  %v22749_v21 = vld [vmem:[#allocation25_spill] sm:$0xff] }
 0xa47   :  { %16108 = vmatpush3.bf16.msra.mxu0 %v17717_v50  ;;  %v9684_v50 = vld [vmem:[#allocation2 + $0x80] sm:$0xff] }
 0xa48   :  { %16109 = vmatprep.subr.bf16.mxu0 %v17718_v56 }
 0xa4a   :  { %16094 = vmatmul.mubr.bf16.gmra.mrb[40].mxu0 %v9288_v37  ;;  %v9693_v37 = vpack.c.bf16 %v9684_v50, %v9683_v18 }
 0xa4b   :  { %16097 = vmatprep.mubr.bf16.mxu0 %v9289_v4  ;;  %16110 = vmatpush3.bf16.msra.mxu0 %v17718_v56  ;;  %v17735_v56 = vld [vmem:[%s22370_s2 + $0x6a8] sm:$0xff]  }
 0xa4c   :  { %16111 = vmatprep.subr.bf16.mxu0 %v17719_v23  ;;  %v9685_v4 = vld [vmem:[#allocation2 + $0x88] sm:$0xff] }
 0xa4f   :  { %16112 = vmatpush3.bf16.msra.mxu0 %v17719_v23  ;;  %v17736_v23 = vld [vmem:[%s22370_s2 + $0x6b0] sm:$0xff]  }
 0xa50   :  { %16113 = vmatprep.subr.bf16.mxu0 %v17720_v5 }
 0xa52   :  { %16098 = vmatmul.mubr.bf16.gmra.mrb[44].mxu0 %v9290_v15 }
 0xa53   :  { %16114 = vmatpush3.bf16.msra.mxu0 %v17720_v5  ;;  %16117 = vmatprep.mubr.bf16.mxu0 %v20995_v47  ;;  %v17725_v47 = vld [vmem:[%s22370_s2 + $0x658] sm:$0xff]   ;;  %v9686_v5 = vld [vmem:[#allocation2 + $0x90] sm:$0xff] }
 0xa54   :  { %16115 = vmatprep.subr.bf16.mxu0 %v17721_v54  ;;  %v9694_v15 = vpack.c.bf16 %v9686_v5, %v9685_v4  ;;  %v21420_v4 = vld [vmem:[%s22374_s6 + $0x480] sm:$0xff]  }
 0xa57   :  { %16116 = vmatpush3.bf16.msra.mxu0 %v17721_v54  ;;  %v17737_v54 = vld [vmem:[%s22370_s2 + $0x6b8] sm:$0xff]  }
 0xa58   :  { %16133 = vmatprep.subr.bf16.mxu0 %v17722_v6 }
 0xa5a   :  { %16118 = vmatmul.mubr.bf16.vlgmr.msra.gmra.mrb[32].mxu0 %v21002_v48  ;;  %v17726_v48 = vld [vmem:[%s22370_s2 + $0x660] sm:$0xff]  }
 0xa5b   :  { %16121 = vmatprep.mubr.bf16.mxu0 %v21019_v52  ;;  %16134 = vmatpush3.bf16.msra.mxu0 %v17722_v6  ;;  %v17727_v52 = vld [vmem:[%s22370_s2 + $0x668] sm:$0xff]  }
 0xa5c   :  { %16135 = vmatprep.subr.bf16.mxu0 %v17723_v19  ;;  %v22744_v6 = vld [vmem:[#allocation18_spill] sm:$0xff] }
 0xa5f   :  { %16136 = vmatpush3.bf16.msra.mxu0 %v17723_v19  ;;  %v22745_v19 = vld [vmem:[#allocation15_spill] sm:$0xff] }
 0xa60   :  { %16137 = vmatprep.subr.bf16.mxu0 %v17724_v22 }
 0xa62   :  { %16122 = vmatmul.mubr.bf16.gmra.mrb[36].mxu0 %v21026_v13  ;;  %v17728_v13 = vld [vmem:[%s22370_s2 + $0x670] sm:$0xff]  }
 0xa63   :  { %16125 = vmatprep.mubr.bf16.mxu0 %v21043_v36  ;;  %16138 = vmatpush3.bf16.msra.mxu0 %v17724_v22  ;;  %v9484_v36 = vld [vmem:[#allocation2 + $0x8f] sm:$0xff] }
 0xa64   :  { %16139 = vmatprep.subr.bf16.mxu0 %v17725_v47  ;;  %v9492_v39 = vpack.c.bf16 %v9484_v36, %v21194_v43  ;;  %v9688_v43 = vpack.c.bf16 %v9674_v42, %v9673_v41  ;;  %v9888_v22 = vld [vmem:[#allocation2 + $0x91] sm:$0xff] }
 0xa65   :  { %v17744_v41 = vld [vmem:[%s22374_s6 + $0x4f0] sm:$0xff]  }
 0xa67   :  { %16140 = vmatpush3.bf16.msra.mxu0 %v17725_v47  ;;  %v9896_v47 = vpack.c.bf16 %v9888_v22, %v21276_v7  ;;  %v21365_v7 = vld [vmem:[%s22371_s3 + $0x2] ss:$0 sm:$0xff] }
 0xa68   :  { %16141 = vmatprep.subr.bf16.mxu0 %v17726_v48 }
 0xa6a   :  { %16126 = vmatmul.mubr.bf16.gmra.mrb[40].mxu0 %v21050_v34  ;;  %v9687_v34 = vpack.c.bf16 %v9672_v1, %v9671_v0 }
 0xa6b   :  { %16129 = vmatprep.mubr.bf16.mxu0 %v21065_v24  ;;  %16142 = vmatpush3.bf16.msra.mxu0 %v17726_v48  ;;  %v17730_v24 = vld [vmem:[%s22370_s2 + $0x680] sm:$0xff]  }
 0xa6c   :  { %16143 = vmatprep.subr.bf16.mxu0 %v17727_v52 }
 0xa6f   :  { %16144 = vmatpush3.bf16.msra.mxu0 %v17727_v52 }
 0xa70   :  { %16145 = vmatprep.subr.bf16.mxu0 %v17728_v13 }
 0xa72   :  { %16130 = vmatmul.mubr.bf16.gmra.mrb[44].mxu0 %v9492_v39 }
 0xa73   :  { %16146 = vmatpush3.bf16.msra.mxu0 %v17728_v13  ;;  %16149 = vmatprep.mubr.bf16.mxu0 %v9687_v34  ;;  %v17743_v13 = vld [vmem:[%s22374_s6 + $0x4e8] sm:$0xff]  }
 0xa74   :  { %16147 = vmatprep.subr.bf16.mxu0 %v17729_v49 }
 0xa77   :  { %16148 = vmatpush3.bf16.msra.mxu0 %v17729_v49 }
 0xa78   :  { %16165 = vmatprep.subr.bf16.mxu0 %v17730_v24 }
 0xa7a   :  { %16150 = vmatmul.mubr.bf16.vlgmr.msra.gmra.mrb[32].mxu0 %v9688_v43  ;;  %v22746_v43 = vld [vmem:[#allocation22_spill] sm:$0xff] }
 0xa7b   :  { %16153 = vmatprep.mubr.bf16.mxu0 %v9689_v8  ;;  %16166 = vmatpush3.bf16.msra.mxu0 %v17730_v24  ;;  %v22747_v8 = vld [vmem:[#allocation24_spill] sm:$0xff] }
 0xa7c   :  { %16167 = vmatprep.subr.bf16.mxu0 %v17731_v28 }
 0xa7f   :  { %16168 = vmatpush3.bf16.msra.mxu0 %v17731_v28 }
 0xa80   :  { %16169 = vmatprep.subr.bf16.mxu0 %v17732_v38 }
 0xa82   :  { %16154 = vmatmul.mubr.bf16.gmra.mrb[36].mxu0 %v9690_v29 }
 0xa83   :  { %16157 = vmatprep.mubr.bf16.mxu0 %v9691_v59  ;;  %16170 = vmatpush3.bf16.msra.mxu0 %v17732_v38 }
 0xa84   :  { %16171 = vmatprep.subr.bf16.mxu0 %v17733_v9 }
 0xa87   :  { %16172 = vmatpush3.bf16.msra.mxu0 %v17733_v9 }
 0xa88   :  { %16173 = vmatprep.subr.bf16.mxu0 %v17734_v53 }
 0xa8a   :  { %16158 = vmatmul.mubr.bf16.gmra.mrb[40].mxu0 %v9692_v27 }
 0xa8b   :  { %16161 = vmatprep.mubr.bf16.mxu0 %v9693_v37  ;;  %16174 = vmatpush3.bf16.msra.mxu0 %v17734_v53 }
 0xa8c   :  { %16175 = vmatprep.subr.bf16.mxu0 %v17735_v56 }
 0xa8f   :  { %16176 = vmatpush3.bf16.msra.mxu0 %v17735_v56 }
 0xa90   :  { %16177 = vmatprep.subr.bf16.mxu0 %v17736_v23 }
 0xa92   :  { %16162 = vmatmul.mubr.bf16.gmra.mrb[44].mxu0 %v9694_v15  ;;  %v22750_v15 = vld [vmem:[#allocation26_spill] sm:$0xff] }
 0xa93   :  { %16178 = vmatpush3.bf16.msra.mxu0 %v17736_v23  ;;  %16181 = vmatprep.mubr.bf16.mxu0 %v21085_v35  ;;  %v17738_v35 = vld [vmem:[%s22374_s6 + $0x4c0] sm:$0xff]  }
 0xa94   :  { %16179 = vmatprep.subr.bf16.mxu0 %v17737_v54  ;;  %16197 = vmatprep.subr.bf16.mxu1 %v17738_v35 }
 0xa95   :  { %16198 = vmatpush3.bf16.msra.mxu1 %v17738_v35  ;;  %v22751_v35 = vld [vmem:[#allocation27_spill] sm:$0xff] }
 0xa97   :  { %16180 = vmatpush3.bf16.msra.mxu0 %v17737_v54 }
 0xa9a   :  { %16182 = vmatmul.mubr.bf16.vlgmr.msra.gmra.mrb[32].mxu0 %v21092_v10  ;;  %v17742_v10 = vld [vmem:[%s22374_s6 + $0x4e0] sm:$0xff]  }
 0xa9b   :  { %16185 = vmatprep.mubr.bf16.mxu0 %v21109_v51  ;;  %v17741_v51 = vld [vmem:[%s22374_s6 + $0x4d8] sm:$0xff]  }
 0xaa2   :  { %16186 = vmatmul.mubr.bf16.gmra.mrb[36].mxu0 %v21116_v32  ;;  %v17739_v32 = vld [vmem:[%s22374_s6 + $0x4c8] sm:$0xff]  }
 0xaa3   :  { %16189 = vmatprep.mubr.bf16.mxu0 %v22744_v6  ;;  %16199 = vmatprep.subr.bf16.mxu1 %v17739_v32 }
 0xaa4   :  { %16200 = vmatpush3.bf16.msra.mxu1 %v17739_v32 }
 0xaaa   :  { %16190 = vmatmul.mubr.bf16.gmra.mrb[40].mxu0 %v22745_v19 }
 0xaab   :  { %16193 = vmatprep.mubr.bf16.mxu0 %v21153_v61  ;;  %v17740_v61 = vld [vmem:[%s22374_s6 + $0x4d0] sm:$0xff]  }
 0xaac   :  { %16201 = vmatprep.subr.bf16.mxu1 %v17740_v61 }
 0xaad   :  { %16202 = vmatpush3.bf16.msra.mxu1 %v17740_v61 }
 0xaae   :  { %16203 = vmatprep.subr.bf16.mxu1 %v17741_v51 }
 0xab1   :  { %16204 = vmatpush3.bf16.msra.mxu1 %v17741_v51 }
 0xab2   :  { %16194 = vmatmul.mubr.bf16.gmra.mrb[44].mxu0 %v9896_v47  ;;  %16205 = vmatprep.subr.bf16.mxu1 %v17742_v10 }
 0xab5   :  { %16206 = vmatpush3.bf16.msra.mxu1 %v17742_v10  ;;  %v22752_v10 = vld [vmem:[#allocation28_spill] sm:$0xff] }
 0xab6   :  { %16207 = vmatprep.subr.bf16.mxu1 %v17743_v13 }
 0xab9   :  { %16208 = vmatpush3.bf16.msra.mxu1 %v17743_v13 }
 0xaba   :  { %16209 = vmatprep.subr.bf16.mxu1 %v17744_v41 }
 0xabd   :  { %16210 = vmatpush3.bf16.msra.mxu1 %v17744_v41 }
 0xabe   :  { %16211 = vmatprep.subr.bf16.mxu1 %v17745_v14 }
 0xac1   :  { %16212 = vmatpush3.bf16.msra.mxu1 %v17745_v14 }
 0xac2   :  { %16229 = vmatprep.subr.bf16.mxu1 %v21420_v4 }
 0xb6d   :  { %v16183_v48 = vpop.f32.mrb[32].mxu0 }
 0xb6e   :  { %v9996_v52 = vpop.f32.mrb[33].mxu0  ;;  %v21371_v36 = vadd.f32 %v16183_v48, %v21365_v7 }
 0xb6f   :  { %v21374_v0 = vadd.f32 %v21365_v7, %v9996_v52  ;;  %v16184_v1 = vpop.f32.mrb[34].mxu0 }
 0xb70   :  { %v21377_v39 = vadd.f32 %v16184_v1, %v21365_v7  ;;  %v9999_v49 = vpop.f32.mrb[35].mxu0  ;;  %v22519_v42 = vmax.f32 %v21371_v36, 0.0 }
 0xb71   :  { %v22521_v34 = vmax.f32 %v21374_v0, 0.0  ;;  %v21381_v24 = vadd.f32 %v21365_v7, %v9999_v49 }
 0xb72   :  { %v22518_v57 = vmax.f32 %v21377_v39, 0.0  ;;  %v10121_v29 = vmul.f32 %v22519_v42, %v22748_v3 }
 0xb73   :  { %v22520_v58 = vmax.f32 %v21381_v24, 0.0  ;;  %v10119_v28 = vmul.f32 %v22521_v34, %v22746_v43 }
 0xb74   :  { %v10122_v18 = vmul.f32 %v22518_v57, %v22749_v21 }
 0xb75   :  { %v10120_v38 = vmul.f32 %v22520_v58, %v22747_v8  ;;  %v16187_v62 = vpop.f32.mrb[36].mxu0 }
 0xb76   :  { %v10012_v20 = vpop.f32.mrb[37].mxu0  ;;  %v21402_v59 = vadd.f32 %v16187_v62, %v21365_v7 }
 0xb77   :  { %v10135_v9 = vadd.f32 %v10120_v38, %v10119_v28  ;;  %v21405_v53 = vadd.f32 %v21365_v7, %v10012_v20  ;;  %v16188_v12 = vpop.f32.mrb[38].mxu0  ;;  %v22753_v38 = vld [vmem:[#allocation29_spill] sm:$0xff] }
 0xb78   :  { %v10015_v50 = vpop.f32.mrb[39].mxu0  ;;  %v21412_v37 = vadd.f32 %v16188_v12, %v21365_v7  ;;  %v22516_v5 = vmax.f32 %v21402_v59, 0.0  ;;  %v22754_v12 = vld [vmem:[#allocation30_spill] sm:$0xff] }
 0xb79   :  { %v10136_v27 = vadd.f32 %v10135_v9, %v10121_v29  ;;  %v22517_v56 = vmax.f32 %v21405_v53, 0.0  ;;  %v21415_v23 = vadd.f32 %v21365_v7, %v10015_v50 }
 0xb7a   :  { %v10106_v47 = vmax.f32 %v21412_v37, 0.0  ;;  %v10125_v48 = vmul.f32 %v22516_v5, %v22752_v10 }
 0xb7b   :  { %v10123_v54 = vmul.f32 %v22517_v56, %v22750_v15  ;;  %v10137_v6 = vadd.f32 %v10136_v27, %v10122_v18  ;;  %v10104_v19 = vmax.f32 %v21415_v23, 0.0 }
 0xb7c   :  { %v10126_v62 = vmul.f32 %v10106_v47, %v22753_v38 }
 0xb7d   :  { %v10138_v22 = vadd.f32 %v10137_v6, %v10123_v54  ;;  %v10124_v32 = vmul.f32 %v10104_v19, %v22751_v35  ;;  %v16191_v61 = vpop.f32.mrb[40].mxu0  ;;  %v22755_v54 = vld [vmem:[#allocation31_spill] sm:$0xff] }
 0xb7e   :  { %v10028_v51 = vpop.f32.mrb[41].mxu0  ;;  %v10093_v13 = vadd.f32 %v16191_v61, %v21365_v7  ;;  %v22756_v61 = vld [vmem:[#allocation32_spill] sm:$0xff] }
 0xb7f   :  { %v10139_v52 = vadd.f32 %v10138_v22, %v10124_v32  ;;  %v10091_v1 = vadd.f32 %v21365_v7, %v10028_v51  ;;  %v16192_v49 = vpop.f32.mrb[42].mxu0 }
 0xb80   :  { %v10094_v41 = vadd.f32 %v16192_v49, %v21365_v7  ;;  %v10031_v28 = vpop.f32.mrb[43].mxu0  ;;  %v10109_v9 = vmax.f32 %v10093_v13, 0.0 }
 0xb81   :  { %v10140_v20 = vadd.f32 %v10139_v52, %v10125_v48  ;;  %v10107_v14 = vmax.f32 %v10091_v1, 0.0  ;;  %v10092_v29 = vadd.f32 %v21365_v7, %v10031_v28  ;;  %v22757_v1 = vld [vmem:[#allocation33_spill] sm:$0xff] }
 0xb82   :  { %v10110_v37 = vmax.f32 %v10094_v41, 0.0  ;;  %v10129_v51 = vmul.f32 %v10109_v9, %v22756_v61 }
 0xb83   :  { %v10127_v18 = vmul.f32 %v10107_v14, %v22754_v12  ;;  %v10141_v50 = vadd.f32 %v10140_v20, %v10126_v62  ;;  %v10108_v27 = vmax.f32 %v10092_v29, 0.0 }
 0xb84   :  { %v10130_v13 = vmul.f32 %v10110_v37, %v22757_v1 }
 0xb85   :  { %v10142_v23 = vadd.f32 %v10141_v50, %v10127_v18  ;;  %v10128_v6 = vmul.f32 %v10108_v27, %v22755_v54  ;;  %v16195_v22 = vpop.f32.mrb[44].mxu0  ;;  %v22758_v18 = vld [vmem:[#allocation34_spill] sm:$0xff] }
 0xb86   :  { %v10044_v32 = vpop.f32.mrb[45].mxu0  ;;  %v10097_v5 = vadd.f32 %v16195_v22, %v21365_v7  ;;  %v22759_v22 = vld [vmem:[#allocation35_spill] sm:$0xff] }
 0xb87   :  { %v10143_v49 = vadd.f32 %v10142_v23, %v10128_v6  ;;  %v10095_v48 = vadd.f32 %v21365_v7, %v10044_v32  ;;  %v16196_v52 = vpop.f32.mrb[46].mxu0  ;;  %v22760_v32 = vld [vmem:[#allocation36_spill] sm:$0xff] }
 0xb88   :  { %v10047_v28 = vpop.f32.mrb[47].mxu0  ;;  %v10098_v41 = vadd.f32 %v16196_v52, %v21365_v7  ;;  %v10113_v29 = vmax.f32 %v10097_v5, 0.0 }
 0xb89   :  { %v10144_v56 = vadd.f32 %v10143_v49, %v10129_v51  ;;  %v10111_v62 = vmax.f32 %v10095_v48, 0.0  ;;  %v10096_v20 = vadd.f32 %v21365_v7, %v10047_v28 }
 0xb8a   :  { %v10114_v6 = vmax.f32 %v10098_v41, 0.0  ;;  %v10133_v34 = vmul.f32 %v10113_v29, %v22760_v32 }
 0xb8b   :  { %v10131_v50 = vmul.f32 %v10111_v62, %v22758_v18  ;;  %v10145_v57 = vadd.f32 %v10144_v56, %v10130_v13  ;;  %v10112_v42 = vmax.f32 %v10096_v20, 0.0  ;;  %v22762_v56 = vmax.f32 %v21374_v0, 0.0 }
 0xb8c   :  { %v10134_v11 = vmul.f32 %v10114_v6, %v22761_v44  ;;  %v22763_v13 = vmax.f32 %v21381_v24, 0.0  ;;  %v22767_v0 = vmax.f32 %v21402_v59, 0.0 }
 0xb8d   :  { %v10146_v23 = vadd.f32 %v10145_v57, %v10131_v50  ;;  %v10132_v58 = vmul.f32 %v10112_v42, %v22759_v22 }
 0xb8f   :  { %v10147_v60 = vadd.f32 %v10146_v23, %v10132_v58  ;;  %v22764_v58 = vmax.f32 %v21371_v36, 0.0 }
 0xb91   :  { %v10148_v51 = vadd.f32 %v10147_v60, %v10133_v34 }
 0xb93   :  { %v10149_v49 = vadd.f32 %v10148_v51, %v10134_v11  ;;  %v22765_v11 = vmax.f32 %v21377_v39, 0.0 }
 0xb95   :  { %v10150_v48 = vrot.slane %v10149_v49, 4 }
 0xb97   :  { %v10151_v52 = vadd.f32 %v10150_v48, %v10149_v49 }
 0xb99   :  { %v10152_v40 = vrot.slane %v10151_v52, 2 }
 0xb9b   :  { %v10153_v7 = vadd.f32 %v10152_v40, %v10151_v52  ;;  %v22766_v40 = vmax.f32 %v21405_v53, 0.0 }
 0xb9d   :  { %v10154_v5 = vrot.slane %v10153_v7, 1 }
 0xb9f   :  { %v10155_v28 = vadd.f32 %v10154_v5, %v10153_v7 }
 0xba1   :  { %v10156_v55 = vmul.f32 0.013888889, %v10155_v28 }
 0xba3   :  { %v21452_v57 = vsub.f32 %v22762_v56, %v10156_v55  ;;  %v21456_v41 = vsub.f32 %v22763_v13, %v10156_v55  ;;  %v21460_v20 = vsub.f32 %v22764_v58, %v10156_v55  ;;  %v21464_v60 = vsub.f32 %v22765_v11, %v10156_v55 }
 0xba4   :  { %v21468_v34 = vsub.f32 %v22766_v40, %v10156_v55  ;;  %v21470_v50 = vsub.f32 %v10104_v19, %v10156_v55  ;;  %v21474_v23 = vsub.f32 %v22767_v0, %v10156_v55  ;;  %v21476_v24 = vsub.f32 %v10106_v47, %v10156_v55 }
 0xba5   :  { %v21478_v51 = vsub.f32 %v10107_v14, %v10156_v55  ;;  %v21480_v36 = vsub.f32 %v10108_v27, %v10156_v55  ;;  %v21482_v49 = vsub.f32 %v10109_v9, %v10156_v55  ;;  %v21484_v39 = vsub.f32 %v10110_v37, %v10156_v55 }
 0xba6   :  { %v21486_v48 = vsub.f32 %v10111_v62, %v10156_v55  ;;  %v21488_v53 = vsub.f32 %v10112_v42, %v10156_v55  ;;  %v21490_v19 = vsub.f32 %v10113_v29, %v10156_v55  ;;  %v21492_v52 = vsub.f32 %v10114_v6, %v10156_v55 }
 0xba7   :  { %v10173_v59 = vmul.f32 %v21452_v57, %v22746_v43  ;;  %v10174_v47 = vmul.f32 %v21456_v41, %v22747_v8  ;;  %v10175_v14 = vmul.f32 %v21460_v20, %v22748_v3  ;;  %v10176_v37 = vmul.f32 %v21464_v60, %v22749_v21 }
 0xba8   :  { %v10177_v42 = vmul.f32 %v21468_v34, %v22750_v15  ;;  %v10178_v29 = vmul.f32 %v21470_v50, %v22751_v35  ;;  %v10179_v5 = vmul.f32 %v21474_v23, %v22752_v10  ;;  %v10180_v13 = vmul.f32 %v21476_v24, %v22753_v38 }
 0xba9   :  { %v10189_v9 = vmul.f32 %v10173_v59, %v10173_v59  ;;  %v10190_v27 = vmul.f32 %v10174_v47, %v10174_v47  ;;  %v10191_v62 = vmul.f32 %v10175_v14, %v10175_v14  ;;  %v10192_v6 = vmul.f32 %v10176_v37, %v10176_v37 }
 0xbaa   :  { %v10193_v28 = vmul.f32 %v10177_v42, %v10177_v42  ;;  %v10194_v58 = vmul.f32 %v10178_v29, %v10178_v29  ;;  %v10181_v40 = vmul.f32 %v21478_v51, %v22754_v12  ;;  %v10195_v0 = vmul.f32 %v10179_v5, %v10179_v5 }
 0xbab   :  { %v10205_v55 = vadd.f32 %v10190_v27, %v10189_v9  ;;  %v10182_v47 = vmul.f32 %v21480_v36, %v22755_v54  ;;  %v10196_v14 = vmul.f32 %v10180_v13, %v10180_v13  ;;  %v10183_v27 = vmul.f32 %v21482_v49, %v22756_v61 }
 0xbac   :  { %v10197_v37 = vmul.f32 %v10181_v40, %v10181_v40 }
 0xbad   :  { %v10206_v7 = vadd.f32 %v10205_v55, %v10191_v62  ;;  %v10184_v62 = vmul.f32 %v21484_v39, %v22757_v1  ;;  %v10198_v55 = vmul.f32 %v10182_v47, %v10182_v47 }
 0xbaf   :  { %v10207_v56 = vadd.f32 %v10206_v7, %v10192_v6  ;;  %v10185_v6 = vmul.f32 %v21486_v48, %v22758_v18  ;;  %v10199_v7 = vmul.f32 %v10183_v27, %v10183_v27 }
 0xbb1   :  { %v10208_v11 = vadd.f32 %v10207_v56, %v10193_v28  ;;  %v10186_v28 = vmul.f32 %v21488_v53, %v22759_v22  ;;  %v10200_v56 = vmul.f32 %v10184_v62, %v10184_v62 }
 0xbb3   :  { %v10209_v59 = vadd.f32 %v10208_v11, %v10194_v58  ;;  %v10187_v58 = vmul.f32 %v21490_v19, %v22760_v32  ;;  %v10201_v11 = vmul.f32 %v10185_v6, %v10185_v6 }
 0xbb5   :  { %v10210_v9 = vadd.f32 %v10209_v59, %v10195_v0  ;;  %v10188_v0 = vmul.f32 %v21492_v52, %v22761_v44  ;;  %v10202_v59 = vmul.f32 %v10186_v28, %v10186_v28 }
 0xbb7   :  { %v10211_v42 = vadd.f32 %v10210_v9, %v10196_v14  ;;  %v10203_v14 = vmul.f32 %v10187_v58, %v10187_v58 }
 0xbb9   :  { %v10212_v29 = vadd.f32 %v10211_v42, %v10197_v37  ;;  %v10204_v37 = vmul.f32 %v10188_v0, %v10188_v0 }
 0xbbb   :  { %v10213_v5 = vadd.f32 %v10212_v29, %v10198_v55 }
 0xbbd   :  { %v10214_v13 = vadd.f32 %v10213_v5, %v10199_v7 }
 0xbbf   :  { %v10215_v40 = vadd.f32 %v10214_v13, %v10200_v56 }
 0xbc1   :  { %v10216_v47 = vadd.f32 %v10215_v40, %v10201_v11  ;;  %v13634_v11 = vld [vmem:[%s22372_s4 + $0x2] ss:$0 sm:$0xff] }
 0xbc3   :  { %v10217_v9 = vadd.f32 %v10216_v47, %v10202_v59 }
 0xbc5   :  { %v10218_v27 = vadd.f32 %v10217_v9, %v10203_v14 }
 0xbc7   :  { %v10219_v42 = vadd.f32 %v10218_v27, %v10204_v37 }
 0xbc9   :  { %v10220_v55 = vrot.slane %v10219_v42, 4 }
 0xbcb   :  { %v10221_v29 = vadd.f32 %v10220_v55, %v10219_v42 }
 0xbcd   :  { %v10222_v26 = vrot.slane %v10221_v29, 2 }
 0xbcf   :  { %v10223_v62 = vadd.f32 %v10222_v26, %v10221_v29 }
 0xbd1   :  { %v10224_v7 = vrot.slane %v10223_v62, 1 }
 0xbd3   :  { %v10225_v5 = vadd.f32 %v10224_v7, %v10223_v62 }
 0xbd5   :  { %v10226_v63 = vmul.f32 0.013888889, %v10225_v5 }
 0xbd7   :  { %v10227_v31 = vadd.f32 1e-05, %v10226_v63 }
 0xbd9   :  { %17818 = vrsqrt.f32 %v10227_v31 }
 0xbe3   :  { %v17819_v6 = vpop.eup %17818 }
 0xbe4   :  { %v10229_v56 = vmul.f32 %v17819_v6, %v21452_v57  ;;  %v10230_v28 = vmul.f32 %v17819_v6, %v21456_v41  ;;  %v10231_v13 = vmul.f32 %v17819_v6, %v21460_v20  ;;  %v10232_v58 = vmul.f32 %v17819_v6, %v21464_v60 }
 0xbe5   :  { %v10233_v26 = vmul.f32 %v17819_v6, %v21468_v34  ;;  %v10234_v40 = vmul.f32 %v17819_v6, %v21470_v50  ;;  %v10235_v63 = vmul.f32 %v17819_v6, %v21474_v23  ;;  %v10236_v31 = vmul.f32 %v17819_v6, %v21476_v24 }
 0xbe6   :  { %v10237_v57 = vmul.f32 %v17819_v6, %v21478_v51  ;;  %v10238_v41 = vmul.f32 %v17819_v6, %v21480_v36  ;;  %v10239_v20 = vmul.f32 %v17819_v6, %v21482_v49  ;;  %v10240_v60 = vmul.f32 %v17819_v6, %v21484_v39  ;;  %v13635_v51 = vld [vmem:[%s22373_s5 + $0x2] ss:$0 sm:$0xff]  ;;  %s17867_s5 = smov [#allocation3]  }
 0xbe7   :  { %v10241_v0 = vmul.f32 %v17819_v6, %v21486_v48  ;;  %v10242_v59 = vmul.f32 %v17819_v6, %v21488_v53  ;;  %v10243_v34 = vmul.f32 %v17819_v6, %v21490_v19  ;;  %v10244_v50 = vmul.f32 %v17819_v6, %v21492_v52  ;;  %s12556_s0 = sshll.u32 %s17867_s5, 4  ;;  %s12557_s0 = int_to_ptr.vmem [resolvable:$true] %s12556_s0 }
 0xbe8   :  { %v10251_v47 = vmul.f32 %v13634_v11, %v10229_v56  ;;  %v10252_v23 = vmul.f32 %v13634_v11, %v10230_v28  ;;  %v10253_v14 = vmul.f32 %v13634_v11, %v10231_v13  ;;  %v10254_v24 = vmul.f32 %v13634_v11, %v10232_v58  ;;  %s17839_s24 = scalar_lea.vmem %s12557_s0, 32  ;;  %p17844_p1 = scmp.lt.s32.totalorder %s12557_s0, %s12557_s0 }
 0xbe9   :  { %v10255_v36 = vmul.f32 %v13634_v11, %v10233_v26  ;;  %v10256_v49 = vmul.f32 %v13634_v11, %v10234_v40  ;;  %v10257_v9 = vmul.f32 %v13634_v11, %v10235_v63  ;;  %v10258_v39 = vmul.f32 %v13634_v11, %v10236_v31  ;;  %p17840_p0 = scmp.ne.s32.totalorder %s12557_s0, %s17839_s24  ;;  %p17845_p2 = scmp.lt.s32.totalorder %s17839_s24, %s17839_s24 }
 0xbea   :  { %v10259_v37 = vmul.f32 %v13634_v11, %v10237_v57  ;;  %v10260_v48 = vmul.f32 %v13634_v11, %v10238_v41  ;;  %v10261_v27 = vmul.f32 %v13634_v11, %v10239_v20  ;;  %v10262_v53 = vmul.f32 %v13634_v11, %v10240_v60 }
 0xbeb   :  { %v10263_v42 = vmul.f32 %v13634_v11, %v10241_v0  ;;  %v10264_v19 = vmul.f32 %v13634_v11, %v10242_v59  ;;  %v10265_v55 = vmul.f32 %v13634_v11, %v10243_v34  ;;  %v10266_v52 = vmul.f32 %v13634_v11, %v10244_v50  ;;  %p17846_p3 = por %p17845_p2, %p17844_p1 }
 0xbec   :  { %v10273_v29 = vadd.f32 %v13635_v51, %v10251_v47  ;;  %v10274_v62 = vadd.f32 %v13635_v51, %v10252_v23  ;;  %v10275_v7 = vadd.f32 %v13635_v51, %v10253_v14  ;;  %v10276_v5 = vadd.f32 %v13635_v51, %v10254_v24  ;;  %v10362_v14 = vld [vmem:[#allocation2 + $0x8] sm:$0xff] }
 0xbed   :  { %v10277_v6 = vadd.f32 %v13635_v51, %v10255_v36  ;;  %v10278_v56 = vadd.f32 %v13635_v51, %v10256_v49  ;;  %v10279_v28 = vadd.f32 %v13635_v51, %v10257_v9  ;;  %v10280_v13 = vadd.f32 %v13635_v51, %v10258_v39  ;;  %p17847_p4 = pnand %p17846_p3, %p17840_p0 }
 0xbee   :  { %v10281_v58 = vadd.f32 %v13635_v51, %v10259_v37  ;;  %v10282_v26 = vadd.f32 %v13635_v51, %v10260_v48  ;;  %v10283_v40 = vadd.f32 %v13635_v51, %v10261_v27  ;;  %v10284_v63 = vadd.f32 %v13635_v51, %v10262_v53 }
 0xbef   :  { %v10285_v31 = vadd.f32 %v13635_v51, %v10263_v42  ;;  %v10286_v57 = vadd.f32 %v13635_v51, %v10264_v19  ;;  %v10287_v41 = vadd.f32 %v13635_v51, %v10265_v55  ;;  %v10288_v20 = vadd.f32 %v13635_v51, %v10266_v52  ;;  %v17747_v55 = vld [vmem:[%s22374_s6 + $0x488] sm:$0xff]  }
 0xbf0   :  { %v21549_v60 = vmul.f32 %v10273_v29, %v22746_v43  ;;  %v21552_v11 = vmul.f32 %v10274_v62, %v22747_v8  ;;  %v21555_v0 = vmul.f32 %v10275_v7, %v22748_v3  ;;  %v21558_v59 = vmul.f32 %v10276_v5, %v22749_v21 }
 0xbf1   :  { %v21561_v34 = vmul.f32 %v10277_v6, %v22750_v15  ;;  %v21564_v50 = vmul.f32 %v10278_v56, %v22751_v35  ;;  %v21567_v47 = vmul.f32 %v10279_v28, %v22752_v10  ;;  %v21570_v23 = vmul.f32 %v10280_v13, %v22753_v38 }
 0xbf2   :  { %v21573_v24 = vmul.f32 %v10281_v58, %v22754_v12  ;;  %v21576_v51 = vmul.f32 %v10282_v26, %v22755_v54  ;;  %v21579_v36 = vmul.f32 %v10283_v40, %v22756_v61  ;;  %v21582_v49 = vmul.f32 %v10284_v63, %v22757_v1  ;;  %10305 = vst [vmem:[#allocation2 + $0x10] sm:$0xff] %v21549_v60  ;;  %v17748_v63 = vld [vmem:[%s22374_s6 + $0x490] sm:$0xff]  }
 0xbf3   :  { %10306 = vst [vmem:[#allocation2 + $0x18] sm:$0xff] %v21552_v11  ;;  %10307 = vst [vmem:[#allocation2 + $0x20] sm:$0xff] %v21555_v0  ;;  %v21589_v9 = vmul.f32 %v10285_v31, %v22758_v18  ;;  %v21592_v39 = vmul.f32 %v10286_v57, %v22759_v22  ;;  %v21595_v37 = vmul.f32 %v10287_v41, %v22760_v32  ;;  %v17749_v31 = vld [vmem:[%s22374_s6 + $0x498] sm:$0xff]   ;;  %v17750_v57 = vld [vmem:[%s22374_s6 + $0x4a0] sm:$0xff]  }
 0xbf4   :  { %10308 = vst [vmem:[#allocation2 + $0x28] sm:$0xff] %v21558_v59  ;;  %v21598_v48 = vmul.f32 %v10288_v20, %v22761_v44  ;;  %10309 = vst [vmem:[#allocation2 + $0x30] sm:$0xff] %v21561_v34  ;;  %v10378_v27 = vpack.c.bf16 %v21549_v60, %v10362_v14  ;;  %v10379_v53 = vpack.c.bf16 %v21555_v0, %v21552_v11  ;;  %v17752_v41 = vld [vmem:[%s22374_s6 + $0x4b0] sm:$0xff]   ;;  %v10321_v20 = vld [vmem:[#allocation2 + $0x7] sm:$0xff] }
 0xbf5   :  { %10310 = vst [vmem:[#allocation2 + $0x38] sm:$0xff] %v21564_v50  ;;  %10311 = vst [vmem:[#allocation2 + $0x40] sm:$0xff] %v21567_v47  ;;  %v10380_v42 = vpack.c.bf16 %v21561_v34, %v21558_v59  ;;  %v10381_v19 = vpack.c.bf16 %v21567_v47, %v21564_v50  ;;  %v10382_v52 = vpack.c.bf16 %v21573_v24, %v21570_v23 }
 0xbf6   :  { %10312 = vst [vmem:[#allocation2 + $0x48] sm:$0xff] %v21570_v23  ;;  %10313 = vst [vmem:[#allocation2 + $0x50] sm:$0xff] %v21573_v24  ;;  %v10383_v29 = vpack.c.bf16 %v21579_v36, %v21576_v51  ;;  %v10384_v62 = vpack.c.bf16 %v21589_v9, %v21582_v49  ;;  %v10385_v7 = vpack.c.bf16 %v21595_v37, %v21592_v39  ;;  %16213 = vmatprep.mubr.bf16.mxu1 %v10378_v27  ;;  %v17753_v27 = vld [vmem:[%s22374_s6 + $0x4b8] sm:$0xff]  }
 0xbf7   :  { %10314 = vst [vmem:[#allocation2 + $0x58] sm:$0xff] %v21576_v51  ;;  %10315 = vst [vmem:[#allocation2 + $0x60] sm:$0xff] %v21579_v36  ;;  %16214 = vmatmul.mubr.bf16.vlgmr.msra.gmra.mrb[32].mxu1 %v10379_v53 }
 0xbf8   :  { %10316 = vst [vmem:[#allocation2 + $0x68] sm:$0xff] %v21582_v49  ;;  %10317 = vst [vmem:[#allocation2 + $0x70] sm:$0xff] %v21589_v9  ;;  %16217 = vmatprep.mubr.bf16.mxu1 %v10380_v42  ;;  %16230 = vmatpush3.bf16.msra.mxu1 %v21420_v4  ;;  %v17751_v4 = vld [vmem:[%s22374_s6 + $0x4a8] sm:$0xff]   ;;  %v17754_v42 = vld [vmem:[%s22374_s6 + $0x500] sm:$0xff]  }
 0xbf9   :  { %10318 = vst [vmem:[#allocation2 + $0x78] sm:$0xff] %v21592_v39  ;;  %10319 = vst [vmem:[#allocation2 + $0x80] sm:$0xff] %v21595_v37  ;;  %16231 = vmatprep.subr.bf16.mxu1 %v17747_v55  ;;  %v21662_v14 = vld [vmem:[#allocation2 + $0xf] sm:$0xff] }
 0xbfa   :  { %10320 = vst [vmem:[#allocation2 + $0x88] sm:$0xff] %v21598_v48  ;;  %v10337_v53 = vpack.c.bf16 %v21662_v14, %v10321_v20  ;;  %v10693_v44 = vld [vmem:[#allocation2 + $0x9] sm:$0xff]  ;;  %v21747_v32 = vld [vmem:[#allocation2 + $0x11] sm:$0xff]  ;;  %v21761_v1 = vld [vmem:[#allocation2 + $0x19] sm:$0xff] }
 0xbfb   :  { %v10709_v18 = vpack.c.bf16 %v21747_v32, %v10693_v44  ;;  %v21763_v61 = vld [vmem:[#allocation2 + $0x21] sm:$0xff]  ;;  %v21765_v54 = vld [vmem:[#allocation2 + $0x29] sm:$0xff] }
 0xbfc   :  { %16232 = vmatpush3.bf16.msra.mxu1 %v17747_v55  ;;  %v21673_v55 = vld [vmem:[#allocation2 + $0x1f] sm:$0xff]  ;;  %v21767_v12 = vld [vmem:[#allocation2 + $0x31] sm:$0xff]  ;;  %v21771_v44 = vpack.c.bf16 %v21763_v61, %v21761_v1 }
 0xbfd   :  { %16233 = vmatprep.subr.bf16.mxu1 %v17748_v63  ;;  %v21701_v20 = vld [vmem:[#allocation2 + $0x4f] sm:$0xff]  ;;  %v21785_v38 = vld [vmem:[#allocation2 + $0x39] sm:$0xff]  ;;  %v21787_v10 = vld [vmem:[#allocation2 + $0x41] sm:$0xff] }
 0xbfe   :  { %v21719_v40 = vld [vmem:[#allocation2 + $0x57] sm:$0xff]  ;;  %v21721_v26 = vld [vmem:[#allocation2 + $0x5f] sm:$0xff]  ;;  %v21789_v35 = vld [vmem:[#allocation2 + $0x49] sm:$0xff]  ;;  %v21795_v46 = vpack.c.bf16 %v21787_v10, %v21785_v38 }
 0xbff   :  { %16218 = vmatmul.mubr.bf16.gmra.mrb[36].mxu1 %v10381_v19  ;;  %v21671_v19 = vld [vmem:[#allocation2 + $0x17] sm:$0xff]  ;;  %v21723_v58 = vld [vmem:[#allocation2 + $0x67] sm:$0xff]  ;;  %v21725_v13 = vld [vmem:[#allocation2 + $0x6f] sm:$0xff]  ;;  %v21729_v28 = vpack.c.bf16 %v21721_v26, %v21719_v40 }
 0xc00   :  { %16221 = vmatprep.mubr.bf16.mxu1 %v10382_v52  ;;  %16234 = vmatpush3.bf16.msra.mxu1 %v17748_v63  ;;  %v21675_v52 = vld [vmem:[#allocation2 + $0x27] sm:$0xff]  ;;  %v21736_v56 = vpack.c.bf16 %v21725_v13, %v21723_v58  ;;  %v21743_v6 = vld [vmem:[#allocation2 + $0x77] sm:$0xff]  ;;  %v21745_v5 = vld [vmem:[#allocation2 + $0x7f] sm:$0xff] }
 0xc01   :  { %16235 = vmatprep.subr.bf16.mxu1 %v17749_v31  ;;  %v21751_v22 = vpack.c.bf16 %v21745_v5, %v21743_v6  ;;  %v21791_v15 = vld [vmem:[#allocation2 + $0x51] sm:$0xff]  ;;  %v21809_v21 = vld [vmem:[#allocation2 + $0x59] sm:$0xff]  ;;  %v21811_v30 = vld [vmem:[#allocation2 + $0x61] sm:$0xff] }
 0xc02   :  { %v21802_v45 = vpack.c.bf16 %v21791_v15, %v21789_v35  ;;  %v21813_v33 = vld [vmem:[#allocation2 + $0x69] sm:$0xff]  ;;  %v21815_v3 = vld [vmem:[#allocation2 + $0x71] sm:$0xff]  ;;  %v21819_v8 = vpack.c.bf16 %v21811_v30, %v21809_v21  ;;  %v21833_v25 = vld [vmem:[#allocation2 + $0x79] sm:$0xff] }
 0xc03   :  { %v21826_v43 = vpack.c.bf16 %v21815_v3, %v21813_v33  ;;  %v21835_v17 = vld [vmem:[#allocation2 + $0x81] sm:$0xff] }
 0xc04   :  { %16236 = vmatpush3.bf16.msra.mxu1 %v17749_v31  ;;  %v17756_v31 = vld [vmem:[%s22374_s6 + $0x510] sm:$0xff]   ;;  %22768 = vst [vmem:[#allocation18_spill] sm:$0xff] %v21819_v8  ;;  %v21839_v2 = vpack.c.bf16 %v21835_v17, %v21833_v25 }
 0xc05   :  { %16237 = vmatprep.subr.bf16.mxu1 %v17750_v57  ;;  %22769 = vst [vmem:[#allocation15_spill] sm:$0xff] %v21826_v43 }
 0xc07   :  { %16222 = vmatmul.mubr.bf16.gmra.mrb[40].mxu1 %v10383_v29  ;;  %v21677_v29 = vld [vmem:[#allocation2 + $0x2f] sm:$0xff] }
 0xc08   :  { %16225 = vmatprep.mubr.bf16.mxu1 %v10384_v62  ;;  %16238 = vmatpush3.bf16.msra.mxu1 %v17750_v57  ;;  %v21681_v62 = vpack.c.bf16 %v21673_v55, %v21671_v19  ;;  %v21688_v63 = vpack.c.bf16 %v21677_v29, %v21675_v52  ;;  %v21695_v57 = vld [vmem:[#allocation2 + $0x37] sm:$0xff] }
 0xc09   :  { %16239 = vmatprep.subr.bf16.mxu1 %v17751_v4 }
 0xc0c   :  { %16240 = vmatpush3.bf16.msra.mxu1 %v17751_v4  ;;  %v21697_v4 = vld [vmem:[#allocation2 + $0x3f] sm:$0xff] }
 0xc0d   :  { %16241 = vmatprep.subr.bf16.mxu1 %v17752_v41 }
 0xc0f   :  { %16226 = vmatmul.mubr.bf16.gmra.mrb[44].mxu1 %v10385_v7  ;;  %v17755_v7 = vld [vmem:[%s22374_s6 + $0x508] sm:$0xff]  }
 0xc10   :  { %16242 = vmatpush3.bf16.msra.mxu1 %v17752_v41  ;;  %16245 = vmatprep.mubr.bf16.mxu1 %v10337_v53  ;;  %v21699_v41 = vld [vmem:[#allocation2 + $0x47] sm:$0xff]  ;;  %v17757_v53 = vld [vmem:[%s22374_s6 + $0x518] sm:$0xff]  }
 0xc11   :  { %16243 = vmatprep.subr.bf16.mxu1 %v17753_v27 }
 0xc14   :  { %16244 = vmatpush3.bf16.msra.mxu1 %v17753_v27  ;;  %v21705_v27 = vpack.c.bf16 %v21697_v4, %v21695_v57 }
 0xc15   :  { %16261 = vmatprep.subr.bf16.mxu1 %v17754_v42 }
 0xc17   :  { %16246 = vmatmul.mubr.bf16.vlgmr.msra.gmra.mrb[32].mxu1 %v21681_v62 }
 0xc18   :  { %16249 = vmatprep.mubr.bf16.mxu1 %v21688_v63  ;;  %16262 = vmatpush3.bf16.msra.mxu1 %v17754_v42  ;;  %v21712_v42 = vpack.c.bf16 %v21701_v20, %v21699_v41 }
 0xc19   :  { %16263 = vmatprep.subr.bf16.mxu1 %v17755_v7 }
 0xc1c   :  { %16264 = vmatpush3.bf16.msra.mxu1 %v17755_v7  ;;  %v17758_v7 = vld [vmem:[%s22374_s6 + $0x520] sm:$0xff]  }
 0xc1d   :  { %16265 = vmatprep.subr.bf16.mxu1 %v17756_v31 }
 0xc1f   :  { %16250 = vmatmul.mubr.bf16.gmra.mrb[36].mxu1 %v21705_v27 }
 0xc20   :  { %16253 = vmatprep.mubr.bf16.mxu1 %v21712_v42  ;;  %16266 = vmatpush3.bf16.msra.mxu1 %v17756_v31  ;;  %v17759_v31 = vld [vmem:[%s22374_s6 + $0x528] sm:$0xff]  }
 0xc21   :  { %16267 = vmatprep.subr.bf16.mxu1 %v17757_v53 }
 0xc24   :  { %16268 = vmatpush3.bf16.msra.mxu1 %v17757_v53  ;;  %v17760_v53 = vld [vmem:[%s22374_s6 + $0x530] sm:$0xff]  }
 0xc25   :  { %16269 = vmatprep.subr.bf16.mxu1 %v17758_v7 }
 0xc27   :  { %16254 = vmatmul.mubr.bf16.gmra.mrb[40].mxu1 %v21729_v28 }
 0xc28   :  { %16257 = vmatprep.mubr.bf16.mxu1 %v21736_v56  ;;  %16270 = vmatpush3.bf16.msra.mxu1 %v17758_v7  ;;  %v17761_v7 = vld [vmem:[%s22374_s6 + $0x538] sm:$0xff]  }
 0xc29   :  { %16271 = vmatprep.subr.bf16.mxu1 %v17759_v31 }
 0xc2c   :  { %16272 = vmatpush3.bf16.msra.mxu1 %v17759_v31  ;;  %v17762_v31 = vld [vmem:[%s22374_s6 + $0x540] sm:$0xff]  }
 0xc2d   :  { %16273 = vmatprep.subr.bf16.mxu1 %v17760_v53 }
 0xc2f   :  { %16258 = vmatmul.mubr.bf16.gmra.mrb[44].mxu1 %v21751_v22 }
 0xc30   :  { %16274 = vmatpush3.bf16.msra.mxu1 %v17760_v53  ;;  %16277 = vmatprep.mubr.bf16.mxu1 %v10709_v18  ;;  %v17763_v18 = vld [vmem:[%s22374_s6 + $0x548] sm:$0xff]   ;;  %v21778_v53 = vpack.c.bf16 %v21767_v12, %v21765_v54 }
 0xc31   :  { %16275 = vmatprep.subr.bf16.mxu1 %v17761_v7 }
 0xc34   :  { %16276 = vmatpush3.bf16.msra.mxu1 %v17761_v7  ;;  %v17764_v7 = vld [vmem:[%s22374_s6 + $0x550] sm:$0xff]  }
 0xc35   :  { %16293 = vmatprep.subr.bf16.mxu1 %v17762_v31 }
 0xc37   :  { %16278 = vmatmul.mubr.bf16.vlgmr.msra.gmra.mrb[32].mxu1 %v21771_v44 }
 0xc38   :  { %16281 = vmatprep.mubr.bf16.mxu1 %v21778_v53  ;;  %16294 = vmatpush3.bf16.msra.mxu1 %v17762_v31  ;;  %v17765_v31 = vld [vmem:[%s22374_s6 + $0x558] sm:$0xff]  }
 0xc39   :  { %16295 = vmatprep.subr.bf16.mxu1 %v17763_v18 }
 0xc3c   :  { %16296 = vmatpush3.bf16.msra.mxu1 %v17763_v18  ;;  %v17766_v18 = vld [vmem:[%s22374_s6 + $0x560] sm:$0xff]  }
 0xc3d   :  { %16297 = vmatprep.subr.bf16.mxu1 %v17764_v7 }
 0xc3f   :  { %16282 = vmatmul.mubr.bf16.gmra.mrb[36].mxu1 %v21795_v46 }
 0xc40   :  { %16285 = vmatprep.mubr.bf16.mxu1 %v21802_v45  ;;  %16298 = vmatpush3.bf16.msra.mxu1 %v17764_v7  ;;  %v17767_v7 = vld [vmem:[%s22374_s6 + $0x568] sm:$0xff]  }
 0xc41   :  { %16299 = vmatprep.subr.bf16.mxu1 %v17765_v31 }
 0xc44   :  { %16300 = vmatpush3.bf16.msra.mxu1 %v17765_v31  ;;  %v17768_v31 = vld [vmem:[%s22374_s6 + $0x570] sm:$0xff]  }
 0xc45   :  { %16301 = vmatprep.subr.bf16.mxu1 %v17766_v18 }
 0xc47   :  { %16286 = vmatmul.mubr.bf16.gmra.mrb[40].mxu1 %v21819_v8  ;;  %v17771_v8 = vld [vmem:[%s22374_s6 + $0x588] sm:$0xff]  }
 0xc48   :  { %16289 = vmatprep.mubr.bf16.mxu1 %v21826_v43  ;;  %16302 = vmatpush3.bf16.msra.mxu1 %v17766_v18  ;;  %v10911_v18 = vpack.c.bf16 %v21671_v19, %v21662_v14  ;;  %v10912_v43 = vpack.c.bf16 %v21675_v52, %v21673_v55  ;;  %v10913_v14 = vpack.c.bf16 %v21695_v57, %v21677_v29  ;;  %v17772_v19 = vld [vmem:[%s22374_s6 + $0x590] sm:$0xff]   ;;  %v17773_v55 = vld [vmem:[%s22374_s6 + $0x598] sm:$0xff]   ;;  %v17775_v29 = vld [vmem:[%s22374_s6 + $0x5a8] sm:$0xff]  }
 0xc49   :  { %16303 = vmatprep.subr.bf16.mxu1 %v17767_v7  ;;  %v10915_v52 = vpack.c.bf16 %v21719_v40, %v21701_v20  ;;  %v10917_v40 = vpack.c.bf16 %v21743_v6, %v21725_v13  ;;  %v17776_v57 = vld [vmem:[%s22374_s6 + $0x5b0] sm:$0xff]   ;;  %v22770_v6 = vpack.c.bf16 %v21552_v11, %v21549_v60  ;;  %v17778_v13 = vld [vmem:[%s22374_s6 + $0x5c0] sm:$0xff]   ;;  %v22772_v20 = vpack.c.bf16 %v21564_v50, %v21561_v34  ;;  %v17781_v11 = vld [vmem:[%s22374_s6 + $0x5d8] sm:$0xff]  }
 0xc4a   :  { %v17780_v60 = vld [vmem:[%s22374_s6 + $0x5d0] sm:$0xff]   ;;  %v17782_v34 = vld [vmem:[%s22374_s6 + $0x5e0] sm:$0xff]   ;;  %v17783_v50 = vld [vmem:[%s22374_s6 + $0x5e8] sm:$0xff]  }
 0xc4c   :  { %16304 = vmatpush3.bf16.msra.mxu1 %v17767_v7  ;;  %v17770_v7 = vld [vmem:[%s22374_s6 + $0x580] sm:$0xff]  }
 0xc4d   :  { %16305 = vmatprep.subr.bf16.mxu1 %v17768_v31 }
 0xc4f   :  { %16290 = vmatmul.mubr.bf16.gmra.mrb[44].mxu1 %v21839_v2 }
 0xc50   :  { %16306 = vmatpush3.bf16.msra.mxu1 %v17768_v31  ;;  %16309 = vmatprep.mubr.bf16.mxu1 %v10911_v18  ;;  %v11703_v31 = vld [vmem:[#allocation2 + $0x18] sm:$0xff]  ;;  %v11704_v18 = vld [vmem:[#allocation2 + $0x20] sm:$0xff] }
 0xc51   :  { %16307 = vmatprep.subr.bf16.mxu1 %v17769_v16 }
 0xc54   :  { %16308 = vmatpush3.bf16.msra.mxu1 %v17769_v16  ;;  %v10914_v16 = vpack.c.bf16 %v21699_v41, %v21697_v4  ;;  %v21880_v4 = vld [vmem:[#allocation2 + $0x87] sm:$0xff]  ;;  %v22771_v41 = vpack.c.bf16 %v21558_v59, %v21555_v0  ;;  %v22773_v0 = vpack.c.bf16 %v21570_v23, %v21567_v47  ;;  %v22774_v59 = vpack.c.bf16 %v21576_v51, %v21573_v24  ;;  %v17784_v24 = vld [vmem:[%s22374_s6 + $0x5f0] sm:$0xff]   ;;  %v17785_v51 = vld [vmem:[%s22374_s6 + $0x5f8] sm:$0xff]  }
 0xc55   :  { %16325 = vmatprep.subr.bf16.mxu1 %v17770_v7  ;;  %v22775_v47 = vpack.c.bf16 %v21582_v49, %v21579_v36  ;;  %v22776_v23 = vpack.c.bf16 %v21592_v39, %v21589_v9  ;;  %v11315_v36 = vpack.c.bf16 %v21761_v1, %v21747_v32  ;;  %v22777_v49 = vpack.c.bf16 %v21598_v48, %v21595_v37  ;;  %v17786_v9 = vld [vmem:[%s22374_s6 + $0x600] sm:$0xff]   ;;  %v17787_v1 = vld [vmem:[%s22374_s6 + $0x608] sm:$0xff]   ;;  %v17788_v37 = vld [vmem:[%s22374_s6 + $0x610] sm:$0xff]  }
 0xc56   :  { %v11316_v39 = vpack.c.bf16 %v21765_v54, %v21763_v61  ;;  %v11317_v32 = vpack.c.bf16 %v21785_v38, %v21767_v12  ;;  %v11318_v54 = vpack.c.bf16 %v21789_v35, %v21787_v10  ;;  %v17789_v61 = vld [vmem:[%s22374_s6 + $0x618] sm:$0xff]   ;;  %v11319_v38 = vpack.c.bf16 %v21809_v21, %v21791_v15  ;;  %v17790_v12 = vld [vmem:[%s22374_s6 + $0x620] sm:$0xff]   ;;  %v17791_v10 = vld [vmem:[%s22374_s6 + $0x628] sm:$0xff]  }
 0xc57   :  { %16310 = vmatmul.mubr.bf16.vlgmr.msra.gmra.mrb[32].mxu1 %v10912_v43  ;;  %v17774_v43 = vld [vmem:[%s22374_s6 + $0x5a0] sm:$0xff]   ;;  %v11320_v35 = vpack.c.bf16 %v21813_v33, %v21811_v30  ;;  %v11321_v21 = vpack.c.bf16 %v21833_v25, %v21815_v3  ;;  %v17792_v15 = vld [vmem:[%s22374_s6 + $0x630] sm:$0xff]   ;;  %v17793_v33 = vld [vmem:[%s22374_s6 + $0x638] sm:$0xff]  }
 0xc58   :  { %16313 = vmatprep.mubr.bf16.mxu1 %v10913_v14  ;;  %16326 = vmatpush3.bf16.msra.mxu1 %v17770_v7  ;;  %v21970_v48 = vld [vmem:[#allocation2 + $0x89] sm:$0xff]  ;;  %v17794_v25 = vld [vmem:[%s22374_s6 + $0x640] sm:$0xff]   ;;  %v17801_v14 = vld [vmem:[%s22374_s6 + $0x678] sm:$0xff]  }
 0xc59   :  { %16327 = vmatprep.subr.bf16.mxu1 %v17771_v8  ;;  %v11322_v30 = vpack.c.bf16 %v21970_v48, %v21835_v17  ;;  %v17795_v17 = vld [vmem:[%s22374_s6 + $0x648] sm:$0xff]   ;;  %v17796_v3 = vld [vmem:[%s22374_s6 + $0x650] sm:$0xff]  }
 0xc5c   :  { %16328 = vmatpush3.bf16.msra.mxu1 %v17771_v8  ;;  %v10916_v8 = vpack.c.bf16 %v21723_v58, %v21721_v26  ;;  %v10918_v58 = vpack.c.bf16 %v21880_v4, %v21745_v5  ;;  %v17777_v26 = vld [vmem:[%s22374_s6 + $0x5b8] sm:$0xff]   ;;  %v17779_v5 = vld [vmem:[%s22374_s6 + $0x5c8] sm:$0xff]  }
 0xc5d   :  { %16329 = vmatprep.subr.bf16.mxu1 %v17772_v19 }
 0xc5f   :  { %16314 = vmatmul.mubr.bf16.gmra.mrb[36].mxu1 %v10914_v16  ;;  %v11706_v16 = vld [vmem:[#allocation2 + $0x30] sm:$0xff] }
 0xc60   :  { %16317 = vmatprep.mubr.bf16.mxu1 %v10915_v52  ;;  %16330 = vmatpush3.bf16.msra.mxu1 %v17772_v19  ;;  %v11705_v19 = vld [vmem:[#allocation2 + $0x28] sm:$0xff]  ;;  %v11708_v52 = vld [vmem:[#allocation2 + $0x40] sm:$0xff] }
 0xc61   :  { %16331 = vmatprep.subr.bf16.mxu1 %v17773_v55 }
 0xc64   :  { %16332 = vmatpush3.bf16.msra.mxu1 %v17773_v55  ;;  %v11707_v55 = vld [vmem:[#allocation2 + $0x38] sm:$0xff] }
 0xc65   :  { %16333 = vmatprep.subr.bf16.mxu1 %v17774_v43 }
 0xc67   :  { %16318 = vmatmul.mubr.bf16.gmra.mrb[40].mxu1 %v10916_v8  ;;  %v17803_v8 = vld [vmem:[%s22374_s6 + $0x688] sm:$0xff]  }
 0xc68   :  { %16321 = vmatprep.mubr.bf16.mxu1 %v10917_v40  ;;  %16334 = vmatpush3.bf16.msra.mxu1 %v17774_v43  ;;  %v11720_v43 = vpack.c.bf16 %v11706_v16, %v11705_v19  ;;  %v17804_v40 = vld [vmem:[%s22374_s6 + $0x690] sm:$0xff]  }
 0xc69   :  { %16335 = vmatprep.subr.bf16.mxu1 %v17775_v29 }
 0xc6c   :  { %16336 = vmatpush3.bf16.msra.mxu1 %v17775_v29  ;;  %v11721_v29 = vpack.c.bf16 %v11708_v52, %v11707_v55  ;;  %v22787_v52 = vld [vmem:[#allocation12_spill] sm:$0xff] }
 0xc6d   :  { %16337 = vmatprep.subr.bf16.mxu1 %v17776_v57 }
 0xc6f   :  { %16322 = vmatmul.mubr.bf16.gmra.mrb[44].mxu1 %v10918_v58  ;;  %v11711_v58 = vld [vmem:[#allocation2 + $0x58] sm:$0xff] }
 0xc70   :  { %16338 = vmatpush3.bf16.msra.mxu1 %v17776_v57  ;;  %16341 = vmatprep.mubr.bf16.mxu1 %v22770_v6  ;;  %v11709_v57 = vld [vmem:[#allocation2 + $0x48] sm:$0xff] }
 0xc71   :  { %16339 = vmatprep.subr.bf16.mxu1 %v17777_v26 }
 0xc74   :  { %16340 = vmatpush3.bf16.msra.mxu1 %v17777_v26  ;;  %v11712_v26 = vld [vmem:[#allocation2 + $0x60] sm:$0xff] }
 0xc75   :  { %16357 = vmatprep.subr.bf16.mxu1 %v17778_v13 }
 0xc77   :  { %16342 = vmatmul.mubr.bf16.vlgmr.msra.gmra.mrb[32].mxu1 %v22771_v41  ;;  %v17806_v41 = vld [vmem:[%s22374_s6 + $0x6a0] sm:$0xff]  }
 0xc78   :  { %16345 = vmatprep.mubr.bf16.mxu1 %v22772_v20  ;;  %16358 = vmatpush3.bf16.msra.mxu1 %v17778_v13  ;;  %v17805_v13 = vld [vmem:[%s22374_s6 + $0x698] sm:$0xff]   ;;  %v11713_v20 = vld [vmem:[#allocation2 + $0x68] sm:$0xff] }
 0xc79   :  { %16359 = vmatprep.subr.bf16.mxu1 %v17779_v5 }
 0xc7c   :  { %16360 = vmatpush3.bf16.msra.mxu1 %v17779_v5  ;;  %v11723_v5 = vpack.c.bf16 %v11712_v26, %v11711_v58  ;;  %v22790_v58 = vld [vmem:[#allocation9_spill] sm:$0xff] }
 0xc7d   :  { %16361 = vmatprep.subr.bf16.mxu1 %v17780_v60 }
 0xc7f   :  { %16346 = vmatmul.mubr.bf16.gmra.mrb[36].mxu1 %v22773_v0  ;;  %v11716_v0 = vld [vmem:[#allocation2 + $0x80] sm:$0xff] }
 0xc80   :  { %16349 = vmatprep.mubr.bf16.mxu1 %v22774_v59  ;;  %16362 = vmatpush3.bf16.msra.mxu1 %v17780_v60  ;;  %v11714_v60 = vld [vmem:[#allocation2 + $0x70] sm:$0xff] }
 0xc81   :  { %16363 = vmatprep.subr.bf16.mxu1 %v17781_v11  ;;  %v11724_v59 = vpack.c.bf16 %v11714_v60, %v11713_v20  ;;  %v17864_v20 = vmov 0.0|0.0  }
 0xc82   :  { %16555 = vmatprep.subr.bf16.mxu0 %v17864_v20 }
 0xc84   :  { %16364 = vmatpush3.bf16.msra.mxu1 %v17781_v11  ;;  %v11715_v11 = vld [vmem:[#allocation2 + $0x78] sm:$0xff] }
 0xc85   :  { %16365 = vmatprep.subr.bf16.mxu1 %v17782_v34 }
 0xc87   :  { %16350 = vmatmul.mubr.bf16.gmra.mrb[40].mxu1 %v22775_v47  ;;  %v17808_v47 = vld [vmem:[%s22374_s6 + $0x6b0] sm:$0xff]  }
 0xc88   :  { %16353 = vmatprep.mubr.bf16.mxu1 %v22776_v23  ;;  %16366 = vmatpush3.bf16.msra.mxu1 %v17782_v34  ;;  %v17807_v34 = vld [vmem:[%s22374_s6 + $0x6a8] sm:$0xff]  }
 0xc89   :  { %16367 = vmatprep.subr.bf16.mxu1 %v17783_v50  ;;  %v11717_v23 = vld [vmem:[#allocation2 + $0x88] sm:$0xff] }
 0xc8c   :  { %16368 = vmatpush3.bf16.msra.mxu1 %v17783_v50  ;;  %v11725_v50 = vpack.c.bf16 %v11716_v0, %v11715_v11  ;;  %v22792_v11 = vld [vmem:[#allocation26_spill] sm:$0xff] }
 0xc8d   :  { %16369 = vmatprep.subr.bf16.mxu1 %v17784_v24 }
 0xc8f   :  { %16354 = vmatmul.mubr.bf16.gmra.mrb[44].mxu1 %v22777_v49  ;;  %v22778_v49 = vld [vmem:[#allocation18_spill] sm:$0xff] }
 0xc90   :  { %16370 = vmatpush3.bf16.msra.mxu1 %v17784_v24  ;;  %16373 = vmatprep.mubr.bf16.mxu1 %v11315_v36  ;;  %v11718_v24 = vld [vmem:[#allocation2 + $0x90] sm:$0xff]  ;;  %v17809_v36 = vld [vmem:[%s22374_s6 + $0x6b8] sm:$0xff]  }
 0xc91   :  { %16371 = vmatprep.subr.bf16.mxu1 %v17785_v51 }
 0xc94   :  { %16372 = vmatpush3.bf16.msra.mxu1 %v17785_v51  ;;  %v11726_v51 = vpack.c.bf16 %v11718_v24, %v11717_v23 }
 0xc95   :  { %16389 = vmatprep.subr.bf16.mxu1 %v17786_v9 }
 0xc97   :  { %16374 = vmatmul.mubr.bf16.vlgmr.msra.gmra.mrb[32].mxu1 %v11316_v39  ;;  %v11920_v39 = vld [vmem:[#allocation2 + $0x91] sm:$0xff] }
 0xc98   :  { %16377 = vmatprep.mubr.bf16.mxu1 %v11317_v32  ;;  %16390 = vmatpush3.bf16.msra.mxu1 %v17786_v9  ;;  %v22779_v9 = vld [vmem:[#allocation15_spill] sm:$0xff] }
 0xc99   :  { %16391 = vmatprep.subr.bf16.mxu1 %v17787_v1 }
 0xc9c   :  { %16392 = vmatpush3.bf16.msra.mxu1 %v17787_v1  ;;  %v11928_v1 = vpack.c.bf16 %v11920_v39, %v21970_v48 }
 0xc9d   :  { %16393 = vmatprep.subr.bf16.mxu1 %v17788_v37 }
 0xc9f   :  { %16378 = vmatmul.mubr.bf16.gmra.mrb[36].mxu1 %v11318_v54  ;;  %v22780_v54 = vld [vmem:[#allocation8_spill] sm:$0xff] }
 0xca0   :  { %16381 = vmatprep.mubr.bf16.mxu1 %v11319_v38  ;;  %16394 = vmatpush3.bf16.msra.mxu1 %v17788_v37 }
 0xca1   :  { %16395 = vmatprep.subr.bf16.mxu1 %v17789_v61 }
 0xca4   :  { %16396 = vmatpush3.bf16.msra.mxu1 %v17789_v61 }
 0xca5   :  { %16397 = vmatprep.subr.bf16.mxu1 %v17790_v12 }
 0xca7   :  { %16382 = vmatmul.mubr.bf16.gmra.mrb[40].mxu1 %v11320_v35 }
 0xca8   :  { %16385 = vmatprep.mubr.bf16.mxu1 %v11321_v21  ;;  %16398 = vmatpush3.bf16.msra.mxu1 %v17790_v12  ;;  %v22781_v12 = vld [vmem:[#allocation21_spill] sm:$0xff]  ;;  %v22782_v21 = vld [vmem:[#allocation38_spill] sm:$0xff] }
 0xca9   :  { %16399 = vmatprep.subr.bf16.mxu1 %v17791_v10 }
 0xcac   :  { %16400 = vmatpush3.bf16.msra.mxu1 %v17791_v10 }
 0xcad   :  { %16401 = vmatprep.subr.bf16.mxu1 %v17792_v15 }
 0xcaf   :  { %16386 = vmatmul.mubr.bf16.gmra.mrb[44].mxu1 %v11322_v30  ;;  %v22783_v30 = vld [vmem:[#allocation19_spill] sm:$0xff] }
 0xcb0   :  { %16402 = vmatpush3.bf16.msra.mxu1 %v17792_v15  ;;  %16405 = vmatprep.mubr.bf16.mxu1 %v21681_v62  ;;  %v17797_v62 = vld [vmem:[%s22374_s6 + $0x658] sm:$0xff]  }
 0xcb1   :  { %16403 = vmatprep.subr.bf16.mxu1 %v17793_v33 }
 0xcb4   :  { %16404 = vmatpush3.bf16.msra.mxu1 %v17793_v33 }
 0xcb5   :  { %16421 = vmatprep.subr.bf16.mxu1 %v17794_v25 }
 0xcb7   :  { %16406 = vmatmul.mubr.bf16.vlgmr.msra.gmra.mrb[32].mxu1 %v21688_v63  ;;  %v17798_v63 = vld [vmem:[%s22374_s6 + $0x660] sm:$0xff]  }
 0xcb8   :  { %16409 = vmatprep.mubr.bf16.mxu1 %v21705_v27  ;;  %16422 = vmatpush3.bf16.msra.mxu1 %v17794_v25  ;;  %v17799_v27 = vld [vmem:[%s22374_s6 + $0x668] sm:$0xff]  }
 0xcb9   :  { %16423 = vmatprep.subr.bf16.mxu1 %v17795_v17 }
 0xcbc   :  { %16424 = vmatpush3.bf16.msra.mxu1 %v17795_v17 }
 0xcbd   :  { %16425 = vmatprep.subr.bf16.mxu1 %v17796_v3 }
 0xcbf   :  { %16410 = vmatmul.mubr.bf16.gmra.mrb[36].mxu1 %v21712_v42  ;;  %v11516_v42 = vld [vmem:[#allocation2 + $0x8f] sm:$0xff] }
 0xcc0   :  { %16413 = vmatprep.mubr.bf16.mxu1 %v21729_v28  ;;  %16426 = vmatpush3.bf16.msra.mxu1 %v17796_v3  ;;  %v17800_v28 = vld [vmem:[%s22374_s6 + $0x670] sm:$0xff]   ;;  %v11524_v7 = vpack.c.bf16 %v11516_v42, %v21880_v4 }
 0xcc1   :  { %16427 = vmatprep.subr.bf16.mxu1 %v17797_v62  ;;  %v11710_v4 = vld [vmem:[#allocation2 + $0x50] sm:$0xff] }
 0xcc2   :  { %v11722_v6 = vpack.c.bf16 %v11710_v4, %v11709_v57  ;;  %v22789_v57 = vld [vmem:[#allocation25_spill] sm:$0xff] }
 0xcc4   :  { %16428 = vmatpush3.bf16.msra.mxu1 %v17797_v62 }
 0xcc5   :  { %16429 = vmatprep.subr.bf16.mxu1 %v17798_v63 }
 0xcc7   :  { %16414 = vmatmul.mubr.bf16.gmra.mrb[40].mxu1 %v21736_v56  ;;  %v11719_v56 = vpack.c.bf16 %v11704_v18, %v11703_v31  ;;  %v22785_v31 = vld [vmem:[#allocation24_spill] sm:$0xff] }
 0xcc8   :  { %16417 = vmatprep.mubr.bf16.mxu1 %v21751_v22  ;;  %16430 = vmatpush3.bf16.msra.mxu1 %v17798_v63  ;;  %v17802_v22 = vld [vmem:[%s22374_s6 + $0x680] sm:$0xff]  }
 0xcc9   :  { %16431 = vmatprep.subr.bf16.mxu1 %v17799_v27 }
 0xccc   :  { %16432 = vmatpush3.bf16.msra.mxu1 %v17799_v27 }
 0xccd   :  { %16433 = vmatprep.subr.bf16.mxu1 %v17800_v28 }
 0xccf   :  { %16418 = vmatmul.mubr.bf16.gmra.mrb[44].mxu1 %v11524_v7 }
 0xcd0   :  { %16434 = vmatpush3.bf16.msra.mxu1 %v17800_v28  ;;  %16437 = vmatprep.mubr.bf16.mxu1 %v11719_v56  ;;  %v22784_v28 = vld [vmem:[#allocation22_spill] sm:$0xff]  ;;  %v22786_v56 = vld [vmem:[#allocation23_spill] sm:$0xff] }
 0xcd1   :  { %16435 = vmatprep.subr.bf16.mxu1 %v17801_v14 }
 0xcd4   :  { %16436 = vmatpush3.bf16.msra.mxu1 %v17801_v14 }
 0xcd5   :  { %16453 = vmatprep.subr.bf16.mxu1 %v17802_v22 }
 0xcd7   :  { %16438 = vmatmul.mubr.bf16.vlgmr.msra.gmra.mrb[32].mxu1 %v11720_v43 }
 0xcd8   :  { %16441 = vmatprep.mubr.bf16.mxu1 %v11721_v29  ;;  %16454 = vmatpush3.bf16.msra.mxu1 %v17802_v22 }
 0xcd9   :  { %16455 = vmatprep.subr.bf16.mxu1 %v17803_v8 }
 0xcdc   :  { %16456 = vmatpush3.bf16.msra.mxu1 %v17803_v8  ;;  %v22788_v8 = vld [vmem:[#allocation6_spill] sm:$0xff] }
 0xcdd   :  { %16457 = vmatprep.subr.bf16.mxu1 %v17804_v40 }
 0xcdf   :  { %16442 = vmatmul.mubr.bf16.gmra.mrb[36].mxu1 %v11722_v6 }
 0xce0   :  { %16445 = vmatprep.mubr.bf16.mxu1 %v11723_v5  ;;  %16458 = vmatpush3.bf16.msra.mxu1 %v17804_v40  ;;  %v22791_v5 = vld [vmem:[#allocation39_spill] sm:$0xff] }
 0xce1   :  { %16459 = vmatprep.subr.bf16.mxu1 %v17805_v13 }
 0xce4   :  { %16460 = vmatpush3.bf16.msra.mxu1 %v17805_v13 }
 0xce5   :  { %16461 = vmatprep.subr.bf16.mxu1 %v17806_v41 }
 0xce7   :  { %16446 = vmatmul.mubr.bf16.gmra.mrb[40].mxu1 %v11724_v59 }
 0xce8   :  { %16449 = vmatprep.mubr.bf16.mxu1 %v11725_v50  ;;  %16462 = vmatpush3.bf16.msra.mxu1 %v17806_v41 }
 0xce9   :  { %16463 = vmatprep.subr.bf16.mxu1 %v17807_v34 }
 0xcec   :  { %16464 = vmatpush3.bf16.msra.mxu1 %v17807_v34 }
 0xced   :  { %16465 = vmatprep.subr.bf16.mxu1 %v17808_v47 }
 0xcef   :  { %16450 = vmatmul.mubr.bf16.gmra.mrb[44].mxu1 %v11726_v51 }
 0xcf0   :  { %16466 = vmatpush3.bf16.msra.mxu1 %v17808_v47  ;;  %16469 = vmatprep.mubr.bf16.mxu1 %v21771_v44  ;;  %v22044_v44 = vld [vmem:[%s22375_s7 + $0x2] ss:$0 sm:$0xff] }
 0xcf1   :  { %16467 = vmatprep.subr.bf16.mxu1 %v17809_v36 }
 0xcf4   :  { %16468 = vmatpush3.bf16.msra.mxu1 %v17809_v36  ;;  %v22793_v36 = vld [vmem:[#allocation27_spill] sm:$0xff] }
 0xcf5   :  { %16579 = vmatprep.subr.bf16.mxu1 %v17864_v20 }
 0xcf7   :  { %16470 = vmatmul.mubr.bf16.vlgmr.msra.gmra.mrb[32].mxu1 %v21778_v53 }
 0xcf8   :  { %16473 = vmatprep.mubr.bf16.mxu1 %v21795_v46 }
 0xcff   :  { %16474 = vmatmul.mubr.bf16.gmra.mrb[36].mxu1 %v21802_v45 }
 0xd00   :  { %16477 = vmatprep.mubr.bf16.mxu1 %v22778_v49 }
 0xd07   :  { %16478 = vmatmul.mubr.bf16.gmra.mrb[40].mxu1 %v22779_v9 }
 0xd08   :  { %16481 = vmatprep.mubr.bf16.mxu1 %v21839_v2 }
 0xd0f   :  { %16482 = vmatmul.mubr.bf16.gmra.mrb[44].mxu1 %v11928_v1  ;;  %v22794_v1 = vld [vmem:[#allocation16_spill] sm:$0xff] }
 0xdca   :  { %v16471_v53 = vpop.f32.mrb[32].mxu1 }
 0xdcb   :  { %v12117_v46 = vadd.f32 %v16471_v53, %v22044_v44  ;;  %v12028_v32 = vpop.f32.mrb[33].mxu1 }
 0xdcc   :  { %v12115_v45 = vadd.f32 %v22044_v44, %v12028_v32  ;;  %v16472_v37 = vpop.f32.mrb[34].mxu1 }
 0xdcd   :  { %v22049_v61 = vadd.f32 %v12117_v46, %v22780_v54  ;;  %v12118_v2 = vadd.f32 %v16472_v37, %v22044_v44  ;;  %v12031_v38 = vpop.f32.mrb[35].mxu1 }
 0xdce   :  { %v22053_v35 = vadd.f32 %v12115_v45, %v22781_v12  ;;  %v12116_v10 = vadd.f32 %v22044_v44, %v12031_v38  ;;  %v22795_v45 = vld [vmem:[#allocation28_spill] sm:$0xff] }
 0xdcf   :  { %v22057_v15 = vadd.f32 %v12118_v2, %v22782_v21  ;;  %v12149_v25 = vmax.f32 %v22049_v61, 0.0  ;;  %v22796_v2 = vld [vmem:[#allocation10_spill] sm:$0xff] }
 0xdd0   :  { %v12147_v48 = vmax.f32 %v22053_v35, 0.0  ;;  %v22061_v33 = vadd.f32 %v12116_v10, %v22783_v30  ;;  %v22797_v10 = vld [vmem:[#allocation13_spill] sm:$0xff] }
 0xdd1   :  { %v12150_v62 = vmax.f32 %v22057_v15, 0.0  ;;  %v12169_v22 = vmul.f32 %v12149_v25, %v22786_v56  ;;  %v22798_v30 = vld [vmem:[#allocation29_spill] sm:$0xff] }
 0xdd2   :  { %v12148_v17 = vmax.f32 %v22061_v33, 0.0  ;;  %v16475_v3 = vpop.f32.mrb[36].mxu1  ;;  %v12167_v42 = vmul.f32 %v12147_v48, %v22784_v28 }
 0xdd3   :  { %v12121_v63 = vadd.f32 %v16475_v3, %v22044_v44  ;;  %v12044_v27 = vpop.f32.mrb[37].mxu1  ;;  %v12170_v4 = vmul.f32 %v12150_v62, %v22789_v57 }
 0xdd4   :  { %v12168_v18 = vmul.f32 %v12148_v17, %v22785_v31  ;;  %v12119_v7 = vadd.f32 %v22044_v44, %v12044_v27  ;;  %v16476_v14 = vpop.f32.mrb[38].mxu1 }
 0xdd5   :  { %v12122_v19 = vadd.f32 %v16476_v14, %v22044_v44  ;;  %v12047_v16 = vpop.f32.mrb[39].mxu1  ;;  %v22079_v43 = vadd.f32 %v12121_v63, %v22787_v52  ;;  %v22800_v14 = vld [vmem:[#allocation30_spill] sm:$0xff] }
 0xdd6   :  { %v12183_v55 = vadd.f32 %v12168_v18, %v12167_v42  ;;  %v22082_v29 = vadd.f32 %v12119_v7, %v22788_v8  ;;  %v12120_v40 = vadd.f32 %v22044_v44, %v12047_v16  ;;  %v22799_v42 = vld [vmem:[#allocation7_spill] sm:$0xff] }
 0xdd7   :  { %v22089_v26 = vadd.f32 %v12122_v19, %v22790_v58  ;;  %v12153_v60 = vmax.f32 %v22079_v43, 0.0  ;;  %v22801_v58 = vld [vmem:[#allocation31_spill] sm:$0xff] }
 0xdd8   :  { %v12184_v6 = vadd.f32 %v12183_v55, %v12169_v22  ;;  %v12151_v13 = vmax.f32 %v22082_v29, 0.0  ;;  %v22093_v41 = vadd.f32 %v12120_v40, %v22791_v5  ;;  %v12465_v43 = vld [vmem:[%s22379_s11 + $0x48] sm:$0xff] }
 0xdd9   :  { %v12154_v51 = vmax.f32 %v22089_v26, 0.0  ;;  %v12173_v37 = vmul.f32 %v12153_v60, %v22795_v45 }
 0xdda   :  { %v12171_v0 = vmul.f32 %v12151_v13, %v22792_v11  ;;  %v12185_v59 = vadd.f32 %v12184_v6, %v12170_v4  ;;  %v12152_v34 = vmax.f32 %v22093_v41, 0.0  ;;  %v16479_v50 = vpop.f32.mrb[40].mxu1 }
 0xddb   :  { %v12125_v47 = vadd.f32 %v16479_v50, %v22044_v44  ;;  %v12060_v23 = vpop.f32.mrb[41].mxu1  ;;  %v12174_v3 = vmul.f32 %v12154_v51, %v22798_v30 }
 0xddc   :  { %v12186_v24 = vadd.f32 %v12185_v59, %v12171_v0  ;;  %v12172_v49 = vmul.f32 %v12152_v34, %v22793_v36  ;;  %v12123_v9 = vadd.f32 %v22044_v44, %v12060_v23  ;;  %v16480_v39 = vpop.f32.mrb[42].mxu1  ;;  %v22802_v59 = vld [vmem:[#allocation32_spill] sm:$0xff] }
 0xddd   :  { %v22109_v53 = vadd.f32 %v12125_v47, %v22794_v1  ;;  %v12126_v46 = vadd.f32 %v16480_v39, %v22044_v44  ;;  %v12063_v32 = vpop.f32.mrb[43].mxu1  ;;  %v22804_v39 = vld [vmem:[#allocation14_spill] sm:$0xff] }
 0xdde   :  { %v12187_v54 = vadd.f32 %v12186_v24, %v12172_v49  ;;  %v22116_v38 = vadd.f32 %v12123_v9, %v22796_v2  ;;  %v12124_v12 = vadd.f32 %v22044_v44, %v12063_v32  ;;  %v22803_v49 = vld [vmem:[#allocation20_spill] sm:$0xff]  ;;  %v22805_v32 = vld [vmem:[#allocation33_spill] sm:$0xff] }
 0xddf   :  { %v22120_v21 = vadd.f32 %v12126_v46, %v22797_v10  ;;  %v12157_v7 = vmax.f32 %v22109_v53, 0.0  ;;  %v12466_v53 = vld [vmem:[%s22379_s11 + $0x50] sm:$0xff] }
 0xde0   :  { %v12188_v63 = vadd.f32 %v12187_v54, %v12173_v37  ;;  %v12155_v27 = vmax.f32 %v22116_v38, 0.0  ;;  %v22127_v18 = vadd.f32 %v12124_v12, %v22799_v42  ;;  %v22806_v12 = vld [vmem:[#allocation17_spill] sm:$0xff] }
 0xde1   :  { %v12158_v52 = vmax.f32 %v22120_v21, 0.0  ;;  %v12177_v50 = vmul.f32 %v12157_v7, %v22802_v59  ;;  %v12467_v38 = vld [vmem:[%s22379_s11 + $0x58] sm:$0xff] }
 0xde2   :  { %v12175_v22 = vmul.f32 %v12155_v27, %v22800_v14  ;;  %v12189_v19 = vadd.f32 %v12188_v63, %v12174_v3  ;;  %v12156_v16 = vmax.f32 %v22127_v18, 0.0  ;;  %v16483_v55 = vpop.f32.mrb[44].mxu1  ;;  %v22807_v3 = vld [vmem:[#allocation11_spill] sm:$0xff] }
 0xde3   :  { %v12129_v8 = vadd.f32 %v16483_v55, %v22044_v44  ;;  %v12076_v40 = vpop.f32.mrb[45].mxu1  ;;  %v12178_v37 = vmul.f32 %v12158_v52, %v22805_v32 }
 0xde4   :  { %v12190_v4 = vadd.f32 %v12189_v19, %v12175_v22  ;;  %v12176_v6 = vmul.f32 %v12156_v16, %v22801_v58  ;;  %v12127_v5 = vadd.f32 %v22044_v44, %v12076_v40  ;;  %v16484_v0 = vpop.f32.mrb[46].mxu1  ;;  %v22808_v22 = vld [vmem:[#allocation34_spill] sm:$0xff] }
 0xde5   :  { %v12130_v47 = vadd.f32 %v16484_v0, %v22044_v44  ;;  %v12079_v23 = vpop.f32.mrb[47].mxu1  ;;  %v22145_v9 = vadd.f32 %v12129_v8, %v22803_v49 }
 0xde6   :  { %v12191_v24 = vadd.f32 %v12190_v4, %v12176_v6  ;;  %v22148_v1 = vadd.f32 %v12127_v5, %v22804_v39  ;;  %v12128_v46 = vadd.f32 %v22044_v44, %v12079_v23  ;;  %v22809_v44 = vld [vmem:[#allocation35_spill] sm:$0xff]  ;;  %v22810_v5 = vld [vmem:[#allocation36_spill] sm:$0xff] }
 0xde7   :  { %v12146_v10 = vadd.f32 %v12130_v47, %v22806_v12  ;;  %v12161_v42 = vmax.f32 %v22145_v9, 0.0  ;;  %v12458_v12 = vld [vmem:[%s22379_s11 + $0x10] sm:$0xff] }
 0xde8   :  { %v12192_v54 = vadd.f32 %v12191_v24, %v12177_v50  ;;  %v12159_v2 = vmax.f32 %v22148_v1, 0.0  ;;  %v12144_v63 = vadd.f32 %v12128_v46, %v22807_v3  ;;  %v22811_v50 = vld [vmem:[#allocation37_spill] sm:$0xff]  ;;  %v17866_v46 = vmov 0.0  }
 0xde9   :  { %v12162_v4 = vmax.f32 %v12146_v10, 0.0  ;;  %v12181_v0 = vmul.f32 %v12161_v42, %v22810_v5  ;;  %16517 = vmatprep.mubr.msk.f32.mxu0 %vm17865_vm0, %v17866_v46  ;;  %16552 = vmatprep.mubr.msk.f32.mxu1 %vm17865_vm0, %v17866_v46  ;;  %v12459_v3 = vld [vmem:[%s22379_s11 + $0x18] sm:$0xff] }
 0xdea   :  { %v12179_v19 = vmul.f32 %v12159_v2, %v22808_v22  ;;  %v12193_v55 = vadd.f32 %v12192_v54, %v12178_v37  ;;  %v12160_v8 = vmax.f32 %v12144_v63, 0.0  ;;  %v12456_v37 = vld [vmem:[%s22379_s11] sm:$0xff]  ;;  %v12457_v54 = vld [vmem:[%s22379_s11 + $0x8] sm:$0xff] }
 0xdeb   :  { %v12182_v24 = vmul.f32 %v12162_v4, %v22811_v50  ;;  %v16580_v10 = vpack.c.bf16 %v12457_v54, %v12456_v37 }
 0xdec   :  { %v12194_v40 = vadd.f32 %v12193_v55, %v12179_v19  ;;  %v12180_v6 = vmul.f32 %v12160_v8, %v22809_v44  ;;  %v16583_v19 = vpack.c.bf16 %v12459_v3, %v12458_v12 }
 0xded   :  { %16581 = vmatpush3.bf16.msra.mxu1 %v16580_v10 }
 0xdee   :  { %v12195_v23 = vadd.f32 %v12194_v40, %v12180_v6  ;;  %16582 = vmatprep.subr.bf16.mxu1 %v17864_v20  ;;  %v12460_v40 = vld [vmem:[%s22379_s11 + $0x20] sm:$0xff]  ;;  %v12461_v6 = vld [vmem:[%s22379_s11 + $0x28] sm:$0xff] }
 0xdf0   :  { %v12196_v49 = vadd.f32 %v12195_v23, %v12181_v0  ;;  %v12462_v23 = vld [vmem:[%s22379_s11 + $0x30] sm:$0xff] }
 0xdf1   :  { %16584 = vmatpush3.bf16.msra.mxu1 %v16583_v19  ;;  %v12470_v19 = vld [vmem:[%s22379_s11 + $0x70] sm:$0xff] }
 0xdf2   :  { %v12197_v39 = vadd.f32 %v12196_v49, %v12182_v24  ;;  %v12463_v24 = vld [vmem:[%s22379_s11 + $0x38] sm:$0xff]  ;;  %v16586_v49 = vpack.c.bf16 %v12461_v6, %v12460_v40  ;;  %16585 = vmatprep.subr.bf16.mxu1 %v17864_v20 }
 0xdf4   :  { %v12198_v47 = vrot.slane %v12197_v39, 4 }
 0xdf5   :  { %16587 = vmatpush3.bf16.msra.mxu1 %v16586_v49 }
 0xdf6   :  { %v12199_v1 = vadd.f32 %v12198_v47, %v12197_v39  ;;  %v16589_v47 = vpack.c.bf16 %v12463_v24, %v12462_v23  ;;  %16588 = vmatprep.subr.bf16.mxu1 %v17864_v20 }
 0xdf8   :  { %v12200_v9 = vrot.slane %v12199_v1, 2 }
 0xdf9   :  { %16590 = vmatpush3.bf16.msra.mxu1 %v16589_v47 }
 0xdfa   :  { %v12201_v63 = vadd.f32 %v12200_v9, %v12199_v1  ;;  %16591 = vmatprep.subr.bf16.mxu1 %v17864_v20 }
 0xdfc   :  { %v12202_v55 = vrot.slane %v12201_v63, 1 }
 0xdfe   :  { %v12203_v0 = vadd.f32 %v12202_v55, %v12201_v63  ;;  %v12471_v55 = vld [vmem:[%s22379_s11 + $0x78] sm:$0xff] }
 0xdff   :  { %v16601_v23 = vpack.c.bf16 %v12471_v55, %v12470_v19 }
 0xe00   :  { %v12204_v39 = vmul.f32 0.013888889, %v12203_v0 }
 0xe02   :  { %v22190_v1 = vsub.f32 %v12147_v48, %v12204_v39  ;;  %v22194_v46 = vsub.f32 %v12148_v17, %v12204_v39  ;;  %v22198_v9 = vsub.f32 %v12149_v25, %v12204_v39  ;;  %v22202_v37 = vsub.f32 %v12150_v62, %v12204_v39  ;;  %v12464_v62 = vld [vmem:[%s22379_s11 + $0x40] sm:$0xff] }
 0xe03   :  { %v22206_v54 = vsub.f32 %v12151_v13, %v12204_v39  ;;  %v22210_v35 = vsub.f32 %v12152_v34, %v12204_v39  ;;  %v22214_v48 = vsub.f32 %v12153_v60, %v12204_v39  ;;  %v22218_v61 = vsub.f32 %v12154_v51, %v12204_v39 }
 0xe04   :  { %v22222_v15 = vsub.f32 %v12155_v27, %v12204_v39  ;;  %v22226_v33 = vsub.f32 %v12156_v16, %v12204_v39  ;;  %v22230_v25 = vsub.f32 %v12157_v7, %v12204_v39  ;;  %v22234_v17 = vsub.f32 %v12158_v52, %v12204_v39  ;;  %v12468_v52 = vld [vmem:[%s22379_s11 + $0x60] sm:$0xff] }
 0xe05   :  { %v22243_v29 = vsub.f32 %v12159_v2, %v12204_v39  ;;  %v22245_v26 = vsub.f32 %v12160_v8, %v12204_v39  ;;  %v22247_v13 = vsub.f32 %v12161_v42, %v12204_v39  ;;  %v22249_v41 = vsub.f32 %v12162_v4, %v12204_v39  ;;  %v12469_v2 = vld [vmem:[%s22379_s11 + $0x68] sm:$0xff] }
 0xe06   :  { %v12221_v60 = vmul.f32 %v22190_v1, %v22784_v28  ;;  %v12222_v34 = vmul.f32 %v22194_v46, %v22785_v31  ;;  %v16592_v51 = vpack.c.bf16 %v12465_v43, %v12464_v62  ;;  %v12223_v21 = vmul.f32 %v22198_v9, %v22786_v56 }
 0xe07   :  { %v16595_v7 = vpack.c.bf16 %v12467_v38, %v12466_v53  ;;  %v12224_v16 = vmul.f32 %v22202_v37, %v22789_v57  ;;  %v12225_v42 = vmul.f32 %v22206_v54, %v22792_v11  ;;  %v16598_v12 = vpack.c.bf16 %v12469_v2, %v12468_v52 }
 0xe08   :  { %v12237_v27 = vmul.f32 %v12221_v60, %v12221_v60  ;;  %v12238_v18 = vmul.f32 %v12222_v34, %v12222_v34  ;;  %16593 = vmatpush3.bf16.msra.mxu1 %v16592_v51  ;;  %v12239_v8 = vmul.f32 %v12223_v21, %v12223_v21  ;;  %v12226_v10 = vmul.f32 %v22210_v35, %v22793_v36 }
 0xe09   :  { %16594 = vmatprep.subr.bf16.mxu1 %v17864_v20  ;;  %v12240_v3 = vmul.f32 %v12224_v16, %v12224_v16  ;;  %v12227_v40 = vmul.f32 %v22214_v48, %v22795_v45  ;;  %v12241_v6 = vmul.f32 %v12225_v42, %v12225_v42  ;;  %v12228_v24 = vmul.f32 %v22218_v61, %v22798_v30 }
 0xe0a   :  { %v12253_v4 = vadd.f32 %v12238_v18, %v12237_v27  ;;  %v12242_v49 = vmul.f32 %v12226_v10, %v12226_v10  ;;  %v12229_v47 = vmul.f32 %v22222_v15, %v22800_v14  ;;  %v12230_v60 = vmul.f32 %v22226_v33, %v22801_v58 }
 0xe0b   :  { %v12243_v62 = vmul.f32 %v12227_v40, %v12227_v40  ;;  %v12244_v34 = vmul.f32 %v12228_v24, %v12228_v24  ;;  %v12231_v53 = vmul.f32 %v22230_v25, %v22802_v59  ;;  %v12232_v27 = vmul.f32 %v22234_v17, %v22805_v32 }
 0xe0c   :  { %16596 = vmatpush3.bf16.msra.mxu1 %v16595_v7  ;;  %v12254_v63 = vadd.f32 %v12253_v4, %v12239_v8  ;;  %v12245_v38 = vmul.f32 %v12229_v47, %v12229_v47  ;;  %v12246_v18 = vmul.f32 %v12230_v60, %v12230_v60  ;;  %v12233_v16 = vmul.f32 %v22243_v29, %v22808_v22 }
 0xe0d   :  { %16597 = vmatprep.subr.bf16.mxu1 %v17864_v20  ;;  %v12247_v52 = vmul.f32 %v12231_v53, %v12231_v53  ;;  %v12234_v42 = vmul.f32 %v22245_v26, %v22809_v44  ;;  %v12248_v8 = vmul.f32 %v12232_v27, %v12232_v27 }
 0xe0e   :  { %v12255_v0 = vadd.f32 %v12254_v63, %v12240_v3  ;;  %v12249_v10 = vmul.f32 %v12233_v16, %v12233_v16  ;;  %v12236_v63 = vmul.f32 %v22249_v41, %v22811_v50 }
 0xe0f   :  { %v12250_v19 = vmul.f32 %v12234_v42, %v12234_v42 }
 0xe10   :  { %16599 = vmatpush3.bf16.msra.mxu1 %v16598_v12  ;;  %v12256_v39 = vadd.f32 %v12255_v0, %v12241_v6  ;;  %v12235_v12 = vmul.f32 %v22247_v13, %v22810_v5  ;;  %v12252_v0 = vmul.f32 %v12236_v63, %v12236_v63 }
 0xe11   :  { %16600 = vmatprep.subr.bf16.mxu1 %v17864_v20 }
 0xe12   :  { %v12257_v43 = vadd.f32 %v12256_v39, %v12242_v49  ;;  %v12251_v40 = vmul.f32 %v12235_v12, %v12235_v12 }
 0xe14   :  { %16602 = vmatpush3.bf16.msra.mxu1 %v16601_v23  ;;  %v12258_v51 = vadd.f32 %v12257_v43, %v12243_v62 }
 0xe16   :  { %v12259_v21 = vadd.f32 %v12258_v51, %v12244_v34 }
 0xe18   :  { %v12260_v7 = vadd.f32 %v12259_v21, %v12245_v38 }
 0xe1a   :  { %v12261_v2 = vadd.f32 %v12260_v7, %v12246_v18  ;;  %v13856_v7 = vld [vmem:[%s22376_s8 + $0x2] ss:$0 sm:$0xff] }
 0xe1c   :  { %v12262_v4 = vadd.f32 %v12261_v2, %v12247_v52 }
 0xe1e   :  { %v12263_v3 = vadd.f32 %v12262_v4, %v12248_v8 }
 0xe20   :  { %v12264_v55 = vadd.f32 %v12263_v3, %v12249_v10 }
 0xe22   :  { %v12265_v6 = vadd.f32 %v12264_v55, %v12250_v19 }
 0xe24   :  { %v12266_v23 = vadd.f32 %v12265_v6, %v12251_v40 }
 0xe26   :  { %v12267_v24 = vadd.f32 %v12266_v23, %v12252_v0 }
 0xe28   :  { %v12268_v49 = vrot.slane %v12267_v24, 4 }
 0xe2a   :  { %v12269_v39 = vadd.f32 %v12268_v49, %v12267_v24 }
 0xe2c   :  { %v12270_v47 = vrot.slane %v12269_v39, 2 }
 0xe2e   :  { %v12271_v62 = vadd.f32 %v12270_v47, %v12269_v39 }
 0xe30   :  { %v12272_v43 = vrot.slane %v12271_v62, 1 }
 0xe32   :  { %v12273_v60 = vadd.f32 %v12272_v43, %v12271_v62 }
 0xe34   :  { %v12274_v34 = vmul.f32 0.013888889, %v12273_v60 }
 0xe36   :  { %v12275_v51 = vadd.f32 1e-05, %v12274_v34 }
 0xe38   :  { %17820 = vrsqrt.f32 %v12275_v51 }
 0xe42   :  { %v17821_v53 = vpop.eup %17820 }
 0xe43   :  { %v12277_v38 = vmul.f32 %v17821_v53, %v22190_v1  ;;  %v12278_v21 = vmul.f32 %v17821_v53, %v22194_v46  ;;  %v12279_v27 = vmul.f32 %v17821_v53, %v22198_v9  ;;  %v12280_v18 = vmul.f32 %v17821_v53, %v22202_v37 }
 0xe44   :  { %v12281_v16 = vmul.f32 %v17821_v53, %v22206_v54  ;;  %v12282_v52 = vmul.f32 %v17821_v53, %v22210_v35  ;;  %v12283_v2 = vmul.f32 %v17821_v53, %v22214_v48  ;;  %v12284_v42 = vmul.f32 %v17821_v53, %v22218_v61 }
 0xe45   :  { %v12285_v1 = vmul.f32 %v17821_v53, %v22222_v15  ;;  %v12286_v46 = vmul.f32 %v17821_v53, %v22226_v33  ;;  %v12287_v9 = vmul.f32 %v17821_v53, %v22230_v25  ;;  %v12288_v37 = vmul.f32 %v17821_v53, %v22234_v17  ;;  %v13857_v15 = vld [vmem:[%s22377_s9 + $0x2] ss:$0 sm:$0xff] }
 0xe46   :  { %v12289_v8 = vmul.f32 %v17821_v53, %v22243_v29  ;;  %v12290_v4 = vmul.f32 %v17821_v53, %v22245_v26  ;;  %v12291_v54 = vmul.f32 %v17821_v53, %v22247_v13  ;;  %v12292_v35 = vmul.f32 %v17821_v53, %v22249_v41 }
 0xe47   :  { %v12299_v12 = vmul.f32 %v13856_v7, %v12277_v38  ;;  %v12300_v48 = vmul.f32 %v13856_v7, %v12278_v21  ;;  %v12301_v10 = vmul.f32 %v13856_v7, %v12279_v27  ;;  %v12302_v61 = vmul.f32 %v13856_v7, %v12280_v18 }
 0xe48   :  { %v12303_v33 = vmul.f32 %v13856_v7, %v12281_v16  ;;  %v12304_v25 = vmul.f32 %v13856_v7, %v12282_v52  ;;  %v12305_v3 = vmul.f32 %v13856_v7, %v12283_v2  ;;  %v12306_v17 = vmul.f32 %v13856_v7, %v12284_v42 }
 0xe49   :  { %v12307_v63 = vmul.f32 %v13856_v7, %v12285_v1  ;;  %v12308_v29 = vmul.f32 %v13856_v7, %v12286_v46  ;;  %v12309_v19 = vmul.f32 %v13856_v7, %v12287_v9  ;;  %v12310_v26 = vmul.f32 %v13856_v7, %v12288_v37 }
 0xe4a   :  { %v12311_v55 = vmul.f32 %v13856_v7, %v12289_v8  ;;  %v12312_v13 = vmul.f32 %v13856_v7, %v12290_v4  ;;  %v12313_v40 = vmul.f32 %v13856_v7, %v12291_v54  ;;  %v12314_v41 = vmul.f32 %v13856_v7, %v12292_v35  ;;  %v13858_v4 = vld [vmem:[%s22380_s12] ss:$0 sm:$0xff] }
 0xe4b   :  { %v12321_v6 = vadd.f32 %v13857_v15, %v12299_v12  ;;  %v12322_v0 = vadd.f32 %v13857_v15, %v12300_v48  ;;  %v12323_v23 = vadd.f32 %v13857_v15, %v12301_v10  ;;  %v12324_v24 = vadd.f32 %v13857_v15, %v12302_v61 }
 0xe4c   :  { %v12325_v49 = vadd.f32 %v13857_v15, %v12303_v33  ;;  %v12326_v39 = vadd.f32 %v13857_v15, %v12304_v25  ;;  %v12327_v47 = vadd.f32 %v13857_v15, %v12305_v3  ;;  %v12328_v62 = vadd.f32 %v13857_v15, %v12306_v17 }
 0xe4d   :  { %v12329_v43 = vadd.f32 %v13857_v15, %v12307_v63  ;;  %v12330_v60 = vadd.f32 %v13857_v15, %v12308_v29  ;;  %v12331_v34 = vadd.f32 %v13857_v15, %v12309_v19  ;;  %v12332_v51 = vadd.f32 %v13857_v15, %v12310_v26 }
 0xe4e   :  { %v12333_v53 = vadd.f32 %v13857_v15, %v12311_v55  ;;  %v12334_v38 = vadd.f32 %v13857_v15, %v12312_v13  ;;  %v12335_v21 = vadd.f32 %v13857_v15, %v12313_v40  ;;  %v12336_v27 = vadd.f32 %v13857_v15, %v12314_v41 }
 0xe4f   :  { %v12337_v18 = vmul.f32 %v12321_v6, %v22784_v28  ;;  %v12338_v7 = vmul.f32 %v12322_v0, %v22785_v31  ;;  %v12339_v16 = vmul.f32 %v12323_v23, %v22786_v56  ;;  %v12340_v52 = vmul.f32 %v12324_v24, %v22789_v57 }
 0xe50   :  { %v12341_v2 = vmul.f32 %v12325_v49, %v22792_v11  ;;  %v12342_v42 = vmul.f32 %v12326_v39, %v22793_v36  ;;  %v12343_v1 = vmul.f32 %v12327_v47, %v22795_v45  ;;  %v12344_v46 = vmul.f32 %v12328_v62, %v22798_v30 }
 0xe51   :  { %v12345_v9 = vmul.f32 %v12329_v43, %v22800_v14  ;;  %v12346_v37 = vmul.f32 %v12330_v60, %v22801_v58  ;;  %v12347_v28 = vmul.f32 %v12331_v34, %v22802_v59  ;;  %v12348_v31 = vmul.f32 %v12332_v51, %v22805_v32  ;;  %12353 = vst [vmem:[#allocation2 + $0x10] sm:$0xff] %v12337_v18 }
 0xe52   :  { %12354 = vst [vmem:[#allocation2 + $0x18] sm:$0xff] %v12338_v7  ;;  %12355 = vst [vmem:[#allocation2 + $0x20] sm:$0xff] %v12339_v16  ;;  %v12349_v56 = vmul.f32 %v12333_v53, %v22808_v22  ;;  %v12350_v57 = vmul.f32 %v12334_v38, %v22809_v44  ;;  %v12351_v11 = vmul.f32 %v12335_v21, %v22810_v5  ;;  %v12385_v5 = vld [vmem:[%s22378_s10] sm:$0x3] }
 0xe53   :  { %12356 = vst [vmem:[#allocation2 + $0x28] sm:$0xff] %v12340_v52  ;;  %v12352_v36 = vmul.f32 %v12336_v27, %v22811_v50  ;;  %12357 = vst [vmem:[#allocation2 + $0x30] sm:$0xff] %v12341_v2  ;;  %v16556_v45 = vpack.c.bf16 %v12338_v7, %v12337_v18  ;;  %v16559_v30 = vpack.c.bf16 %v12340_v52, %v12339_v16 }
 0xe54   :  { %12358 = vst [vmem:[#allocation2 + $0x38] sm:$0xff] %v12342_v42  ;;  %12359 = vst [vmem:[#allocation2 + $0x40] sm:$0xff] %v12343_v1  ;;  %v16562_v14 = vpack.c.bf16 %v12342_v42, %v12341_v2  ;;  %v16565_v58 = vpack.c.bf16 %v12344_v46, %v12343_v1  ;;  %v16568_v59 = vpack.c.bf16 %v12346_v37, %v12345_v9 }
 0xe55   :  { %12360 = vst [vmem:[#allocation2 + $0x48] sm:$0xff] %v12344_v46  ;;  %12361 = vst [vmem:[#allocation2 + $0x50] sm:$0xff] %v12345_v9  ;;  %v16571_v32 = vpack.c.bf16 %v12348_v31, %v12347_v28  ;;  %v16574_v22 = vpack.c.bf16 %v12350_v57, %v12349_v56  ;;  %v16577_v44 = vpack.c.bf16 %v12352_v36, %v12351_v11  ;;  %16557 = vmatpush3.bf16.msra.mxu0 %v16556_v45 }
 0xe56   :  { %12362 = vst [vmem:[#allocation2 + $0x58] sm:$0xff] %v12346_v37  ;;  %12363 = vst [vmem:[#allocation2 + $0x60] sm:$0xff] %v12347_v28  ;;  %16558 = vmatprep.subr.bf16.mxu0 %v17864_v20 }
 0xe57   :  { %12364 = vst [vmem:[#allocation2 + $0x68] sm:$0xff] %v12348_v31  ;;  %12365 = vst [vmem:[#allocation2 + $0x70] sm:$0xff] %v12349_v56 }
 0xe58   :  { %12366 = vst [vmem:[#allocation2 + $0x78] sm:$0xff] %v12350_v57  ;;  %12367 = vst [vmem:[#allocation2 + $0x80] sm:$0xff] %v12351_v11 }
 0xe59   :  { %12368 = vst [vmem:[#allocation2 + $0x88] sm:$0xff] %v12352_v36  ;;  %16560 = vmatpush3.bf16.msra.mxu0 %v16559_v30 }
 0xe5a   :  { %16561 = vmatprep.subr.bf16.mxu0 %v17864_v20 }
 0xe5d   :  { %16563 = vmatpush3.bf16.msra.mxu0 %v16562_v14 }
 0xe5e   :  { %16564 = vmatprep.subr.bf16.mxu0 %v17864_v20 }
 0xe61   :  { %16566 = vmatpush3.bf16.msra.mxu0 %v16565_v58 }
 0xe62   :  { %16567 = vmatprep.subr.bf16.mxu0 %v17864_v20 }
 0xe65   :  { %16569 = vmatpush3.bf16.msra.mxu0 %v16568_v59 }
 0xe66   :  { %16570 = vmatprep.subr.bf16.mxu0 %v17864_v20 }
 0xe69   :  { %16572 = vmatpush3.bf16.msra.mxu0 %v16571_v32 }
 0xe6a   :  { %16573 = vmatprep.subr.bf16.mxu0 %v17864_v20 }
 0xe6d   :  { %16575 = vmatpush3.bf16.msra.mxu0 %v16574_v22 }
 0xe6e   :  { %16576 = vmatprep.subr.bf16.mxu0 %v17864_v20 }
 0xe71   :  { %16578 = vmatpush3.bf16.msra.mxu0 %v16577_v44 }
 0xe74   :  { %16518 = vmatmul.mubr.f32.vlgmr.msra.gmra.mrb[48].mxu0 %v12385_v5 }
 0xf47   :  { %v12452_v50 = vpop.f32.mrb[48].mxu0 }
 0xf48   :  { %v16519_v8 = vpop.f32.mrb[49].mxu0  ;;  %16553 = vmatmul.mubr.f32.vlgmr.msra.gmra.mrb[48].mxu1 %v12452_v50 }
0x101b   :  { %v12545_v54 = vpop.f32.mrb[48].mxu1 }
0x101c   :  { %v12546_v35 = vadd.f32 %v13858_v4, %v12545_v54  ;;  %v16554_v12 = vpop.f32.mrb[49].mxu1 }
0x101e   :  { %12549 = vst [vmem:[#allocation3] sm:$0x3] %v12546_v35 }
0x101f   :  { %17850 = shalt.err (!%p17847_p4)
}
0x1020   :  { %s17851_s26 = scalar_lea.hbm %s22381_s13, 32 }
0x1021   :  { %p17852_p5 = scmp.ne.s32.totalorder %s22381_s13, %s17851_s26  ;;  %p17855_p6 = scmp.lt.u32.totalorder %s17851_s26, %s22381_s13 }
0x1023   :  { %p17857_p7 = pnand %p17855_p6, %p17852_p5 }
0x1025   :  { %17860 = shalt.err (!%p17857_p7)
}
0x1026   :  { %12559 = dma.vmem_to_hbm [thread:$0]  %s12557_s0, 32, %s22381_s13, [#allocation4]  }
0x1027   :  { %17861 = dma.done.wait [#allocation4], 32  }
0x1028   :  { %17862 = vsyncadd [#allocation4], 4294967264 }
0x1029   :  { %12563 = vsyncpa [#allocation4], 1 }

</bundles_post_ra>
